<compile_context>
chip_gen: v5e
topology: v5e:2x2
jax: 0.10.0
libtpu: 0.0.40
codegen_flags: <defaults>
</compile_context>

<pallas_src>
import math

import jax
import jax.numpy as jnp
from jax import lax
from jax.experimental import pallas as pl
from jax.experimental.pallas import tpu as pltpu

F32 = jnp.float32
BF16 = jnp.bfloat16
NIF_OUT_LANES = 128     # packed output slab: lanes [0:33]=features, [33:36]=g_point, rest zero


# ----------------------------- encoder_BN kernel -----------------------------

def _bn_relu(y, gamma, beta, eps=1e-5):
    # train-mode BatchNorm1d: batch statistics over the row axis, biased variance (f32 math)
    mu = jnp.mean(y, axis=0, keepdims=True)
    var = jnp.mean((y - mu) ** 2, axis=0, keepdims=True)
    return jnp.maximum((y - mu) * lax.rsqrt(var + eps) * gamma + beta, 0.0)


def make_encoder_kernel(B, N):
    # TODO(synk): if B*N grows large, grid this kernel over row tiles with a per-batch
    # running-max VMEM accumulator instead of one monolithic invocation.
    def encoder_kernel(x_ref,
                       w1_ref, b1_ref, g1_ref, be1_ref,
                       w2_ref, b2_ref, g2_ref, be2_ref,
                       w3_ref, b3_ref, g3_ref, be3_ref,
                       wf1_ref, bf1_ref, g4_ref, be4_ref,
                       wf2_ref, bf2_ref, g5_ref, be5_ref,
                       out_ref):
        x = x_ref[...]                                    # (B*N, 3) f32
        w1 = w1_ref[...]                                  # (3, 64)  f32
        # first conv has K=3: VPU broadcast multiply-adds instead of an MXU matmul
        y1 = (x[:, 0:1] * w1[0:1, :] + x[:, 1:2] * w1[1:2, :]
              + x[:, 2:3] * w1[2:3, :] + b1_ref[...])
        h = _bn_relu(y1, g1_ref[...], be1_ref[...])                         # (B*N, 64)
        h = _bn_relu(jnp.dot(h.astype(BF16), w2_ref[...],
                             preferred_element_type=F32) + b2_ref[...],
                     g2_ref[...], be2_ref[...])                             # (B*N, 128)
        h = _bn_relu(jnp.dot(h.astype(BF16), w3_ref[...],
                             preferred_element_type=F32) + b3_ref[...],
                     g3_ref[...], be3_ref[...])                             # (B*N, 1024)
        # torch.max(x, dim=2): per-batch max over points — one reshape + one reduction
        h = jnp.max(h.reshape(B, N, 1024), axis=1)                          # (B, 1024)
        h = _bn_relu(jnp.dot(h.astype(BF16), wf1_ref[...],
                             preferred_element_type=F32) + bf1_ref[...],
                     g4_ref[...], be4_ref[...])                             # (B, 512)
        h = _bn_relu(jnp.dot(h.astype(BF16), wf2_ref[...],
                             preferred_element_type=F32) + bf2_ref[...],
                     g5_ref[...], be5_ref[...])                             # (B, 128)
        out_ref[...] = h
    return encoder_kernel


def encoder_forward(params, gt):
    B, N, _ = gt.shape
    x = gt.reshape(B * N, 3).astype(F32)
    p = params["enc"]
    bf = lambda a: a.astype(BF16)
    args = (x,
            p["w1"], p["b1"], p["g1"], p["be1"],         # first layer stays f32 (VPU path)
            bf(p["w2"]), p["b2"], p["g2"], p["be2"],
            bf(p["w3"]), p["b3"], p["g3"], p["be3"],
            bf(p["wf1"]), p["bf1"], p["g4"], p["be4"],
            bf(p["wf2"]), p["bf2"], p["g5"], p["be5"])
    return pl.pallas_call(
        make_encoder_kernel(B, N),
        out_shape=jax.ShapeDtypeStruct((B, 128), F32),
        compiler_params=pltpu.CompilerParams(vmem_limit_bytes=32 * 1024 * 1024),
    )(*args)


# ------------------------------ local_NIF kernel ------------------------------

def nif_kernel(feat_ref, pts_ref,
               w1_ref, b1_ref, w2_ref, b2_ref,
               w3a_ref, w3b_ref, w3aT_ref, b3_ref,
               w4s_ref, w4sT_ref, b4s_ref,
               w5_ref, b5_ref, w6_ref, b6_ref, seed_ref,
               out_ref):
    TP = feat_ref.shape[0]
    feat = feat_ref[...]                       # (TP, 128) bf16
    pts = pts_ref[...]                         # (TP, 3)   f32
    w2 = w2_ref[...]                           # (3, 512)  f32

    # ------------- forward (MXU in bf16, accumulate / activate in f32) -------------
    feature_f = jnp.maximum(
        jnp.dot(feat, w1_ref[...], preferred_element_type=F32) + b1_ref[...], 0.0)
    # fc2 has K=3: VPU broadcast multiply-adds, keep the MXU free
    h1 = jnp.maximum(
        pts[:, 0:1] * w2[0:1, :] + pts[:, 1:2] * w2[1:2, :]
        + pts[:, 2:3] * w2[2:3, :] + b2_ref[...], 0.0)
    # fc3 applied to concat([h1, feature_f], dim=-1), expressed with a split weight
    net = jnp.maximum(
        jnp.dot(h1.astype(BF16), w3a_ref[...], preferred_element_type=F32)
        + jnp.dot(feature_f.astype(BF16), w3b_ref[...], preferred_element_type=F32)
        + b3_ref[...], 0.0)

    b4s = b4s_ref[...]                         # (7, 512) f32
    acts = [net.astype(BF16)]                  # ReLU masks recorded via these activations
    cur = acts[0]
    for i in range(7):
        cur = jnp.maximum(
            jnp.dot(cur, w4s_ref[i], preferred_element_type=F32) + b4s[i:i + 1, :],
            0.0).astype(BF16)
        acts.append(cur)

    feats33 = jnp.dot(cur, w5_ref[...], preferred_element_type=F32) + b5_ref[...]  # (TP,33) f32
    # fc6 has K=33: lane reduction instead of an MXU matmul
    sdf = jnp.sum(feats33 * w6_ref[...], axis=-1, keepdims=True) + b6_ref[...]     # (TP,1)

    # -------- manual backward: d(sdf)/d(pts), upstream grad = ones --------
    # rank-1 seed v = w6 @ w5^T is precomputed in the wrapper; broadcast it to all rows.
    # all backward contractions use pre-transposed weights (no in-kernel transposes).
    g = jnp.broadcast_to(seed_ref[...], (TP, 512))            # (TP, 512) f32
    for i in range(6, -1, -1):
        gm = jnp.where(acts[i + 1] > 0, g, 0.0).astype(BF16)
        g = jnp.dot(gm, w4sT_ref[i], preferred_element_type=F32)
    gm = jnp.where(acts[0] > 0, g, 0.0).astype(BF16)
    g = jnp.dot(gm, w3aT_ref[...], preferred_element_type=F32)   # grad wrt h1, (TP,512) f32
    gm = jnp.where(h1 > 0, g, 0.0)                               # f32
    # grad wrt points: (TP,512) x (512,3) done as 3 lane reductions (off the MXU)
    grad = jnp.concatenate(
        [jnp.sum(gm * w2[j:j + 1, :], axis=-1, keepdims=True) for j in range(3)],
        axis=-1)                                              # (TP, 3)

    # pytorch_safe_norm + projection: g_point = pts - sdf * grad / sqrt(||grad||^2 + eps)
    inv_norm = lax.rsqrt(jnp.sum(grad * grad, axis=-1, keepdims=True) + 1e-12)
    gpt = pts - sdf * grad * inv_norm

    # single lane-dense output slab: [0:33]=features, [33:36]=g_point, rest zero padding
    pad = jnp.zeros((TP, NIF_OUT_LANES - 36), F32)
    out_ref[...] = jnp.concatenate([feats33, gpt, pad], axis=-1)


def _nif_pallas_call(P_pad, tile, cost_estimate):
    def const_spec(shape):
        zeros = (0,) * len(shape)
        return pl.BlockSpec(shape, lambda i, _z=zeros: _z)

    in_specs = [
        pl.BlockSpec((tile, 128), lambda i: (i, 0)),    # point_feature (bf16)
        pl.BlockSpec((tile, 3), lambda i: (i, 0)),      # input_points  (f32)
        const_spec((128, 512)), const_spec((1, 512)),   # fc1
        const_spec((3, 512)), const_spec((1, 512)),     # fc2
        const_spec((512, 512)), const_spec((512, 512)),                 # fc3 (split)
        const_spec((512, 512)), const_spec((1, 512)),                   # fc3a^T, fc3 bias
        const_spec((7, 512, 512)),                      # fc4_0..6 weights (bf16)
        const_spec((7, 512, 512)),                      # fc4_0..6 weights, transposed (bf16)
        const_spec((7, 512)),                           # fc4_0..6 biases
        const_spec((512, 33)), const_spec((1, 33)),     # fc5
        const_spec((1, 33)), const_spec((1, 1)),        # fc6
        const_spec((1, 512)),                           # backward seed  w6 @ w5^T
    ]
    out_specs = pl.BlockSpec((tile, NIF_OUT_LANES), lambda i: (i, 0))
    return pl.pallas_call(
        nif_kernel,
        grid=(P_pad // tile,),
        in_specs=in_specs,
        out_specs=out_specs,
        out_shape=jax.ShapeDtypeStruct((P_pad, NIF_OUT_LANES), F32),
        compiler_params=pltpu.CompilerParams(
            dimension_semantics=("parallel",),
            vmem_limit_bytes=48 * 1024 * 1024),
        cost_estimate=cost_estimate,
    )


def nif_get_gradient(params, point_feature, input_points, tile=256):
    # point_feature: (P, 128), input_points: (P, 3)
    P = input_points.shape[0]
    P_pad = ((P + tile - 1) // tile) * tile
    p = params["nif"]

    feat = point_feature.astype(BF16)
    pts = input_points.astype(F32)
    if P_pad != P:
        feat = jnp.pad(feat, ((0, P_pad - P), (0, 0)))
        pts = jnp.pad(pts, ((0, P_pad - P), (0, 0)))

    # hoisted rank-1 backward seed: d(sdf)/d(fc5 input) is identical for every row
    seed = jnp.dot(p["w6"], p["w5"].T).astype(F32)            # (1, 512)
    # pre-transposed backward weights (grid-invariant; avoids in-kernel transposes)
    w4sT = jnp.swapaxes(p["w4s"], 1, 2)                       # (7, 512, 512), [i] = w4s[i].T
    w3aT = p["w3a"].T                                         # (512, 512)

    bf = lambda a: a.astype(BF16)
    args = (feat, pts,
            bf(p["w1"]), p["b1"], p["w2"], p["b2"],
            bf(p["w3a"]), bf(p["w3b"]), bf(w3aT), p["b3"],
            bf(p["w4s"]), bf(w4sT), p["b4s"],
            bf(p["w5"]), p["b5"], p["w6"], p["b6"], seed)

    # rough cost estimate so XLA schedules around a correctly-sized custom call
    mm_macs = (128 * 512 + 2 * 512 * 512 + 7 * 512 * 512 + 512 * 33      # forward
               + 7 * 512 * 512 + 512 * 512)                              # backward
    weight_bytes = 2 * (128 * 512 + 3 * 512 * 512 + 14 * 512 * 512 + 512 * 33)
    ce = pl.CostEstimate(
        flops=2 * mm_macs * P_pad,
        transcendentals=P_pad,
        bytes_accessed=P_pad * (128 * 2 + 3 * 4 + NIF_OUT_LANES * 4) + weight_bytes)

    out = _nif_pallas_call(P_pad, tile, ce)(*args)

    features = out[:P, :33]
    g_point = out[:P, 33:36]
    return features, g_point


# ------------------------------ SDF_Model forward ------------------------------

def sdf_model_forward(params, gt, noisy_points):
    # gt: (B, N, 3)    noisy_points: (1, P, 3)
    num_points = noisy_points.shape[1]
    enc = encoder_forward(params, gt)                          # (B, 128)
    pointnet_feature = jnp.mean(enc, axis=0, keepdims=True)    # (1, 128) mean over encoder batch
    point_feature = jnp.tile(pointnet_feature[:, None, :], (1, num_points, 1))  # (1, P, 128)
    feat_flat = point_feature.reshape(num_points, 128)
    pts_flat = noisy_points.reshape(num_points, 3).astype(F32)
    features, g_point = nif_get_gradient(params, feat_flat, pts_flat)
    return features.reshape(1, num_points, 33), g_point.reshape(1, num_points, 3)


# ------------------------------ parameter init ------------------------------

def init_params(key):
    ks = iter(jax.random.split(key, 32))

    def lin(out_dim, in_dim, std=None, mean=0.0, bias=0.0):
        if std is None:
            std = 1.0 / math.sqrt(in_dim)
        w = mean + std * jax.random.normal(next(ks), (in_dim, out_dim), F32)   # (in, out)
        b = jnp.full((1, out_dim), bias, F32)
        return w, b

    def bn(c):
        return jnp.ones((1, c), F32), jnp.zeros((1, c), F32)

    enc = {}
    enc["w1"], enc["b1"] = lin(64, 3)
    enc["g1"], enc["be1"] = bn(64)
    enc["w2"], enc["b2"] = lin(128, 64)
    enc["g2"], enc["be2"] = bn(128)
    enc["w3"], enc["b3"] = lin(1024, 128)
    enc["g3"], enc["be3"] = bn(1024)
    enc["wf1"], enc["bf1"] = lin(512, 1024)
    enc["g4"], enc["be4"] = bn(512)
    enc["wf2"], enc["bf2"] = lin(128, 512)
    enc["g5"], enc["be5"] = bn(128)

    std512 = math.sqrt(2.0) / math.sqrt(512.0)
    nif = {}
    nif["w1"], nif["b1"] = lin(512, 128)
    nif["w2"], nif["b2"] = lin(512, 3)
    w3, b3 = lin(512, 1024, std=std512, bias=0.0)
    nif["w3a"], nif["w3b"], nif["b3"] = w3[:512, :], w3[512:, :], b3
    w4s, b4s = [], []
    for _ in range(7):        # only fc4_0..fc4_6 are used by the torch forward
        w, b = lin(512, 512, std=std512, bias=0.0)   # weight_norm folded (identity at init)
        w4s.append(w)
        b4s.append(b[0])
    nif["w4s"] = jnp.stack(w4s)                      # (7, 512, 512)
    nif["b4s"] = jnp.stack(b4s)                      # (7, 512)
    nif["w5"], nif["b5"] = lin(33, 512, std=std512, bias=0.0)
    nif["w6"] = (2.0 * math.sqrt(math.pi) / math.sqrt(33.0)
                 + 1e-6 * jax.random.normal(next(ks), (1, 33), F32))   # fc6 weight (out=1,in=33)
    nif["b6"] = jnp.full((1, 1), -0.5, F32)

    return {"enc": enc, "nif": nif}


# ------------------------------------ main ------------------------------------

if __name__ == "__main__":
    key = jax.random.PRNGKey(0)
    k_gt, k_np, k_par = jax.random.split(key, 3)

    B, N, P = 2, 64, 512                       # gt batch, gt points, noisy points
    gt = jax.random.normal(k_gt, (B, N, 3), F32)
    noisy_points = jax.random.normal(k_np, (1, P, 3), F32)

    params = init_params(k_par)
    features, g_point = sdf_model_forward(params, gt, noisy_points)
    jax.block_until_ready((features, g_point))

    assert features.shape == (1, P, 33)
    assert g_point.shape == (1, P, 3)
    assert bool(jnp.all(jnp.isfinite(features))) and bool(jnp.all(jnp.isfinite(g_point)))
    print("KERNEL_OK")
</pallas_src>

<mosaic_0001>
module attributes {stable_mosaic.version = 11 : i64} {
  func.func @encoder_kernel(%arg0: memref<128x3xf32, #tpu.memory_space<vmem>>, %arg1: memref<3x64xf32, #tpu.memory_space<vmem>>, %arg2: memref<1x64xf32, #tpu.memory_space<vmem>>, %arg3: memref<1x64xf32, #tpu.memory_space<vmem>>, %arg4: memref<1x64xf32, #tpu.memory_space<vmem>>, %arg5: memref<64x128xbf16, #tpu.memory_space<vmem>>, %arg6: memref<1x128xf32, #tpu.memory_space<vmem>>, %arg7: memref<1x128xf32, #tpu.memory_space<vmem>>, %arg8: memref<1x128xf32, #tpu.memory_space<vmem>>, %arg9: memref<128x1024xbf16, #tpu.memory_space<vmem>>, %arg10: memref<1x1024xf32, #tpu.memory_space<vmem>>, %arg11: memref<1x1024xf32, #tpu.memory_space<vmem>>, %arg12: memref<1x1024xf32, #tpu.memory_space<vmem>>, %arg13: memref<1024x512xbf16, #tpu.memory_space<vmem>>, %arg14: memref<1x512xf32, #tpu.memory_space<vmem>>, %arg15: memref<1x512xf32, #tpu.memory_space<vmem>>, %arg16: memref<1x512xf32, #tpu.memory_space<vmem>>, %arg17: memref<512x128xbf16, #tpu.memory_space<vmem>>, %arg18: memref<1x128xf32, #tpu.memory_space<vmem>>, %arg19: memref<1x128xf32, #tpu.memory_space<vmem>>, %arg20: memref<1x128xf32, #tpu.memory_space<vmem>>, %arg21: memref<2x128xf32, #tpu.memory_space<vmem>>) attributes {dimension_semantics = [], scalar_prefetch = 0 : i64, scratch_operands = 0 : i64, tpu.core_type = #tpu.core_type<tc>} {
    %c0 = arith.constant 0 : index
    %c0_0 = arith.constant 0 : index
    %0 = vector.load %arg0[%c0, %c0_0] : memref<128x3xf32, #tpu.memory_space<vmem>>, vector<128x3xf32>
    %c0_1 = arith.constant 0 : index
    %c0_2 = arith.constant 0 : index
    %1 = vector.load %arg1[%c0_1, %c0_2] : memref<3x64xf32, #tpu.memory_space<vmem>>, vector<3x64xf32>
    %2 = vector.extract_strided_slice %0 {offsets = [0, 0], sizes = [128, 1], strides = [1, 1]} : vector<128x3xf32> to vector<128x1xf32>
    %3 = vector.extract_strided_slice %1 {offsets = [0, 0], sizes = [1, 64], strides = [1, 1]} : vector<3x64xf32> to vector<1x64xf32>
    %4 = vector.broadcast %2 : vector<128x1xf32> to vector<128x64xf32>
    %5 = vector.broadcast %3 : vector<1x64xf32> to vector<128x64xf32>
    %6 = arith.mulf %4, %5 : vector<128x64xf32>
    %7 = vector.extract_strided_slice %0 {offsets = [0, 1], sizes = [128, 1], strides = [1, 1]} : vector<128x3xf32> to vector<128x1xf32>
    %8 = vector.extract_strided_slice %1 {offsets = [1, 0], sizes = [1, 64], strides = [1, 1]} : vector<3x64xf32> to vector<1x64xf32>
    %9 = vector.broadcast %7 : vector<128x1xf32> to vector<128x64xf32>
    %10 = vector.broadcast %8 : vector<1x64xf32> to vector<128x64xf32>
    %11 = arith.mulf %9, %10 : vector<128x64xf32>
    %12 = arith.addf %6, %11 : vector<128x64xf32>
    %13 = vector.extract_strided_slice %0 {offsets = [0, 2], sizes = [128, 1], strides = [1, 1]} : vector<128x3xf32> to vector<128x1xf32>
    %14 = vector.extract_strided_slice %1 {offsets = [2, 0], sizes = [1, 64], strides = [1, 1]} : vector<3x64xf32> to vector<1x64xf32>
    %15 = vector.broadcast %13 : vector<128x1xf32> to vector<128x64xf32>
    %16 = vector.broadcast %14 : vector<1x64xf32> to vector<128x64xf32>
    %17 = arith.mulf %15, %16 : vector<128x64xf32>
    %18 = arith.addf %12, %17 : vector<128x64xf32>
    %c0_3 = arith.constant 0 : index
    %c0_4 = arith.constant 0 : index
    %19 = vector.load %arg2[%c0_3, %c0_4] : memref<1x64xf32, #tpu.memory_space<vmem>>, vector<1x64xf32>
    %20 = vector.broadcast %19 : vector<1x64xf32> to vector<128x64xf32>
    %21 = arith.addf %18, %20 : vector<128x64xf32>
    %c0_5 = arith.constant 0 : index
    %c0_6 = arith.constant 0 : index
    %22 = vector.load %arg3[%c0_5, %c0_6] : memref<1x64xf32, #tpu.memory_space<vmem>>, vector<1x64xf32>
    %c0_7 = arith.constant 0 : index
    %c0_8 = arith.constant 0 : index
    %23 = vector.load %arg4[%c0_7, %c0_8] : memref<1x64xf32, #tpu.memory_space<vmem>>, vector<1x64xf32>
    %cst = arith.constant dense<0.000000e+00> : vector<64xf32>
    %24 = vector.multi_reduction <add>, %21, %cst [0] : vector<128x64xf32> to vector<64xf32>
    %25 = vector.shape_cast %24 : vector<64xf32> to vector<1x64xf32>
    %cst_9 = arith.constant 1.280000e+02 : f32
    %26 = vector.broadcast %cst_9 : f32 to vector<1x64xf32>
    %27 = arith.divf %25, %26 : vector<1x64xf32>
    %28 = vector.broadcast %27 : vector<1x64xf32> to vector<128x64xf32>
    %29 = arith.subf %21, %28 : vector<128x64xf32>
    %30 = arith.mulf %29, %29 : vector<128x64xf32>
    %cst_10 = arith.constant dense<0.000000e+00> : vector<64xf32>
    %31 = vector.multi_reduction <add>, %30, %cst_10 [0] : vector<128x64xf32> to vector<64xf32>
    %32 = vector.shape_cast %31 : vector<64xf32> to vector<1x64xf32>
    %cst_11 = arith.constant 1.280000e+02 : f32
    %33 = vector.broadcast %cst_11 : f32 to vector<1x64xf32>
    %34 = arith.divf %32, %33 : vector<1x64xf32>
    %35 = vector.broadcast %27 : vector<1x64xf32> to vector<128x64xf32>
    %36 = arith.subf %21, %35 : vector<128x64xf32>
    %cst_12 = arith.constant 9.99999974E-6 : f32
    %37 = vector.broadcast %cst_12 : f32 to vector<1x64xf32>
    %38 = arith.addf %34, %37 : vector<1x64xf32>
    %39 = math.rsqrt %38 : vector<1x64xf32>
    %40 = vector.broadcast %39 : vector<1x64xf32> to vector<128x64xf32>
    %41 = arith.mulf %36, %40 : vector<128x64xf32>
    %42 = vector.broadcast %22 : vector<1x64xf32> to vector<128x64xf32>
    %43 = arith.mulf %41, %42 : vector<128x64xf32>
    %44 = vector.broadcast %23 : vector<1x64xf32> to vector<128x64xf32>
    %45 = arith.addf %43, %44 : vector<128x64xf32>
    %cst_13 = arith.constant 0.000000e+00 : f32
    %46 = vector.broadcast %cst_13 : f32 to vector<128x64xf32>
    %47 = arith.maximumf %45, %46 : vector<128x64xf32>
    %48 = arith.truncf %47 : vector<128x64xf32> to vector<128x64xbf16>
    %c0_14 = arith.constant 0 : index
    %c0_15 = arith.constant 0 : index
    %49 = vector.load %arg5[%c0_14, %c0_15] : memref<64x128xbf16, #tpu.memory_space<vmem>>, vector<64x128xbf16>
    %cst_16 = arith.constant dense<0.000000e+00> : vector<128x128xf32>
    %50 = tpu.matmul %48, %49, %cst_16 {dimension_numbers = #tpu.dot_dimension_numbers<[1], [0], [0], [1], [0, 0, 1, 1], [], []>} : vector<128x64xbf16>, vector<64x128xbf16>, vector<128x128xf32> -> vector<128x128xf32>
    %c0_17 = arith.constant 0 : index
    %c0_18 = arith.constant 0 : index
    %51 = vector.load %arg6[%c0_17, %c0_18] : memref<1x128xf32, #tpu.memory_space<vmem>>, vector<1x128xf32>
    %52 = vector.broadcast %51 : vector<1x128xf32> to vector<128x128xf32>
    %53 = arith.addf %50, %52 : vector<128x128xf32>
    %c0_19 = arith.constant 0 : index
    %c0_20 = arith.constant 0 : index
    %54 = vector.load %arg7[%c0_19, %c0_20] : memref<1x128xf32, #tpu.memory_space<vmem>>, vector<1x128xf32>
    %c0_21 = arith.constant 0 : index
    %c0_22 = arith.constant 0 : index
    %55 = vector.load %arg8[%c0_21, %c0_22] : memref<1x128xf32, #tpu.memory_space<vmem>>, vector<1x128xf32>
    %cst_23 = arith.constant dense<0.000000e+00> : vector<128xf32>
    %56 = vector.multi_reduction <add>, %53, %cst_23 [0] : vector<128x128xf32> to vector<128xf32>
    %57 = vector.shape_cast %56 : vector<128xf32> to vector<1x128xf32>
    %cst_24 = arith.constant 1.280000e+02 : f32
    %58 = vector.broadcast %cst_24 : f32 to vector<1x128xf32>
    %59 = arith.divf %57, %58 : vector<1x128xf32>
    %60 = vector.broadcast %59 : vector<1x128xf32> to vector<128x128xf32>
    %61 = arith.subf %53, %60 : vector<128x128xf32>
    %62 = arith.mulf %61, %61 : vector<128x128xf32>
    %cst_25 = arith.constant dense<0.000000e+00> : vector<128xf32>
    %63 = vector.multi_reduction <add>, %62, %cst_25 [0] : vector<128x128xf32> to vector<128xf32>
    %64 = vector.shape_cast %63 : vector<128xf32> to vector<1x128xf32>
    %cst_26 = arith.constant 1.280000e+02 : f32
    %65 = vector.broadcast %cst_26 : f32 to vector<1x128xf32>
    %66 = arith.divf %64, %65 : vector<1x128xf32>
    %67 = vector.broadcast %59 : vector<1x128xf32> to vector<128x128xf32>
    %68 = arith.subf %53, %67 : vector<128x128xf32>
    %cst_27 = arith.constant 9.99999974E-6 : f32
    %69 = vector.broadcast %cst_27 : f32 to vector<1x128xf32>
    %70 = arith.addf %66, %69 : vector<1x128xf32>
    %71 = math.rsqrt %70 : vector<1x128xf32>
    %72 = vector.broadcast %71 : vector<1x128xf32> to vector<128x128xf32>
    %73 = arith.mulf %68, %72 : vector<128x128xf32>
    %74 = vector.broadcast %54 : vector<1x128xf32> to vector<128x128xf32>
    %75 = arith.mulf %73, %74 : vector<128x128xf32>
    %76 = vector.broadcast %55 : vector<1x128xf32> to vector<128x128xf32>
    %77 = arith.addf %75, %76 : vector<128x128xf32>
    %cst_28 = arith.constant 0.000000e+00 : f32
    %78 = vector.broadcast %cst_28 : f32 to vector<128x128xf32>
    %79 = arith.maximumf %77, %78 : vector<128x128xf32>
    %80 = arith.truncf %79 : vector<128x128xf32> to vector<128x128xbf16>
    %c0_29 = arith.constant 0 : index
    %c0_30 = arith.constant 0 : index
    %81 = vector.load %arg9[%c0_29, %c0_30] : memref<128x1024xbf16, #tpu.memory_space<vmem>>, vector<128x1024xbf16>
    %cst_31 = arith.constant dense<0.000000e+00> : vector<128x1024xf32>
    %82 = tpu.matmul %80, %81, %cst_31 {dimension_numbers = #tpu.dot_dimension_numbers<[1], [0], [0], [1], [0, 0, 1, 1], [], []>} : vector<128x128xbf16>, vector<128x1024xbf16>, vector<128x1024xf32> -> vector<128x1024xf32>
    %c0_32 = arith.constant 0 : index
    %c0_33 = arith.constant 0 : index
    %83 = vector.load %arg10[%c0_32, %c0_33] : memref<1x1024xf32, #tpu.memory_space<vmem>>, vector<1x1024xf32>
    %84 = vector.broadcast %83 : vector<1x1024xf32> to vector<128x1024xf32>
    %85 = arith.addf %82, %84 : vector<128x1024xf32>
    %c0_34 = arith.constant 0 : index
    %c0_35 = arith.constant 0 : index
    %86 = vector.load %arg11[%c0_34, %c0_35] : memref<1x1024xf32, #tpu.memory_space<vmem>>, vector<1x1024xf32>
    %c0_36 = arith.constant 0 : index
    %c0_37 = arith.constant 0 : index
    %87 = vector.load %arg12[%c0_36, %c0_37] : memref<1x1024xf32, #tpu.memory_space<vmem>>, vector<1x1024xf32>
    %cst_38 = arith.constant dense<0.000000e+00> : vector<1024xf32>
    %88 = vector.multi_reduction <add>, %85, %cst_38 [0] : vector<128x1024xf32> to vector<1024xf32>
    %89 = vector.shape_cast %88 : vector<1024xf32> to vector<1x1024xf32>
    %cst_39 = arith.constant 1.280000e+02 : f32
    %90 = vector.broadcast %cst_39 : f32 to vector<1x1024xf32>
    %91 = arith.divf %89, %90 : vector<1x1024xf32>
    %92 = vector.broadcast %91 : vector<1x1024xf32> to vector<128x1024xf32>
    %93 = arith.subf %85, %92 : vector<128x1024xf32>
    %94 = arith.mulf %93, %93 : vector<128x1024xf32>
    %cst_40 = arith.constant dense<0.000000e+00> : vector<1024xf32>
    %95 = vector.multi_reduction <add>, %94, %cst_40 [0] : vector<128x1024xf32> to vector<1024xf32>
    %96 = vector.shape_cast %95 : vector<1024xf32> to vector<1x1024xf32>
    %cst_41 = arith.constant 1.280000e+02 : f32
    %97 = vector.broadcast %cst_41 : f32 to vector<1x1024xf32>
    %98 = arith.divf %96, %97 : vector<1x1024xf32>
    %99 = vector.broadcast %91 : vector<1x1024xf32> to vector<128x1024xf32>
    %100 = arith.subf %85, %99 : vector<128x1024xf32>
    %cst_42 = arith.constant 9.99999974E-6 : f32
    %101 = vector.broadcast %cst_42 : f32 to vector<1x1024xf32>
    %102 = arith.addf %98, %101 : vector<1x1024xf32>
    %103 = math.rsqrt %102 : vector<1x1024xf32>
    %104 = vector.broadcast %103 : vector<1x1024xf32> to vector<128x1024xf32>
    %105 = arith.mulf %100, %104 : vector<128x1024xf32>
    %106 = vector.broadcast %86 : vector<1x1024xf32> to vector<128x1024xf32>
    %107 = arith.mulf %105, %106 : vector<128x1024xf32>
    %108 = vector.broadcast %87 : vector<1x1024xf32> to vector<128x1024xf32>
    %109 = arith.addf %107, %108 : vector<128x1024xf32>
    %cst_43 = arith.constant 0.000000e+00 : f32
    %110 = vector.broadcast %cst_43 : f32 to vector<128x1024xf32>
    %111 = arith.maximumf %109, %110 : vector<128x1024xf32>
    %112 = vector.shape_cast %111 : vector<128x1024xf32> to vector<2x64x1024xf32>
    %cst_44 = arith.constant dense<0xFF800000> : vector<2x1024xf32>
    %113 = vector.multi_reduction <maximumf>, %112, %cst_44 [1] : vector<2x64x1024xf32> to vector<2x1024xf32>
    %114 = arith.truncf %113 : vector<2x1024xf32> to vector<2x1024xbf16>
    %c0_45 = arith.constant 0 : index
    %c0_46 = arith.constant 0 : index
    %115 = vector.load %arg13[%c0_45, %c0_46] : memref<1024x512xbf16, #tpu.memory_space<vmem>>, vector<1024x512xbf16>
    %cst_47 = arith.constant dense<0.000000e+00> : vector<2x512xf32>
    %116 = tpu.matmul %114, %115, %cst_47 {dimension_numbers = #tpu.dot_dimension_numbers<[1], [0], [0], [1], [0, 0, 1, 1], [], []>} : vector<2x1024xbf16>, vector<1024x512xbf16>, vector<2x512xf32> -> vector<2x512xf32>
    %c0_48 = arith.constant 0 : index
    %c0_49 = arith.constant 0 : index
    %117 = vector.load %arg14[%c0_48, %c0_49] : memref<1x512xf32, #tpu.memory_space<vmem>>, vector<1x512xf32>
    %118 = vector.broadcast %117 : vector<1x512xf32> to vector<2x512xf32>
    %119 = arith.addf %116, %118 : vector<2x512xf32>
    %c0_50 = arith.constant 0 : index
    %c0_51 = arith.constant 0 : index
    %120 = vector.load %arg15[%c0_50, %c0_51] : memref<1x512xf32, #tpu.memory_space<vmem>>, vector<1x512xf32>
    %c0_52 = arith.constant 0 : index
    %c0_53 = arith.constant 0 : index
    %121 = vector.load %arg16[%c0_52, %c0_53] : memref<1x512xf32, #tpu.memory_space<vmem>>, vector<1x512xf32>
    %cst_54 = arith.constant dense<0.000000e+00> : vector<512xf32>
    %122 = vector.multi_reduction <add>, %119, %cst_54 [0] : vector<2x512xf32> to vector<512xf32>
    %123 = vector.shape_cast %122 : vector<512xf32> to vector<1x512xf32>
    %cst_55 = arith.constant 2.000000e+00 : f32
    %124 = vector.broadcast %cst_55 : f32 to vector<1x512xf32>
    %125 = arith.divf %123, %124 : vector<1x512xf32>
    %126 = vector.broadcast %125 : vector<1x512xf32> to vector<2x512xf32>
    %127 = arith.subf %119, %126 : vector<2x512xf32>
    %128 = arith.mulf %127, %127 : vector<2x512xf32>
    %cst_56 = arith.constant dense<0.000000e+00> : vector<512xf32>
    %129 = vector.multi_reduction <add>, %128, %cst_56 [0] : vector<2x512xf32> to vector<512xf32>
    %130 = vector.shape_cast %129 : vector<512xf32> to vector<1x512xf32>
    %cst_57 = arith.constant 2.000000e+00 : f32
    %131 = vector.broadcast %cst_57 : f32 to vector<1x512xf32>
    %132 = arith.divf %130, %131 : vector<1x512xf32>
    %133 = vector.broadcast %125 : vector<1x512xf32> to vector<2x512xf32>
    %134 = arith.subf %119, %133 : vector<2x512xf32>
    %cst_58 = arith.constant 9.99999974E-6 : f32
    %135 = vector.broadcast %cst_58 : f32 to vector<1x512xf32>
    %136 = arith.addf %132, %135 : vector<1x512xf32>
    %137 = math.rsqrt %136 : vector<1x512xf32>
    %138 = vector.broadcast %137 : vector<1x512xf32> to vector<2x512xf32>
    %139 = arith.mulf %134, %138 : vector<2x512xf32>
    %140 = vector.broadcast %120 : vector<1x512xf32> to vector<2x512xf32>
    %141 = arith.mulf %139, %140 : vector<2x512xf32>
    %142 = vector.broadcast %121 : vector<1x512xf32> to vector<2x512xf32>
    %143 = arith.addf %141, %142 : vector<2x512xf32>
    %cst_59 = arith.constant 0.000000e+00 : f32
    %144 = vector.broadcast %cst_59 : f32 to vector<2x512xf32>
    %145 = arith.maximumf %143, %144 : vector<2x512xf32>
    %146 = arith.truncf %145 : vector<2x512xf32> to vector<2x512xbf16>
    %c0_60 = arith.constant 0 : index
    %c0_61 = arith.constant 0 : index
    %147 = vector.load %arg17[%c0_60, %c0_61] : memref<512x128xbf16, #tpu.memory_space<vmem>>, vector<512x128xbf16>
    %cst_62 = arith.constant dense<0.000000e+00> : vector<2x128xf32>
    %148 = tpu.matmul %146, %147, %cst_62 {dimension_numbers = #tpu.dot_dimension_numbers<[1], [0], [0], [1], [0, 0, 1, 1], [], []>} : vector<2x512xbf16>, vector<512x128xbf16>, vector<2x128xf32> -> vector<2x128xf32>
    %c0_63 = arith.constant 0 : index
    %c0_64 = arith.constant 0 : index
    %149 = vector.load %arg18[%c0_63, %c0_64] : memref<1x128xf32, #tpu.memory_space<vmem>>, vector<1x128xf32>
    %150 = vector.broadcast %149 : vector<1x128xf32> to vector<2x128xf32>
    %151 = arith.addf %148, %150 : vector<2x128xf32>
    %c0_65 = arith.constant 0 : index
    %c0_66 = arith.constant 0 : index
    %152 = vector.load %arg19[%c0_65, %c0_66] : memref<1x128xf32, #tpu.memory_space<vmem>>, vector<1x128xf32>
    %c0_67 = arith.constant 0 : index
    %c0_68 = arith.constant 0 : index
    %153 = vector.load %arg20[%c0_67, %c0_68] : memref<1x128xf32, #tpu.memory_space<vmem>>, vector<1x128xf32>
    %cst_69 = arith.constant dense<0.000000e+00> : vector<128xf32>
    %154 = vector.multi_reduction <add>, %151, %cst_69 [0] : vector<2x128xf32> to vector<128xf32>
    %155 = vector.shape_cast %154 : vector<128xf32> to vector<1x128xf32>
    %cst_70 = arith.constant 2.000000e+00 : f32
    %156 = vector.broadcast %cst_70 : f32 to vector<1x128xf32>
    %157 = arith.divf %155, %156 : vector<1x128xf32>
    %158 = vector.broadcast %157 : vector<1x128xf32> to vector<2x128xf32>
    %159 = arith.subf %151, %158 : vector<2x128xf32>
    %160 = arith.mulf %159, %159 : vector<2x128xf32>
    %cst_71 = arith.constant dense<0.000000e+00> : vector<128xf32>
    %161 = vector.multi_reduction <add>, %160, %cst_71 [0] : vector<2x128xf32> to vector<128xf32>
    %162 = vector.shape_cast %161 : vector<128xf32> to vector<1x128xf32>
    %cst_72 = arith.constant 2.000000e+00 : f32
    %163 = vector.broadcast %cst_72 : f32 to vector<1x128xf32>
    %164 = arith.divf %162, %163 : vector<1x128xf32>
    %165 = vector.broadcast %157 : vector<1x128xf32> to vector<2x128xf32>
    %166 = arith.subf %151, %165 : vector<2x128xf32>
    %cst_73 = arith.constant 9.99999974E-6 : f32
    %167 = vector.broadcast %cst_73 : f32 to vector<1x128xf32>
    %168 = arith.addf %164, %167 : vector<1x128xf32>
    %169 = math.rsqrt %168 : vector<1x128xf32>
    %170 = vector.broadcast %169 : vector<1x128xf32> to vector<2x128xf32>
    %171 = arith.mulf %166, %170 : vector<2x128xf32>
    %172 = vector.broadcast %152 : vector<1x128xf32> to vector<2x128xf32>
    %173 = arith.mulf %171, %172 : vector<2x128xf32>
    %174 = vector.broadcast %153 : vector<1x128xf32> to vector<2x128xf32>
    %175 = arith.addf %173, %174 : vector<2x128xf32>
    %cst_74 = arith.constant 0.000000e+00 : f32
    %176 = vector.broadcast %cst_74 : f32 to vector<2x128xf32>
    %177 = arith.maximumf %175, %176 : vector<2x128xf32>
    %c0_75 = arith.constant 0 : index
    %c0_76 = arith.constant 0 : index
    %178 = vector.load %arg21[%c0_75, %c0_76] : memref<2x128xf32, #tpu.memory_space<vmem>>, vector<2x128xf32>
    tpu.vector_store %arg21[%c0_75, %c0_76], %177 {strides = array<i32>} : memref<2x128xf32, #tpu.memory_space<vmem>>, vector<2x128xf32>,
    return
  }
}

</mosaic_0001>

<bundles_post_ra>
// kernel: tpu_custom_call.1
= control target key start
LH: loop header
LB: loop body
LE: loop exit
PB: predicated region body
PF: predicated region fallthrough
CT: control target
= control target key end

     0   :  { %s11211_s0 = inlined_call_operand.vmem [shape: f32[128,3], index: 0, kind: input, shape index: {}]   ;;  %s11212_s1 = inlined_call_operand.vmem [shape: f32[3,64], index: 1, kind: input, shape index: {}]   ;;  %s11213_s2 = inlined_call_operand.vmem [shape: f32[1,64], index: 2, kind: input, shape index: {}]   ;;  %s11214_s3 = inlined_call_operand.vmem [shape: f32[1,64], index: 3, kind: input, shape index: {}]   ;;  %s11215_s4 = inlined_call_operand.vmem [shape: f32[1,64], index: 4, kind: input, shape index: {}]   ;;  %s11216_s5 = inlined_call_operand.vmem [shape: bf16[64,128], index: 5, kind: input, shape index: {}]   ;;  %s11217_s6 = inlined_call_operand.vmem [shape: f32[1,128], index: 6, kind: input, shape index: {}]   ;;  %s11218_s7 = inlined_call_operand.vmem [shape: f32[1,128], index: 7, kind: input, shape index: {}]   ;;  %s11219_s8 = inlined_call_operand.vmem [shape: f32[1,128], index: 8, kind: input, shape index: {}]   ;;  %s11220_s9 = inlined_call_operand.hbm [shape: bf16[128,1024], index: 9, kind: input, shape index: {}]   ;;  %s11221_s10 = inlined_call_operand.vmem [shape: f32[1,1024], index: 10, kind: input, shape index: {}]   ;;  %s11222_s11 = inlined_call_operand.vmem [shape: f32[1,1024], index: 11, kind: input, shape index: {}]   ;;  %s11223_s12 = inlined_call_operand.vmem [shape: f32[1,1024], index: 12, kind: input, shape index: {}]   ;;  %s11224_s13 = inlined_call_operand.hbm [shape: bf16[1024,512], index: 13, kind: input, shape index: {}]   ;;  %s11225_s14 = inlined_call_operand.vmem [shape: f32[1,512], index: 14, kind: input, shape index: {}]   ;;  %s11226_s15 = inlined_call_operand.vmem [shape: f32[1,512], index: 15, kind: input, shape index: {}]   ;;  %s11227_s16 = inlined_call_operand.vmem [shape: f32[1,512], index: 16, kind: input, shape index: {}]   ;;  %s11228_s17 = inlined_call_operand.hbm [shape: bf16[512,128], index: 17, kind: input, shape index: {}]   ;;  %s11229_s18 = inlined_call_operand.vmem [shape: f32[1,128], index: 18, kind: input, shape index: {}]   ;;  %s11230_s19 = inlined_call_operand.vmem [shape: f32[1,128], index: 19, kind: input, shape index: {}]   ;;  %s11231_s20 = inlined_call_operand.vmem [shape: f32[1,128], index: 20, kind: input, shape index: {}]   ;;  %s11232_s21 = inlined_call_operand.hbm [shape: f32[2,128], index: 21, kind: output, shape index: {}]  }
   0x1   :  { %11423 = sst [smem:[#allocation99_spill]] %s11211_s0 }
   0x2   :  { %11424 = sst [smem:[#allocation100_spill]] %s11212_s1 }
   0x3   :  { %11425 = sst [smem:[#allocation101_spill]] %s11213_s2 }
   0x4   :  { %11426 = sst [smem:[#allocation102_spill]] %s11214_s3 }
   0x5   :  { %11427 = sst [smem:[#allocation103_spill]] %s11215_s4 }
   0x6   :  { %11428 = sst [smem:[#allocation104_spill]] %s11216_s5 }
   0x7   :  { %26 = vsyncpa [#allocation3], 0 }
   0x8   :  { %27 = vsyncpa [#allocation6], 0  ;;  %s70_s26 = sshll.u32 %s11224_s13, 4  ;;  %s71_s26 = int_to_ptr.hbm [resolvable:$true] %s70_s26 }
   0x9   :  { %28 = vsyncpa [#allocation4], 0  ;;  %s7722_s27 = smov [#allocation5]   ;;  %s51_s0 = sshll.u32 %s11220_s9, 4  ;;  %s52_s0 = int_to_ptr.hbm [resolvable:$true] %s51_s0 }
   0xa   :  { %s72_s3 = sshll.u32 %s7722_s27, 4  ;;  %s7723_s4 = smov 256   ;;  %s73_s3 = int_to_ptr.vmem [resolvable:$true] %s72_s3 }
   0xb   :  { %s7724_s30 = smov 16   ;;  %s7725_s5 = smov [#allocation2]  }
   0xc   :  { %78 = dma.hbm_to_vmem [thread:$0]  %s71_s26, 32768, %s73_s3, [#allocation6], %s7723_s4, %s7723_s4, %s7724_s30  }
   0xd   :  { %s53_s22 = sshll.u32 %s7725_s5, 4  ;;  %s7726_s23 = smov 512   ;;  %s54_s22 = int_to_ptr.vmem [resolvable:$true] %s53_s22 }
   0xe   :  { %s7727_s1 = smov 32   ;;  %s89_s2 = sshll.u32 %s11228_s17, 4  ;;  %s90_s2 = int_to_ptr.hbm [resolvable:$true] %s89_s2 }
   0xf   :  { %59 = dma.hbm_to_vmem [thread:$0]  %s52_s0, 8192, %s54_s22, [#allocation3], %s7726_s23, %s7726_s23, %s7727_s1  }
  0x10   :  { %s7728_s25 = smov [#allocation7]   ;;  %s7729_s28 = smov 64  }
  0x11   :  { %s91_s27 = sshll.u32 %s7728_s25, 4  ;;  %s7730_s9 = smov 4   ;;  %s92_s27 = int_to_ptr.vmem [resolvable:$true] %s91_s27 }
  0x12   :  { %97 = dma.hbm_to_vmem [thread:$0]  %s90_s2, 4096, %s92_s27, [#allocation6], %s7729_s28, %s7729_s28, %s7730_s9  }
  0x13   :  { %7716 = dma.done.wait [#allocation3], 8192  }
  0x14   :  { %7717 = vsyncadd [#allocation3], 4294959104 }
  0x15   :  { %7718 = dma.done.wait [#allocation6], 36864  }
  0x16   :  { %7719 = vsyncadd [#allocation6], 4294930432  ;;  %v7731_v0 = vmov 2   ;;  %v7732_v1 = vmov 1   ;;  %v7733_v2 = vmov 0   ;;  %s11429_s3 = sld [smem:[#allocation99_spill]] }
  0x17   :  { %7551 = vset.pattern.permute.xlu0 %v7731_v0  ;;  %7548 = vset.pattern.permute.xlu1 %v7732_v1  ;;  %s11430_s24 = sld [smem:[#allocation100_spill]]  ;;  %vm447_vm0 = vcmask 523264  }
  0x18   :  { %7549 = vset.pattern.permute.xlu2 %v7733_v2  ;;  %s11431_s29 = sld [smem:[#allocation101_spill]] }
  0x19   :  { %s11433_s30 = sld [smem:[#allocation104_spill]] }
  0x1a   :  { %s11434_s27 = sld [smem:[#allocation102_spill]] }
  0x1b   :  { %s11435_s17 = sld [smem:[#allocation103_spill]] }
  0x1c   :  { %v119_v3 = vld [vmem:[%s11429_s3 + $0x10] sm:$0xff]  ;;  %v117_v4 = vld [vmem:[%s11429_s3] sm:$0xff]  ;;  %v118_v6 = vld [vmem:[%s11429_s3 + $0x8] sm:$0xff] }
  0x1d   :  { %146 = vperm.xlu2 %7549, %v119_v3   ;;  %329 = vperm.xlu0 %7551, %v117_v4   ;;  %v121_v5 = vld [vmem:[%s11429_s3 + $0x20] sm:$0xff]  ;;  %v126_v7 = vld [vmem:[%s11429_s3 + $0x48] sm:$0xff]  ;;  %v120_v8 = vld [vmem:[%s11429_s3 + $0x18] sm:$0xff] }
  0x1e   :  { %232 = vperm.xlu1 %7548, %v117_v4   ;;  %v124_v9 = vld [vmem:[%s11429_s3 + $0x38] sm:$0xff]  ;;  %v7889_v10 = vld [vmem:[%s11429_s3 + $0x60] sm:$0xff]  ;;  %v122_v11 = vld [vmem:[%s11429_s3 + $0x28] sm:$0xff] }
  0x1f   :  { %v123_v12 = vld [vmem:[%s11429_s3 + $0x30] sm:$0xff]  ;;  %v125_v13 = vld [vmem:[%s11429_s3 + $0x40] sm:$0xff]  ;;  %v128_v22 = vld [vmem:[%s11429_s3 + $0x58] sm:$0xff] }
  0x20   :  { %v131_v14 = vld [vmem:[%s11429_s3 + $0x70] sm:$0xff]  ;;  %v133_v17 = vld [vmem:[%s11430_s24] sm:$0x7]  ;;  %v130_v29 = vld [vmem:[%s11429_s3 + $0x68] sm:$0xff] }
  0x21   :  { %v127_v16 = vld [vmem:[%s11429_s3 + $0x50] sm:$0xff]  ;;  %v7920_v18 = vperm.slane %v133_v17, 0  ;;  %v7923_v20 = vperm.slane %v133_v17, 1  ;;  %v7932_v26 = vperm.slane %v133_v17, 2  ;;  %v132_v44 = vld [vmem:[%s11429_s3 + $0x78] sm:$0xff] }
  0x25   :  { %7550 = vset.pattern.permute.xlu2 %v7732_v1  ;;  %345 = vperm.xlu0 %7551, %v121_v5  }
  0x26   :  { %236 = vperm.xlu1 %7548, %v118_v6   ;;  %240 = vperm.xlu2 %7550, %v119_v3  }
  0x2d   :  { %365 = vperm.xlu0 %7551, %v126_v7  }
  0x2e   :  { %7552 = vset.pattern.permute.xlu1 %v7731_v0  ;;  %7553 = vset.pattern.permute.xlu2 %v7733_v2 }
  0x2f   :  { %333 = vperm.xlu1 %7552, %v118_v6   ;;  %151 = vperm.xlu2 %7553, %v120_v8  }
  0x35   :  { %7564 = vset.pattern.permute.xlu0 %v7732_v1 }
  0x36   :  { %260 = vperm.xlu0 %7564, %v124_v9  }
  0x37   :  { %7554 = vset.pattern.permute.xlu1 %v7732_v1  ;;  %7555 = vset.pattern.permute.xlu2 %v7731_v0 }
  0x38   :  { %244 = vperm.xlu1 %7554, %v120_v8   ;;  %337 = vperm.xlu2 %7555, %v119_v3  }
  0x3e   :  { %280 = vperm.xlu0 %7564, %v7889_v10  }
  0x40   :  { %248 = vperm.xlu1 %7554, %v121_v5   ;;  %341 = vperm.xlu2 %7555, %v120_v8  }
  0x46   :  { %7567 = vset.pattern.permute.xlu0 %v7733_v2 }
  0x47   :  { %136 = vperm.xlu0 %7567, %v117_v4  }
  0x48   :  { %7556 = vset.pattern.permute.xlu1 %v7733_v2  ;;  %7557 = vset.pattern.permute.xlu2 %v7732_v1 }
  0x49   :  { %161 = vperm.xlu1 %7556, %v122_v11   ;;  %252 = vperm.xlu2 %7557, %v122_v11  }
  0x4f   :  { %141 = vperm.xlu0 %7567, %v118_v6  }
  0x51   :  { %166 = vperm.xlu1 %7556, %v123_v12   ;;  %256 = vperm.xlu2 %7557, %v123_v12  }
  0x57   :  { %156 = vperm.xlu0 %7567, %v121_v5  }
  0x59   :  { %7558 = vset.pattern.permute.xlu1 %v7731_v0  ;;  %7559 = vset.pattern.permute.xlu2 %v7733_v2 }
  0x5a   :  { %349 = vperm.xlu1 %7558, %v122_v11   ;;  %171 = vperm.xlu2 %7559, %v124_v9  }
  0x5f   :  { %181 = vperm.xlu0 %7567, %v126_v7  }
  0x62   :  { %353 = vperm.xlu1 %7558, %v123_v12   ;;  %176 = vperm.xlu2 %7559, %v125_v13  }
  0x67   :  { %206 = vperm.xlu0 %7567, %v131_v14  }
  0x6a   :  { %7560 = vset.pattern.permute.xlu1 %v7732_v1  ;;  %7561 = vset.pattern.permute.xlu2 %v7731_v0 }
  0x6b   :  { %264 = vperm.xlu1 %7560, %v125_v13   ;;  %357 = vperm.xlu2 %7561, %v124_v9  }
  0x6f   :  { %7572 = vset.pattern.permute.xlu0 %v7731_v0 }
  0x70   :  { %385 = vperm.xlu0 %7572, %v131_v14  }
  0x73   :  { %268 = vperm.xlu1 %7560, %v126_v7   ;;  %361 = vperm.xlu2 %7561, %v125_v13  }
  0x77   :  { %v147_v15 = vpop.permute.xlu2 %146 }
  0x78   :  { %v217_v19 = vmul.f32 %v7920_v18, %v147_v15 }
  0x7b   :  { %7562 = vset.pattern.permute.xlu1 %v7733_v2  ;;  %7563 = vset.pattern.permute.xlu2 %v7732_v1 }
  0x7c   :  { %186 = vperm.xlu1 %7562, %v127_v16   ;;  %272 = vperm.xlu2 %7563, %v127_v16  }
  0x80   :  { %v241_v21 = vpop.permute.xlu2 %240 }
  0x81   :  { %v298_v23 = vmul.f32 %v7923_v20, %v241_v21 }
  0x83   :  { %v314_v24 = vadd.f32 %v298_v23, %v217_v19 }
  0x84   :  { %191 = vperm.xlu1 %7562, %v128_v22   ;;  %276 = vperm.xlu2 %7563, %v128_v22  }
  0x89   :  { %v152_v25 = vpop.permute.xlu2 %151 }
  0x8a   :  { %v218_v41 = vmul.f32 %v7920_v18, %v152_v25 }
  0x8c   :  { %7565 = vset.pattern.permute.xlu1 %v7731_v0  ;;  %7566 = vset.pattern.permute.xlu2 %v7733_v2 }
  0x8d   :  { %369 = vperm.xlu1 %7565, %v127_v16   ;;  %196 = vperm.xlu2 %7566, %v7889_v10  }
  0x8f   :  { %v330_v27 = vpop.permute.xlu0 %329 }
  0x90   :  { %v233_v28 = vpop.permute.xlu1 %232  ;;  %v393_v57 = vmul.f32 %v7932_v26, %v330_v27 }
  0x91   :  { %v296_v55 = vmul.f32 %v7923_v20, %v233_v28 }
  0x92   :  { %v338_v30 = vpop.permute.xlu2 %337 }
  0x93   :  { %v395_v31 = vmul.f32 %v7932_v26, %v338_v30 }
  0x95   :  { %373 = vperm.xlu1 %7565, %v128_v22   ;;  %201 = vperm.xlu2 %7566, %v130_v29   ;;  %v411_v32 = vadd.f32 %v395_v31, %v314_v24 }
  0x97   :  { %v346_v33 = vpop.permute.xlu0 %345 }
  0x98   :  { %v237_v34 = vpop.permute.xlu1 %236  ;;  %v397_v12 = vmul.f32 %v7932_v26, %v346_v33 }
  0x99   :  { %v297_v61 = vmul.f32 %v7923_v20, %v237_v34 }
  0x9a   :  { %v342_v35 = vpop.permute.xlu2 %341 }
  0x9b   :  { %v396_v42 = vmul.f32 %v7932_v26, %v342_v35 }
  0x9d   :  { %7568 = vset.pattern.permute.xlu1 %v7732_v1  ;;  %7569 = vset.pattern.permute.xlu2 %v7731_v0 }
  0x9e   :  { %284 = vperm.xlu1 %7568, %v130_v29   ;;  %377 = vperm.xlu2 %7569, %v7889_v10  }
  0x9f   :  { %v7941_v36 = vpop.permute.xlu0 %365 }
  0xa1   :  { %v334_v37 = vpop.permute.xlu1 %333 }
  0xa2   :  { %v394_v3 = vmul.f32 %v7932_v26, %v334_v37 }
  0xa3   :  { %v253_v38 = vpop.permute.xlu2 %252 }
  0xa4   :  { %v301_v51 = vmul.f32 %v7923_v20, %v253_v38 }
  0xa6   :  { %288 = vperm.xlu1 %7568, %v131_v14   ;;  %381 = vperm.xlu2 %7569, %v130_v29  }
  0xa8   :  { %v261_v39 = vpop.permute.xlu0 %260 }
  0xa9   :  { %v303_v21 = vmul.f32 %v7923_v20, %v261_v39 }
  0xaa   :  { %v245_v40 = vpop.permute.xlu1 %244 }
  0xab   :  { %v299_v43 = vmul.f32 %v7923_v20, %v245_v40  ;;  %v257_v47 = vpop.permute.xlu2 %256 }
  0xac   :  { %v302_v62 = vmul.f32 %v7923_v20, %v257_v47 }
  0xad   :  { %v315_v45 = vadd.f32 %v299_v43, %v218_v41 }
  0xae   :  { %7570 = vset.pattern.permute.xlu1 %v7733_v2  ;;  %7571 = vset.pattern.permute.xlu2 %v7732_v1  ;;  %v7965_v2 = vld [vmem:[%s11431_s29] ss:$0 sm:$0xff] }
  0xaf   :  { %v412_v46 = vadd.f32 %v396_v42, %v315_v45  ;;  %211 = vperm.xlu1 %7570, %v132_v44   ;;  %292 = vperm.xlu2 %7571, %v132_v44   ;;  %v7973_v10 = vadd.f32 %v7965_v2, %v411_v32 }
  0xb0   :  { %v7951_v48 = vpop.permute.xlu0 %280 }
  0xb1   :  { %v7980_v13 = vadd.f32 %v7965_v2, %v412_v46  ;;  %v451_v24 = vsel %vm447_vm0, %v7973_v10, 0.0 }
  0xb2   :  { %v249_v49 = vpop.permute.xlu1 %248 }
  0xb3   :  { %v300_v15 = vmul.f32 %v7923_v20, %v249_v49  ;;  %v453_v30 = vsel %vm447_vm0, %v7980_v13, 0.0 }
  0xb4   :  { %v172_v52 = vpop.permute.xlu2 %171 }
  0xb5   :  { %v222_v22 = vmul.f32 %v7920_v18, %v172_v52 }
  0xb7   :  { %7573 = vset.pattern.permute.xlu1 %v7731_v0  ;;  %v319_v33 = vadd.f32 %v303_v21, %v222_v22  ;;  %v402_v22 = vmul.f32 %v7932_v26, %v7941_v36 }
  0xb8   :  { %389 = vperm.xlu1 %7573, %v132_v44  }
  0xb9   :  { %v137_v50 = vpop.permute.xlu0 %136 }
  0xba   :  { %v215_v53 = vmul.f32 %v7920_v18, %v137_v50 }
  0xbb   :  { %v162_v54 = vpop.permute.xlu1 %161 }
  0xbc   :  { %v220_v56 = vmul.f32 %v7920_v18, %v162_v54  ;;  %v312_v58 = vadd.f32 %v296_v55, %v215_v53  ;;  %v177_v4 = vpop.permute.xlu2 %176 }
  0xbe   :  { %v317_v59 = vadd.f32 %v301_v51, %v220_v56  ;;  %v409_v63 = vadd.f32 %v393_v57, %v312_v58 }
  0xc0   :  { %v7970_v7 = vadd.f32 %v7965_v2, %v409_v63 }
  0xc1   :  { %v142_v60 = vpop.permute.xlu0 %141 }
  0xc2   :  { %v216_v0 = vmul.f32 %v7920_v18, %v142_v60  ;;  %v448_v16 = vsel %vm447_vm0, %v7970_v7, 0.0 }
  0xc3   :  { %v167_v1 = vpop.permute.xlu1 %166 }
  0xc4   :  { %v313_v5 = vadd.f32 %v297_v61, %v216_v0  ;;  %v221_v6 = vmul.f32 %v7920_v18, %v167_v1 }
  0xc5   :  { %v358_v31 = vpop.permute.xlu2 %357 }
  0xc6   :  { %v410_v8 = vadd.f32 %v394_v3, %v313_v5  ;;  %v318_v9 = vadd.f32 %v302_v62, %v221_v6  ;;  %v400_v34 = vmul.f32 %v7932_v26, %v358_v31  ;;  %v223_v6 = vmul.f32 %v7920_v18, %v177_v4 }
  0xc8   :  { %v7976_v11 = vadd.f32 %v7965_v2, %v410_v8  ;;  %v416_v41 = vadd.f32 %v400_v34, %v319_v33 }
  0xc9   :  { %v157_v14 = vpop.permute.xlu0 %156 }
  0xca   :  { %v449_v17 = vsel %vm447_vm0, %v7976_v11, 0.0  ;;  %v219_v19 = vmul.f32 %v7920_v18, %v157_v14  ;;  %v8008_v47 = vadd.f32 %v7965_v2, %v416_v41 }
  0xcb   :  { %v450_v23 = vadd.f32 %v449_v17, %v448_v16 }
  0xcc   :  { %v316_v25 = vadd.f32 %v300_v15, %v219_v19  ;;  %v350_v27 = vpop.permute.xlu1 %349  ;;  %v461_v51 = vsel %vm447_vm0, %v8008_v47, 0.0 }
  0xcd   :  { %v452_v28 = vadd.f32 %v451_v24, %v450_v23  ;;  %v398_v29 = vmul.f32 %v7932_v26, %v350_v27  ;;  %v362_v56 = vpop.permute.xlu2 %361 }
  0xce   :  { %v413_v32 = vadd.f32 %v397_v12, %v316_v25  ;;  %v401_v14 = vmul.f32 %v7932_v26, %v362_v56 }
  0xcf   :  { %v454_v35 = vadd.f32 %v453_v30, %v452_v28  ;;  %v414_v37 = vadd.f32 %v398_v29, %v317_v59 }
  0xd0   :  { %v7997_v38 = vadd.f32 %v7965_v2, %v413_v32 }
  0xd1   :  { %v8000_v39 = vadd.f32 %v7965_v2, %v414_v37  ;;  %v182_v3 = vpop.permute.xlu0 %181 }
  0xd2   :  { %v455_v40 = vsel %vm447_vm0, %v7997_v38, 0.0  ;;  %v224_v8 = vmul.f32 %v7920_v18, %v182_v3 }
  0xd3   :  { %v456_v42 = vadd.f32 %v455_v40, %v454_v35  ;;  %v457_v43 = vsel %vm447_vm0, %v8000_v39, 0.0  ;;  %v308_v35 = vmul.f32 %v7923_v20, %v7951_v48 }
  0xd4   :  { %v354_v44 = vpop.permute.xlu1 %353 }
  0xd5   :  { %v458_v45 = vadd.f32 %v457_v43, %v456_v42  ;;  %v399_v46 = vmul.f32 %v7932_v26, %v354_v44 }
  0xd6   :  { %v273_v58 = vpop.permute.xlu2 %272 }
  0xd7   :  { %v415_v49 = vadd.f32 %v399_v46, %v318_v9  ;;  %v306_v19 = vmul.f32 %v7923_v20, %v273_v58 }
  0xd9   :  { %v8011_v50 = vadd.f32 %v7965_v2, %v415_v49  ;;  %v207_v24 = vpop.permute.xlu0 %206 }
  0xda   :  { %v229_v46 = vmul.f32 %v7920_v18, %v207_v24 }
  0xdb   :  { %v459_v52 = vsel %vm447_vm0, %v8011_v50, 0.0 }
  0xdc   :  { %v460_v53 = vadd.f32 %v459_v52, %v458_v45 }
  0xdd   :  { %v265_v54 = vpop.permute.xlu1 %264 }
  0xde   :  { %v462_v55 = vadd.f32 %v461_v51, %v460_v53  ;;  %v277_v60 = vpop.permute.xlu2 %276  ;;  %v304_v5 = vmul.f32 %v7923_v20, %v265_v54 }
  0xdf   :  { %v307_v4 = vmul.f32 %v7923_v20, %v277_v60 }
  0xe0   :  { %v320_v15 = vadd.f32 %v304_v5, %v223_v6  ;;  %v7734_v5 = vmov 128.0  }
  0xe1   :  { %7583 = vrcp.f32 %v7734_v5 }
  0xe2   :  { %v417_v23 = vadd.f32 %v401_v14, %v320_v15  ;;  %v386_v49 = vpop.permute.xlu0 %385 }
  0xe4   :  { %v8031_v32 = vadd.f32 %v7965_v2, %v417_v23 }
  0xe5   :  { %v269_v57 = vpop.permute.xlu1 %268 }
  0xe6   :  { %v305_v9 = vmul.f32 %v7923_v20, %v269_v57  ;;  %v463_v45 = vsel %vm447_vm0, %v8031_v32, 0.0 }
  0xe7   :  { %v197_v63 = vpop.permute.xlu2 %196 }
  0xe8   :  { %v321_v16 = vadd.f32 %v305_v9, %v224_v8  ;;  %v227_v40 = vmul.f32 %v7920_v18, %v197_v63 }
  0xea   :  { %v418_v28 = vadd.f32 %v402_v22, %v321_v16  ;;  %v324_v56 = vadd.f32 %v308_v35, %v227_v40 }
  0xec   :  { %v8037_v37 = vadd.f32 %v7965_v2, %v418_v28 }
  0xee   :  { %v187_v59 = vpop.permute.xlu1 %186  ;;  %v465_v54 = vsel %vm447_vm0, %v8037_v37, 0.0 }
  0xef   :  { %v202_v1 = vpop.permute.xlu2 %201  ;;  %v225_v21 = vmul.f32 %v7920_v18, %v187_v59  ;;  %v407_v59 = vmul.f32 %v7932_v26, %v386_v49 }
  0xf0   :  { %v228_v42 = vmul.f32 %v7920_v18, %v202_v1 }
  0xf1   :  { %v322_v30 = vadd.f32 %v306_v19, %v225_v21  ;;  %v7584_v19 = vpop.eup %7583 }
  0xf2   :  { %vm490_vm1 = vweird.f32 %v7584_v19 }
  0xf6   :  { %v192_v61 = vpop.permute.xlu1 %191 }
  0xf7   :  { %v226_v25 = vmul.f32 %v7920_v18, %v192_v61  ;;  %v464_v61 = vadd.f32 %v463_v45, %v462_v55 }
  0xf8   :  { %v378_v17 = vpop.permute.xlu2 %377 }
  0xf9   :  { %v323_v33 = vadd.f32 %v307_v4, %v226_v25  ;;  %v405_v51 = vmul.f32 %v7932_v26, %v378_v17  ;;  %v466_v1 = vadd.f32 %v465_v54, %v464_v61 }
  0xff   :  { %v370_v62 = vpop.permute.xlu1 %369 }
 0x100   :  { %v403_v27 = vmul.f32 %v7932_v26, %v370_v62  ;;  %v382_v41 = vpop.permute.xlu2 %381  ;;  %v421_v62 = vadd.f32 %v405_v51, %v324_v56 }
 0x101   :  { %v406_v53 = vmul.f32 %v7932_v26, %v382_v41 }
 0x102   :  { %v419_v34 = vadd.f32 %v403_v27, %v322_v30 }
 0x104   :  { %v8047_v48 = vadd.f32 %v7965_v2, %v419_v34 }
 0x106   :  { %v467_v63 = vsel %vm447_vm0, %v8047_v48, 0.0 }
 0x107   :  { %v374_v0 = vpop.permute.xlu1 %373  ;;  %v468_v9 = vadd.f32 %v467_v63, %v466_v1 }
 0x108   :  { %v404_v31 = vmul.f32 %v7932_v26, %v374_v0 }
 0x109   :  { %v293_v3 = vpop.permute.xlu2 %292 }
 0x10a   :  { %v420_v43 = vadd.f32 %v404_v31, %v323_v33  ;;  %v311_v55 = vmul.f32 %v7923_v20, %v293_v3 }
 0x10c   :  { %v8053_v57 = vadd.f32 %v7965_v2, %v420_v43 }
 0x10e   :  { %v469_v6 = vsel %vm447_vm0, %v8053_v57, 0.0 }
 0x10f   :  { %v470_v16 = vadd.f32 %v469_v6, %v468_v9 }
 0x110   :  { %v285_v12 = vpop.permute.xlu1 %284 }
 0x111   :  { %v309_v36 = vmul.f32 %v7923_v20, %v285_v12  ;;  %v8061_v12 = vadd.f32 %v7965_v2, %v421_v62 }
 0x113   :  { %v325_v52 = vadd.f32 %v309_v36, %v228_v42  ;;  %v471_v22 = vsel %vm447_vm0, %v8061_v12, 0.0 }
 0x114   :  { %v472_v25 = vadd.f32 %v471_v22, %v470_v16 }
 0x115   :  { %v422_v0 = vadd.f32 %v406_v53, %v325_v52 }
 0x117   :  { %v8064_v14 = vadd.f32 %v7965_v2, %v422_v0 }
 0x118   :  { %v289_v29 = vpop.permute.xlu1 %288 }
 0x119   :  { %v310_v44 = vmul.f32 %v7923_v20, %v289_v29  ;;  %v473_v23 = vsel %vm447_vm0, %v8064_v14, 0.0 }
 0x11a   :  { %v474_v28 = vadd.f32 %v473_v23, %v472_v25 }
 0x11b   :  { %v326_v58 = vadd.f32 %v310_v44, %v229_v46 }
 0x11d   :  { %v423_v8 = vadd.f32 %v407_v59, %v326_v58 }
 0x11f   :  { %v8069_v17 = vadd.f32 %v7965_v2, %v423_v8 }
 0x121   :  { %v212_v60 = vpop.permute.xlu1 %211  ;;  %v475_v20 = vsel %vm447_vm0, %v8069_v17, 0.0 }
 0x122   :  { %v230_v15 = vmul.f32 %v7920_v18, %v212_v60  ;;  %v486_v18 = vmul.f32 128.0, %v7584_v19  ;;  %v476_v30 = vadd.f32 %v475_v20, %v474_v28 }
 0x124   :  { %v327_v24 = vadd.f32 %v311_v55, %v230_v15  ;;  %v487_v31 = vsub.f32 1.0, %v486_v18 }
 0x126   :  { %v488_v35 = vmul.f32 %v7584_v19, %v487_v31 }
 0x128   :  { %v489_v41 = vadd.f32 %v7584_v19, %v488_v35 }
 0x12a   :  { %v390_v21 = vpop.permute.xlu1 %389  ;;  %v8083_v44 = vsel %vm490_vm1, %v7584_v19, %v489_v41  ;;  %vm3488_vm1 = vcmask 1041409  }
 0x12b   :  { %v408_v4 = vmul.f32 %v7932_v26, %v390_v21  ;;  %11432 = vst [vmem:[#allocation12_spill] sm:$0xff] %v8083_v44 }
 0x12d   :  { %v424_v27 = vadd.f32 %v408_v4, %v327_v24 }
 0x12f   :  { %v8079_v29 = vadd.f32 %v7965_v2, %v424_v27 }
 0x131   :  { %v477_v33 = vsel %vm447_vm0, %v8079_v29, 0.0 }
 0x132   :  { %v478_v34 = vadd.f32 %v477_v33, %v476_v30 }
 0x134   :  { %v479_v36 = vrot.slane %v478_v34, 4 }
 0x136   :  { %v480_v40 = vadd.f32 %v479_v36, %v478_v34 }
 0x138   :  { %v481_v26 = vrot.slane %v480_v40, 2 }
 0x13a   :  { %v482_v42 = vadd.f32 %v481_v26, %v480_v40 }
 0x13c   :  { %v483_v43 = vrot.slane %v482_v42, 1 }
 0x13e   :  { %v484_v45 = vadd.f32 %v483_v43, %v482_v42 }
 0x140   :  { %v492_v2 = vmul.f32 %v8083_v44, %v484_v45 }
 0x142   :  { %v8087_v46 = vsub.f32 %v7970_v7, %v492_v2  ;;  %v8090_v49 = vsub.f32 %v7976_v11, %v492_v2  ;;  %v8093_v51 = vsub.f32 %v7973_v10, %v492_v2  ;;  %v8096_v52 = vsub.f32 %v7980_v13, %v492_v2 }
 0x143   :  { %v8099_v53 = vsub.f32 %v7997_v38, %v492_v2  ;;  %v8102_v54 = vsub.f32 %v8000_v39, %v492_v2  ;;  %v8105_v56 = vsub.f32 %v8011_v50, %v492_v2  ;;  %v8108_v7 = vsub.f32 %v8008_v47, %v492_v2 }
 0x144   :  { %v509_v11 = vmul.f32 %v8087_v46, %v8087_v46  ;;  %v510_v10 = vmul.f32 %v8090_v49, %v8090_v49  ;;  %v511_v13 = vmul.f32 %v8093_v51, %v8093_v51  ;;  %v512_v38 = vmul.f32 %v8096_v52, %v8096_v52 }
 0x145   :  { %v513_v47 = vmul.f32 %v8099_v53, %v8099_v53  ;;  %v514_v61 = vmul.f32 %v8102_v54, %v8102_v54  ;;  %v8127_v0 = vsub.f32 %v8031_v32, %v492_v2  ;;  %v515_v1 = vmul.f32 %v8105_v56, %v8105_v56 }
 0x146   :  { %v525_v39 = vsel %vm447_vm0, %v509_v11, 0.0  ;;  %v526_v50 = vsel %vm447_vm0, %v510_v10, 0.0  ;;  %v528_v59 = vsel %vm447_vm0, %v511_v13, 0.0  ;;  %v530_v62 = vsel %vm447_vm0, %v512_v38, 0.0  ;;  %v7180_v11 = vld [vmem:[%s11433_s30 + $0x18] sm:$0xff]  ;;  %v7179_v38 = vld [vmem:[%s11433_s30 + $0x10] sm:$0xff] }
 0x147   :  { %v527_v58 = vadd.f32 %v526_v50, %v525_v39  ;;  %v532_v3 = vsel %vm447_vm0, %v513_v47, 0.0  ;;  %v8133_v6 = vsub.f32 %v8037_v37, %v492_v2  ;;  %v516_v8 = vmul.f32 %v8108_v7, %v8108_v7  ;;  %716 = vmatpush.bf16.msra.mxu0 %v7180_v11  ;;  %v7178_v50 = vld [vmem:[%s11433_s30 + $0x8] sm:$0xff] }
 0x148   :  { %v534_v9 = vsel %vm447_vm0, %v514_v61, 0.0  ;;  %v8139_v15 = vsub.f32 %v8047_v48, %v492_v2  ;;  %v517_v32 = vmul.f32 %v8127_v0, %v8127_v0  ;;  %v536_v16 = vsel %vm447_vm0, %v515_v1, 0.0 }
 0x149   :  { %v529_v60 = vadd.f32 %v528_v59, %v527_v58  ;;  %v8145_v21 = vsub.f32 %v8053_v57, %v492_v2  ;;  %v518_v37 = vmul.f32 %v8133_v6, %v8133_v6  ;;  %v538_v22 = vsel %vm447_vm0, %v516_v8, 0.0  ;;  %v7177_v59 = vld [vmem:[%s11433_s30] sm:$0xff] }
 0x14a   :  { %v8151_v24 = vsub.f32 %v8061_v12, %v492_v2  ;;  %v519_v48 = vmul.f32 %v8139_v15, %v8139_v15  ;;  %v540_v4 = vsel %vm447_vm0, %v517_v32, 0.0  ;;  %v8157_v20 = vsub.f32 %v8064_v14, %v492_v2 }
 0x14b   :  { %v531_v63 = vadd.f32 %v530_v62, %v529_v60  ;;  %v520_v57 = vmul.f32 %v8145_v21, %v8145_v21  ;;  %v542_v18 = vsel %vm447_vm0, %v518_v37, 0.0  ;;  %v8163_v28 = vsub.f32 %v8069_v17, %v492_v2  ;;  %717 = vmatpush.bf16.msra.mxu0 %v7179_v38  ;;  %v8205_v37 = vld [vmem:[%s11435_s17] ss:$0 sm:$0xff] }
 0x14c   :  { %v521_v12 = vmul.f32 %v8151_v24, %v8151_v24  ;;  %v544_v30 = vsel %vm447_vm0, %v519_v48, 0.0  ;;  %v508_v33 = vsub.f32 %v8079_v29, %v492_v2  ;;  %v522_v14 = vmul.f32 %v8157_v20, %v8157_v20 }
 0x14d   :  { %v533_v5 = vadd.f32 %v532_v3, %v531_v63  ;;  %v546_v34 = vsel %vm447_vm0, %v520_v57, 0.0  ;;  %v523_v35 = vmul.f32 %v8163_v28, %v8163_v28 }
 0x14e   :  { %v548_v17 = vsel %vm447_vm0, %v521_v12, 0.0  ;;  %v524_v26 = vmul.f32 %v508_v33, %v508_v33  ;;  %v550_v41 = vsel %vm447_vm0, %v522_v14, 0.0 }
 0x14f   :  { %v535_v55 = vadd.f32 %v534_v9, %v533_v5  ;;  %v552_v43 = vsel %vm447_vm0, %v523_v35, 0.0  ;;  %718 = vmatpush.bf16.msra.mxu0 %v7178_v50 }
 0x150   :  { %v554_v29 = vsel %vm447_vm0, %v524_v26, 0.0 }
 0x151   :  { %v537_v19 = vadd.f32 %v536_v16, %v535_v55  ;;  %v8194_v55 = vld [vmem:[%s11434_s27] ss:$0 sm:$0xff] }
 0x153   :  { %v539_v23 = vadd.f32 %v538_v22, %v537_v19  ;;  %719 = vmatpush.bf16.msra.mxu0 %v7177_v59 }
 0x155   :  { %v541_v25 = vadd.f32 %v540_v4, %v539_v23 }
 0x157   :  { %v543_v27 = vadd.f32 %v542_v18, %v541_v25 }
 0x159   :  { %v545_v31 = vadd.f32 %v544_v30, %v543_v27 }
 0x15b   :  { %v547_v36 = vadd.f32 %v546_v34, %v545_v31 }
 0x15d   :  { %v549_v40 = vadd.f32 %v548_v17, %v547_v36 }
 0x15f   :  { %v551_v42 = vadd.f32 %v550_v41, %v549_v40 }
 0x161   :  { %v553_v45 = vadd.f32 %v552_v43, %v551_v42 }
 0x163   :  { %v555_v2 = vadd.f32 %v554_v29, %v553_v45 }
 0x165   :  { %v556_v10 = vrot.slane %v555_v2, 4 }
 0x167   :  { %v557_v13 = vadd.f32 %v556_v10, %v555_v2 }
 0x169   :  { %v558_v39 = vrot.slane %v557_v13, 2 }
 0x16b   :  { %v559_v58 = vadd.f32 %v558_v39, %v557_v13 }
 0x16d   :  { %v560_v47 = vrot.slane %v559_v58, 1 }
 0x16f   :  { %v561_v60 = vadd.f32 %v560_v47, %v559_v58 }
 0x171   :  { %v562_v61 = vmul.f32 %v561_v60, %v8083_v44 }
 0x173   :  { %v563_v62 = vadd.f32 1e-05, %v562_v61 }
 0x175   :  { %7585 = vrsqrt.f32 %v563_v62  ;;  %vm570_vm3 = vweird.f32 %v563_v62 }
 0x17b   :  { %v7586_v63 = vpop.eup %7585 }
 0x17c   :  { %v565_v1 = vmul.f32 %v7586_v63, %v563_v62  ;;  %vm571_vm2 = vweird.f32 %v7586_v63 }
 0x17d   :  { %vm572_vm4 = vmor %vm570_vm3, %vm571_vm2 }
 0x17e   :  { %v566_v3 = vmul.f32 %v7586_v63, %v565_v1 }
 0x180   :  { %v567_v5 = vmul.f32 0.5, %v566_v3 }
 0x182   :  { %v568_v8 = vsub.f32 1.5, %v567_v5 }
 0x184   :  { %v569_v9 = vmul.f32 %v7586_v63, %v568_v8 }
 0x186   :  { %v8196_v32 = vsel %vm572_vm4, %v7586_v63, %v569_v9 }
 0x187   :  { %v574_v16 = vmul.f32 %v8196_v32, %v8087_v46  ;;  %v575_v19 = vmul.f32 %v8196_v32, %v8090_v49  ;;  %v576_v48 = vmul.f32 %v8196_v32, %v8093_v51  ;;  %v577_v46 = vmul.f32 %v8196_v32, %v8096_v52 }
 0x188   :  { %v589_v27 = vmul.f32 %v8196_v32, %v508_v33  ;;  %v582_v30 = vmul.f32 %v8196_v32, %v8127_v0  ;;  %v583_v51 = vmul.f32 %v8196_v32, %v8133_v6  ;;  %v584_v14 = vmul.f32 %v8196_v32, %v8139_v15 }
 0x189   :  { %v593_v22 = vmul.f32 %v8194_v55, %v574_v16  ;;  %v594_v23 = vmul.f32 %v8194_v55, %v575_v19  ;;  %v595_v18 = vmul.f32 %v8194_v55, %v576_v48  ;;  %v596_v31 = vmul.f32 %v8194_v55, %v577_v46 }
 0x18a   :  { %v585_v52 = vmul.f32 %v8196_v32, %v8145_v21  ;;  %v601_v33 = vmul.f32 %v8194_v55, %v582_v30  ;;  %v602_v36 = vmul.f32 %v8194_v55, %v583_v51  ;;  %v586_v0 = vmul.f32 %v8196_v32, %v8151_v24 }
 0x18b   :  { %v612_v4 = vadd.f32 %v8205_v37, %v593_v22  ;;  %v613_v25 = vadd.f32 %v8205_v37, %v594_v23  ;;  %v614_v34 = vadd.f32 %v8205_v37, %v595_v18  ;;  %v603_v6 = vmul.f32 %v8194_v55, %v584_v14 }
 0x18c   :  { %v604_v35 = vmul.f32 %v8194_v55, %v585_v52  ;;  %v587_v15 = vmul.f32 %v8196_v32, %v8157_v20  ;;  %v588_v21 = vmul.f32 %v8196_v32, %v8163_v28  ;;  %v620_v17 = vadd.f32 %v8205_v37, %v601_v33 }
 0x18d   :  { %v628_v49 = vmax.f32 %v612_v4, 0.0  ;;  %v629_v57 = vmax.f32 %v613_v25, 0.0  ;;  %v621_v40 = vadd.f32 %v8205_v37, %v602_v36  ;;  %v605_v26 = vmul.f32 %v8194_v55, %v586_v0 }
 0x18e   :  { %v608_v41 = vmul.f32 %v8194_v55, %v589_v27  ;;  %v622_v24 = vadd.f32 %v8205_v37, %v603_v6  ;;  %v623_v42 = vadd.f32 %v8205_v37, %v604_v35  ;;  %v606_v43 = vmul.f32 %v8194_v55, %v587_v15 }
 0x18f   :  { %v644_v12 = vpack.c.bf16 %v629_v57, %v628_v49  ;;  %v607_v45 = vmul.f32 %v8194_v55, %v588_v21  ;;  %v636_v20 = vmax.f32 %v620_v17, 0.0  ;;  %v637_v29 = vmax.f32 %v621_v40, 0.0 }
 0x190   :  { %v624_v28 = vadd.f32 %v8205_v37, %v605_v26  ;;  %v627_v2 = vadd.f32 %v8205_v37, %v608_v41  ;;  %v638_v11 = vmax.f32 %v622_v24, 0.0  ;;  %v639_v10 = vmax.f32 %v623_v42, 0.0 }
 0x191   :  { %5761 = vmatmul.msk.bf16.vlgmr.msra.gmra.mxu0 %vm447_vm0, %v644_v12  ;;  %v625_v13 = vadd.f32 %v8205_v37, %v606_v43  ;;  %v626_v38 = vadd.f32 %v8205_v37, %v607_v45  ;;  %v615_v39 = vadd.f32 %v8205_v37, %v596_v31  ;;  %v648_v50 = vpack.c.bf16 %v637_v29, %v636_v20 }
 0x192   :  { %v640_v58 = vmax.f32 %v624_v28, 0.0  ;;  %v643_v47 = vmax.f32 %v627_v2, 0.0  ;;  %v649_v59 = vpack.c.bf16 %v639_v10, %v638_v11  ;;  %v630_v1 = vmax.f32 %v614_v34, 0.0 }
 0x193   :  { %v641_v60 = vmax.f32 %v625_v13, 0.0  ;;  %v642_v61 = vmax.f32 %v626_v38, 0.0  ;;  %v631_v3 = vmax.f32 %v615_v39, 0.0  ;;  %v578_v8 = vmul.f32 %v8196_v32, %v8099_v53 }
 0x194   :  { %v579_v9 = vmul.f32 %v8196_v32, %v8102_v54  ;;  %v580_v46 = vmul.f32 %v8196_v32, %v8105_v56  ;;  %v581_v53 = vmul.f32 %v8196_v32, %v8108_v7 }
 0x195   :  { %v650_v62 = vpack.c.bf16 %v641_v60, %v640_v58  ;;  %v651_v63 = vpack.c.bf16 %v643_v47, %v642_v61  ;;  %v645_v5 = vpack.c.bf16 %v631_v3, %v630_v1  ;;  %v597_v16 = vmul.f32 %v8194_v55, %v578_v8 }
 0x196   :  { %v598_v19 = vmul.f32 %v8194_v55, %v579_v9  ;;  %v599_v54 = vmul.f32 %v8194_v55, %v580_v46  ;;  %v600_v49 = vmul.f32 %v8194_v55, %v581_v53  ;;  %v7577_v55 = vld [vmem:[%s11217_s6] ss:$0 sm:$0xff]  ;;  %s7736_s6 = smov [#allocation8]  }
 0x197   :  { %v616_v22 = vadd.f32 %v8205_v37, %v597_v16  ;;  %s5732_s29 = sshll.u32 %s7736_s6, 4  ;;  %s5733_s29 = int_to_ptr.vmem [resolvable:$true] %s5732_s29 }
 0x198   :  { %v617_v23 = vadd.f32 %v8205_v37, %v598_v19  ;;  %v618_v57 = vadd.f32 %v8205_v37, %v599_v54  ;;  %v619_v18 = vadd.f32 %v8205_v37, %v600_v49 }
 0x199   :  { %v632_v48 = vmax.f32 %v616_v22, 0.0 }
 0x19a   :  { %v633_v4 = vmax.f32 %v617_v23, 0.0  ;;  %v634_v27 = vmax.f32 %v618_v57, 0.0  ;;  %v635_v12 = vmax.f32 %v619_v18, 0.0 }
 0x19c   :  { %v646_v25 = vpack.c.bf16 %v633_v4, %v632_v48  ;;  %v647_v30 = vpack.c.bf16 %v635_v12, %v634_v27 }
 0x1a1   :  { %5762 = vmatmul.msk.bf16.gmra.mxu0 %vm447_vm0, %v645_v5 }
 0x1b1   :  { %5763 = vmatmul.msk.bf16.gmra.mxu0 %vm447_vm0, %v646_v25 }
 0x1c1   :  { %5764 = vmatmul.msk.bf16.gmra.mxu0 %vm447_vm0, %v647_v30 }
 0x1d1   :  { %5765 = vmatmul.msk.bf16.gmra.mxu0 %vm447_vm0, %v648_v50 }
 0x1e1   :  { %5766 = vmatmul.msk.bf16.gmra.mxu0 %vm447_vm0, %v649_v59 }
 0x1f1   :  { %5767 = vmatmul.msk.bf16.gmra.mxu0 %vm447_vm0, %v650_v62 }
 0x201   :  { %5768 = vmatmul.msk.bf16.gmra.mxu0 %vm447_vm0, %v651_v63 }
 0x20e   :  { %v721_v56 = vpop.f32.mrf.mxu0 }
 0x20f   :  { %v722_v37 = vadd.f32 %v7577_v55, %v721_v56 }
 0x216   :  { %v723_v7 = vpop.f32.mrf.mxu0 }
 0x217   :  { %v724_v32 = vadd.f32 %v7577_v55, %v723_v7 }
 0x219   :  { %v763_v31 = vadd.f32 %v724_v32, %v722_v37 }
 0x21e   :  { %v726_v51 = vpop.f32.mrf.mxu0 }
 0x21f   :  { %v727_v14 = vadd.f32 %v7577_v55, %v726_v51 }
 0x221   :  { %v764_v52 = vadd.f32 %v763_v31, %v727_v14 }
 0x226   :  { %v728_v34 = vpop.f32.mrf.mxu0 }
 0x227   :  { %v729_v33 = vadd.f32 %v7577_v55, %v728_v34 }
 0x229   :  { %v765_v0 = vadd.f32 %v764_v52, %v729_v33 }
 0x22e   :  { %v731_v36 = vpop.f32.mrf.mxu0 }
 0x22f   :  { %v732_v6 = vadd.f32 %v7577_v55, %v731_v36 }
 0x231   :  { %v766_v35 = vadd.f32 %v765_v0, %v732_v6 }
 0x236   :  { %v733_v15 = vpop.f32.mrf.mxu0 }
 0x237   :  { %v734_v43 = vadd.f32 %v7577_v55, %v733_v15 }
 0x239   :  { %v767_v20 = vadd.f32 %v766_v35, %v734_v43 }
 0x23e   :  { %v736_v21 = vpop.f32.mrf.mxu0 }
 0x23f   :  { %v737_v45 = vadd.f32 %v7577_v55, %v736_v21 }
 0x241   :  { %v768_v2 = vadd.f32 %v767_v20, %v737_v45 }
 0x246   :  { %v738_v17 = vpop.f32.mrf.mxu0 }
 0x247   :  { %v739_v29 = vadd.f32 %v7577_v55, %v738_v17 }
 0x249   :  { %v769_v10 = vadd.f32 %v768_v2, %v739_v29 }
 0x24e   :  { %v741_v40 = vpop.f32.mrf.mxu0 }
 0x24f   :  { %v742_v11 = vadd.f32 %v7577_v55, %v741_v40 }
 0x251   :  { %v770_v38 = vadd.f32 %v769_v10, %v742_v11  ;;  %v7237_v10 = vld [vmem:[#allocation2 + $0x1c4] sm:$0xf] }
 0x256   :  { %v743_v26 = vpop.f32.mrf.mxu0 }
 0x257   :  { %v744_v13 = vadd.f32 %v7577_v55, %v743_v26 }
 0x259   :  { %v771_v50 = vadd.f32 %v770_v38, %v744_v13 }
 0x25e   :  { %v746_v41 = vpop.f32.mrf.mxu0 }
 0x25f   :  { %v747_v39 = vadd.f32 %v7577_v55, %v746_v41 }
 0x261   :  { %v772_v59 = vadd.f32 %v771_v50, %v747_v39  ;;  %v6003_v50 = vld [vmem:[#allocation2 + $0x1c8] sm:$0xf] }
 0x266   :  { %v748_v24 = vpop.f32.mrf.mxu0 }
 0x267   :  { %v749_v58 = vadd.f32 %v7577_v55, %v748_v24 }
 0x269   :  { %v773_v61 = vadd.f32 %v772_v59, %v749_v58 }
 0x26e   :  { %v751_v42 = vpop.f32.mrf.mxu0 }
 0x26f   :  { %v752_v60 = vadd.f32 %v7577_v55, %v751_v42  ;;  %v7238_v42 = vld [vmem:[#allocation2 + $0x1cc] sm:$0xf] }
 0x271   :  { %v774_v63 = vadd.f32 %v773_v61, %v752_v60 }
 0x276   :  { %v753_v28 = vpop.f32.mrf.mxu0 }
 0x277   :  { %v754_v62 = vadd.f32 %v7577_v55, %v753_v28 }
 0x279   :  { %v775_v3 = vadd.f32 %v774_v63, %v754_v62  ;;  %v7230_v63 = vld [vmem:[#allocation2 + $0x18c] sm:$0xf] }
 0x27e   :  { %v756_v47 = vpop.f32.mrf.mxu0 }
 0x27f   :  { %v8277_v1 = vadd.f32 %v7577_v55, %v756_v47 }
 0x281   :  { %v776_v8 = vadd.f32 %v775_v3, %v8277_v1  ;;  %v5973_v3 = vld [vmem:[#allocation2 + $0x1a8] sm:$0xf0] }
 0x286   :  { %v758_v5 = vpop.f32.mrf.mxu0 }
 0x287   :  { %v8280_v9 = vadd.f32 %v7577_v55, %v758_v5  ;;  %v5963_v5 = vld [vmem:[#allocation2 + $0x180] sm:$0xf] }
 0x289   :  { %v777_v16 = vadd.f32 %v776_v8, %v8280_v9 }
 0x28b   :  { %v778_v19 = vrot.slane %v777_v16, 4 }
 0x28d   :  { %v779_v22 = vadd.f32 %v778_v19, %v777_v16  ;;  %v5976_v19 = vor.u32 %v7230_v63, %v5973_v3  ;;  %v7209_v63 = vld [vmem:[#allocation2 + $0xdc] sm:$0xf0]  ;;  %v7205_v3 = vld [vmem:[#allocation2 + $0xc4] sm:$0xf] }
 0x28f   :  { %v780_v23 = vrot.slane %v779_v22, 2 }
 0x291   :  { %v781_v48 = vadd.f32 %v780_v23, %v779_v22  ;;  %v7233_v22 = vld [vmem:[#allocation2 + $0x19c] sm:$0xf0]  ;;  %v7229_v23 = vld [vmem:[#allocation2 + $0x184] sm:$0xf] }
 0x293   :  { %v782_v4 = vrot.slane %v781_v48, 1 }
 0x295   :  { %v783_v25 = vadd.f32 %v782_v4, %v781_v48  ;;  %v5965_v48 = vld [vmem:[#allocation2 + $0x1a0] sm:$0xf0]  ;;  %v5964_v4 = vor.u32 %v7233_v22, %v5963_v5  ;;  %v7210_v22 = vld [vmem:[#allocation2 + $0xe4] sm:$0xf0] }
 0x297   :  { %v8284_v46 = vmul.f32 %v783_v25, %v8083_v44  ;;  %v5968_v25 = vor.u32 %v7229_v23, %v5965_v48 }
 0x299   :  { %v8287_v53 = vsub.f32 %v722_v37, %v8284_v46  ;;  %v8290_v54 = vsub.f32 %v724_v32, %v8284_v46  ;;  %v8293_v49 = vsub.f32 %v727_v14, %v8284_v46  ;;  %v8296_v57 = vsub.f32 %v732_v6, %v8284_v46 }
 0x29a   :  { %v8303_v12 = vsub.f32 %v729_v33, %v8284_v46  ;;  %v8308_v7 = vsub.f32 %v734_v43, %v8284_v46  ;;  %v8313_v37 = vsub.f32 %v737_v45, %v8284_v46  ;;  %v8318_v14 = vsub.f32 %v739_v29, %v8284_v46  ;;  %v6005_v43 = vld [vmem:[#allocation2 + $0x1e8] sm:$0xf0]  ;;  %v5995_v45 = vld [vmem:[#allocation2 + $0x1c0] sm:$0xf] }
 0x29b   :  { %v801_v18 = vmul.f32 %v8287_v53, %v8287_v53  ;;  %v802_v27 = vmul.f32 %v8290_v54, %v8290_v54  ;;  %v803_v30 = vmul.f32 %v8293_v49, %v8293_v49  ;;  %v805_v51 = vmul.f32 %v8296_v57, %v8296_v57 }
 0x29c   :  { %v804_v55 = vmul.f32 %v8303_v12, %v8303_v12  ;;  %v806_v52 = vmul.f32 %v8308_v7, %v8308_v7  ;;  %v8323_v33 = vsub.f32 %v742_v11, %v8284_v46  ;;  %v807_v36 = vmul.f32 %v8313_v37, %v8313_v37  ;;  %v7241_v11 = vld [vmem:[#allocation2 + $0x1dc] sm:$0xf0] }
 0x29d   :  { %v817_v56 = vadd.f32 %v802_v27, %v801_v18  ;;  %v8328_v6 = vsub.f32 %v744_v13, %v8284_v46  ;;  %v808_v35 = vmul.f32 %v8318_v14, %v8318_v14  ;;  %v8333_v21 = vsub.f32 %v747_v39, %v8284_v46  ;;  %v5997_v13 = vld [vmem:[#allocation2 + $0x1e0] sm:$0xf0]  ;;  %v5971_v18 = vld [vmem:[#allocation2 + $0x188] sm:$0xf] }
 0x29e   :  { %v809_v17 = vmul.f32 %v8323_v33, %v8323_v33  ;;  %v8338_v26 = vsub.f32 %v749_v58, %v8284_v46  ;;  %v8343_v20 = vsub.f32 %v752_v60, %v8284_v46  ;;  %v6008_v2 = vor.u32 %v7238_v42, %v6005_v43  ;;  %v7242_v58 = vld [vmem:[#allocation2 + $0x1e4] sm:$0xf0]  ;;  %v5899_v43 = vld [vmem:[#allocation2 + $0x100] sm:$0xf] }
 0x29f   :  { %v818_v32 = vadd.f32 %v817_v56, %v803_v30  ;;  %v810_v41 = vmul.f32 %v8328_v6, %v8328_v6  ;;  %v811_v29 = vmul.f32 %v8333_v21, %v8333_v21  ;;  %v5996_v38 = vor.u32 %v7241_v11, %v5995_v45  ;;  %v7234_v27 = vld [vmem:[#allocation2 + $0x1a4] sm:$0xf0]  ;;  %v7217_v45 = vld [vmem:[#allocation2 + $0x11c] sm:$0xf0]  ;;  %v5901_v11 = vld [vmem:[#allocation2 + $0x120] sm:$0xf0] }
 0x2a0   :  { %v6000_v39 = vor.u32 %v7237_v10, %v5997_v13  ;;  %v8348_v47 = vsub.f32 %v754_v62, %v8284_v46  ;;  %v812_v59 = vmul.f32 %v8338_v26, %v8338_v26  ;;  %1477 = vmatpush.bf16.msrb.mxu0 %v6008_v2  ;;  %v6004_v61 = vor.u32 %v7242_v58, %v6003_v50  ;;  %v5907_v10 = vld [vmem:[#allocation2 + $0x108] sm:$0xf]  ;;  %v7214_v50 = vld [vmem:[#allocation2 + $0x10c] sm:$0xf] }
 0x2a1   :  { %v819_v31 = vadd.f32 %v818_v32, %v804_v55  ;;  %1330 = vmatpush.bf16.msra.mxu1 %v5996_v38  ;;  %v8354_v8 = vsub.f32 %v8277_v1, %v8284_v46  ;;  %v813_v16 = vmul.f32 %v8343_v20, %v8343_v20  ;;  %v8360_v30 = vsub.f32 %v8280_v9, %v8284_v46  ;;  %v5931_v32 = vld [vmem:[#allocation2 + $0x140] sm:$0xf]  ;;  %v5939_v9 = vld [vmem:[#allocation2 + $0x148] sm:$0xf]  ;;  %v5909_v58 = vld [vmem:[#allocation2 + $0x128] sm:$0xf0] }
 0x2a2   :  { %1379 = vmatpush.bf16.msra.mxu2 %v6000_v39  ;;  %1428 = vmatpush.bf16.msra.mxu3 %v6004_v61  ;;  %v814_v1 = vmul.f32 %v8348_v47, %v8348_v47  ;;  %v5972_v55 = vor.u32 %v7234_v27, %v5971_v18  ;;  %v7226_v46 = vld [vmem:[#allocation2 + $0x164] sm:$0xf0]  ;;  %v5900_v2 = vor.u32 %v7217_v45, %v5899_v43  ;;  %v5867_v61 = vld [vmem:[#allocation2 + $0xc0] sm:$0xf]  ;;  %v5805_v43 = vld [vmem:[#allocation2 + $0x60] sm:$0xf0] }
 0x2a3   :  { %v820_v34 = vadd.f32 %v819_v31, %v805_v51  ;;  %v7225_v51 = vld [vmem:[#allocation2 + $0x15c] sm:$0xf0]  ;;  %v7221_v31 = vld [vmem:[#allocation2 + $0x144] sm:$0xf]  ;;  %v7218_v13 = vld [vmem:[#allocation2 + $0x124] sm:$0xf0] }
 0x2a4   :  { %1478 = vmatpush.bf16.msrb.mxu0 %v5976_v19  ;;  %v5908_v39 = vor.u32 %v7218_v13, %v5907_v10  ;;  %v5875_v19 = vld [vmem:[#allocation2 + $0xc8] sm:$0xf]  ;;  %v5813_v10 = vld [vmem:[#allocation2 + $0x68] sm:$0xf0] }
 0x2a5   :  { %v821_v0 = vadd.f32 %v820_v34, %v806_v52  ;;  %1331 = vmatpush.bf16.msra.mxu1 %v5964_v4  ;;  %v815_v52 = vmul.f32 %v8354_v8, %v8354_v8  ;;  %v5876_v48 = vor.u32 %v7210_v22, %v5875_v19  ;;  %v7206_v4 = vld [vmem:[#allocation2 + $0xcc] sm:$0xf]  ;;  %v5811_v45 = vld [vmem:[#allocation2 + $0x48] sm:$0xf] }
 0x2a6   :  { %1380 = vmatpush.bf16.msra.mxu2 %v5968_v25  ;;  %1429 = vmatpush.bf16.msra.mxu3 %v5972_v55  ;;  %v5877_v25 = vld [vmem:[#allocation2 + $0xe8] sm:$0xf0] }
 0x2a7   :  { %v822_v15 = vadd.f32 %v821_v0, %v807_v36  ;;  %v5932_v36 = vor.u32 %v7225_v51, %v5931_v32  ;;  %v5933_v0 = vld [vmem:[#allocation2 + $0x160] sm:$0xf0]  ;;  %v5880_v27 = vor.u32 %v7206_v4, %v5877_v25 }
 0x2a8   :  { %v7197_v51 = vld [vmem:[#allocation2 + $0x84] sm:$0xf] }
 0x2a9   :  { %v823_v40 = vadd.f32 %v822_v15, %v808_v35  ;;  %v5936_v35 = vor.u32 %v7221_v31, %v5933_v0  ;;  %v5940_v15 = vor.u32 %v7226_v46, %v5939_v9  ;;  %1332 = vmatpush.bf16.msra.mxu1 %v5932_v36  ;;  %v5837_v31 = vld [vmem:[#allocation2 + $0xa0] sm:$0xf0]  ;;  %v7202_v36 = vld [vmem:[#allocation2 + $0xa4] sm:$0xf0]  ;;  %v7198_v0 = vld [vmem:[#allocation2 + $0x8c] sm:$0xf] }
 0x2ab   :  { %v824_v24 = vadd.f32 %v823_v40, %v809_v17  ;;  %v7222_v17 = vld [vmem:[#allocation2 + $0x14c] sm:$0xf]  ;;  %1381 = vmatpush.bf16.msra.mxu2 %v5936_v35  ;;  %1430 = vmatpush.bf16.msra.mxu3 %v5940_v15 }
 0x2ac   :  { %v5941_v40 = vld [vmem:[#allocation2 + $0x168] sm:$0xf0] }
 0x2ad   :  { %v825_v28 = vadd.f32 %v824_v24, %v810_v41  ;;  %v816_v41 = vmul.f32 %v8360_v30, %v8360_v30  ;;  %v5944_v42 = vor.u32 %v7222_v17, %v5941_v40  ;;  %1333 = vmatpush.bf16.msra.mxu1 %v5900_v2  ;;  %v5845_v35 = vld [vmem:[#allocation2 + $0xa8] sm:$0xf0]  ;;  %v5803_v17 = vld [vmem:[#allocation2 + $0x40] sm:$0xf] }
 0x2ae   :  { %v5848_v15 = vor.u32 %v7198_v0, %v5845_v35  ;;  %v7193_v40 = vld [vmem:[#allocation2 + $0x5c] sm:$0xf0] }
 0x2af   :  { %v826_v60 = vadd.f32 %v825_v28, %v811_v29  ;;  %v7213_v29 = vld [vmem:[#allocation2 + $0x104] sm:$0xf]  ;;  %1479 = vmatpush.bf16.msrb.mxu0 %v5944_v42  ;;  %1431 = vmatpush.bf16.msra.mxu3 %v5908_v39  ;;  %v5804_v42 = vor.u32 %v7193_v40, %v5803_v17  ;;  %v5771_v39 = vld [vmem:[#allocation2] sm:$0xf] }
 0x2b0   :  { %v5904_v38 = vor.u32 %v7213_v29, %v5901_v11  ;;  %v7194_v29 = vld [vmem:[#allocation2 + $0x64] sm:$0xf0]  ;;  %v7190_v11 = vld [vmem:[#allocation2 + $0x4c] sm:$0xf] }
 0x2b1   :  { %v827_v62 = vadd.f32 %v826_v60, %v812_v59  ;;  %v5912_v60 = vor.u32 %v7214_v50, %v5909_v58  ;;  %v5812_v2 = vor.u32 %v7194_v29, %v5811_v45  ;;  %v7185_v50 = vld [vmem:[#allocation2 + $0x1c] sm:$0xf0]  ;;  %v7181_v58 = vld [vmem:[#allocation2 + $0x4] sm:$0xf] }
 0x2b2   :  { %1382 = vmatpush.bf16.msra.mxu2 %v5904_v38  ;;  %v5816_v38 = vor.u32 %v7190_v11, %v5813_v10 }
 0x2b3   :  { %v828_v56 = vadd.f32 %v827_v62, %v813_v16  ;;  %1480 = vmatpush.bf16.msrb.mxu0 %v5912_v60  ;;  %v5868_v16 = vor.u32 %v7209_v63, %v5867_v61  ;;  %v5869_v62 = vld [vmem:[#allocation2 + $0xe0] sm:$0xf0]  ;;  %1432 = vmatpush.bf16.msra.mxu3 %v5876_v48  ;;  %v5772_v60 = vor.u32 %v7185_v50, %v5771_v39  ;;  %v5779_v63 = vld [vmem:[#allocation2 + $0x8] sm:$0xf] }
 0x2b4   :  { %v5872_v23 = vor.u32 %v7205_v3, %v5869_v62  ;;  %v5773_v61 = vld [vmem:[#allocation2 + $0x20] sm:$0xf0]  ;;  %v5781_v62 = vld [vmem:[#allocation2 + $0x28] sm:$0xf0] }
 0x2b5   :  { %v829_v34 = vadd.f32 %v828_v56, %v814_v1  ;;  %1334 = vmatpush.bf16.msra.mxu1 %v5868_v16  ;;  %v5835_v1 = vld [vmem:[#allocation2 + $0x80] sm:$0xf]  ;;  %v5776_v3 = vor.u32 %v7181_v58, %v5773_v61  ;;  %v7182_v16 = vld [vmem:[#allocation2 + $0xc] sm:$0xf] }
 0x2b6   :  { %1383 = vmatpush.bf16.msra.mxu2 %v5872_v23  ;;  %v7201_v56 = vld [vmem:[#allocation2 + $0x9c] sm:$0xf0]  ;;  %v5784_v22 = vor.u32 %v7182_v16, %v5781_v62 }
 0x2b7   :  { %v830_v24 = vadd.f32 %v829_v34, %v815_v52  ;;  %1481 = vmatpush.bf16.msrb.mxu0 %v5880_v27  ;;  %v5836_v32 = vor.u32 %v7201_v56, %v5835_v1  ;;  %v5843_v52 = vld [vmem:[#allocation2 + $0x88] sm:$0xf]  ;;  %v5840_v34 = vor.u32 %v7197_v51, %v5837_v31  ;;  %v8374_v56 = vld [vmem:[%s11218_s7] ss:$0 sm:$0xff] }
 0x2b8   :  { %v5844_v46 = vor.u32 %v7202_v36, %v5843_v52 }
 0x2b9   :  { %v831_v28 = vadd.f32 %v830_v24, %v816_v41  ;;  %1335 = vmatpush.bf16.msra.mxu1 %v5836_v32  ;;  %v7189_v41 = vld [vmem:[#allocation2 + $0x44] sm:$0xf] }
 0x2ba   :  { %1384 = vmatpush.bf16.msra.mxu2 %v5840_v34  ;;  %1433 = vmatpush.bf16.msra.mxu3 %v5844_v46 }
 0x2bb   :  { %v832_v59 = vrot.slane %v831_v28, 4  ;;  %1482 = vmatpush.bf16.msrb.mxu0 %v5848_v15 }
 0x2bd   :  { %v833_v5 = vadd.f32 %v832_v59, %v831_v28  ;;  %v5808_v28 = vor.u32 %v7189_v41, %v5805_v43  ;;  %1336 = vmatpush.bf16.msra.mxu1 %v5804_v42 }
 0x2be   :  { %1434 = vmatpush.bf16.msra.mxu3 %v5812_v2 }
 0x2bf   :  { %v834_v18 = vrot.slane %v833_v5, 2  ;;  %1385 = vmatpush.bf16.msra.mxu2 %v5808_v28  ;;  %1483 = vmatpush.bf16.msrb.mxu0 %v5816_v38 }
 0x2c1   :  { %v835_v55 = vadd.f32 %v834_v18, %v833_v5  ;;  %v7186_v5 = vld [vmem:[#allocation2 + $0x24] sm:$0xf0]  ;;  %1337 = vmatpush.bf16.msra.mxu1 %v5772_v60 }
 0x2c2   :  { %v5780_v19 = vor.u32 %v7186_v5, %v5779_v63 }
 0x2c3   :  { %v836_v9 = vrot.slane %v835_v55, 1  ;;  %1386 = vmatpush.bf16.msra.mxu2 %v5776_v3  ;;  %1484 = vmatpush.bf16.msrb.mxu0 %v5784_v22 }
 0x2c4   :  { %1435 = vmatpush.bf16.msra.mxu3 %v5780_v19 }
 0x2c5   :  { %v837_v24 = vadd.f32 %v836_v9, %v835_v55 }
 0x2c7   :  { %v838_v13 = vmul.f32 %v837_v24, %v8083_v44 }
 0x2c9   :  { %v839_v59 = vadd.f32 1e-05, %v838_v13 }
 0x2cb   :  { %7587 = vrsqrt.f32 %v839_v59  ;;  %vm846_vm6 = vweird.f32 %v839_v59 }
 0x2d1   :  { %v7588_v23 = vpop.eup %7587 }
 0x2d2   :  { %v841_v48 = vmul.f32 %v7588_v23, %v839_v59  ;;  %vm847_vm5 = vweird.f32 %v7588_v23 }
 0x2d3   :  { %vm848_vm7 = vmor %vm846_vm6, %vm847_vm5 }
 0x2d4   :  { %v842_v4 = vmul.f32 %v7588_v23, %v841_v48 }
 0x2d6   :  { %v843_v25 = vmul.f32 0.5, %v842_v4 }
 0x2d8   :  { %v844_v18 = vsub.f32 1.5, %v843_v25 }
 0x2da   :  { %v845_v27 = vmul.f32 %v7588_v23, %v844_v18 }
 0x2dc   :  { %v8369_v1 = vsel %vm848_vm7, %v7588_v23, %v845_v27 }
 0x2dd   :  { %v858_v55 = vmul.f32 %v8369_v1, %v8323_v33  ;;  %v859_v32 = vmul.f32 %v8369_v1, %v8328_v6  ;;  %v860_v51 = vmul.f32 %v8369_v1, %v8333_v21  ;;  %v861_v31 = vmul.f32 %v8369_v1, %v8338_v26  ;;  %v8393_v33 = vld [vmem:[%s11219_s8] ss:$0 sm:$0xff]  ;;  %s5734_s8 = sshll.u32 %s11232_s21, 4  ;;  %s5735_s8 = int_to_ptr.hbm [resolvable:$true] %s5734_s8 }
 0x2de   :  { %v862_v52 = vmul.f32 %v8369_v1, %v8343_v20  ;;  %v863_v34 = vmul.f32 %v8369_v1, %v8348_v47  ;;  %v864_v36 = vmul.f32 %v8369_v1, %v8354_v8  ;;  %v865_v6 = vmul.f32 %v8369_v1, %v8360_v30 }
 0x2df   :  { %v877_v21 = vmul.f32 %v8374_v56, %v858_v55  ;;  %v878_v26 = vmul.f32 %v8374_v56, %v859_v32  ;;  %v879_v20 = vmul.f32 %v8374_v56, %v860_v51  ;;  %v880_v0 = vmul.f32 %v8374_v56, %v861_v31 }
 0x2e0   :  { %v881_v47 = vmul.f32 %v8374_v56, %v862_v52  ;;  %v882_v8 = vmul.f32 %v8374_v56, %v863_v34  ;;  %v883_v9 = vmul.f32 %v8374_v56, %v864_v36  ;;  %v884_v46 = vmul.f32 %v8374_v56, %v865_v6  ;;  %v7239_v6 = vld [vmem:[#allocation2 + $0x1d4] sm:$0xf] }
 0x2e1   :  { %v896_v35 = vadd.f32 %v8393_v33, %v877_v21  ;;  %v897_v30 = vadd.f32 %v8393_v33, %v878_v26  ;;  %v898_v15 = vadd.f32 %v8393_v33, %v879_v20  ;;  %v899_v17 = vadd.f32 %v8393_v33, %v880_v0  ;;  %v6013_v21 = vld [vmem:[#allocation2 + $0x1f0] sm:$0xf0]  ;;  %v6011_v26 = vld [vmem:[#allocation2 + $0x1d0] sm:$0xf] }
 0x2e2   :  { %v900_v40 = vadd.f32 %v8393_v33, %v881_v47  ;;  %v901_v41 = vadd.f32 %v8393_v33, %v882_v8  ;;  %v902_v24 = vadd.f32 %v8393_v33, %v883_v9  ;;  %v903_v42 = vadd.f32 %v8393_v33, %v884_v46  ;;  %v7243_v47 = vld [vmem:[#allocation2 + $0x1ec] sm:$0xf0] }
 0x2e3   :  { %v914_v43 = vmax.f32 %v898_v15, 0.0  ;;  %v915_v45 = vmax.f32 %v899_v17, 0.0  ;;  %v850_v10 = vmul.f32 %v8369_v1, %v8287_v53  ;;  %v851_v13 = vmul.f32 %v8369_v1, %v8290_v54  ;;  %v6019_v15 = vld [vmem:[#allocation2 + $0x1d8] sm:$0xf] }
 0x2e4   :  { %v916_v29 = vmax.f32 %v900_v40, 0.0  ;;  %v917_v28 = vmax.f32 %v901_v41, 0.0  ;;  %v918_v2 = vmax.f32 %v902_v24, 0.0  ;;  %v919_v11 = vmax.f32 %v903_v42, 0.0  ;;  %v7244_v40 = vld [vmem:[#allocation2 + $0x1f4] sm:$0xf0] }
 0x2e5   :  { %v912_v38 = vmax.f32 %v896_v35, 0.0  ;;  %v8417_v39 = vpack.c.bf16 %v915_v45, %v914_v43  ;;  %v913_v58 = vmax.f32 %v897_v30, 0.0  ;;  %v869_v60 = vmul.f32 %v8374_v56, %v850_v10  ;;  %v5981_v30 = vld [vmem:[#allocation2 + $0x1b0] sm:$0xf0]  ;;  %v5979_v41 = vld [vmem:[#allocation2 + $0x190] sm:$0xf] }
 0x2e6   :  { %v8419_v50 = vpack.c.bf16 %v917_v28, %v916_v29  ;;  %v8421_v59 = vpack.c.bf16 %v919_v11, %v918_v2  ;;  %v870_v61 = vmul.f32 %v8374_v56, %v851_v13  ;;  %v853_v54 = vmul.f32 %v8369_v1, %v8303_v12  ;;  %v7235_v24 = vld [vmem:[#allocation2 + $0x1ac] sm:$0xf0]  ;;  %v7240_v43 = vld [vmem:[#allocation2 + $0x1dc] sm:$0xf]  ;;  %v7223_v28 = vld [vmem:[#allocation2 + $0x154] sm:$0xf] }
 0x2e7   :  { %v888_v63 = vadd.f32 %v8393_v33, %v869_v60  ;;  %v8427_v16 = vpack.c.bf16 %v913_v58, %v912_v38  ;;  %v852_v19 = vmul.f32 %v8369_v1, %v8293_v49  ;;  %v854_v49 = vmul.f32 %v8369_v1, %v8296_v57  ;;  %v6021_v45 = vld [vmem:[#allocation2 + $0x1f8] sm:$0xf0]  ;;  %v5949_v2 = vld [vmem:[#allocation2 + $0x170] sm:$0xf0]  ;;  %v5987_v11 = vld [vmem:[#allocation2 + $0x198] sm:$0xf] }
 0x2e8   :  { %v889_v3 = vadd.f32 %v8393_v33, %v870_v61  ;;  %v872_v23 = vmul.f32 %v8374_v56, %v853_v54  ;;  %v855_v18 = vmul.f32 %v8369_v1, %v8308_v7  ;;  %v856_v52 = vmul.f32 %v8369_v1, %v8313_v37  ;;  %v7236_v13 = vld [vmem:[#allocation2 + $0x1b4] sm:$0xf0]  ;;  %v5947_v38 = vld [vmem:[#allocation2 + $0x150] sm:$0xf] }
 0x2e9   :  { %v904_v53 = vmax.f32 %v888_v63, 0.0  ;;  %v871_v22 = vmul.f32 %v8374_v56, %v852_v19  ;;  %v873_v32 = vmul.f32 %v8374_v56, %v854_v49  ;;  %v857_v34 = vmul.f32 %v8369_v1, %v8318_v14  ;;  %v7227_v58 = vld [vmem:[#allocation2 + $0x16c] sm:$0xf0]  ;;  %v7232_v63 = vld [vmem:[#allocation2 + $0x19c] sm:$0xf] }
 0x2ea   :  { %v905_v5 = vmax.f32 %v889_v3, 0.0  ;;  %v891_v12 = vadd.f32 %v8393_v33, %v872_v23  ;;  %v874_v55 = vmul.f32 %v8374_v56, %v855_v18  ;;  %v875_v20 = vmul.f32 %v8374_v56, %v856_v52  ;;  %v5989_v3 = vld [vmem:[#allocation2 + $0x1b8] sm:$0xf0]  ;;  %v7228_v54 = vld [vmem:[#allocation2 + $0x174] sm:$0xf0] }
 0x2eb   :  { %v890_v48 = vadd.f32 %v8393_v33, %v871_v22  ;;  %v892_v51 = vadd.f32 %v8393_v33, %v873_v32  ;;  %v876_v37 = vmul.f32 %v8374_v56, %v857_v34  ;;  %v6016_v0 = vor.u32 %v7239_v6, %v6013_v21  ;;  %v7231_v56 = vld [vmem:[#allocation2 + $0x194] sm:$0xf]  ;;  %v7224_v19 = vld [vmem:[#allocation2 + $0x15c] sm:$0xf]  ;;  %v7220_v32 = vld [vmem:[#allocation2 + $0x134] sm:$0xf0] }
 0x2ec   :  { %v8431_v62 = vpack.c.bf16 %v905_v5, %v904_v53  ;;  %v907_v25 = vmax.f32 %v891_v12, 0.0  ;;  %v893_v57 = vadd.f32 %v8393_v33, %v874_v55  ;;  %v6012_v14 = vor.u32 %v7243_v47, %v6011_v26  ;;  %v5955_v53 = vld [vmem:[#allocation2 + $0x158] sm:$0xf]  ;;  %v5957_v22 = vld [vmem:[#allocation2 + $0x178] sm:$0xf0] }
 0x2ed   :  { %v906_v4 = vmax.f32 %v890_v48, 0.0  ;;  %v908_v31 = vmax.f32 %v892_v51, 0.0  ;;  %1575 = vmatpush.bf16.msrb.mxu2 %v6016_v0  ;;  %v895_v1 = vadd.f32 %v8393_v33, %v876_v37  ;;  %v894_v8 = vadd.f32 %v8393_v33, %v875_v20  ;;  %v5915_v48 = vld [vmem:[#allocation2 + $0x110] sm:$0xf]  ;;  %v5917_v18 = vld [vmem:[#allocation2 + $0x130] sm:$0xf0] }
 0x2ee   :  { %1338 = vmatmul.bf16.vlgmr.msra.gmra.mxu1 %v8431_v62  ;;  %1387 = vmatmul.bf16.vlgmr.msra.gmra.mxu2 %v8431_v62  ;;  %v909_v7 = vmax.f32 %v893_v57, 0.0  ;;  %v5984_v17 = vor.u32 %v7231_v56, %v5981_v30  ;;  %v6020_v33 = vor.u32 %v7244_v40, %v6019_v15  ;;  %v5980_v42 = vor.u32 %v7235_v24, %v5979_v41  ;;  %v7219_v12 = vld [vmem:[#allocation2 + $0x12c] sm:$0xf0]  ;;  %v5923_v55 = vld [vmem:[#allocation2 + $0x118] sm:$0xf] }
 0x2ef   :  { %1436 = vmatmul.bf16.vlgmr.msra.gmra.mxu3 %v8431_v62  ;;  %1485 = vmatmul.bf16.vlgmr.msrb.gmra.mxu0 %v8431_v62  ;;  %v8447_v27 = vpack.c.bf16 %v907_v25, %v906_v4  ;;  %v910_v9 = vmax.f32 %v894_v8, 0.0  ;;  %v911_v46 = vmax.f32 %v895_v1, 0.0  ;;  %v6024_v29 = vor.u32 %v7240_v43, %v6021_v45  ;;  %v7215_v4 = vld [vmem:[#allocation2 + $0x114] sm:$0xf]  ;;  %v7216_v57 = vld [vmem:[#allocation2 + $0x11c] sm:$0xf] }
 0x2f0   :  { %v8461_v36 = vpack.c.bf16 %v909_v7, %v908_v31  ;;  %1526 = vmatpush.bf16.msrb.mxu1 %v6012_v14  ;;  %1624 = vmatpush.bf16.msrb.mxu3 %v6020_v33  ;;  %v5952_v10 = vor.u32 %v7223_v28, %v5949_v2  ;;  %v5988_v60 = vor.u32 %v7236_v13, %v5987_v11  ;;  %v5925_v31 = vld [vmem:[#allocation2 + $0x138] sm:$0xf0]  ;;  %v5883_v34 = vld [vmem:[#allocation2 + $0xd0] sm:$0xf]  ;;  %v7207_v21 = vld [vmem:[#allocation2 + $0xd4] sm:$0xf] }
 0x2f1   :  { %v8471_v35 = vpack.c.bf16 %v911_v46, %v910_v9  ;;  %1576 = vmatpush.bf16.msrb.mxu2 %v5984_v17  ;;  %1673 = vmatpush.bf16.msra.mxu0 %v6024_v29  ;;  %v5948_v61 = vor.u32 %v7227_v58, %v5947_v38  ;;  %v5992_v5 = vor.u32 %v7232_v63, %v5989_v3  ;;  %v7211_v6 = vld [vmem:[#allocation2 + $0xec] sm:$0xf0]  ;;  %v5885_v20 = vld [vmem:[#allocation2 + $0xf0] sm:$0xf0]  ;;  %v5891_v37 = vld [vmem:[#allocation2 + $0xd8] sm:$0xf] }
 0x2f2   :  { %v5956_v23 = vor.u32 %v7228_v54, %v5955_v53  ;;  %v5960_v25 = vor.u32 %v7224_v19, %v5957_v22  ;;  %v5916_v49 = vor.u32 %v7219_v12, %v5915_v48  ;;  %v5920_v51 = vor.u32 %v7215_v4, %v5917_v18  ;;  %v7212_v0 = vld [vmem:[#allocation2 + $0xf4] sm:$0xf0]  ;;  %v7208_v1 = vld [vmem:[#allocation2 + $0xdc] sm:$0xf]  ;;  %v5851_v9 = vld [vmem:[#allocation2 + $0x90] sm:$0xf] }
 0x2f3   :  { %v5924_v7 = vor.u32 %v7220_v32, %v5923_v55  ;;  %v5928_v52 = vor.u32 %v7216_v57, %v5925_v31  ;;  %v5884_v26 = vor.u32 %v7211_v6, %v5883_v34  ;;  %v5888_v47 = vor.u32 %v7207_v21, %v5885_v20  ;;  %v5893_v8 = vld [vmem:[#allocation2 + $0xf8] sm:$0xf0]  ;;  %v7203_v56 = vld [vmem:[#allocation2 + $0xac] sm:$0xf0]  ;;  %v7199_v30 = vld [vmem:[#allocation2 + $0x94] sm:$0xf] }
 0x2f4   :  { %1527 = vmatpush.bf16.msrb.mxu1 %v5980_v42  ;;  %1625 = vmatpush.bf16.msrb.mxu3 %v5988_v60  ;;  %v5892_v14 = vor.u32 %v7212_v0, %v5891_v37  ;;  %v5896_v46 = vor.u32 %v7208_v1, %v5893_v8  ;;  %v5853_v15 = vld [vmem:[#allocation2 + $0xb0] sm:$0xf0]  ;;  %v5852_v17 = vor.u32 %v7203_v56, %v5851_v9  ;;  %v5859_v41 = vld [vmem:[#allocation2 + $0x98] sm:$0xf]  ;;  %v7200_v33 = vld [vmem:[#allocation2 + $0x9c] sm:$0xf] }
 0x2f5   :  { %1577 = vmatpush.bf16.msrb.mxu2 %v5952_v10  ;;  %1674 = vmatpush.bf16.msra.mxu0 %v5992_v5  ;;  %v5856_v40 = vor.u32 %v7199_v30, %v5853_v15  ;;  %v7204_v24 = vld [vmem:[#allocation2 + $0xb4] sm:$0xf0]  ;;  %v5861_v43 = vld [vmem:[#allocation2 + $0xb8] sm:$0xf0]  ;;  %v5819_v45 = vld [vmem:[#allocation2 + $0x50] sm:$0xf] }
 0x2f6   :  { %v5860_v42 = vor.u32 %v7204_v24, %v5859_v41  ;;  %v7195_v29 = vld [vmem:[#allocation2 + $0x6c] sm:$0xf0]  ;;  %v5864_v28 = vor.u32 %v7200_v33, %v5861_v43  ;;  %v7191_v2 = vld [vmem:[#allocation2 + $0x54] sm:$0xf]  ;;  %v5827_v10 = vld [vmem:[#allocation2 + $0x58] sm:$0xf] }
 0x2f7   :  { %v5821_v11 = vld [vmem:[#allocation2 + $0x70] sm:$0xf0]  ;;  %v5820_v13 = vor.u32 %v7195_v29, %v5819_v45  ;;  %v7196_v38 = vld [vmem:[#allocation2 + $0x74] sm:$0xf0]  ;;  %v7192_v58 = vld [vmem:[#allocation2 + $0x5c] sm:$0xf] }
 0x2f8   :  { %1528 = vmatpush.bf16.msrb.mxu1 %v5948_v61  ;;  %1626 = vmatpush.bf16.msrb.mxu3 %v5956_v23  ;;  %v5829_v60 = vld [vmem:[#allocation2 + $0x78] sm:$0xf0]  ;;  %v5824_v61 = vor.u32 %v7191_v2, %v5821_v11  ;;  %v5828_v63 = vor.u32 %v7196_v38, %v5827_v10  ;;  %v5787_v53 = vld [vmem:[#allocation2 + $0x10] sm:$0xf]  ;;  %v7183_v54 = vld [vmem:[#allocation2 + $0x14] sm:$0xf] }
 0x2f9   :  { %1675 = vmatpush.bf16.msra.mxu0 %v5960_v25  ;;  %1578 = vmatpush.bf16.msrb.mxu2 %v5920_v51  ;;  %v5832_v3 = vor.u32 %v7192_v58, %v5829_v60  ;;  %v7187_v5 = vld [vmem:[#allocation2 + $0x2c] sm:$0xf0]  ;;  %v5789_v22 = vld [vmem:[#allocation2 + $0x30] sm:$0xf0]  ;;  %v5795_v23 = vld [vmem:[#allocation2 + $0x18] sm:$0xf] }
 0x2fa   :  { %v5788_v19 = vor.u32 %v7187_v5, %v5787_v53  ;;  %v7188_v48 = vld [vmem:[#allocation2 + $0x34] sm:$0xf0]  ;;  %v5792_v12 = vor.u32 %v7183_v54, %v5789_v22  ;;  %v7184_v25 = vld [vmem:[#allocation2 + $0x1c] sm:$0xf]  ;;  %v8496_v51 = vld [vmem:[%s11221_s10] sm:$0xff] }
 0x2fb   :  { %v5796_v4 = vor.u32 %v7188_v48, %v5795_v23  ;;  %11436 = vst [vmem:[#allocation13_spill] sm:$0xff] %v8496_v51  ;;  %v8503_v57 = vperm.slane %v8496_v51, 0  ;;  %v8506_v31 = vperm.slane %v8496_v51, 3  ;;  %v8521_v37 = vperm.slane %v8496_v51, 1 }
 0x2fc   :  { %1529 = vmatpush.bf16.msrb.mxu1 %v5916_v49  ;;  %1627 = vmatpush.bf16.msrb.mxu3 %v5924_v7  ;;  %v5797_v49 = vld [vmem:[#allocation2 + $0x38] sm:$0xf0] }
 0x2fd   :  { %1676 = vmatpush.bf16.msra.mxu0 %v5928_v52  ;;  %1579 = vmatpush.bf16.msrb.mxu2 %v5888_v47  ;;  %v5800_v18 = vor.u32 %v7184_v25, %v5797_v49  ;;  %v8526_v47 = vperm.slane %v8496_v51, 2 }
 0x2fe   :  { %1343 = vmatmul.bf16.gmra.mxu1 %v8447_v27  ;;  %1392 = vmatmul.bf16.gmra.mxu2 %v8447_v27 }
 0x2ff   :  { %1441 = vmatmul.bf16.gmra.mxu3 %v8447_v27  ;;  %1490 = vmatmul.bf16.gmra.mxu0 %v8447_v27 }
 0x300   :  { %1530 = vmatpush.bf16.msrb.mxu1 %v5884_v26  ;;  %1628 = vmatpush.bf16.msrb.mxu3 %v5892_v14 }
 0x301   :  { %1677 = vmatpush.bf16.msra.mxu0 %v5896_v46  ;;  %1580 = vmatpush.bf16.msrb.mxu2 %v5856_v40 }
 0x304   :  { %1531 = vmatpush.bf16.msrb.mxu1 %v5852_v17  ;;  %1629 = vmatpush.bf16.msrb.mxu3 %v5860_v42 }
 0x305   :  { %1678 = vmatpush.bf16.msra.mxu0 %v5864_v28  ;;  %1581 = vmatpush.bf16.msrb.mxu2 %v5824_v61 }
 0x308   :  { %1532 = vmatpush.bf16.msrb.mxu1 %v5820_v13  ;;  %1630 = vmatpush.bf16.msrb.mxu3 %v5828_v63 }
 0x309   :  { %1679 = vmatpush.bf16.msra.mxu0 %v5832_v3  ;;  %1582 = vmatpush.bf16.msrb.mxu2 %v5792_v12 }
 0x30c   :  { %1533 = vmatpush.bf16.msrb.mxu1 %v5788_v19  ;;  %1631 = vmatpush.bf16.msrb.mxu3 %v5796_v4 }
 0x30d   :  { %1680 = vmatpush.bf16.msra.mxu0 %v5800_v18 }
 0x30e   :  { %1348 = vmatmul.bf16.gmra.mxu1 %v8461_v36  ;;  %1397 = vmatmul.bf16.gmra.mxu2 %v8461_v36 }
 0x30f   :  { %1446 = vmatmul.bf16.gmra.mxu3 %v8461_v36  ;;  %1495 = vmatmul.bf16.gmra.mxu0 %v8461_v36 }
 0x31e   :  { %1353 = vmatmul.bf16.gmra.mxu1 %v8471_v35  ;;  %1402 = vmatmul.bf16.gmra.mxu2 %v8471_v35 }
 0x31f   :  { %1451 = vmatmul.bf16.gmra.mxu3 %v8471_v35  ;;  %1500 = vmatmul.bf16.gmra.mxu0 %v8471_v35 }
 0x32e   :  { %1358 = vmatmul.bf16.gmra.mxu1 %v8427_v16  ;;  %1407 = vmatmul.bf16.gmra.mxu2 %v8427_v16 }
 0x32f   :  { %1456 = vmatmul.bf16.gmra.mxu3 %v8427_v16  ;;  %1505 = vmatmul.bf16.gmra.mxu0 %v8427_v16 }
 0x33e   :  { %1363 = vmatmul.bf16.gmra.mxu1 %v8417_v39  ;;  %1412 = vmatmul.bf16.gmra.mxu2 %v8417_v39 }
 0x33f   :  { %1461 = vmatmul.bf16.gmra.mxu3 %v8417_v39  ;;  %1510 = vmatmul.bf16.gmra.mxu0 %v8417_v39 }
 0x34e   :  { %1368 = vmatmul.bf16.gmra.mxu1 %v8419_v50  ;;  %1417 = vmatmul.bf16.gmra.mxu2 %v8419_v50 }
 0x34f   :  { %1466 = vmatmul.bf16.gmra.mxu3 %v8419_v50  ;;  %1515 = vmatmul.bf16.gmra.mxu0 %v8419_v50 }
 0x35e   :  { %1373 = vmatmul.bf16.gmra.mxu1 %v8421_v59  ;;  %1422 = vmatmul.bf16.gmra.mxu2 %v8421_v59 }
 0x35f   :  { %1471 = vmatmul.bf16.gmra.mxu3 %v8421_v59  ;;  %1520 = vmatmul.bf16.gmra.mxu0 %v8421_v59 }
 0x36b   :  { %v1339_v55 = vpop.f32.mrf.mxu1 }
 0x36c   :  { %v1486_v32 = vpop.f32.mrf.mxu0  ;;  %v8509_v6 = vadd.f32 %v1339_v55, %v8503_v57 }
 0x36d   :  { %v8515_v20 = vadd.f32 %v1486_v32, %v8506_v31 }
 0x36e   :  { %1534 = vmatmul.bf16.vlgmr.msrb.gmra.mxu1 %v8431_v62  ;;  %1583 = vmatmul.bf16.vlgmr.msrb.gmra.mxu2 %v8431_v62 }
 0x36f   :  { %1632 = vmatmul.bf16.vlgmr.msrb.gmra.mxu3 %v8431_v62  ;;  %1681 = vmatmul.bf16.vlgmr.msra.gmra.mxu0 %v8431_v62 }
 0x371   :  { %v1388_v7 = vpop.f32.mrf.mxu2 }
 0x372   :  { %v1437_v52 = vpop.f32.mrf.mxu3  ;;  %v8531_v8 = vadd.f32 %v1388_v7, %v8521_v37 }
 0x373   :  { %v1341_v34 = vpop.f32.mrf.mxu1  ;;  %v8537_v56 = vadd.f32 %v1437_v52, %v8526_v47 }
 0x374   :  { %v8512_v21 = vadd.f32 %v1341_v34, %v8503_v57  ;;  %v1488_v26 = vpop.f32.mrf.mxu0 }
 0x375   :  { %v8518_v62 = vadd.f32 %v1488_v26, %v8506_v31  ;;  %11437 = vst [vmem:[#allocation14_spill] sm:$0xff] %v8537_v56 }
 0x376   :  { %v1724_v0 = vadd.f32 %v8512_v21, %v8509_v6 }
 0x377   :  { %v1787_v14 = vadd.f32 %v8518_v62, %v8515_v20 }
 0x379   :  { %v1390_v1 = vpop.f32.mrf.mxu2 }
 0x37a   :  { %v8534_v9 = vadd.f32 %v1390_v1, %v8521_v37  ;;  %v1439_v46 = vpop.f32.mrf.mxu3 }
 0x37b   :  { %v8540_v30 = vadd.f32 %v1439_v46, %v8526_v47  ;;  %v1344_v15 = vpop.f32.mrf.mxu1 }
 0x37c   :  { %v1745_v17 = vadd.f32 %v8534_v9, %v8531_v8  ;;  %v8545_v40 = vadd.f32 %v1344_v15, %v8503_v57  ;;  %v1491_v41 = vpop.f32.mrf.mxu0 }
 0x37d   :  { %11438 = vst [vmem:[#allocation15_spill] sm:$0xff] %v8540_v30  ;;  %v1766_v24 = vadd.f32 %v8540_v30, %v8537_v56  ;;  %v8550_v33 = vadd.f32 %v1491_v41, %v8506_v31 }
 0x37e   :  { %v1725_v42 = vadd.f32 %v1724_v0, %v8545_v40  ;;  %1539 = vmatmul.bf16.gmra.mxu1 %v8447_v27  ;;  %1588 = vmatmul.bf16.gmra.mxu2 %v8447_v27 }
 0x37f   :  { %v1788_v43 = vadd.f32 %v1787_v14, %v8550_v33  ;;  %1637 = vmatmul.bf16.gmra.mxu3 %v8447_v27  ;;  %1686 = vmatmul.bf16.gmra.mxu0 %v8447_v27 }
 0x381   :  { %v1393_v45 = vpop.f32.mrf.mxu2 }
 0x382   :  { %v8559_v29 = vadd.f32 %v1393_v45, %v8521_v37  ;;  %v1442_v28 = vpop.f32.mrf.mxu3 }
 0x383   :  { %v8562_v2 = vadd.f32 %v1442_v28, %v8526_v47  ;;  %v1346_v11 = vpop.f32.mrf.mxu1 }
 0x384   :  { %v1746_v10 = vadd.f32 %v1745_v17, %v8559_v29  ;;  %v8566_v13 = vadd.f32 %v1346_v11, %v8503_v57  ;;  %v1493_v38 = vpop.f32.mrf.mxu0 }
 0x385   :  { %11439 = vst [vmem:[#allocation16_spill] sm:$0xff] %v8562_v2  ;;  %v1767_v58 = vadd.f32 %v1766_v24, %v8562_v2  ;;  %v8570_v60 = vadd.f32 %v1493_v38, %v8506_v31 }
 0x386   :  { %v1726_v27 = vadd.f32 %v1725_v42, %v8566_v13 }
 0x387   :  { %v1789_v61 = vadd.f32 %v1788_v43, %v8570_v60 }
 0x389   :  { %v1395_v63 = vpop.f32.mrf.mxu2 }
 0x38a   :  { %v8575_v3 = vadd.f32 %v1395_v63, %v8521_v37  ;;  %v1444_v53 = vpop.f32.mrf.mxu3 }
 0x38b   :  { %v8578_v5 = vadd.f32 %v1444_v53, %v8526_v47  ;;  %v1349_v54 = vpop.f32.mrf.mxu1 }
 0x38c   :  { %v1747_v19 = vadd.f32 %v1746_v10, %v8575_v3  ;;  %v8582_v22 = vadd.f32 %v1349_v54, %v8503_v57  ;;  %v1496_v23 = vpop.f32.mrf.mxu0 }
 0x38d   :  { %11440 = vst [vmem:[#allocation17_spill] sm:$0xff] %v8578_v5  ;;  %v1768_v48 = vadd.f32 %v1767_v58, %v8578_v5  ;;  %v8586_v12 = vadd.f32 %v1496_v23, %v8506_v31 }
 0x38e   :  { %v1727_v4 = vadd.f32 %v1726_v27, %v8582_v22  ;;  %1544 = vmatmul.bf16.gmra.mxu1 %v8461_v36  ;;  %1593 = vmatmul.bf16.gmra.mxu2 %v8461_v36 }
 0x38f   :  { %v1790_v25 = vadd.f32 %v1789_v61, %v8586_v12  ;;  %1642 = vmatmul.bf16.gmra.mxu3 %v8461_v36  ;;  %1691 = vmatmul.bf16.gmra.mxu0 %v8461_v36 }
 0x391   :  { %v1398_v49 = vpop.f32.mrf.mxu2 }
 0x392   :  { %v8595_v18 = vadd.f32 %v1398_v49, %v8521_v37  ;;  %v1447_v55 = vpop.f32.mrf.mxu3 }
 0x393   :  { %v8598_v32 = vadd.f32 %v1447_v55, %v8526_v47  ;;  %v1351_v7 = vpop.f32.mrf.mxu1 }
 0x394   :  { %v1748_v52 = vadd.f32 %v1747_v19, %v8595_v18  ;;  %v8602_v34 = vadd.f32 %v1351_v7, %v8503_v57  ;;  %v1498_v26 = vpop.f32.mrf.mxu0 }
 0x395   :  { %11441 = vst [vmem:[#allocation18_spill] sm:$0xff] %v8598_v32  ;;  %v1769_v0 = vadd.f32 %v1768_v48, %v8598_v32  ;;  %v8606_v14 = vadd.f32 %v1498_v26, %v8506_v31 }
 0x396   :  { %v1728_v36 = vadd.f32 %v1727_v4, %v8602_v34 }
 0x397   :  { %v1791_v1 = vadd.f32 %v1790_v25, %v8606_v14 }
 0x399   :  { %v1400_v46 = vpop.f32.mrf.mxu2 }
 0x39a   :  { %v8611_v15 = vadd.f32 %v1400_v46, %v8521_v37  ;;  %v1449_v17 = vpop.f32.mrf.mxu3 }
 0x39b   :  { %v8614_v41 = vadd.f32 %v1449_v17, %v8526_v47  ;;  %v1354_v24 = vpop.f32.mrf.mxu1 }
 0x39c   :  { %v1749_v42 = vadd.f32 %v1748_v52, %v8611_v15  ;;  %v8618_v43 = vadd.f32 %v1354_v24, %v8503_v57  ;;  %v1501_v45 = vpop.f32.mrf.mxu0 }
 0x39d   :  { %11442 = vst [vmem:[#allocation19_spill] sm:$0xff] %v8614_v41  ;;  %v1770_v28 = vadd.f32 %v1769_v0, %v8614_v41  ;;  %v8622_v11 = vadd.f32 %v1501_v45, %v8506_v31 }
 0x39e   :  { %v1729_v10 = vadd.f32 %v1728_v36, %v8618_v43  ;;  %1549 = vmatmul.bf16.gmra.mxu1 %v8471_v35  ;;  %1598 = vmatmul.bf16.gmra.mxu2 %v8471_v35 }
 0x39f   :  { %v1792_v38 = vadd.f32 %v1791_v1, %v8622_v11  ;;  %1647 = vmatmul.bf16.gmra.mxu3 %v8471_v35  ;;  %1696 = vmatmul.bf16.gmra.mxu0 %v8471_v35 }
 0x3a1   :  { %v1403_v58 = vpop.f32.mrf.mxu2 }
 0x3a2   :  { %v8631_v27 = vadd.f32 %v1403_v58, %v8521_v37  ;;  %v1452_v61 = vpop.f32.mrf.mxu3 }
 0x3a3   :  { %v8634_v63 = vadd.f32 %v1452_v61, %v8526_v47  ;;  %v1356_v53 = vpop.f32.mrf.mxu1 }
 0x3a4   :  { %v1750_v54 = vadd.f32 %v1749_v42, %v8631_v27  ;;  %v8638_v19 = vadd.f32 %v1356_v53, %v8503_v57  ;;  %v1503_v23 = vpop.f32.mrf.mxu0 }
 0x3a5   :  { %11443 = vst [vmem:[#allocation20_spill] sm:$0xff] %v8634_v63  ;;  %v1771_v48 = vadd.f32 %v1770_v28, %v8634_v63  ;;  %v8642_v4 = vadd.f32 %v1503_v23, %v8506_v31 }
 0x3a6   :  { %v1730_v35 = vadd.f32 %v1729_v10, %v8638_v19 }
 0x3a7   :  { %v1793_v25 = vadd.f32 %v1792_v38, %v8642_v4 }
 0x3a9   :  { %v1405_v49 = vpop.f32.mrf.mxu2 }
 0x3aa   :  { %v8647_v55 = vadd.f32 %v1405_v49, %v8521_v37  ;;  %v1454_v7 = vpop.f32.mrf.mxu3 }
 0x3ab   :  { %v8650_v52 = vadd.f32 %v1454_v7, %v8526_v47  ;;  %v1359_v26 = vpop.f32.mrf.mxu1 }
 0x3ac   :  { %11444 = vst [vmem:[#allocation21_spill] sm:$0xff] %v8647_v55  ;;  %v8653_v0 = vadd.f32 %v1750_v54, %v8647_v55  ;;  %v1506_v36 = vpop.f32.mrf.mxu0  ;;  %v8679_v7 = vadd.f32 %v1359_v26, %v8503_v57 }
 0x3ad   :  { %11445 = vst [vmem:[#allocation22_spill] sm:$0xff] %v8650_v52  ;;  %v8656_v1 = vadd.f32 %v1771_v48, %v8650_v52  ;;  %v8659_v46 = vadd.f32 %v1506_v36, %v8506_v31 }
 0x3ae   :  { %1554 = vmatmul.bf16.gmra.mxu1 %v8427_v16  ;;  %1603 = vmatmul.bf16.gmra.mxu2 %v8427_v16  ;;  %v1731_v41 = vadd.f32 %v1730_v35, %v8679_v7 }
 0x3af   :  { %v1794_v17 = vadd.f32 %v1793_v25, %v8659_v46  ;;  %1652 = vmatmul.bf16.gmra.mxu3 %v8427_v16  ;;  %1701 = vmatmul.bf16.gmra.mxu0 %v8427_v16 }
 0x3b1   :  { %v1408_v24 = vpop.f32.mrf.mxu2 }
 0x3b2   :  { %v8670_v61 = vpop.f32.mrf.mxu3 }
 0x3b3   :  { %v1361_v42 = vpop.f32.mrf.mxu1 }
 0x3b4   :  { %v1508_v45 = vpop.f32.mrf.mxu0  ;;  %v8682_v51 = vadd.f32 %v1361_v42, %v8503_v57 }
 0x3b5   :  { %v8685_v52 = vadd.f32 %v1508_v45, %v8506_v31 }
 0x3b6   :  { %v1732_v26 = vadd.f32 %v1731_v41, %v8682_v51 }
 0x3b7   :  { %v1795_v42 = vadd.f32 %v1794_v17, %v8685_v52  ;;  %v8719_v17 = vadd.f32 %v1408_v24, %v8521_v37 }
 0x3b9   :  { %v1410_v28 = vpop.f32.mrf.mxu2  ;;  %11449 = vst [vmem:[#allocation26_spill] sm:$0xff] %v8719_v17 }
 0x3ba   :  { %v8672_v25 = vpop.f32.mrf.mxu3 }
 0x3bb   :  { %v1364_v10 = vpop.f32.mrf.mxu1 }
 0x3bc   :  { %v1511_v38 = vpop.f32.mrf.mxu0  ;;  %v8691_v32 = vadd.f32 %v1364_v10, %v8503_v57 }
 0x3be   :  { %1559 = vmatmul.bf16.gmra.mxu1 %v8417_v39  ;;  %1608 = vmatmul.bf16.gmra.mxu2 %v8417_v39  ;;  %v1733_v35 = vadd.f32 %v1732_v26, %v8691_v32  ;;  %v8732_v26 = vadd.f32 %v1410_v28, %v8521_v37 }
 0x3bf   :  { %1657 = vmatmul.bf16.gmra.mxu3 %v8417_v39  ;;  %1706 = vmatmul.bf16.gmra.mxu0 %v8417_v39 }
 0x3c0   :  { %11450 = vst [vmem:[#allocation27_spill] sm:$0xff] %v8732_v26 }
 0x3c1   :  { %v1413_v58 = vpop.f32.mrf.mxu2 }
 0x3c2   :  { %v8687_v63 = vpop.f32.mrf.mxu3 }
 0x3c3   :  { %v1366_v53 = vpop.f32.mrf.mxu1 }
 0x3c4   :  { %v1513_v54 = vpop.f32.mrf.mxu0  ;;  %v8698_v2 = vadd.f32 %v1366_v53, %v8503_v57 }
 0x3c5   :  { %v8702_v45 = vadd.f32 %v1513_v54, %v8506_v31 }
 0x3c6   :  { %v1734_v41 = vadd.f32 %v1733_v35, %v8698_v2 }
 0x3c7   :  { %11447 = vst [vmem:[#allocation24_spill] sm:$0xff] %v8702_v45 }
 0x3c9   :  { %v1415_v16 = vpop.f32.mrf.mxu2 }
 0x3cb   :  { %v1369_v23 = vpop.f32.mrf.mxu1 }
 0x3cc   :  { %v1516_v48 = vpop.f32.mrf.mxu0  ;;  %v8706_v10 = vadd.f32 %v1369_v23, %v8503_v57 }
 0x3cd   :  { %v8710_v55 = vadd.f32 %v1516_v48, %v8506_v31 }
 0x3ce   :  { %1564 = vmatmul.bf16.gmra.mxu1 %v8419_v50  ;;  %1613 = vmatmul.bf16.gmra.mxu2 %v8419_v50  ;;  %v1735_v48 = vadd.f32 %v1734_v41, %v8706_v10  ;;  %v8744_v41 = vadd.f32 %v1413_v58, %v8521_v37 }
 0x3cf   :  { %1662 = vmatmul.bf16.gmra.mxu3 %v8419_v50  ;;  %1711 = vmatmul.bf16.gmra.mxu0 %v8419_v50  ;;  %v8694_v50 = vadd.f32 %v1511_v38, %v8506_v31  ;;  %11448 = vst [vmem:[#allocation25_spill] sm:$0xff] %v8710_v55 }
 0x3d0   :  { %11451 = vst [vmem:[#allocation28_spill] sm:$0xff] %v8744_v41 }
 0x3d1   :  { %v1418_v49 = vpop.f32.mrf.mxu2  ;;  %11446 = vst [vmem:[#allocation23_spill] sm:$0xff] %v8694_v50  ;;  %v1796_v38 = vadd.f32 %v1795_v42, %v8694_v50  ;;  %v8734_v42 = vpop.f32.mrf.mxu3 }
 0x3d3   :  { %v1371_v39 = vpop.f32.mrf.mxu1  ;;  %v1797_v54 = vadd.f32 %v1796_v38, %v8702_v45 }
 0x3d4   :  { %v1518_v36 = vpop.f32.mrf.mxu0  ;;  %v8714_v53 = vadd.f32 %v1371_v39, %v8503_v57 }
 0x3d5   :  { %v8723_v23 = vadd.f32 %v1518_v36, %v8506_v31  ;;  %v1798_v24 = vadd.f32 %v1797_v54, %v8710_v55  ;;  %v8753_v55 = vadd.f32 %v1415_v16, %v8521_v37 }
 0x3d6   :  { %v1736_v38 = vadd.f32 %v1735_v48, %v8714_v53 }
 0x3d7   :  { %11452 = vst [vmem:[#allocation29_spill] sm:$0xff] %v8753_v55 }
 0x3d9   :  { %v1420_v5 = vpop.f32.mrf.mxu2 }
 0x3da   :  { %v8767_v16 = vadd.f32 %v1420_v5, %v8521_v37 }
 0x3db   :  { %v1374_v30 = vpop.f32.mrf.mxu1 }
 0x3dc   :  { %v1521_v56 = vpop.f32.mrf.mxu0  ;;  %v8729_v39 = vadd.f32 %v1374_v30, %v8503_v57  ;;  %v1799_v30 = vadd.f32 %v1798_v24, %v8723_v23 }
 0x3dd   :  { %v8738_v35 = vadd.f32 %v1521_v56, %v8506_v31 }
 0x3de   :  { %1569 = vmatmul.bf16.gmra.mxu1 %v8421_v59  ;;  %1618 = vmatmul.bf16.gmra.mxu2 %v8421_v59  ;;  %v1737_v45 = vadd.f32 %v1736_v38, %v8729_v39  ;;  %v8762_v38 = vadd.f32 %v1418_v49, %v8521_v37 }
 0x3df   :  { %1667 = vmatmul.bf16.gmra.mxu3 %v8421_v59  ;;  %1716 = vmatmul.bf16.gmra.mxu0 %v8421_v59  ;;  %v1752_v59 = vadd.f32 %v8653_v0, %v8719_v17  ;;  %v1800_v48 = vadd.f32 %v1799_v30, %v8738_v35 }
 0x3e0   :  { %11454 = vst [vmem:[#allocation31_spill] sm:$0xff] %v8762_v38 }
 0x3e1   :  { %v1423_v36 = vpop.f32.mrf.mxu2  ;;  %v1753_v56 = vadd.f32 %v1752_v59, %v8732_v26 }
 0x3e3   :  { %v1376_v28 = vpop.f32.mrf.mxu1  ;;  %v1754_v24 = vadd.f32 %v1753_v56, %v8744_v41 }
 0x3e4   :  { %v8749_v50 = vadd.f32 %v1376_v28, %v8503_v57  ;;  %v1523_v54 = vpop.f32.mrf.mxu0 }
 0x3e5   :  { %v8757_v0 = vadd.f32 %v1523_v54, %v8506_v31  ;;  %v1755_v59 = vadd.f32 %v1754_v24, %v8753_v55  ;;  %v1467_v54 = vpop.f32.mrf.mxu3 }
 0x3e6   :  { %v1738_v58 = vadd.f32 %v1737_v45, %v8749_v50  ;;  %v8771_v45 = vadd.f32 %v1423_v36, %v8521_v37  ;;  %v8781_v36 = vadd.f32 %v8670_v61, %v8526_v47 }
 0x3e7   :  { %11453 = vst [vmem:[#allocation30_spill] sm:$0xff] %v8757_v0  ;;  %v1801_v57 = vadd.f32 %v1800_v48, %v8757_v0  ;;  %v1756_v31 = vadd.f32 %v1755_v59, %v8762_v38 }
 0x3e8   :  { %v1739_v28 = vrot.slane %v1738_v58, 4 }
 0x3e9   :  { %v1802_v26 = vrot.slane %v1801_v57, 4  ;;  %v1425_v17 = vpop.f32.mrf.mxu2  ;;  %v1757_v41 = vadd.f32 %v1756_v31, %v8767_v16 }
 0x3ea   :  { %v1740_v30 = vadd.f32 %v1739_v28, %v1738_v58  ;;  %v8775_v0 = vadd.f32 %v1425_v17, %v8521_v37  ;;  %v8788_v37 = vadd.f32 %v8672_v25, %v8526_v47  ;;  %v8826_v25 = vadd.f32 %v8687_v63, %v8526_v47 }
 0x3eb   :  { %v1803_v56 = vadd.f32 %v1802_v26, %v1801_v57  ;;  %v1758_v5 = vadd.f32 %v1757_v41, %v8771_v45  ;;  %v8842_v63 = vadd.f32 %v1467_v54, %v8526_v47 }
 0x3ec   :  { %v1741_v49 = vrot.slane %v1740_v30, 2 }
 0x3ed   :  { %v1804_v48 = vrot.slane %v1803_v56, 2  ;;  %v1759_v59 = vadd.f32 %v1758_v5, %v8775_v0  ;;  %v1469_v17 = vpop.f32.mrf.mxu3  ;;  %11464 = vst [vmem:[#allocation41_spill] sm:$0xff] %v8842_v63 }
 0x3ee   :  { %v1742_v24 = vadd.f32 %v1741_v49, %v1740_v30 }
 0x3ef   :  { %v1805_v55 = vadd.f32 %v1804_v48, %v1803_v56  ;;  %v1760_v41 = vrot.slane %v1759_v59, 4 }
 0x3f0   :  { %v1743_v58 = vrot.slane %v1742_v24, 1 }
 0x3f1   :  { %v1806_v28 = vrot.slane %v1805_v55, 1 }
 0x3f2   :  { %v1744_v38 = vadd.f32 %v1743_v58, %v1742_v24 }
 0x3f3   :  { %v1807_v57 = vadd.f32 %v1806_v28, %v1805_v55 }
 0x3f4   :  { %v8784_v26 = vmul.f32 %v1744_v38, %v8083_v44 }
 0x3f5   :  { %v8834_v49 = vmul.f32 %v1807_v57, %v8083_v44 }
 0x3f6   :  { %v8792_v30 = vsub.f32 %v8509_v6, %v8784_v26  ;;  %v8796_v31 = vsub.f32 %v8512_v21, %v8784_v26  ;;  %v8800_v61 = vsub.f32 %v8545_v40, %v8784_v26  ;;  %v8804_v38 = vsub.f32 %v8566_v13, %v8784_v26 }
 0x3f7   :  { %v8808_v55 = vsub.f32 %v8582_v22, %v8784_v26  ;;  %v8812_v6 = vsub.f32 %v8602_v34, %v8784_v26  ;;  %v8816_v21 = vsub.f32 %v8618_v43, %v8784_v26  ;;  %v8820_v40 = vsub.f32 %v8638_v19, %v8784_v26 }
 0x3f8   :  { %11455 = vst [vmem:[#allocation32_spill] sm:$0xff] %v8792_v30  ;;  %v1773_v13 = vadd.f32 %v8656_v1, %v8781_v36  ;;  %v1761_v22 = vadd.f32 %v1760_v41, %v1759_v59  ;;  %v2028_v34 = vmul.f32 %v8792_v30, %v8792_v30  ;;  %v2036_v43 = vmul.f32 %v8796_v31, %v8796_v31  ;;  %v1472_v59 = vpop.f32.mrf.mxu3 }
 0x3f9   :  { %11456 = vst [vmem:[#allocation33_spill] sm:$0xff] %v8796_v31  ;;  %v8839_v1 = vadd.f32 %v8734_v42, %v8526_v47  ;;  %v2044_v48 = vmul.f32 %v8800_v61, %v8800_v61  ;;  %v8848_v58 = vsub.f32 %v8515_v20, %v8834_v49  ;;  %v8852_v28 = vsub.f32 %v8518_v62, %v8834_v49 }
 0x3fa   :  { %11457 = vst [vmem:[#allocation34_spill] sm:$0xff] %v8800_v61  ;;  %v1774_v56 = vadd.f32 %v1773_v13, %v8788_v37  ;;  %v1762_v24 = vrot.slane %v1761_v22, 2  ;;  %v2156_v5 = vadd.f32 %v2036_v43, %v2028_v34  ;;  %v8856_v42 = vsub.f32 %v8550_v33, %v8834_v49  ;;  %v11509_v61 = vld [vmem:[#allocation28_spill] sm:$0xff] }
 0x3fb   :  { %11458 = vst [vmem:[#allocation35_spill] sm:$0xff] %v8804_v38  ;;  %v8860_v54 = vsub.f32 %v8570_v60, %v8834_v49  ;;  %v8864_v57 = vsub.f32 %v8586_v12, %v8834_v49  ;;  %v8868_v20 = vsub.f32 %v8606_v14, %v8834_v49  ;;  %v8872_v62 = vsub.f32 %v8622_v11, %v8834_v49 }
 0x3fc   :  { %11459 = vst [vmem:[#allocation36_spill] sm:$0xff] %v8808_v55  ;;  %v1775_v19 = vadd.f32 %v1774_v56, %v8826_v25  ;;  %v2052_v33 = vmul.f32 %v8804_v38, %v8804_v38  ;;  %v2157_v41 = vadd.f32 %v2156_v5, %v2044_v48  ;;  %v8878_v60 = vsub.f32 %v8642_v4, %v8834_v49 }
 0x3fd   :  { %11460 = vst [vmem:[#allocation37_spill] sm:$0xff] %v8812_v6  ;;  %v8882_v12 = vsub.f32 %v8659_v46, %v8834_v49  ;;  %v8886_v14 = vadd.f32 %v1469_v17, %v8526_v47  ;;  %v2060_v11 = vmul.f32 %v8808_v55, %v8808_v55  ;;  %v2031_v34 = vmul.f32 %v8848_v58, %v8848_v58 }
 0x3fe   :  { %11461 = vst [vmem:[#allocation38_spill] sm:$0xff] %v8816_v21  ;;  %v1776_v13 = vadd.f32 %v1775_v19, %v8839_v1  ;;  %v2158_v56 = vadd.f32 %v2157_v41, %v2052_v33  ;;  %v2039_v4 = vmul.f32 %v8852_v28, %v8852_v28  ;;  %v1763_v43 = vadd.f32 %v1762_v24, %v1761_v22 }
 0x3ff   :  { %11462 = vst [vmem:[#allocation39_spill] sm:$0xff] %v8820_v40  ;;  %v2068_v46 = vmul.f32 %v8812_v6, %v8812_v6  ;;  %v8898_v17 = vadd.f32 %v1472_v59, %v8526_v47  ;;  %v8903_v33 = vsub.f32 %v8679_v7, %v8784_v26  ;;  %v2076_v41 = vmul.f32 %v8816_v21, %v8816_v21  ;;  %v11507_v6 = vld [vmem:[#allocation27_spill] sm:$0xff] }
 0x400   :  { %11463 = vst [vmem:[#allocation40_spill] sm:$0xff] %v8839_v1  ;;  %v1777_v48 = vadd.f32 %v1776_v13, %v8842_v63  ;;  %v2159_v19 = vadd.f32 %v2158_v56, %v2060_v11  ;;  %v8909_v22 = vsub.f32 %v8682_v51, %v8784_v26  ;;  %v2047_v24 = vmul.f32 %v8856_v42, %v8856_v42 }
 0x401   :  { %11465 = vst [vmem:[#allocation42_spill] sm:$0xff] %v8848_v58  ;;  %v2219_v13 = vadd.f32 %v2039_v4, %v2031_v34  ;;  %v1764_v59 = vrot.slane %v1763_v43, 1  ;;  %v8915_v11 = vsub.f32 %v8691_v32, %v8784_v26  ;;  %v2084_v7 = vmul.f32 %v8820_v40, %v8820_v40  ;;  %v1474_v58 = vpop.f32.mrf.mxu3 }
 0x402   :  { %11466 = vst [vmem:[#allocation43_spill] sm:$0xff] %v8852_v28  ;;  %v1778_v5 = vadd.f32 %v1777_v48, %v8886_v14  ;;  %v2160_v28 = vadd.f32 %v2159_v19, %v2068_v46  ;;  %v2055_v46 = vmul.f32 %v8860_v54, %v8860_v54  ;;  %v8924_v34 = vsub.f32 %v8698_v2, %v8784_v26 }
 0x403   :  { %11467 = vst [vmem:[#allocation44_spill] sm:$0xff] %v8856_v42  ;;  %v2220_v51 = vadd.f32 %v2219_v13, %v2047_v24  ;;  %v1765_v19 = vadd.f32 %v1764_v59, %v1763_v43  ;;  %v8928_v32 = vsub.f32 %v8706_v10, %v8784_v26  ;;  %v2092_v4 = vmul.f32 %v8903_v33, %v8903_v33 }
 0x404   :  { %11468 = vst [vmem:[#allocation45_spill] sm:$0xff] %v8860_v54  ;;  %v2161_v56 = vadd.f32 %v2160_v28, %v2076_v41  ;;  %v1779_v48 = vadd.f32 %v1778_v5, %v8898_v17  ;;  %v2100_v5 = vmul.f32 %v8909_v22, %v8909_v22  ;;  %v2063_v41 = vmul.f32 %v8864_v57, %v8864_v57 }
 0x405   :  { %11469 = vst [vmem:[#allocation46_spill] sm:$0xff] %v8864_v57  ;;  %v2221_v43 = vadd.f32 %v2220_v51, %v2055_v46  ;;  %v8937_v24 = vmul.f32 %v1765_v19, %v8083_v44  ;;  %v2108_v2 = vmul.f32 %v8915_v11, %v8915_v11  ;;  %v2071_v10 = vmul.f32 %v8868_v20, %v8868_v20 }
 0x406   :  { %11470 = vst [vmem:[#allocation47_spill] sm:$0xff] %v8868_v20  ;;  %v2162_v28 = vadd.f32 %v2161_v56, %v2084_v7  ;;  %v8944_v59 = vadd.f32 %v1474_v58, %v8526_v47 }
 0x407   :  { %11471 = vst [vmem:[#allocation48_spill] sm:$0xff] %v8872_v62  ;;  %v2222_v7 = vadd.f32 %v2221_v43, %v2063_v41  ;;  %v8948_v56 = vsub.f32 %v8531_v8, %v8937_v24  ;;  %v8952_v46 = vsub.f32 %v8534_v9, %v8937_v24  ;;  %v8956_v51 = vsub.f32 %v8559_v29, %v8937_v24 }
 0x408   :  { %11472 = vst [vmem:[#allocation49_spill] sm:$0xff] %v8878_v60  ;;  %v2163_v13 = vadd.f32 %v2162_v28, %v2092_v4  ;;  %v8960_v4 = vsub.f32 %v8575_v3, %v8937_v24  ;;  %v8964_v47 = vsub.f32 %v8595_v18, %v8937_v24  ;;  %v8968_v8 = vsub.f32 %v8611_v15, %v8937_v24  ;;  %v11483_v28 = vld [vmem:[#allocation21_spill] sm:$0xff] }
 0x409   :  { %11473 = vst [vmem:[#allocation50_spill] sm:$0xff] %v8886_v14  ;;  %v2079_v9 = vmul.f32 %v8872_v62, %v8872_v62  ;;  %v2223_v58 = vadd.f32 %v2222_v7, %v2071_v10  ;;  %v8974_v29 = vsub.f32 %v8631_v27, %v8937_v24  ;;  %v8978_v3 = vsub.f32 %v11483_v28, %v8937_v24 }
 0x40a   :  { %11474 = vst [vmem:[#allocation51_spill] sm:$0xff] %v8898_v17  ;;  %v2164_v19 = vadd.f32 %v2163_v13, %v2100_v5  ;;  %v8982_v18 = vsub.f32 %v8714_v53, %v8784_v26  ;;  %v2116_v15 = vmul.f32 %v8924_v34, %v8924_v34  ;;  %v1780_v41 = vadd.f32 %v1779_v48, %v8944_v59 }
 0x40b   :  { %11475 = vst [vmem:[#allocation52_spill] sm:$0xff] %v8944_v59  ;;  %v8989_v43 = vsub.f32 %v8685_v52, %v8834_v49  ;;  %v2087_v27 = vmul.f32 %v8878_v60, %v8878_v60  ;;  %v2224_v13 = vadd.f32 %v2223_v58, %v2079_v9  ;;  %v8995_v10 = vsub.f32 %v8729_v39, %v8784_v26 }
 0x40c   :  { %11476 = vst [vmem:[#allocation53_spill] sm:$0xff] %v8948_v56  ;;  %v2165_v5 = vadd.f32 %v2164_v19, %v2108_v2  ;;  %v2124_v53 = vmul.f32 %v8928_v32, %v8928_v32  ;;  %v11485_v2 = vld [vmem:[#allocation23_spill] sm:$0xff]  ;;  %v2095_v52 = vmul.f32 %v8882_v12, %v8882_v12  ;;  %v2029_v28 = vmul.f32 %v8948_v56, %v8948_v56 }
 0x40d   :  { %11477 = vst [vmem:[#allocation54_spill] sm:$0xff] %v8952_v46  ;;  %v9001_v19 = vsub.f32 %v11485_v2, %v8834_v49  ;;  %v2225_v48 = vadd.f32 %v2224_v13, %v2087_v27  ;;  %v2037_v9 = vmul.f32 %v8952_v46, %v8952_v46  ;;  %v9011_v39 = vsub.f32 %v8749_v50, %v8784_v26  ;;  %v11486_v2 = vld [vmem:[#allocation24_spill] sm:$0xff]  ;;  %v11487_v50 = vld [vmem:[#allocation25_spill] sm:$0xff]  ;;  %v11505_v46 = vld [vmem:[#allocation26_spill] sm:$0xff] }
 0x40e   :  { %11478 = vst [vmem:[#allocation55_spill] sm:$0xff] %v8956_v51  ;;  %v2166_v7 = vadd.f32 %v2165_v5, %v2116_v15  ;;  %v2132_v58 = vmul.f32 %v8982_v18, %v8982_v18  ;;  %v1781_v5 = vrot.slane %v1780_v41, 4  ;;  %v9017_v60 = vsub.f32 %v11486_v2, %v8834_v49 }
 0x40f   :  { %11479 = vst [vmem:[#allocation56_spill] sm:$0xff] %v8960_v4  ;;  %v2103_v27 = vmul.f32 %v8989_v43, %v8989_v43  ;;  %v2226_v13 = vadd.f32 %v2225_v48, %v2095_v52  ;;  %v2140_v62 = vmul.f32 %v8995_v10, %v8995_v10  ;;  %v9025_v26 = vsub.f32 %v11487_v50, %v8834_v49 }
 0x410   :  { %11480 = vst [vmem:[#allocation57_spill] sm:$0xff] %v8964_v47  ;;  %v2167_v15 = vadd.f32 %v2166_v7, %v2124_v53  ;;  %v2111_v53 = vmul.f32 %v9001_v19, %v9001_v19  ;;  %v2045_v2 = vmul.f32 %v8956_v51, %v8956_v51  ;;  %v2177_v57 = vadd.f32 %v2037_v9, %v2029_v28 }
 0x411   :  { %11481 = vst [vmem:[#allocation58_spill] sm:$0xff] %v8968_v8  ;;  %v2227_v7 = vadd.f32 %v2226_v13, %v2103_v27  ;;  %v2148_v54 = vmul.f32 %v9011_v39, %v9011_v39  ;;  %v9035_v48 = vsub.f32 %v8723_v23, %v8834_v49  ;;  %v2053_v27 = vmul.f32 %v8960_v4, %v8960_v4 }
 0x412   :  { %11482 = vst [vmem:[#allocation59_spill] sm:$0xff] %v8974_v29  ;;  %v2168_v20 = vadd.f32 %v2167_v15, %v2132_v58  ;;  %v1782_v58 = vadd.f32 %v1781_v5, %v1780_v41  ;;  %v2119_v15 = vmul.f32 %v9017_v60, %v9017_v60  ;;  %v2178_v13 = vadd.f32 %v2177_v57, %v2045_v2 }
 0x413   :  { %11484 = vst [vmem:[#allocation21_spill] sm:$0xff] %v8978_v3  ;;  %v2228_v50 = vadd.f32 %v2227_v7, %v2111_v53  ;;  %v9043_v28 = vsub.f32 %v8738_v35, %v8834_v49  ;;  %v11488_v7 = vld [vmem:[#allocation30_spill] sm:$0xff]  ;;  %v9109_v55 = vsub.f32 %v11507_v6, %v8937_v24 }
 0x414   :  { %v2169_v52 = vadd.f32 %v2168_v20, %v2140_v62  ;;  %v1783_v9 = vrot.slane %v1782_v58, 2  ;;  %v2127_v20 = vmul.f32 %v9025_v26, %v9025_v26  ;;  %v2061_v62 = vmul.f32 %v8964_v47, %v8964_v47  ;;  %v1682_v47 = vpop.f32.mrf.mxu0 }
 0x415   :  { %v2229_v23 = vadd.f32 %v2228_v50, %v2119_v15  ;;  %v2179_v41 = vadd.f32 %v2178_v13, %v2053_v27  ;;  %v9051_v4 = vsub.f32 %v11488_v7, %v8834_v49  ;;  %v2143_v15 = vmul.f32 %v9043_v28, %v9043_v28 }
 0x416   :  { %v2170_v42 = vadd.f32 %v2169_v52, %v2148_v54  ;;  %v1784_v53 = vadd.f32 %v1783_v9, %v1782_v58  ;;  %v2135_v54 = vmul.f32 %v9035_v48, %v9035_v48  ;;  %v2069_v27 = vmul.f32 %v8968_v8, %v8968_v8  ;;  %v1535_v9 = vpop.f32.mrf.mxu1 }
 0x417   :  { %v2230_v35 = vadd.f32 %v2229_v23, %v2127_v20  ;;  %v2180_v57 = vadd.f32 %v2179_v41, %v2061_v62  ;;  %v2151_v49 = vmul.f32 %v9051_v4, %v9051_v4  ;;  %v2077_v62 = vmul.f32 %v8974_v29, %v8974_v29 }
 0x418   :  { %v2171_v5 = vrot.slane %v2170_v42, 4  ;;  %v1785_v52 = vrot.slane %v1784_v53, 1 }
 0x419   :  { %v2231_v50 = vadd.f32 %v2230_v35, %v2135_v54  ;;  %v2181_v51 = vadd.f32 %v2180_v57, %v2069_v27 }
 0x41a   :  { %v2172_v2 = vadd.f32 %v2171_v5, %v2170_v42  ;;  %v1786_v58 = vadd.f32 %v1785_v52, %v1784_v53  ;;  %v11489_v5 = vld [vmem:[#allocation14_spill] sm:$0xff]  ;;  %v11491_v53 = vld [vmem:[#allocation15_spill] sm:$0xff]  ;;  %v11493_v52 = vld [vmem:[#allocation16_spill] sm:$0xff] }
 0x41b   :  { %v2232_v7 = vadd.f32 %v2231_v50, %v2143_v15  ;;  %v2182_v15 = vadd.f32 %v2181_v51, %v2077_v62  ;;  %v11495_v50 = vld [vmem:[#allocation17_spill] sm:$0xff]  ;;  %v1584_v62 = vpop.f32.mrf.mxu2 }
 0x41c   :  { %v2173_v13 = vrot.slane %v2172_v2, 2  ;;  %v9062_v42 = vmul.f32 %v1786_v58, %v8083_v44  ;;  %v1684_v56 = vpop.f32.mrf.mxu0 }
 0x41d   :  { %v2233_v23 = vadd.f32 %v2232_v7, %v2151_v49  ;;  %v11499_v7 = vld [vmem:[#allocation19_spill] sm:$0xff] }
 0x41e   :  { %v2174_v20 = vadd.f32 %v2173_v13, %v2172_v2  ;;  %v9068_v54 = vsub.f32 %v11489_v5, %v9062_v42  ;;  %v9072_v35 = vsub.f32 %v11491_v53, %v9062_v42  ;;  %v9076_v57 = vsub.f32 %v11493_v52, %v9062_v42  ;;  %v11497_v13 = vld [vmem:[#allocation18_spill] sm:$0xff]  ;;  %v11501_v53 = vld [vmem:[#allocation20_spill] sm:$0xff]  ;;  %11508 = vst [vmem:[#allocation19_spill] sm:$0xff] %v9109_v55 }
 0x41f   :  { %v2234_v2 = vrot.slane %v2233_v23, 4  ;;  %v9080_v27 = vsub.f32 %v11495_v50, %v9062_v42  ;;  %v9084_v58 = vsub.f32 %v11497_v13, %v9062_v42  ;;  %v9088_v5 = vsub.f32 %v11499_v7, %v9062_v42  ;;  %v11503_v52 = vld [vmem:[#allocation22_spill] sm:$0xff]  ;;  %v1633_v50 = vpop.f32.mrf.mxu3  ;;  %v1537_v7 = vpop.f32.mrf.mxu1 }
 0x420   :  { %v2175_v41 = vrot.slane %v2174_v20, 1  ;;  %11490 = vst [vmem:[#allocation23_spill] sm:$0xff] %v9068_v54  ;;  %v9092_v29 = vsub.f32 %v11501_v53, %v9062_v42  ;;  %v9096_v51 = vsub.f32 %v11503_v52, %v9062_v42  ;;  %v9100_v13 = vsub.f32 %v11505_v46, %v8937_v24 }
 0x421   :  { %11492 = vst [vmem:[#allocation24_spill] sm:$0xff] %v9072_v35  ;;  %v2235_v8 = vadd.f32 %v2234_v2, %v2233_v23 }
 0x422   :  { %11494 = vst [vmem:[#allocation25_spill] sm:$0xff] %v9076_v57  ;;  %v2176_v49 = vadd.f32 %v2175_v41, %v2174_v20  ;;  %v2085_v20 = vmul.f32 %v8978_v3, %v8978_v3  ;;  %v2093_v46 = vmul.f32 %v9100_v13, %v9100_v13 }
 0x423   :  { %11496 = vst [vmem:[#allocation30_spill] sm:$0xff] %v9080_v27  ;;  %v2236_v53 = vrot.slane %v2235_v8, 2  ;;  %v1586_v3 = vpop.f32.mrf.mxu2 }
 0x424   :  { %11498 = vst [vmem:[#allocation14_spill] sm:$0xff] %v9084_v58  ;;  %v2324_v41 = vmul.f32 %v2176_v49, %v8083_v44  ;;  %v2183_v40 = vadd.f32 %v2182_v15, %v2085_v20  ;;  %v9116_v15 = vsub.f32 %v11509_v61, %v8937_v24  ;;  %v1687_v6 = vpop.f32.mrf.mxu0 }
 0x425   :  { %11500 = vst [vmem:[#allocation15_spill] sm:$0xff] %v9088_v5  ;;  %v2237_v52 = vadd.f32 %v2236_v53, %v2235_v8  ;;  %v2101_v8 = vmul.f32 %v9109_v55, %v9109_v55  ;;  %v11511_v53 = vld [vmem:[#allocation13_spill] sm:$0xff] }
 0x426   :  { %11502 = vst [vmem:[#allocation16_spill] sm:$0xff] %v9092_v29  ;;  %v9105_v21 = vadd.f32 1e-05, %v2324_v41  ;;  %v2184_v2 = vadd.f32 %v2183_v40, %v2093_v46  ;;  %v9121_v31 = vperm.slane %v11511_v53, 4  ;;  %v9127_v40 = vperm.slane %v11511_v53, 5  ;;  %v11514_v55 = vld [vmem:[#allocation29_spill] sm:$0xff] }
 0x427   :  { %11504 = vst [vmem:[#allocation17_spill] sm:$0xff] %v9096_v51  ;;  %v2238_v23 = vrot.slane %v2237_v52, 1  ;;  %v1635_v49 = vpop.f32.mrf.mxu3  ;;  %v1540_v20 = vpop.f32.mrf.mxu1  ;;  %v9131_v61 = vperm.slane %v11511_v53, 6  ;;  %v9145_v30 = vsub.f32 %v11514_v55, %v8937_v24 }
 0x428   :  { %11506 = vst [vmem:[#allocation18_spill] sm:$0xff] %v9100_v13  ;;  %7589 = vrsqrt.f32 %v9105_v21  ;;  %v2185_v41 = vadd.f32 %v2184_v2, %v2101_v8  ;;  %v9124_v13 = vperm.slane %v11511_v53, 7  ;;  %v9138_v2 = vadd.f32 %v1537_v7, %v9121_v31 }
 0x429   :  { %v2239_v38 = vadd.f32 %v2238_v23, %v2237_v52  ;;  %11510 = vst [vmem:[#allocation20_spill] sm:$0xff] %v9116_v15  ;;  %v2109_v23 = vmul.f32 %v9116_v15, %v9116_v15  ;;  %v9151_v59 = vadd.f32 %v1535_v9, %v9121_v31  ;;  %v9157_v7 = vadd.f32 %v1584_v62, %v9127_v40 }
 0x42a   :  { %11512 = vst [vmem:[#allocation22_spill] sm:$0xff] %v9138_v2  ;;  %v9141_v8 = vadd.f32 %v1684_v56, %v9124_v13  ;;  %v9154_v17 = vadd.f32 %v1682_v47, %v9124_v13  ;;  %v9164_v55 = vadd.f32 %v1633_v50, %v9131_v61  ;;  %v11524_v50 = vld [vmem:[#allocation31_spill] sm:$0xff]  ;;  %vm2346_vm9 = vweird.f32 %v9105_v21 }
 0x42b   :  { %v2327_v52 = vmul.f32 %v2239_v38, %v8083_v44  ;;  %11515 = vst [vmem:[#allocation27_spill] sm:$0xff] %v9145_v30  ;;  %v9148_v38 = vadd.f32 %v1586_v3, %v9127_v40  ;;  %v2186_v53 = vadd.f32 %v2185_v41, %v2109_v23  ;;  %v9167_v3 = vadd.f32 %v1635_v49, %v9131_v61  ;;  %v1589_v41 = vpop.f32.mrf.mxu2 }
 0x42c   :  { %11513 = vst [vmem:[#allocation26_spill] sm:$0xff] %v9141_v8  ;;  %v1808_v47 = vadd.f32 %v9138_v2, %v9151_v59  ;;  %v1871_v62 = vadd.f32 %v9141_v8, %v9154_v17  ;;  %v9174_v23 = vadd.f32 %v1540_v20, %v9121_v31  ;;  %v9181_v14 = vsub.f32 %v11524_v50, %v8937_v24 }
 0x42d   :  { %11516 = vst [vmem:[#allocation28_spill] sm:$0xff] %v9148_v38  ;;  %v9161_v15 = vadd.f32 1e-05, %v2327_v52  ;;  %v9177_v52 = vadd.f32 %v1687_v6, %v9124_v13  ;;  %v2117_v49 = vmul.f32 %v9145_v30, %v9145_v30  ;;  %v1829_v63 = vadd.f32 %v9148_v38, %v9157_v7 }
 0x42e   :  { %v9133_v46 = vpop.eup %7589  ;;  %11517 = vst [vmem:[#allocation13_spill] sm:$0xff] %v9151_v59  ;;  %v9188_v2 = vadd.f32 %v1589_v41, %v9127_v40  ;;  %v1850_v20 = vadd.f32 %v9167_v3, %v9164_v55  ;;  %v1809_v6 = vadd.f32 %v1808_v47, %v9174_v23  ;;  %v2125_v47 = vmul.f32 %v9181_v14, %v9181_v14 }
 0x42f   :  { %11518 = vst [vmem:[#allocation29_spill] sm:$0xff] %v9154_v17  ;;  %v2341_v56 = vmul.f32 %v9133_v46, %v9105_v21  ;;  %v1638_v9 = vpop.f32.mrf.mxu3  ;;  %v1542_v8 = vpop.f32.mrf.mxu1  ;;  %v1872_v59 = vadd.f32 %v1871_v62, %v9177_v52  ;;  %v2187_v1 = vadd.f32 %v2186_v53, %v2117_v49  ;;  %7591 = vrsqrt.f32 %v9161_v15 }
 0x430   :  { %11519 = vst [vmem:[#allocation60_spill] sm:$0xff] %v9157_v7  ;;  %v1689_v17 = vpop.f32.mrf.mxu0  ;;  %v9195_v50 = vadd.f32 %v1638_v9, %v9131_v61  ;;  %v1830_v30 = vadd.f32 %v1829_v63, %v9188_v2  ;;  %v9203_v7 = vsub.f32 %v8767_v16, %v8937_v24  ;;  %v9209_v63 = vsub.f32 %v8771_v45, %v8937_v24 }
 0x431   :  { %11520 = vst [vmem:[#allocation61_spill] sm:$0xff] %v9164_v55  ;;  %v2342_v38 = vmul.f32 %v9133_v46, %v2341_v56  ;;  %v2188_v62 = vadd.f32 %v2187_v1, %v2125_v47  ;;  %v9215_v16 = vsub.f32 %v8775_v0, %v8937_v24  ;;  %v9221_v45 = vadd.f32 %v1542_v8, %v9121_v31 }
 0x432   :  { %11521 = vst [vmem:[#allocation62_spill] sm:$0xff] %v9167_v3  ;;  %v1851_v41 = vadd.f32 %v1850_v20, %v9195_v50  ;;  %v2133_v53 = vmul.f32 %v9203_v7, %v9203_v7  ;;  %vm2347_vm8 = vweird.f32 %v9133_v46  ;;  %v2030_v0 = vmul.f32 %v9068_v54, %v9068_v54 }
 0x433   :  { %11522 = vst [vmem:[#allocation63_spill] sm:$0xff] %v9174_v23  ;;  %v2343_v3 = vmul.f32 0.5, %v2342_v38  ;;  %v1591_v9 = vpop.f32.mrf.mxu2  ;;  %v2141_v38 = vmul.f32 %v9209_v63, %v9209_v63  ;;  %v2149_v47 = vmul.f32 %v9215_v16, %v9215_v16  ;;  %v9230_v24 = vadd.f32 %v1689_v17, %v9124_v13  ;;  %vm2348_vm10 = vmor %vm2346_vm9, %vm2347_vm8 }
 0x434   :  { %11523 = vst [vmem:[#allocation64_spill] sm:$0xff] %v9177_v52  ;;  %v9246_v17 = vadd.f32 %v1591_v9, %v9127_v40  ;;  %vm2376_vm12 = vweird.f32 %v9161_v15 }
 0x435   :  { %11525 = vst [vmem:[#allocation31_spill] sm:$0xff] %v9181_v14  ;;  %v7592_v20 = vpop.eup %7591 }
 0x436   :  { %11526 = vst [vmem:[#allocation65_spill] sm:$0xff] %v9188_v2  ;;  %v2344_v2 = vsub.f32 1.5, %v2343_v3  ;;  %v2371_v1 = vmul.f32 %v7592_v20, %v9161_v15  ;;  %v9235_v3 = vld [vmem:[%s11222_s11] sm:$0xff]  ;;  %vm2377_vm11 = vweird.f32 %v7592_v20 }
 0x437   :  { %11527 = vst [vmem:[#allocation66_spill] sm:$0xff] %v9195_v50  ;;  %v1640_v55 = vpop.f32.mrf.mxu3  ;;  %v1545_v56 = vpop.f32.mrf.mxu1  ;;  %v2189_v50 = vadd.f32 %v2188_v62, %v2133_v53  ;;  %v9261_v9 = vperm.slane %v9235_v3, 0  ;;  %vm2378_vm13 = vmor %vm2376_vm12, %vm2377_vm11 }
 0x438   :  { %11528 = vst [vmem:[#allocation67_spill] sm:$0xff] %v9203_v7  ;;  %v1692_v49 = vpop.f32.mrf.mxu0  ;;  %v2345_v23 = vmul.f32 %v9133_v46, %v2344_v2  ;;  %v2372_v8 = vmul.f32 %v7592_v20, %v2371_v1  ;;  %v1810_v2 = vadd.f32 %v1809_v6, %v9221_v45  ;;  %v9252_v54 = vadd.f32 %v1545_v56, %v9121_v31 }
 0x439   :  { %11529 = vst [vmem:[#allocation68_spill] sm:$0xff] %v9209_v63  ;;  %v2190_v52 = vadd.f32 %v2189_v50, %v2141_v38  ;;  %v2038_v50 = vmul.f32 %v9072_v35, %v9072_v35  ;;  %v9249_v38 = vadd.f32 %v1640_v55, %v9131_v61  ;;  %v9255_v21 = vadd.f32 %v1692_v49, %v9124_v13 }
 0x43a   :  { %11530 = vst [vmem:[#allocation69_spill] sm:$0xff] %v9215_v16  ;;  %v2373_v1 = vmul.f32 0.5, %v2372_v8  ;;  %v9258_v16 = vsel %vm2348_vm10, %v9133_v46, %v2345_v23  ;;  %v1873_v55 = vadd.f32 %v1872_v59, %v9230_v24  ;;  %v9265_v63 = vadd.f32 %v1810_v2, %v9252_v54  ;;  %v9281_v59 = vld [vmem:[%s11223_s12] sm:$0xff] }
 0x43b   :  { %11531 = vst [vmem:[#allocation70_spill] sm:$0xff] %v9221_v45  ;;  %v2191_v35 = vadd.f32 %v2190_v52, %v2149_v47  ;;  %v1594_v6 = vpop.f32.mrf.mxu2  ;;  %v2198_v49 = vadd.f32 %v2038_v50, %v2030_v0  ;;  %v1831_v7 = vadd.f32 %v1830_v30, %v9246_v17  ;;  %v1852_v52 = vadd.f32 %v1851_v41, %v9249_v38 }
 0x43c   :  { %11532 = vst [vmem:[#allocation71_spill] sm:$0xff] %v9230_v24  ;;  %v2374_v56 = vsub.f32 1.5, %v2373_v1  ;;  %v9270_v47 = vadd.f32 %v1873_v55, %v9255_v21  ;;  %v9273_v46 = vadd.f32 %v1594_v6, %v9127_v40  ;;  %v2484_v0 = vmul.f32 %v9258_v16, %v8903_v33 }
 0x43d   :  { %11533 = vst [vmem:[#allocation72_spill] sm:$0xff] %v9246_v17  ;;  %v2192_v41 = vrot.slane %v2191_v35, 4  ;;  %v2492_v8 = vmul.f32 %v9258_v16, %v8909_v22  ;;  %v2046_v1 = vmul.f32 %v9076_v57, %v9076_v57  ;;  %v9303_v15 = vperm.slane %v9281_v59, 0 }
 0x43e   :  { %11534 = vst [vmem:[#allocation73_spill] sm:$0xff] %v9249_v38  ;;  %v2375_v30 = vmul.f32 %v7592_v20, %v2374_v56  ;;  %v9289_v50 = vadd.f32 %v1831_v7, %v9273_v46  ;;  %v9306_v22 = vperm.slane %v9235_v3, 3  ;;  %v2054_v7 = vmul.f32 %v9080_v27, %v9080_v27 }
 0x43f   :  { %v9241_v62 = vpop.f32.mrf.mxu1  ;;  %11535 = vst [vmem:[#allocation74_spill] sm:$0xff] %v9252_v54  ;;  %v1643_v45 = vpop.f32.mrf.mxu3  ;;  %v2629_v55 = vmul.f32 %v9261_v9, %v2484_v0  ;;  %v2193_v56 = vadd.f32 %v2192_v41, %v2191_v35  ;;  %v2500_v27 = vmul.f32 %v9258_v16, %v8915_v11 }
 0x440   :  { %v9243_v53 = vpop.f32.mrf.mxu0  ;;  %11536 = vst [vmem:[#allocation75_spill] sm:$0xff] %v9255_v21  ;;  %v9276_v23 = vadd.f32 %v1643_v45, %v9131_v61  ;;  %v9294_v2 = vsel %vm2378_vm13, %v7592_v20, %v2375_v30  ;;  %v9312_v20 = vperm.slane %v9281_v59, 3  ;;  %v2637_v30 = vmul.f32 %v9261_v9, %v2492_v8 }
 0x441   :  { %11537 = vst [vmem:[#allocation76_spill] sm:$0xff] %v9273_v46  ;;  %v2487_v57 = vmul.f32 %v9294_v2, %v8882_v12  ;;  %v2495_v38 = vmul.f32 %v9294_v2, %v8989_v43  ;;  %v2511_v0 = vmul.f32 %v9294_v2, %v9017_v60  ;;  %v2519_v35 = vmul.f32 %v9294_v2, %v9025_v26 }
 0x442   :  { %11538 = vst [vmem:[#allocation77_spill] sm:$0xff] %v9276_v23  ;;  %v9292_v45 = vadd.f32 %v1852_v52, %v9276_v23  ;;  %v2199_v52 = vadd.f32 %v2198_v49, %v2046_v1  ;;  %v2503_v23 = vmul.f32 %v9294_v2, %v9001_v19  ;;  %v2527_v49 = vmul.f32 %v9294_v2, %v9035_v48 }
 0x443   :  { %11539 = vst [vmem:[#allocation78_spill] sm:$0xff] %v9294_v2  ;;  %v2535_v12 = vmul.f32 %v9294_v2, %v9043_v28  ;;  %v2543_v43 = vmul.f32 %v9294_v2, %v9051_v4  ;;  %v2632_v19 = vmul.f32 %v9306_v22, %v2487_v57  ;;  %v2640_v41 = vmul.f32 %v9306_v22, %v2495_v38  ;;  %v9356_v24 = vpop.f32.mrf.mxu2 }
 0x444   :  { %11540 = vst [vmem:[#allocation79_spill] sm:$0xff] %v9306_v22  ;;  %v2648_v11 = vmul.f32 %v9306_v22, %v2503_v23  ;;  %v2656_v60 = vmul.f32 %v9306_v22, %v2511_v0  ;;  %v2774_v8 = vadd.f32 %v9303_v15, %v2629_v55  ;;  %v2782_v26 = vadd.f32 %v9303_v15, %v2637_v30 }
 0x445   :  { %11541 = vst [vmem:[#allocation80_spill] sm:$0xff] %v9312_v20  ;;  %v2777_v48 = vadd.f32 %v9312_v20, %v2632_v19  ;;  %v2200_v1 = vadd.f32 %v2199_v52, %v2054_v7  ;;  %v2664_v28 = vmul.f32 %v9306_v22, %v2519_v35  ;;  %v2785_v17 = vadd.f32 %v9312_v20, %v2640_v41 }
 0x446   :  { %v2793_v4 = vadd.f32 %v9312_v20, %v2648_v11  ;;  %v2508_v23 = vmul.f32 %v9258_v16, %v8924_v34  ;;  %v2645_v55 = vmul.f32 %v9261_v9, %v2500_v27  ;;  %v2194_v0 = vrot.slane %v2193_v56, 2 }
 0x447   :  { %v9298_v33 = vpop.f32.mrf.mxu1  ;;  %v2062_v30 = vmul.f32 %v9084_v58, %v9084_v58  ;;  %v2672_v7 = vmul.f32 %v9306_v22, %v2527_v49  ;;  %v2801_v52 = vadd.f32 %v9312_v20, %v2656_v60  ;;  %v2905_v35 = vmax.f32 %v2777_v48, 0.0  ;;  %v9358_v34 = vpop.f32.mrf.mxu3 }
 0x448   :  { %v9300_v6 = vpop.f32.mrf.mxu0  ;;  %v2913_v19 = vmax.f32 %v2785_v17, 0.0  ;;  %v2902_v41 = vmax.f32 %v2774_v8, 0.0  ;;  %v2910_v11 = vmax.f32 %v2782_v26, 0.0  ;;  %v2070_v2 = vmul.f32 %v9088_v5, %v9088_v5 }
 0x449   :  { %v2201_v46 = vadd.f32 %v2200_v1, %v2062_v30  ;;  %v2680_v27 = vmul.f32 %v9306_v22, %v2535_v12  ;;  %v2809_v58 = vadd.f32 %v9312_v20, %v2664_v28  ;;  %v2921_v21 = vmax.f32 %v2793_v4, 0.0 }
 0x44a   :  { %v3109_v49 = vmax.f32 %v2905_v35, %v2913_v19  ;;  %v2516_v60 = vmul.f32 %v9258_v16, %v8928_v32  ;;  %v2653_v17 = vmul.f32 %v9261_v9, %v2508_v23  ;;  %v2790_v8 = vadd.f32 %v9303_v15, %v2645_v55 }
 0x44b   :  { %v2195_v26 = vadd.f32 %v2194_v0, %v2193_v56  ;;  %v2688_v48 = vmul.f32 %v9306_v22, %v2543_v43  ;;  %v2817_v1 = vadd.f32 %v9312_v20, %v2672_v7  ;;  %v2929_v30 = vmax.f32 %v2801_v52, 0.0  ;;  %v11556_v22 = vld [vmem:[#allocation52_spill] sm:$0xff] }
 0x44c   :  { %v3110_v5 = vmax.f32 %v3109_v49, %v2921_v21  ;;  %v3070_v54 = vmax.f32 %v2902_v41, %v2910_v11  ;;  %v2825_v12 = vadd.f32 %v9312_v20, %v2680_v27  ;;  %v2937_v28 = vmax.f32 %v2809_v58, 0.0  ;;  %v9384_v49 = vpop.f32.mrf.mxu2 }
 0x44d   :  { %v2202_v35 = vadd.f32 %v2201_v46, %v2070_v2  ;;  %v2524_v23 = vmul.f32 %v9258_v16, %v8982_v18  ;;  %v2661_v56 = vmul.f32 %v9261_v9, %v2516_v60  ;;  %v2798_v43 = vadd.f32 %v9303_v15, %v2653_v17 }
 0x44e   :  { %v3111_v4 = vmax.f32 %v3110_v5, %v2929_v30  ;;  %v2918_v55 = vmax.f32 %v2790_v8, 0.0  ;;  %v2833_v21 = vadd.f32 %v9312_v20, %v2688_v48  ;;  %v2945_v0 = vmax.f32 %v2817_v1, 0.0  ;;  %v6267_v20 = vld [vmem:[#allocation5 + $0x1e0] sm:$0xf] }
 0x44f   :  { %v9343_v57 = vpop.f32.mrf.mxu1  ;;  %v2196_v52 = vrot.slane %v2195_v26, 1  ;;  %v2953_v5 = vmax.f32 %v2825_v12, 0.0  ;;  %v2078_v2 = vmul.f32 %v9092_v29, %v9092_v29  ;;  %v2532_v41 = vmul.f32 %v9258_v16, %v8995_v10  ;;  %v9386_v60 = vpop.f32.mrf.mxu3  ;;  %v6091_v29 = vld [vmem:[#allocation5 + $0x80] sm:$0xf] }
 0x450   :  { %v9345_v38 = vpop.f32.mrf.mxu0  ;;  %v3112_v7 = vmax.f32 %v3111_v4, %v2937_v28  ;;  %v3071_v58 = vmax.f32 %v3070_v54, %v2918_v55  ;;  %v2669_v18 = vmul.f32 %v9261_v9, %v2524_v23  ;;  %v2806_v11 = vadd.f32 %v9303_v15, %v2661_v56 }
 0x451   :  { %v2926_v27 = vmax.f32 %v2798_v43, 0.0  ;;  %v2961_v17 = vmax.f32 %v2833_v21, 0.0  ;;  %v2197_v54 = vadd.f32 %v2196_v52, %v2195_v26  ;;  %v2203_v48 = vadd.f32 %v2202_v35, %v2078_v2 }
 0x452   :  { %v3113_v46 = vmax.f32 %v3112_v7, %v2945_v0  ;;  %v9392_v12 = vsub.f32 %v8781_v36, %v9062_v42  ;;  %v2086_v10 = vmul.f32 %v9096_v51, %v9096_v51  ;;  %v2540_v23 = vmul.f32 %v9258_v16, %v9011_v39 }
 0x453   :  { %v3072_v1 = vmax.f32 %v3071_v58, %v2926_v27  ;;  %v2677_v26 = vmul.f32 %v9261_v9, %v2532_v41  ;;  %v2814_v35 = vadd.f32 %v9303_v15, %v2669_v18  ;;  %v2934_v56 = vmax.f32 %v2806_v11, 0.0 }
 0x454   :  { %v3114_v8 = vmax.f32 %v3113_v46, %v2953_v5  ;;  %11543 = vst [vmem:[#allocation82_spill] sm:$0xff] %v9392_v12  ;;  %v2325_v43 = vmul.f32 %v2197_v54, %v8083_v44  ;;  %v2204_v55 = vadd.f32 %v2203_v48, %v2086_v10  ;;  %v9407_v21 = vsub.f32 %v8788_v37, %v9062_v42  ;;  %v9415_v2 = vpop.f32.mrf.mxu2  ;;  %v7275_v10 = vld [vmem:[#allocation5 + $0xec] sm:$0xf0]  ;;  %v11560_v44 = vld [vmem:[#allocation32_spill] sm:$0xff] }
 0x455   :  { %v3073_v36 = vmax.f32 %v3072_v1, %v2934_v56  ;;  %v2094_v0 = vmul.f32 %v9392_v12, %v9392_v12  ;;  %v2685_v7 = vmul.f32 %v9261_v9, %v2540_v23  ;;  %v2822_v39 = vadd.f32 %v9303_v15, %v2677_v26  ;;  %v6139_v1 = vld [vmem:[#allocation5 + $0xe0] sm:$0xf] }
 0x456   :  { %v9388_v30 = vmax.f32 %v3114_v8, %v2961_v17  ;;  %11544 = vst [vmem:[#allocation83_spill] sm:$0xff] %v9407_v21  ;;  %v2942_v52 = vmax.f32 %v2814_v35, 0.0  ;;  %v9413_v58 = vadd.f32 1e-05, %v2325_v43  ;;  %v9421_v37 = vsub.f32 %v8826_v25, %v9062_v42  ;;  %v11546_v23 = vld [vmem:[#allocation40_spill] sm:$0xff] }
 0x457   :  { %v9369_v19 = vpop.f32.mrf.mxu1  ;;  %v2205_v5 = vadd.f32 %v2204_v55, %v2094_v0  ;;  %v9417_v41 = vpop.f32.mrf.mxu3  ;;  %v2102_v18 = vmul.f32 %v9407_v21, %v9407_v21  ;;  %v2830_v17 = vadd.f32 %v9303_v15, %v2685_v7  ;;  %v2950_v8 = vmax.f32 %v2822_v39, 0.0  ;;  %v6123_v55 = vld [vmem:[#allocation5 + $0xc0] sm:$0xf]  ;;  %v11548_v39 = vld [vmem:[#allocation41_spill] sm:$0xff] }
 0x458   :  { %v9371_v32 = vpop.f32.mrf.mxu0  ;;  %11542 = vst [vmem:[#allocation81_spill] sm:$0xff] %v9388_v30  ;;  %v3074_v46 = vmax.f32 %v3073_v36, %v2942_v52  ;;  %7593 = vrsqrt.f32 %v9413_v58  ;;  %v9433_v25 = vsub.f32 %v11546_v23, %v9062_v42  ;;  %v2110_v26 = vmul.f32 %v9421_v37, %v9421_v37  ;;  %v7271_v36 = vld [vmem:[#allocation5 + $0xcc] sm:$0xf0] }
 0x459   :  { %11545 = vst [vmem:[#allocation84_spill] sm:$0xff] %v9421_v37  ;;  %v2206_v54 = vadd.f32 %v2205_v5, %v2102_v18  ;;  %v2958_v35 = vmax.f32 %v2830_v17, 0.0  ;;  %v6140_v43 = vor.u32 %v7275_v10, %v6139_v1  ;;  %v9441_v52 = vsub.f32 %v11548_v39, %v9062_v42  ;;  %v7267_v1 = vld [vmem:[#allocation5 + $0xac] sm:$0xf0] }
 0x45a   :  { %v3075_v48 = vmax.f32 %v3074_v46, %v2950_v8  ;;  %11547 = vst [vmem:[#allocation40_spill] sm:$0xff] %v9433_v25  ;;  %v2118_v5 = vmul.f32 %v9433_v25, %v9433_v25  ;;  %v6124_v8 = vor.u32 %v7271_v36, %v6123_v55  ;;  %v7307_v55 = vld [vmem:[#allocation5 + $0x1ec] sm:$0xf0]  ;;  %v6395_v36 = vld [vmem:[#allocation5 + $0x2e0] sm:$0xf]  ;;  %v9467_v51 = vsub.f32 %v11556_v22, %v9062_v42 }
 0x45b   :  { %v2207_v56 = vadd.f32 %v2206_v54, %v2110_v26  ;;  %11549 = vst [vmem:[#allocation41_spill] sm:$0xff] %v9441_v52  ;;  %4793 = vmatpush.bf16.msra.mxu1 %v6140_v43  ;;  %v6107_v54 = vld [vmem:[#allocation5 + $0xa0] sm:$0xf]  ;;  %v2126_v43 = vmul.f32 %v9441_v52, %v9441_v52  ;;  %v7263_v25 = vld [vmem:[#allocation5 + $0x8c] sm:$0xf0]  ;;  %v6268_v21 = vor.u32 %v7307_v55, %v6267_v20  ;;  %vm2356_vm15 = vweird.f32 %v9413_v58 }
 0x45c   :  { %v3076_v0 = vmax.f32 %v3075_v48, %v2958_v35  ;;  %v9449_v17 = vpop.f32.mrf.mxu2  ;;  %v11552_v35 = vld [vmem:[#allocation50_spill] sm:$0xff]  ;;  %v6108_v30 = vor.u32 %v7267_v1, %v6107_v54  ;;  %11557 = vst [vmem:[#allocation52_spill] sm:$0xff] %v9467_v51  ;;  %v6092_v1 = vor.u32 %v7263_v25, %v6091_v29  ;;  %v6251_v22 = vld [vmem:[#allocation5 + $0x1c0] sm:$0xf]  ;;  %v9478_v20 = vmul.f32 %v9258_v16, %v11560_v44 }
 0x45d   :  { %11550 = vst [vmem:[#allocation85_spill] sm:$0xff] %v9449_v17  ;;  %v2208_v48 = vadd.f32 %v2207_v56, %v2118_v5  ;;  %v9457_v39 = vsub.f32 %v11552_v35, %v9062_v42  ;;  %v11554_v56 = vld [vmem:[#allocation51_spill] sm:$0xff]  ;;  %v7339_v35 = vld [vmem:[#allocation5 + $0x2ec] sm:$0xf0]  ;;  %4806 = vmatpush.bf16.msra.mxu2 %v6268_v21  ;;  %v2150_v29 = vmul.f32 %v9467_v51, %v9467_v51 }
 0x45e   :  { %v9437_v7 = vpop.eup %7593  ;;  %v3077_v23 = vrot.slane %v3076_v0, 4  ;;  %v9463_v5 = vsub.f32 %v11554_v56, %v9062_v42  ;;  %v6396_v12 = vor.u32 %v7339_v35, %v6395_v36  ;;  %v6075_v56 = vld [vmem:[#allocation5 + $0x60] sm:$0xf]  ;;  %v7303_v17 = vld [vmem:[#allocation5 + $0x1cc] sm:$0xf0] }
 0x45f   :  { %v9396_v28 = vpop.f32.mrf.mxu1  ;;  %v9451_v10 = vpop.f32.mrf.mxu3  ;;  %v2351_v26 = vmul.f32 %v9437_v7, %v9413_v58  ;;  %11553 = vst [vmem:[#allocation50_spill] sm:$0xff] %v9457_v39  ;;  %4794 = vmatpush.bf16.msra.mxu1 %v6124_v8  ;;  %v2209_v37 = vadd.f32 %v2208_v48, %v2126_v43  ;;  %v2134_v54 = vmul.f32 %v9457_v39, %v9457_v39  ;;  %v7259_v21 = vld [vmem:[#allocation5 + $0x6c] sm:$0xf0]  ;;  %v6379_v25 = vld [vmem:[#allocation5 + $0x2c0] sm:$0xf]  ;;  %vm2357_vm14 = vweird.f32 %v9437_v7 }
 0x460   :  { %v9398_v4 = vpop.f32.mrf.mxu0  ;;  %11551 = vst [vmem:[#allocation86_spill] sm:$0xff] %v9451_v10  ;;  %v3078_v52 = vmax.f32 %v3076_v0, %v3077_v23  ;;  %v11561_v0 = vld [vmem:[#allocation33_spill] sm:$0xff]  ;;  %4819 = vmatpush.bf16.msra.mxu3 %v6396_v12  ;;  %v6252_v55 = vor.u32 %v7303_v17, %v6251_v22  ;;  %v11563_v35 = vld [vmem:[#allocation35_spill] sm:$0xff]  ;;  %v11564_v39 = vld [vmem:[#allocation36_spill] sm:$0xff]  ;;  %v9607_v58 = vadd.f32 %v9371_v32, %v9124_v13 }
 0x461   :  { %11555 = vst [vmem:[#allocation51_spill] sm:$0xff] %v9463_v5  ;;  %v2352_v8 = vmul.f32 %v9437_v7, %v2351_v26  ;;  %v9482_v48 = vmul.f32 %v9258_v16, %v11561_v0  ;;  %v7335_v23 = vld [vmem:[#allocation5 + $0x2cc] sm:$0xf0]  ;;  %v2210_v44 = vadd.f32 %v2209_v37, %v2134_v54  ;;  %v9494_v0 = vmul.f32 %v9258_v16, %v11563_v35  ;;  %v6059_v22 = vld [vmem:[#allocation5 + $0x40] sm:$0xf]  ;;  %vm2358_vm0 = vmor %vm2356_vm15, %vm2357_vm14 }
 0x462   :  { %v11562_v26 = vld [vmem:[#allocation34_spill] sm:$0xff]  ;;  %v6380_v36 = vor.u32 %v7335_v23, %v6379_v25  ;;  %v3079_v51 = vrot.slane %v3078_v52, 2  ;;  %v6076_v54 = vor.u32 %v7259_v21, %v6075_v56  ;;  %4807 = vmatpush.bf16.msra.mxu2 %v6252_v55  ;;  %v9522_v23 = vadd.f32 %v9356_v24, %v9127_v40  ;;  %v6363_v56 = vld [vmem:[#allocation5 + $0x2a0] sm:$0xf]  ;;  %11580 = vst [vmem:[#allocation93_spill] sm:$0xff] %v9607_v58 }
 0x463   :  { %4795 = vmatpush.bf16.msra.mxu1 %v6108_v30  ;;  %v2142_v30 = vmul.f32 %v9463_v5, %v9463_v5  ;;  %v9490_v43 = vmul.f32 %v9258_v16, %v11562_v26  ;;  %v9498_v5 = vmul.f32 %v9258_v16, %v11564_v39  ;;  %v11567_v26 = vld [vmem:[#allocation38_spill] sm:$0xff]  ;;  %v6235_v39 = vld [vmem:[#allocation5 + $0x1a0] sm:$0xf]  ;;  %v9535_v24 = vadd.f32 %v9358_v34, %v9131_v61 }
 0x464   :  { %v9500_v12 = vpop.f32.mrf.mxu2  ;;  %v9508_v37 = vmul.f32 %v9258_v16, %v11567_v26  ;;  %v7299_v25 = vld [vmem:[#allocation5 + $0x1ac] sm:$0xf0]  ;;  %11571 = vst [vmem:[#allocation36_spill] sm:$0xff] %v9522_v23  ;;  %4820 = vmatpush.bf16.msra.mxu3 %v6380_v36  ;;  %v11572_v55 = vld [vmem:[#allocation39_spill] sm:$0xff]  ;;  %v9539_v36 = vadd.f32 %v9298_v33, %v9121_v31  ;;  %v9623_v32 = vadd.f32 %v9398_v4, %v9124_v13 }
 0x465   :  { %11565 = vst [vmem:[#allocation32_spill] sm:$0xff] %v9500_v12  ;;  %v7255_v35 = vld [vmem:[#allocation5 + $0x4c] sm:$0xf0]  ;;  %v9526_v26 = vmul.f32 %v9258_v16, %v11572_v55  ;;  %v6219_v33 = vld [vmem:[#allocation5 + $0x180] sm:$0xf] }
 0x466   :  { %11568 = vst [vmem:[#allocation33_spill] sm:$0xff] %v9508_v37  ;;  %v7331_v21 = vld [vmem:[#allocation5 + $0x2ac] sm:$0xf0]  ;;  %v6331_v55 = vld [vmem:[#allocation5 + $0x260] sm:$0xf] }
 0x467   :  { %v9425_v11 = vpop.f32.mrf.mxu1  ;;  %v9510_v17 = vpop.f32.mrf.mxu3  ;;  %4796 = vmatpush.bf16.msra.mxu1 %v6092_v1  ;;  %v6236_v1 = vor.u32 %v7299_v25, %v6235_v39  ;;  %v6364_v12 = vor.u32 %v7331_v21, %v6363_v56  ;;  %v6347_v39 = vld [vmem:[#allocation5 + $0x280] sm:$0xf]  ;;  %v7327_v25 = vld [vmem:[#allocation5 + $0x28c] sm:$0xf0]  ;;  %11582 = vst [vmem:[#allocation95_spill] sm:$0xff] %v9623_v32 }
 0x468   :  { %v9427_v27 = vpop.f32.mrf.mxu0  ;;  %11569 = vst [vmem:[#allocation34_spill] sm:$0xff] %v9510_v17  ;;  %v2211_v17 = vadd.f32 %v2210_v44, %v2142_v30  ;;  %v7295_v30 = vld [vmem:[#allocation5 + $0x18c] sm:$0xf0]  ;;  %v6348_v56 = vor.u32 %v7327_v25, %v6347_v39  ;;  %v6523_v39 = vld [vmem:[#allocation5 + $0x3e0] sm:$0xf] }
 0x469   :  { %4808 = vmatpush.bf16.msra.mxu2 %v6236_v1  ;;  %4821 = vmatpush.bf16.msra.mxu3 %v6364_v12  ;;  %v9566_v1 = vadd.f32 %v9343_v57, %v9121_v31  ;;  %v7371_v25 = vld [vmem:[#allocation5 + $0x3ec] sm:$0xf0] }
 0x46b   :  { %4797 = vmatpush.bf16.msra.mxu1 %v6076_v54  ;;  %v9562_v54 = vadd.f32 %v9386_v60, %v9131_v61  ;;  %v9574_v60 = vadd.f32 %v9345_v38, %v9124_v13  ;;  %v9586_v38 = vadd.f32 %v9369_v19, %v9121_v31 }
 0x46d   :  { %11576 = vst [vmem:[#allocation89_spill] sm:$0xff] %v9562_v54  ;;  %4822 = vmatpush.bf16.msra.mxu3 %v6348_v56 }
 0x46e   :  { %11577 = vst [vmem:[#allocation90_spill] sm:$0xff] %v9574_v60 }
 0x46f   :  { %v9445_v46 = vpop.f32.mrf.mxu1  ;;  %v9599_v19 = vpop.f32.mrf.mxu3 }
 0x470   :  { %v9447_v18 = vpop.f32.mrf.mxu0 }
 0x477   :  { %v9472_v10 = vpop.f32.mrf.mxu1 }
 0x478   :  { %11558 = vst [vmem:[#allocation87_spill] sm:$0xff] %v9472_v10  ;;  %v9474_v42 = vpop.f32.mrf.mxu0  ;;  %v11566_v10 = vld [vmem:[#allocation37_spill] sm:$0xff] }
 0x479   :  { %11559 = vst [vmem:[#allocation88_spill] sm:$0xff] %v9474_v42  ;;  %v2353_v42 = vmul.f32 0.5, %v2352_v8  ;;  %v9504_v14 = vmul.f32 %v9258_v16, %v11566_v10  ;;  %v9514_v8 = vadd.f32 %v9241_v62, %v9121_v31  ;;  %v9518_v10 = vadd.f32 %v9243_v53, %v9124_v13 }
 0x47a   :  { %v9529_v62 = vperm.slane %v9235_v3, 1  ;;  %v9531_v53 = vmax.f32 %v3078_v52, %v3079_v51  ;;  %11573 = vst [vmem:[#allocation37_spill] sm:$0xff] %v9535_v24  ;;  %v9544_v16 = vadd.f32 %v9300_v6, %v9124_v13  ;;  %v9548_v3 = vadd.f32 %v9384_v49, %v9127_v40  ;;  %v6043_v52 = vld [vmem:[#allocation5 + $0x20] sm:$0xf] }
 0x47b   :  { %11570 = vst [vmem:[#allocation35_spill] sm:$0xff] %v9518_v10  ;;  %v2354_v37 = vsub.f32 1.5, %v2353_v42  ;;  %v6060_v51 = vor.u32 %v7255_v35, %v6059_v22  ;;  %v1812_v44 = vadd.f32 %v9265_v63, %v9514_v8  ;;  %v1875_v6 = vadd.f32 %v9270_v47, %v9518_v10  ;;  %v7251_v22 = vld [vmem:[#allocation5 + $0x2c] sm:$0xf0] }
 0x47c   :  { %11574 = vst [vmem:[#allocation38_spill] sm:$0xff] %v9544_v16  ;;  %v1833_v49 = vadd.f32 %v9289_v50, %v9522_v23  ;;  %v2212_v35 = vadd.f32 %v2211_v17, %v2150_v29  ;;  %v6220_v63 = vor.u32 %v7295_v30, %v6219_v33  ;;  %v1854_v50 = vadd.f32 %v9292_v45, %v9535_v24  ;;  %v6203_v17 = vld [vmem:[#allocation5 + $0x160] sm:$0xf]  ;;  %v9588_v30 = vpop.f32.mrf.mxu2 }
 0x47d   :  { %11575 = vst [vmem:[#allocation39_spill] sm:$0xff] %v9548_v3  ;;  %v2355_v47 = vmul.f32 %v9437_v7, %v2354_v37  ;;  %v1813_v21 = vadd.f32 %v1812_v44, %v9539_v36  ;;  %v1876_v29 = vadd.f32 %v1875_v6, %v9544_v16  ;;  %4798 = vmatpush.bf16.msra.mxu1 %v6060_v51  ;;  %v7291_v37 = vld [vmem:[#allocation5 + $0x16c] sm:$0xf0]  ;;  %v6027_v44 = vld [vmem:[#allocation5] sm:$0xf] }
 0x47e   :  { %v1834_v57 = vadd.f32 %v1833_v49, %v9548_v3  ;;  %v6044_v12 = vor.u32 %v7251_v22, %v6043_v52  ;;  %4809 = vmatpush.bf16.msra.mxu2 %v6220_v63  ;;  %v1855_v45 = vadd.f32 %v1854_v50, %v9562_v54  ;;  %v9582_v33 = vadd.f32 %v9415_v2, %v9127_v40  ;;  %v7247_v6 = vld [vmem:[#allocation5 + $0xc] sm:$0xf0]  ;;  %v6187_v23 = vld [vmem:[#allocation5 + $0x140] sm:$0xf] }
 0x47f   :  { %v9550_v34 = vpop.f32.mrf.mxu1  ;;  %v6204_v51 = vor.u32 %v7291_v37, %v6203_v17  ;;  %v7323_v52 = vld [vmem:[#allocation5 + $0x26c] sm:$0xf0]  ;;  %v2213_v49 = vrot.slane %v2212_v35, 4  ;;  %v1814_v2 = vadd.f32 %v1813_v21, %v9566_v1  ;;  %v9597_v22 = vadd.f32 %v9417_v41, %v9131_v61 }
 0x480   :  { %v9552_v42 = vpop.f32.mrf.mxu0  ;;  %11578 = vst [vmem:[#allocation91_spill] sm:$0xff] %v9582_v33  ;;  %v6332_v63 = vor.u32 %v7323_v52, %v6331_v55  ;;  %v9602_v56 = vsel %vm2358_vm0, %v9437_v7, %v2355_v47  ;;  %v1877_v50 = vadd.f32 %v1876_v29, %v9574_v60  ;;  %v9611_v21 = vadd.f32 %v9396_v28, %v9121_v31  ;;  %v7283_v16 = vld [vmem:[#allocation5 + $0x12c] sm:$0xf0] }
 0x481   :  { %11579 = vst [vmem:[#allocation92_spill] sm:$0xff] %v9597_v22  ;;  %v9614_v41 = vperm.slane %v9281_v59, 1  ;;  %4799 = vmatpush.bf16.msra.mxu1 %v6044_v12  ;;  %v6028_v17 = vor.u32 %v7247_v6, %v6027_v44  ;;  %v2565_v7 = vmul.f32 %v9261_v9, %v9478_v20  ;;  %v2573_v47 = vmul.f32 %v9261_v9, %v9482_v48  ;;  %v11584_v12 = vld [vmem:[#allocation18_spill] sm:$0xff]  ;;  %v6507_v44 = vld [vmem:[#allocation5 + $0x3c0] sm:$0xf] }
 0x482   :  { %11581 = vst [vmem:[#allocation94_spill] sm:$0xff] %v9611_v21  ;;  %4810 = vmatpush.bf16.msra.mxu2 %v6204_v51  ;;  %v1815_v29 = vadd.f32 %v1814_v2, %v9586_v38  ;;  %v9627_v28 = vadd.f32 %v9425_v11, %v9121_v31  ;;  %v6524_v59 = vor.u32 %v7371_v25, %v6523_v39  ;;  %v7367_v6 = vld [vmem:[#allocation5 + $0x3cc] sm:$0xf0] }
 0x483   :  { %4823 = vmatpush.bf16.msra.mxu3 %v6332_v63  ;;  %v2485_v37 = vmul.f32 %v9602_v56, %v11584_v12  ;;  %v2214_v55 = vadd.f32 %v2213_v49, %v2212_v35  ;;  %v9632_v20 = vadd.f32 %v1834_v57, %v9582_v33  ;;  %v9635_v48 = vadd.f32 %v1855_v45, %v9597_v22  ;;  %v11587_v57 = vld [vmem:[#allocation19_spill] sm:$0xff]  ;;  %v11588_v49 = vld [vmem:[#allocation20_spill] sm:$0xff]  ;;  %v7363_v22 = vld [vmem:[#allocation5 + $0x3ac] sm:$0xf0] }
 0x484   :  { %11583 = vst [vmem:[#allocation96_spill] sm:$0xff] %v9627_v28  ;;  %v1878_v52 = vadd.f32 %v1877_v50, %v9607_v58  ;;  %v1816_v11 = vadd.f32 %v1815_v29, %v9611_v21  ;;  %v9641_v2 = vadd.f32 %v9427_v27, %v9124_v13  ;;  %v9645_v35 = vadd.f32 %v9445_v46, %v9121_v31  ;;  %v11590_v12 = vld [vmem:[#allocation27_spill] sm:$0xff] }
 0x485   :  { %v2493_v45 = vmul.f32 %v9602_v56, %v11587_v57  ;;  %v9651_v39 = vmul.f32 %v9602_v56, %v11588_v49  ;;  %4800 = vmatpush.bf16.msra.mxu1 %v6028_v17  ;;  %v2710_v25 = vadd.f32 %v9303_v15, %v2565_v7  ;;  %v2718_v63 = vadd.f32 %v9303_v15, %v2573_v47  ;;  %v11591_v49 = vld [vmem:[#allocation31_spill] sm:$0xff] }
 0x486   :  { %11585 = vst [vmem:[#allocation18_spill] sm:$0xff] %v9641_v2  ;;  %v1879_v50 = vadd.f32 %v1878_v52, %v9623_v32  ;;  %v1817_v27 = vadd.f32 %v1816_v11, %v9627_v28  ;;  %v9659_v46 = vadd.f32 %v9447_v18, %v9124_v13  ;;  %v6508_v29 = vor.u32 %v7367_v6, %v6507_v44  ;;  %v11592_v47 = vld [vmem:[#allocation87_spill] sm:$0xff]  ;;  %v9676_v6 = vpop.f32.mrf.mxu2 }
 0x487   :  { %v1570_v4 = vpop.f32.mrf.mxu1  ;;  %11586 = vst [vmem:[#allocation97_spill] sm:$0xff] %v9645_v35  ;;  %v9663_v57 = vmul.f32 %v9602_v56, %v11590_v12  ;;  %v9667_v17 = vmul.f32 %v9602_v56, %v11591_v49  ;;  %v2215_v7 = vrot.slane %v2214_v55, 2  ;;  %v9671_v52 = vadd.f32 %v11592_v47, %v9121_v31  ;;  %v6491_v11 = vld [vmem:[#allocation5 + $0x3a0] sm:$0xf]  ;;  %v9682_v49 = vpop.f32.mrf.mxu3 }
 0x488   :  { %v1717_v51 = vpop.f32.mrf.mxu0  ;;  %11589 = vst [vmem:[#allocation19_spill] sm:$0xff] %v9659_v46  ;;  %v2630_v18 = vmul.f32 %v9529_v62, %v2485_v37  ;;  %v1818_v44 = vadd.f32 %v1817_v27, %v9645_v35  ;;  %v11594_v12 = vld [vmem:[#allocation88_spill] sm:$0xff]  ;;  %v9686_v47 = vadd.f32 %v9550_v34, %v9121_v31  ;;  %v2581_v24 = vmul.f32 %v9261_v9, %v9490_v43  ;;  %v11597_v34 = vld [vmem:[#allocation67_spill] sm:$0xff] }
 0x489   :  { %4832 = vmatpush.bf16.msrb.mxu1 %v6524_v59  ;;  %11593 = vst [vmem:[#allocation20_spill] sm:$0xff] %v9671_v52  ;;  %v1880_v59 = vadd.f32 %v1879_v50, %v9641_v2  ;;  %v9680_v54 = vadd.f32 %v11594_v12, %v9124_v13  ;;  %v2838_v37 = vmax.f32 %v2710_v25, 0.0  ;;  %v2846_v33 = vmax.f32 %v2718_v63, 0.0  ;;  %v7287_v2 = vld [vmem:[#allocation5 + $0x14c] sm:$0xf0] }
 0x48a   :  { %11596 = vst [vmem:[#allocation31_spill] sm:$0xff] %v9686_v47  ;;  %v2638_v50 = vmul.f32 %v9529_v62, %v2493_v45  ;;  %v9694_v3 = vadd.f32 %v9552_v42, %v9124_v13  ;;  %v6492_v12 = vor.u32 %v7363_v22, %v6491_v11  ;;  %v6315_v32 = vld [vmem:[#allocation5 + $0x240] sm:$0xf]  ;;  %v2525_v58 = vmul.f32 %v9602_v56, %v11597_v34  ;;  %v7319_v45 = vld [vmem:[#allocation5 + $0x24c] sm:$0xf0] }
 0x48b   :  { %11595 = vst [vmem:[#allocation27_spill] sm:$0xff] %v9680_v54  ;;  %v1881_v27 = vadd.f32 %v1880_v59, %v9659_v46  ;;  %v2216_v60 = vadd.f32 %v2215_v7, %v2214_v55  ;;  %v1819_v43 = vadd.f32 %v1818_v44, %v9671_v52  ;;  %v9700_v25 = vadd.f32 %v1570_v4, %v9121_v31  ;;  %v6475_v63 = vld [vmem:[#allocation5 + $0x380] sm:$0xf]  ;;  %v7359_v59 = vld [vmem:[#allocation5 + $0x38c] sm:$0xf0] }
 0x48c   :  { %v11598_v46 = vld [vmem:[#allocation68_spill] sm:$0xff]  ;;  %v2775_v22 = vadd.f32 %v9614_v41, %v2630_v18  ;;  %v2589_v55 = vmul.f32 %v9261_v9, %v9494_v0  ;;  %v9710_v4 = vadd.f32 %v1717_v51, %v9124_v13  ;;  %v6188_v44 = vor.u32 %v7287_v2, %v6187_v23  ;;  %v7315_v52 = vld [vmem:[#allocation5 + $0x22c] sm:$0xf0] }
 0x48d   :  { %4833 = vmatpush.bf16.msrb.mxu1 %v6508_v29  ;;  %v2533_v42 = vmul.f32 %v9602_v56, %v11598_v46  ;;  %v1882_v29 = vadd.f32 %v1881_v27, %v9680_v54  ;;  %v6171_v11 = vld [vmem:[#allocation5 + $0x120] sm:$0xf]  ;;  %v1820_v7 = vadd.f32 %v1819_v43, %v9686_v47  ;;  %v2726_v46 = vadd.f32 %v9303_v15, %v2581_v24 }
 0x48e   :  { %v6299_v34 = vld [vmem:[#allocation5 + $0x220] sm:$0xf]  ;;  %v2783_v18 = vadd.f32 %v9614_v41, %v2638_v50  ;;  %v6316_v54 = vor.u32 %v7319_v45, %v6315_v32  ;;  %v6476_v28 = vor.u32 %v7359_v59, %v6475_v63  ;;  %v2217_v0 = vrot.slane %v2216_v60, 1  ;;  %4811 = vmatpush.bf16.msra.mxu2 %v6188_v44 }
 0x48f   :  { %v1572_v10 = vpop.f32.mrf.mxu1  ;;  %v1883_v27 = vadd.f32 %v1882_v29, %v9694_v3  ;;  %v1821_v43 = vadd.f32 %v1820_v7, %v9700_v25  ;;  %v6172_v51 = vor.u32 %v7283_v16, %v6171_v11  ;;  %v2966_v47 = vmax.f32 %v2838_v37, %v2846_v33  ;;  %v11599_v33 = vld [vmem:[#allocation69_spill] sm:$0xff] }
 0x490   :  { %v1719_v35 = vpop.f32.mrf.mxu0  ;;  %4824 = vmatpush.bf16.msra.mxu3 %v6316_v54  ;;  %v6300_v2 = vor.u32 %v7315_v52, %v6299_v34  ;;  %v9718_v21 = vadd.f32 %v1572_v10, %v9121_v31  ;;  %v2646_v32 = vmul.f32 %v9529_v62, %v9651_v39  ;;  %v2597_v50 = vmul.f32 %v9261_v9, %v9498_v5  ;;  %v9732_v31 = vpop.f32.mrf.mxu2  ;;  %v11600_v34 = vld [vmem:[#allocation12_spill] sm:$0xff] }
 0x491   :  { %4834 = vmatpush.bf16.msrb.mxu1 %v6492_v12  ;;  %v1884_v23 = vadd.f32 %v1883_v27, %v9710_v4  ;;  %v9721_v24 = vadd.f32 %v1719_v35, %v9124_v13  ;;  %v2734_v12 = vadd.f32 %v9303_v15, %v2589_v55  ;;  %v2854_v16 = vmax.f32 %v2726_v46, 0.0  ;;  %v9736_v5 = vpop.f32.mrf.mxu3 }
 0x492   :  { %v2541_v37 = vmul.f32 %v9602_v56, %v11599_v33  ;;  %v2654_v54 = vmul.f32 %v9529_v62, %v9663_v57  ;;  %v1822_v13 = vadd.f32 %v1821_v43, %v9718_v21  ;;  %v2903_v35 = vmax.f32 %v2775_v22, 0.0  ;;  %4812 = vmatpush.bf16.msra.mxu2 %v6172_v51  ;;  %v11605_v33 = vld [vmem:[#allocation32_spill] sm:$0xff] }
 0x493   :  { %v1885_v10 = vadd.f32 %v1884_v23, %v9721_v24  ;;  %v2911_v39 = vmax.f32 %v2783_v18, 0.0  ;;  %v2218_v52 = vadd.f32 %v2217_v0, %v2216_v60  ;;  %v2967_v45 = vmax.f32 %v2966_v47, %v2854_v16  ;;  %v11602_v23 = vld [vmem:[#allocation33_spill] sm:$0xff] }
 0x494   :  { %v2662_v63 = vmul.f32 %v9529_v62, %v9667_v17  ;;  %v2670_v59 = vmul.f32 %v9529_v62, %v2525_v58  ;;  %4825 = vmatpush.bf16.msra.mxu3 %v6300_v2  ;;  %v1823_v57 = vrot.slane %v1822_v13, 4  ;;  %v2605_v11 = vmul.f32 %v9261_v9, %v9504_v14  ;;  %v11601_v14 = vld [vmem:[#allocation85_spill] sm:$0xff] }
 0x495   :  { %4835 = vmatpush.bf16.msrb.mxu1 %v6476_v28  ;;  %v1886_v29 = vrot.slane %v1885_v10, 4  ;;  %v2791_v28 = vadd.f32 %v9614_v41, %v2646_v32  ;;  %v2742_v22 = vadd.f32 %v9303_v15, %v2597_v50  ;;  %v2862_v60 = vmax.f32 %v2734_v12, 0.0  ;;  %v11603_v12 = vld [vmem:[#allocation86_spill] sm:$0xff] }
 0x496   :  { %v2678_v55 = vmul.f32 %v9529_v62, %v2533_v42  ;;  %v9747_v47 = vmul.f32 %v9529_v62, %v2541_v37  ;;  %v1824_v7 = vadd.f32 %v1823_v57, %v1822_v13  ;;  %v2799_v58 = vadd.f32 %v9614_v41, %v2654_v54 }
 0x497   :  { %v1887_v17 = vadd.f32 %v1886_v29, %v1885_v10  ;;  %v3083_v44 = vmax.f32 %v2903_v35, %v2911_v39  ;;  %v2326_v46 = vmul.f32 %v2218_v52, %v11600_v34  ;;  %v2968_v18 = vmax.f32 %v2967_v45, %v2862_v60 }
 0x498   :  { %v2807_v27 = vadd.f32 %v9614_v41, %v2662_v63  ;;  %v9754_v0 = vadd.f32 %v11601_v14, %v9127_v40  ;;  %v1825_v43 = vrot.slane %v1824_v7, 2  ;;  %v2919_v42 = vmax.f32 %v2791_v28, 0.0  ;;  %v11606_v63 = vld [vmem:[#allocation34_spill] sm:$0xff]  ;;  %v1616_v28 = vpop.f32.mrf.mxu2 }
 0x499   :  { %v1888_v51 = vrot.slane %v1887_v17, 2  ;;  %v2613_v2 = vmul.f32 %v9261_v9, %v11602_v23  ;;  %v2750_v32 = vadd.f32 %v9303_v15, %v2605_v11  ;;  %v2870_v50 = vmax.f32 %v2742_v22, 0.0  ;;  %v1665_v60 = vpop.f32.mrf.mxu3 }
 0x49a   :  { %v9761_v16 = vadd.f32 %v11603_v12, %v9131_v61  ;;  %v9765_v37 = vadd.f32 %v11605_v33, %v9127_v40  ;;  %v1826_v54 = vadd.f32 %v1825_v43, %v1824_v7  ;;  %v2815_v10 = vadd.f32 %v9614_v41, %v2670_v59 }
 0x49b   :  { %v1889_v13 = vadd.f32 %v1888_v51, %v1887_v17  ;;  %v3084_v35 = vmax.f32 %v3083_v44, %v2919_v42  ;;  %v9768_v39 = vadd.f32 1e-05, %v2326_v46  ;;  %v2969_v52 = vmax.f32 %v2968_v18, %v2870_v50  ;;  %v7355_v42 = vld [vmem:[#allocation5 + $0x36c] sm:$0xf0] }
 0x49c   :  { %11604 = vst [vmem:[#allocation87_spill] sm:$0xff] %v9761_v16  ;;  %v1836_v45 = vadd.f32 %v9632_v20, %v9754_v0  ;;  %v9774_v57 = vadd.f32 %v11606_v63, %v9131_v61  ;;  %v9778_v29 = vadd.f32 %v9588_v30, %v9127_v40  ;;  %v1827_v11 = vrot.slane %v1826_v54, 1  ;;  %v11609_v50 = vld [vmem:[#allocation13_spill] sm:$0xff] }
 0x49d   :  { %v2927_v22 = vmax.f32 %v2799_v58, 0.0  ;;  %v2621_v59 = vmul.f32 %v9261_v9, %v9526_v26  ;;  %v2758_v7 = vadd.f32 %v9303_v15, %v2613_v2  ;;  %v2878_v17 = vmax.f32 %v2750_v32, 0.0 }
 0x49e   :  { %11607 = vst [vmem:[#allocation88_spill] sm:$0xff] %v9774_v57  ;;  %v1857_v20 = vadd.f32 %v9635_v48, %v9761_v16  ;;  %v1837_v44 = vadd.f32 %v1836_v45, %v9765_v37  ;;  %v1828_v46 = vadd.f32 %v1827_v11, %v1826_v54  ;;  %v1890_v18 = vrot.slane %v1889_v13, 1  ;;  %v6459_v48 = vld [vmem:[#allocation5 + $0x360] sm:$0xf]  ;;  %v11616_v45 = vld [vmem:[#allocation74_spill] sm:$0xff] }
 0x49f   :  { %v2935_v14 = vmax.f32 %v2807_v27, 0.0  ;;  %v3085_v30 = vmax.f32 %v3084_v35, %v2927_v22  ;;  %7595 = vrsqrt.f32 %v9768_v39  ;;  %v2970_v43 = vmax.f32 %v2969_v52, %v2878_v17  ;;  %v11613_v54 = vld [vmem:[#allocation63_spill] sm:$0xff] }
 0x4a0   :  { %v1858_v58 = vadd.f32 %v1857_v20, %v9774_v57  ;;  %v1838_v51 = vadd.f32 %v1837_v44, %v9778_v29  ;;  %v9791_v9 = vadd.f32 %v9599_v19, %v9131_v61  ;;  %v9794_v26 = vmul.f32 %v1828_v46, %v11600_v34  ;;  %v11611_v19 = vld [vmem:[#allocation22_spill] sm:$0xff] }
 0x4a1   :  { %v9798_v27 = vadd.f32 %v9676_v6, %v9127_v40  ;;  %v2766_v23 = vadd.f32 %v9303_v15, %v2621_v59  ;;  %v2886_v2 = vmax.f32 %v2758_v7, 0.0  ;;  %v6460_v32 = vor.u32 %v7355_v42, %v6459_v48 }
 0x4a2   :  { %11608 = vst [vmem:[#allocation67_spill] sm:$0xff] %v9791_v9  ;;  %v9803_v12 = vsub.f32 %v11609_v50, %v9794_v26  ;;  %v9807_v33 = vsub.f32 %v11611_v19, %v9794_v26  ;;  %v9811_v35 = vsub.f32 %v11613_v54, %v9794_v26  ;;  %v1891_v52 = vadd.f32 %v1890_v18, %v1889_v13  ;;  %v1619_v18 = vpop.f32.mrf.mxu2 }
 0x4a3   :  { %v9815_v6 = vadd.f32 %v9682_v49, %v9131_v61  ;;  %v9819_v15 = vadd.f32 %v9732_v31, %v9127_v40  ;;  %v9823_v63 = vsub.f32 %v11616_v45, %v9794_v26  ;;  %v2971_v11 = vmax.f32 %v2970_v43, %v2886_v2  ;;  %4836 = vmatpush.bf16.msrb.mxu1 %v6460_v32 }
 0x4a4   :  { %11610 = vst [vmem:[#allocation68_spill] sm:$0xff] %v9803_v12  ;;  %v3081_v22 = vrot.slane %v9531_v53, 1  ;;  %v2823_v59 = vadd.f32 %v9614_v41, %v2678_v55  ;;  %v3086_v7 = vmax.f32 %v3085_v30, %v2935_v14  ;;  %v1859_v13 = vadd.f32 %v1858_v58, %v9791_v9  ;;  %v1668_v58 = vpop.f32.mrf.mxu3 }
 0x4a5   :  { %11612 = vst [vmem:[#allocation69_spill] sm:$0xff] %v9807_v33  ;;  %v9828_v17 = vpop.eup %7595  ;;  %v1839_v49 = vadd.f32 %v1838_v51, %v9798_v27  ;;  %v9833_v31 = vadd.f32 %v9736_v5, %v9131_v61  ;;  %v9836_v20 = vadd.f32 %v1616_v28, %v9127_v40  ;;  %v2894_v44 = vmax.f32 %v2766_v23, 0.0  ;;  %v11619_v23 = vld [vmem:[#allocation70_spill] sm:$0xff] }
 0x4a6   :  { %11614 = vst [vmem:[#allocation12_spill] sm:$0xff] %v9811_v35  ;;  %v2943_v46 = vmax.f32 %v2815_v10, 0.0  ;;  %v2032_v55 = vmul.f32 %v9803_v12, %v9803_v12  ;;  %v2040_v14 = vmul.f32 %v9807_v33, %v9807_v33  ;;  %v9843_v30 = vmul.f32 %v1891_v52, %v11600_v34 }
 0x4a7   :  { %11615 = vst [vmem:[#allocation85_spill] sm:$0xff] %v9815_v6  ;;  %v9847_v43 = vadd.f32 %v9614_v41, %v9747_v47  ;;  %v1860_v5 = vadd.f32 %v1859_v13, %v9815_v6  ;;  %v1840_v28 = vadd.f32 %v1839_v49, %v9819_v15  ;;  %v2972_v10 = vmax.f32 %v2971_v11, %v2894_v44  ;;  %v11623_v11 = vld [vmem:[#allocation29_spill] sm:$0xff]  ;;  %v11629_v44 = vld [vmem:[#allocation75_spill] sm:$0xff] }
 0x4a8   :  { %11617 = vst [vmem:[#allocation33_spill] sm:$0xff] %v9823_v63  ;;  %v2951_v51 = vmax.f32 %v2823_v59, 0.0  ;;  %v3087_v48 = vmax.f32 %v3086_v7, %v2943_v46  ;;  %v2361_v42 = vmul.f32 %v9828_v17, %v9768_v39  ;;  %v9855_v2 = vsub.f32 %v11619_v23, %v9794_v26  ;;  %v11625_v7 = vld [vmem:[#allocation26_spill] sm:$0xff] }
 0x4a9   :  { %11618 = vst [vmem:[#allocation86_spill] sm:$0xff] %v9833_v31  ;;  %v1861_v32 = vadd.f32 %v1860_v5, %v9833_v31  ;;  %v1841_v47 = vadd.f32 %v1840_v28, %v9836_v20  ;;  %v9860_v50 = vadd.f32 %v1665_v60, %v9131_v61  ;;  %v9863_v19 = vadd.f32 %v1619_v18, %v9127_v40  ;;  %v11627_v60 = vld [vmem:[#allocation64_spill] sm:$0xff] }
 0x4aa   :  { %11620 = vst [vmem:[#allocation32_spill] sm:$0xff] %v9855_v2  ;;  %v9866_v54 = vadd.f32 %v1668_v58, %v9131_v61  ;;  %v2048_v52 = vmul.f32 %v9811_v35, %v9811_v35  ;;  %v2240_v45 = vadd.f32 %v2040_v14, %v2032_v55  ;;  %v9872_v59 = vsub.f32 %v11623_v11, %v9843_v30 }
 0x4ab   :  { %11621 = vst [vmem:[#allocation34_spill] sm:$0xff] %v9860_v50  ;;  %v9876_v13 = vsub.f32 %v11625_v7, %v9843_v30  ;;  %v9880_v49 = vsub.f32 %v11627_v60, %v9843_v30  ;;  %v9884_v46 = vsub.f32 %v11629_v44, %v9843_v30  ;;  %v2973_v18 = vrot.slane %v2972_v10, 4  ;;  %v6155_v44 = vld [vmem:[#allocation5 + $0x100] sm:$0xf] }
 0x4ac   :  { %11622 = vst [vmem:[#allocation13_spill] sm:$0xff] %v9866_v54  ;;  %v9888_v55 = vsub.f32 %v9514_v8, %v9794_v26  ;;  %v2056_v14 = vmul.f32 %v9855_v2, %v9855_v2  ;;  %v2241_v5 = vadd.f32 %v2240_v45, %v2048_v52  ;;  %v9893_v28 = vmax.f32 %v9531_v53, %v3081_v22  ;;  %v1670_v33 = vpop.f32.mrf.mxu3 }
 0x4ad   :  { %11624 = vst [vmem:[#allocation22_spill] sm:$0xff] %v9872_v59  ;;  %v9895_v58 = vmax.f32 %v3087_v48, %v2951_v51  ;;  %v2362_v23 = vmul.f32 %v9828_v17, %v2361_v42  ;;  %v1862_v11 = vadd.f32 %v1861_v32, %v9860_v50  ;;  %v1842_v7 = vadd.f32 %v1841_v47, %v9863_v19  ;;  %v11634_v51 = vld [vmem:[#allocation71_spill] sm:$0xff] }
 0x4ae   :  { %11626 = vst [vmem:[#allocation63_spill] sm:$0xff] %v9876_v13  ;;  %v9902_v60 = vsub.f32 %v9539_v36, %v9794_v26  ;;  %v9906_v8 = vsub.f32 %v9566_v1, %v9794_v26  ;;  %v2064_v53 = vmul.f32 %v9823_v63, %v9823_v63  ;;  %v2242_v22 = vadd.f32 %v2241_v5, %v2056_v14  ;;  %v7279_v14 = vld [vmem:[#allocation5 + $0x10c] sm:$0xf0]  ;;  %v6283_v5 = vld [vmem:[#allocation5 + $0x200] sm:$0xf] }
 0x4af   :  { %11628 = vst [vmem:[#allocation74_spill] sm:$0xff] %v9880_v49  ;;  %v9912_v48 = vsub.f32 %v11634_v51, %v9843_v30  ;;  %v2035_v42 = vmul.f32 %v9872_v59, %v9872_v59  ;;  %v2043_v32 = vmul.f32 %v9876_v13, %v9876_v13  ;;  %v2974_v36 = vmax.f32 %v2972_v10, %v2973_v18  ;;  %v11636_v59 = vld [vmem:[#allocation94_spill] sm:$0xff]  ;;  %v11637_v10 = vld [vmem:[#allocation96_spill] sm:$0xff] }
 0x4b0   :  { %11630 = vst [vmem:[#allocation70_spill] sm:$0xff] %v9884_v46  ;;  %v1863_v47 = vadd.f32 %v1862_v11, %v9866_v54  ;;  %v2072_v1 = vmul.f32 %v9888_v55, %v9888_v55  ;;  %v2243_v52 = vadd.f32 %v2242_v22, %v2064_v53  ;;  %v3182_v45 = vpack.c.bf16 %v9893_v28, %v9893_v28  ;;  %v11639_v11 = vld [vmem:[#allocation97_spill] sm:$0xff]  ;;  %v6443_v22 = vld [vmem:[#allocation5 + $0x340] sm:$0xf] }
 0x4b1   :  { %11631 = vst [vmem:[#allocation29_spill] sm:$0xff] %v9888_v55  ;;  %v9925_v51 = vsub.f32 %v9586_v38, %v9794_v26  ;;  %v9929_v13 = vsub.f32 %v11636_v59, %v9794_v26  ;;  %v9933_v18 = vsub.f32 %v11637_v10, %v9794_v26  ;;  %v9937_v53 = vsub.f32 %v11639_v11, %v9794_v26  ;;  %v7311_v28 = vld [vmem:[#allocation5 + $0x20c] sm:$0xf0]  ;;  %v11641_v59 = vld [vmem:[#allocation35_spill] sm:$0xff]  ;;  %v1621_v10 = vpop.f32.mrf.mxu2 }
 0x4b2   :  { %11632 = vst [vmem:[#allocation26_spill] sm:$0xff] %v9902_v60  ;;  %v7351_v55 = vld [vmem:[#allocation5 + $0x34c] sm:$0xf0]  ;;  %v2080_v63 = vmul.f32 %v9902_v60, %v9902_v60  ;;  %v2088_v38 = vmul.f32 %v9906_v8, %v9906_v8  ;;  %v2244_v2 = vadd.f32 %v2243_v52, %v2072_v1  ;;  %v9945_v35 = vsub.f32 %v11641_v59, %v9843_v30 }
 0x4b3   :  { %11633 = vst [vmem:[#allocation64_spill] sm:$0xff] %v9906_v8  ;;  %v2051_v11 = vmul.f32 %v9880_v49, %v9880_v49  ;;  %v2059_v12 = vmul.f32 %v9912_v48, %v9912_v48  ;;  %v2303_v54 = vadd.f32 %v2043_v32, %v2035_v42  ;;  %v2975_v50 = vrot.slane %v2974_v36, 2 }
 0x4b4   :  { %11635 = vst [vmem:[#allocation75_spill] sm:$0xff] %v9912_v48  ;;  %v2245_v31 = vadd.f32 %v2244_v2, %v2080_v63  ;;  %v6156_v60 = vor.u32 %v7279_v14, %v6155_v44  ;;  %v6284_v6 = vor.u32 %v7311_v28, %v6283_v5  ;;  %v6444_v9 = vor.u32 %v7351_v55, %v6443_v22  ;;  %v11647_v14 = vld [vmem:[#allocation31_spill] sm:$0xff] }
 0x4b5   :  { %11638 = vst [vmem:[#allocation71_spill] sm:$0xff] %v9933_v18  ;;  %v2304_v8 = vadd.f32 %v2303_v54, %v2051_v11  ;;  %v2976_v1 = vmax.f32 %v2974_v36, %v2975_v50  ;;  %v9952_v52 = vadd.f32 %v1621_v10, %v9127_v40  ;;  %v9955_v59 = vadd.f32 %v1670_v33, %v9131_v61  ;;  %v11643_v54 = vld [vmem:[#allocation38_spill] sm:$0xff] }
 0x4b6   :  { %11640 = vst [vmem:[#allocation94_spill] sm:$0xff] %v9937_v53  ;;  %v2363_v57 = vmul.f32 0.5, %v2362_v23  ;;  %v2096_v49 = vmul.f32 %v9925_v51, %v9925_v51  ;;  %v2246_v16 = vadd.f32 %v2245_v31, %v2088_v38  ;;  %v2067_v42 = vmul.f32 %v9884_v46, %v9884_v46  ;;  %4813 = vmatpush.bf16.msra.mxu2 %v6156_v60  ;;  %v11649_v38 = vld [vmem:[#allocation90_spill] sm:$0xff]  ;;  %v11682_v46 = vld [vmem:[#allocation41_spill] sm:$0xff] }
 0x4b7   :  { %11642 = vst [vmem:[#allocation96_spill] sm:$0xff] %v9945_v35  ;;  %4826 = vmatpush.bf16.msra.mxu3 %v6284_v6  ;;  %v2305_v63 = vadd.f32 %v2304_v8, %v2059_v12  ;;  %v2977_v2 = vrot.slane %v2976_v1, 1  ;;  %4837 = vmatpush.bf16.msrb.mxu1 %v6444_v9  ;;  %v1843_v50 = vadd.f32 %v1842_v7, %v9952_v52  ;;  %v11645_v9 = vld [vmem:[#allocation20_spill] sm:$0xff]  ;;  %vm2367_vm2 = vweird.f32 %v9828_v17 }
 0x4b8   :  { %v1864_v40 = vadd.f32 %v1863_v47, %v9955_v59  ;;  %v2104_v61 = vmul.f32 %v9929_v13, %v9929_v13  ;;  %v2247_v33 = vadd.f32 %v2246_v16, %v2096_v49  ;;  %v9967_v55 = vsub.f32 %v11643_v54, %v9843_v30 }
 0x4b9   :  { %v2075_v31 = vmul.f32 %v9945_v35, %v9945_v35  ;;  %v2306_v23 = vadd.f32 %v2305_v63, %v2067_v42  ;;  %v2978_v6 = vmax.f32 %v2976_v1, %v2977_v2  ;;  %v1844_v12 = vrot.slane %v1843_v50, 4 }
 0x4ba   :  { %11644 = vst [vmem:[#allocation97_spill] sm:$0xff] %v9967_v55  ;;  %v1865_v60 = vrot.slane %v1864_v40, 4  ;;  %v9973_v7 = vsub.f32 %v11645_v9, %v9794_v26  ;;  %v2112_v8 = vmul.f32 %v9933_v18, %v9933_v18  ;;  %v2248_v32 = vadd.f32 %v2247_v33, %v2104_v61 }
 0x4bb   :  { %v3480_v16 = vunpack.c.l.b16 %v3182_v45  ;;  %v2307_v49 = vadd.f32 %v2306_v23, %v2075_v31  ;;  %v3174_v36 = vpack.c.bf16 %v2978_v6, %v2978_v6  ;;  %v1845_v47 = vadd.f32 %v1844_v12, %v1843_v50 }
 0x4bc   :  { %11646 = vst [vmem:[#allocation35_spill] sm:$0xff] %v9973_v7  ;;  %v1866_v44 = vadd.f32 %v1865_v60, %v1864_v40  ;;  %v9979_v5 = vsub.f32 %v11647_v14, %v9794_v26  ;;  %v2120_v28 = vmul.f32 %v9937_v53, %v9937_v53  ;;  %v2249_v22 = vadd.f32 %v2248_v32, %v2112_v8  ;;  %v11654_v60 = vld [vmem:[#allocation93_spill] sm:$0xff] }
 0x4bd   :  { %v9985_v10 = vsub.f32 %v11649_v38, %v9843_v30  ;;  %v2083_v45 = vmul.f32 %v9967_v55, %v9967_v55  ;;  %v3472_v11 = vunpack.c.l.b16 %v3174_v36  ;;  %v1846_v1 = vrot.slane %v1845_v47, 2  ;;  %v11657_v38 = vld [vmem:[#allocation95_spill] sm:$0xff] }
 0x4be   :  { %11648 = vst [vmem:[#allocation38_spill] sm:$0xff] %v9979_v5  ;;  %v9991_v42 = vsub.f32 %v9700_v25, %v9794_v26  ;;  %v2128_v63 = vmul.f32 %v9973_v7, %v9973_v7  ;;  %v2250_v2 = vadd.f32 %v2249_v22, %v2120_v28  ;;  %v1867_v50 = vrot.slane %v1866_v44, 2  ;;  %v11656_v28 = vld [vmem:[#allocation53_spill] sm:$0xff] }
 0x4bf   :  { %11650 = vst [vmem:[#allocation20_spill] sm:$0xff] %v9985_v10  ;;  %v2364_v40 = vsub.f32 1.5, %v2363_v57  ;;  %v2308_v61 = vadd.f32 %v2307_v49, %v2083_v45  ;;  %v3489_v33 = vsel %vm3488_vm1, %v3480_v16, %v3472_v11  ;;  %v1847_v54 = vadd.f32 %v1846_v1, %v1845_v47  ;;  %v11659_v11 = vld [vmem:[#allocation54_spill] sm:$0xff] }
 0x4c0   :  { %11651 = vst [vmem:[#allocation31_spill] sm:$0xff] %v9991_v42  ;;  %v9998_v31 = vsub.f32 %v9718_v21, %v9794_v26  ;;  %v2136_v23 = vmul.f32 %v9979_v5, %v9979_v5  ;;  %v2251_v6 = vadd.f32 %v2250_v2, %v2128_v63  ;;  %v10002_v25 = vpack.c.b16 %v3489_v33, %v3489_v33  ;;  %v11693_v5 = vld [vmem:[#allocation66_spill] sm:$0xff] }
 0x4c1   :  { %v2959_v12 = vmax.f32 %v9847_v43, 0.0  ;;  %v10007_v9 = vsub.f32 %v11654_v60, %v9843_v30  ;;  %v2091_v57 = vmul.f32 %v9985_v10, %v9985_v10  ;;  %v1848_v8 = vrot.slane %v1847_v54, 1 }
 0x4c2   :  { %11652 = vst [vmem:[#allocation90_spill] sm:$0xff] %v9998_v31  ;;  %v2144_v21 = vmul.f32 %v9991_v42, %v9991_v42  ;;  %v2252_v26 = vadd.f32 %v2251_v6, %v2136_v23  ;;  %4801 = vmatmul.bf16.vlgmr.msra.gmra.mxu1 %v10002_v25  ;;  %v1868_v32 = vadd.f32 %v1867_v50, %v1866_v44  ;;  %vm2366_vm3 = vweird.f32 %v9768_v39  ;;  %v11664_v6 = vld [vmem:[#allocation55_spill] sm:$0xff]  ;;  %v11691_v42 = vld [vmem:[#allocation36_spill] sm:$0xff] }
 0x4c3   :  { %11653 = vst [vmem:[#allocation98_spill] sm:$0xff] %v10002_v25  ;;  %v3089_v16 = vmax.f32 %v9895_v58, %v2959_v12  ;;  %v2309_v49 = vadd.f32 %v2308_v61, %v2091_v57  ;;  %v1849_v36 = vadd.f32 %v1848_v8, %v1847_v54  ;;  %v2365_v43 = vmul.f32 %v9828_v17, %v2364_v40  ;;  %vm2368_vm4 = vmor %vm2366_vm3, %vm2367_vm2  ;;  %v11660_v61 = vld [vmem:[#allocation60_spill] sm:$0xff]  ;;  %v11662_v54 = vld [vmem:[#allocation65_spill] sm:$0xff] }
 0x4c4   :  { %11655 = vst [vmem:[#allocation93_spill] sm:$0xff] %v10007_v9  ;;  %v2152_v47 = vmul.f32 %v9998_v31, %v9998_v31  ;;  %v2253_v14 = vadd.f32 %v2252_v26, %v2144_v21  ;;  %v10021_v22 = vmul.f32 %v9602_v56, %v11656_v28  ;;  %v10025_v45 = vsub.f32 %v11657_v38, %v9843_v30  ;;  %v11665_v57 = vld [vmem:[#allocation76_spill] sm:$0xff] }
 0x4c5   :  { %v2099_v58 = vmul.f32 %v10007_v9, %v10007_v9  ;;  %v10030_v44 = vmul.f32 %v1849_v36, %v11600_v34  ;;  %v10034_v1 = vmul.f32 %v9602_v56, %v11659_v11  ;;  %v1869_v2 = vrot.slane %v1868_v32, 1  ;;  %v11667_v21 = vld [vmem:[#allocation56_spill] sm:$0xff] }
 0x4c6   :  { %11658 = vst [vmem:[#allocation53_spill] sm:$0xff] %v10025_v45  ;;  %v2254_v63 = vadd.f32 %v2253_v14, %v2152_v47  ;;  %v3090_v50 = vrot.slane %v3089_v16, 4  ;;  %v10047_v12 = vmul.f32 %v9602_v56, %v11664_v6  ;;  %v10050_v60 = vsel %vm2368_vm4, %v9828_v17, %v2365_v43  ;;  %v11669_v47 = vld [vmem:[#allocation18_spill] sm:$0xff] }
 0x4c7   :  { %v2310_v40 = vadd.f32 %v2309_v49, %v2099_v58  ;;  %v10039_v33 = vsub.f32 %v11660_v61, %v10030_v44  ;;  %v10043_v23 = vsub.f32 %v11662_v54, %v10030_v44  ;;  %v10054_v8 = vsub.f32 %v11665_v57, %v10030_v44  ;;  %v11668_v49 = vld [vmem:[#allocation57_spill] sm:$0xff]  ;;  %v11671_v43 = vld [vmem:[#allocation58_spill] sm:$0xff]  ;;  %v11672_v58 = vld [vmem:[#allocation28_spill] sm:$0xff] }
 0x4c8   :  { %v2255_v39 = vrot.slane %v2254_v63, 4  ;;  %v10058_v26 = vmul.f32 %v9602_v56, %v11667_v21  ;;  %v10062_v36 = vmul.f32 %v9602_v56, %v11668_v49  ;;  %v10066_v14 = vsub.f32 %v11669_v47, %v9843_v30  ;;  %v11674_v6 = vld [vmem:[#allocation82_spill] sm:$0xff]  ;;  %v10085_v21 = vld [vmem:[%s11222_s11] sm:$0xff] }
 0x4c9   :  { %11661 = vst [vmem:[#allocation95_spill] sm:$0xff] %v10039_v33  ;;  %v2107_v17 = vmul.f32 %v10025_v45, %v10025_v45  ;;  %v10072_v28 = vmul.f32 %v9602_v56, %v11671_v43  ;;  %v10076_v11 = vsub.f32 %v11672_v58, %v10030_v44  ;;  %v1870_v61 = vadd.f32 %v1869_v2, %v1868_v32  ;;  %v11676_v43 = vld [vmem:[#allocation21_spill] sm:$0xff]  ;;  %v11677_v58 = vld [vmem:[#allocation83_spill] sm:$0xff]  ;;  %v11683_v45 = vld [vmem:[#allocation50_spill] sm:$0xff] }
 0x4ca   :  { %11663 = vst [vmem:[#allocation54_spill] sm:$0xff] %v10043_v23  ;;  %v2256_v38 = vadd.f32 %v2255_v39, %v2254_v63  ;;  %v10078_v54 = vmax.f32 %v3089_v16, %v3090_v50  ;;  %v2486_v57 = vmul.f32 %v10050_v60, %v11674_v6  ;;  %v10088_v49 = vperm.slane %v10085_v21, 2  ;;  %v11675_v63 = vld [vmem:[#allocation59_spill] sm:$0xff] }
 0x4cb   :  { %11666 = vst [vmem:[#allocation60_spill] sm:$0xff] %v10054_v8  ;;  %v2311_v47 = vadd.f32 %v2310_v40, %v2107_v17  ;;  %v10092_v39 = vmul.f32 %v9602_v56, %v11675_v63  ;;  %v10096_v32 = vmul.f32 %v9602_v56, %v11676_v43  ;;  %v10101_v16 = vld [vmem:[%s11223_s12] sm:$0xff]  ;;  %v2494_v40 = vmul.f32 %v10050_v60, %v11677_v58 }
 0x4cc   :  { %11670 = vst [vmem:[#allocation65_spill] sm:$0xff] %v10066_v14  ;;  %v10104_v2 = vperm.slane %v10101_v16, 2  ;;  %v2257_v50 = vrot.slane %v2256_v38, 2  ;;  %v11678_v17 = vld [vmem:[#allocation84_spill] sm:$0xff]  ;;  %v11679_v63 = vld [vmem:[#allocation19_spill] sm:$0xff]  ;;  %v2115_v56 = vmul.f32 %v10066_v14, %v10066_v14  ;;  %v2033_v55 = vmul.f32 %v10039_v33, %v10039_v33 }
 0x4cd   :  { %11673 = vst [vmem:[#allocation55_spill] sm:$0xff] %v10076_v11  ;;  %v2502_v6 = vmul.f32 %v10050_v60, %v11678_v17  ;;  %v10112_v25 = vsub.f32 %v11679_v63, %v9843_v30  ;;  %v11681_v43 = vld [vmem:[#allocation40_spill] sm:$0xff]  ;;  %v2041_v35 = vmul.f32 %v10076_v11, %v10076_v11  ;;  %v10123_v58 = vmul.f32 %v1870_v61, %v11600_v34  ;;  %v11684_v33 = vld [vmem:[#allocation51_spill] sm:$0xff] }
 0x4ce   :  { %v2510_v10 = vmul.f32 %v10050_v60, %v11681_v43  ;;  %v10128_v63 = vmul.f32 %v10050_v60, %v11682_v46  ;;  %v2631_v48 = vmul.f32 %v10088_v49, %v2486_v57  ;;  %v2312_v14 = vadd.f32 %v2311_v47, %v2115_v56  ;;  %v11685_v61 = vld [vmem:[#allocation72_spill] sm:$0xff]  ;;  %v11687_v57 = vld [vmem:[#allocation27_spill] sm:$0xff] }
 0x4cf   :  { %11680 = vst [vmem:[#allocation76_spill] sm:$0xff] %v10112_v25  ;;  %v10133_v43 = vmul.f32 %v10050_v60, %v11683_v45  ;;  %v10137_v9 = vmul.f32 %v10050_v60, %v11684_v33  ;;  %v2258_v11 = vadd.f32 %v2257_v50, %v2256_v38  ;;  %v10141_v31 = vsub.f32 %v11685_v61, %v10030_v44  ;;  %v11689_v50 = vld [vmem:[#allocation61_spill] sm:$0xff] }
 0x4d0   :  { %v2639_v17 = vmul.f32 %v10088_v49, %v2494_v40  ;;  %v2647_v46 = vmul.f32 %v10088_v49, %v2502_v6  ;;  %v10147_v47 = vsub.f32 %v11687_v57, %v9843_v30  ;;  %v2123_v45 = vmul.f32 %v10112_v25, %v10112_v25 }
 0x4d1   :  { %11686 = vst [vmem:[#allocation56_spill] sm:$0xff] %v10141_v31  ;;  %v2655_v56 = vmul.f32 %v10088_v49, %v2510_v10  ;;  %v2049_v33 = vmul.f32 %v10043_v23, %v10043_v23  ;;  %v2261_v38 = vadd.f32 %v2041_v35, %v2033_v55  ;;  %v10156_v61 = vsub.f32 %v11689_v50, %v10123_v58  ;;  %v11695_v55 = vld [vmem:[#allocation77_spill] sm:$0xff] }
 0x4d2   :  { %11688 = vst [vmem:[#allocation57_spill] sm:$0xff] %v10147_v47  ;;  %v2776_v40 = vadd.f32 %v10104_v2, %v2631_v48  ;;  %v2313_v6 = vadd.f32 %v2312_v14, %v2123_v45  ;;  %v10161_v57 = vsub.f32 %v11691_v42, %v10030_v44  ;;  %v10165_v25 = vsub.f32 %v11693_v5, %v10123_v58  ;;  %v11697_v45 = vld [vmem:[#allocation39_spill] sm:$0xff] }
 0x4d3   :  { %11690 = vst [vmem:[#allocation18_spill] sm:$0xff] %v10156_v61  ;;  %v2259_v10 = vrot.slane %v2258_v11, 1  ;;  %v2057_v23 = vmul.f32 %v10141_v31, %v10141_v31  ;;  %v2262_v35 = vadd.f32 %v2261_v38, %v2049_v33  ;;  %v10171_v50 = vsub.f32 %v11695_v55, %v10123_v58 }
 0x4d4   :  { %11692 = vst [vmem:[#allocation58_spill] sm:$0xff] %v10161_v57  ;;  %v10175_v48 = vsub.f32 %v9694_v3, %v9843_v30  ;;  %v2131_v42 = vmul.f32 %v10147_v47, %v10147_v47  ;;  %v2566_v5 = vmul.f32 %v9529_v62, %v10021_v22  ;;  %v2574_v14 = vmul.f32 %v9529_v62, %v10034_v1  ;;  %v11699_v3 = vld [vmem:[#allocation62_spill] sm:$0xff] }
 0x4d5   :  { %11694 = vst [vmem:[#allocation28_spill] sm:$0xff] %v10165_v25  ;;  %v10185_v33 = vsub.f32 %v11697_v45, %v10030_v44  ;;  %v2065_v38 = vmul.f32 %v10054_v8, %v10054_v8  ;;  %v2263_v55 = vadd.f32 %v2262_v35, %v2057_v23  ;;  %v10191_v31 = vsub.f32 %v11699_v3, %v10123_v58  ;;  %v11701_v45 = vld [vmem:[#allocation91_spill] sm:$0xff] }
 0x4d6   :  { %11696 = vst [vmem:[#allocation82_spill] sm:$0xff] %v10171_v50  ;;  %v2784_v47 = vadd.f32 %v10104_v2, %v2639_v17  ;;  %v2792_v7 = vadd.f32 %v10104_v2, %v2647_v46  ;;  %v10197_v22 = vsub.f32 %v9710_v4, %v9843_v30  ;;  %v2314_v1 = vadd.f32 %v2313_v6, %v2131_v42 }
 0x4d7   :  { %11698 = vst [vmem:[#allocation59_spill] sm:$0xff] %v10185_v33  ;;  %v2260_v53 = vadd.f32 %v2259_v10, %v2258_v11  ;;  %v10201_v18 = vsub.f32 %v11701_v45, %v10030_v44  ;;  %v2073_v23 = vmul.f32 %v10161_v57, %v10161_v57  ;;  %v2264_v35 = vadd.f32 %v2263_v55, %v2065_v38 }
 0x4d8   :  { %11700 = vst [vmem:[#allocation21_spill] sm:$0xff] %v10191_v31  ;;  %v2139_v3 = vmul.f32 %v10175_v48, %v10175_v48  ;;  %v10209_v17 = vsub.f32 %v9754_v0, %v10030_v44  ;;  %v2711_v4 = vadd.f32 %v9614_v41, %v2566_v5  ;;  %v2719_v46 = vadd.f32 %v9614_v41, %v2574_v14 }
 0x4d9   :  { %11702 = vst [vmem:[#allocation83_spill] sm:$0xff] %v10201_v18  ;;  %v2081_v11 = vmul.f32 %v10185_v33, %v10185_v33  ;;  %v2265_v6 = vadd.f32 %v2264_v35, %v2073_v23  ;;  %v2034_v10 = vmul.f32 %v10156_v61, %v10156_v61  ;;  %v2042_v42 = vmul.f32 %v10191_v31, %v10191_v31 }
 0x4da   :  { %v2904_v38 = vmax.f32 %v2776_v40, 0.0  ;;  %v2912_v55 = vmax.f32 %v2784_v47, 0.0  ;;  %v2315_v45 = vadd.f32 %v2314_v1, %v2139_v3  ;;  %v2582_v0 = vmul.f32 %v9529_v62, %v10047_v12 }
 0x4db   :  { %v2328_v5 = vmul.f32 %v2260_v53, %v11600_v34  ;;  %v10224_v14 = vsub.f32 %v9721_v24, %v9843_v30  ;;  %v2089_v23 = vmul.f32 %v10201_v18, %v10201_v18  ;;  %v2266_v35 = vadd.f32 %v2265_v6, %v2081_v11  ;;  %v11703_v11 = vld [vmem:[#allocation73_spill] sm:$0xff] }
 0x4dc   :  { %v2147_v61 = vmul.f32 %v10197_v22, %v10197_v22  ;;  %v2590_v47 = vmul.f32 %v9529_v62, %v10058_v26  ;;  %v2839_v40 = vmax.f32 %v2711_v4, 0.0  ;;  %v2847_v1 = vmax.f32 %v2719_v46, 0.0 }
 0x4dd   :  { %v10234_v12 = vsub.f32 %v9765_v37, %v10030_v44  ;;  %v2097_v24 = vmul.f32 %v10209_v17, %v10209_v17  ;;  %v2267_v30 = vadd.f32 %v2266_v35, %v2089_v23  ;;  %v2282_v53 = vadd.f32 %v2042_v42, %v2034_v10 }
 0x4de   :  { %v2316_v3 = vadd.f32 %v2315_v45, %v2147_v61  ;;  %v10240_v6 = vsub.f32 %v11703_v11, %v10123_v58  ;;  %v2050_v31 = vmul.f32 %v10165_v25, %v10165_v25  ;;  %v2727_v26 = vadd.f32 %v9614_v41, %v2582_v0 }
 0x4df   :  { %v2663_v4 = vmul.f32 %v10088_v49, %v10128_v63  ;;  %v3096_v37 = vmax.f32 %v2904_v38, %v2912_v55  ;;  %v10247_v46 = vadd.f32 1e-05, %v2328_v5  ;;  %v2268_v18 = vadd.f32 %v2267_v30, %v2097_v24 }
 0x4e0   :  { %11704 = vst [vmem:[#allocation84_spill] sm:$0xff] %v10240_v6  ;;  %v2800_v23 = vadd.f32 %v10104_v2, %v2655_v56  ;;  %v2155_v61 = vmul.f32 %v10224_v14, %v10224_v14  ;;  %v2283_v10 = vadd.f32 %v2282_v53, %v2050_v31  ;;  %v2979_v42 = vmax.f32 %v2839_v40, %v2847_v1 }
 0x4e1   :  { %v2920_v45 = vmax.f32 %v2792_v7, 0.0  ;;  %v10254_v35 = vsub.f32 %v9778_v29, %v10030_v44  ;;  %v2105_v0 = vmul.f32 %v10234_v12, %v10234_v12  ;;  %v2598_v63 = vmul.f32 %v9529_v62, %v10062_v36 }
 0x4e2   :  { %v2317_v38 = vadd.f32 %v2316_v3, %v2155_v61  ;;  %v2058_v56 = vmul.f32 %v10240_v6, %v10240_v6  ;;  %v2735_v55 = vadd.f32 %v9614_v41, %v2590_v47  ;;  %v2855_v5 = vmax.f32 %v2727_v26, 0.0 }
 0x4e3   :  { %v2671_v7 = vmul.f32 %v10088_v49, %v10133_v43  ;;  %v3097_v31 = vmax.f32 %v3096_v37, %v2920_v45  ;;  %7597 = vrsqrt.f32 %v10247_v46  ;;  %v2269_v29 = vadd.f32 %v2268_v18, %v2105_v0  ;;  %v11705_v18 = vld [vmem:[#allocation37_spill] sm:$0xff]  ;;  %v11707_v37 = vld [vmem:[#allocation52_spill] sm:$0xff] }
 0x4e4   :  { %v2808_v40 = vadd.f32 %v10104_v2, %v2663_v4  ;;  %v2928_v1 = vmax.f32 %v2800_v23, 0.0  ;;  %v2284_v24 = vadd.f32 %v2283_v10, %v2058_v56  ;;  %v2980_v30 = vmax.f32 %v2979_v42, %v2855_v5 }
 0x4e5   :  { %v10269_v36 = vsub.f32 %v9798_v27, %v10030_v44  ;;  %v2113_v47 = vmul.f32 %v10254_v35, %v10254_v35  ;;  %v2606_v53 = vmul.f32 %v9529_v62, %v10072_v28  ;;  %v2743_v43 = vadd.f32 %v9614_v41, %v2598_v63 }
 0x4e6   :  { %v2318_v3 = vrot.slane %v2317_v38, 4  ;;  %v10278_v11 = vsub.f32 %v11705_v18, %v10123_v58  ;;  %v2066_v26 = vmul.f32 %v10171_v50, %v10171_v50  ;;  %v2863_v4 = vmax.f32 %v2735_v55, 0.0 }
 0x4e7   :  { %v2542_v27 = vmul.f32 %v10050_v60, %v11707_v37  ;;  %v2679_v23 = vmul.f32 %v10088_v49, %v10137_v9  ;;  %v3098_v61 = vmax.f32 %v3097_v31, %v2928_v1  ;;  %v2270_v10 = vadd.f32 %v2269_v29, %v2113_v47 }
 0x4e8   :  { %11706 = vst [vmem:[#allocation19_spill] sm:$0xff] %v10278_v11  ;;  %v2816_v28 = vadd.f32 %v10104_v2, %v2671_v7  ;;  %v2936_v42 = vmax.f32 %v2808_v40, 0.0  ;;  %v2285_v45 = vadd.f32 %v2284_v24, %v2066_v26  ;;  %v2981_v0 = vmax.f32 %v2980_v30, %v2863_v4  ;;  %v11708_v7 = vld [vmem:[#allocation89_spill] sm:$0xff] }
 0x4e9   :  { %v10287_v63 = vpop.eup %7597  ;;  %v10291_v56 = vsub.f32 %v9819_v15, %v10030_v44  ;;  %v2121_v55 = vmul.f32 %v10269_v36, %v10269_v36  ;;  %v2614_v5 = vmul.f32 %v9529_v62, %v10092_v39  ;;  %v2751_v9 = vadd.f32 %v9614_v41, %v2606_v53 }
 0x4ea   :  { %v2319_v31 = vadd.f32 %v2318_v3, %v2317_v38  ;;  %v10300_v29 = vsub.f32 %v11708_v7, %v10123_v58  ;;  %v2074_v40 = vmul.f32 %v10278_v11, %v10278_v11  ;;  %v2871_v1 = vmax.f32 %v2743_v43, 0.0 }
 0x4eb   :  { %v2687_v15 = vmul.f32 %v10088_v49, %v2542_v27  ;;  %v2824_v24 = vadd.f32 %v10104_v2, %v2679_v23  ;;  %v3099_v30 = vmax.f32 %v3098_v61, %v2936_v42  ;;  %v2271_v47 = vadd.f32 %v2270_v10, %v2121_v55  ;;  %v11710_v27 = vld [vmem:[#allocation92_spill] sm:$0xff] }
 0x4ec   :  { %11709 = vst [vmem:[#allocation40_spill] sm:$0xff] %v10300_v29  ;;  %v2944_v18 = vmax.f32 %v2816_v28, 0.0  ;;  %v2381_v39 = vmul.f32 %v10287_v63, %v10247_v46  ;;  %v2286_v53 = vadd.f32 %v2285_v45, %v2074_v40  ;;  %v2982_v38 = vmax.f32 %v2981_v0, %v2871_v1  ;;  %v11713_v1 = vld [vmem:[#allocation87_spill] sm:$0xff] }
 0x4ed   :  { %v10310_v3 = vsub.f32 %v9836_v20, %v10030_v44  ;;  %v2129_v26 = vmul.f32 %v10291_v56, %v10291_v56  ;;  %v2622_v43 = vmul.f32 %v9529_v62, %v10096_v32  ;;  %v2759_v4 = vadd.f32 %v9614_v41, %v2614_v5 }
 0x4ee   :  { %v2320_v37 = vrot.slane %v2319_v31, 2  ;;  %v10319_v23 = vsub.f32 %v11710_v27, %v10123_v58  ;;  %v2082_v61 = vmul.f32 %v10300_v29, %v10300_v29  ;;  %v2879_v10 = vmax.f32 %v2751_v9, 0.0  ;;  %v11717_v27 = vld [vmem:[#allocation23_spill] sm:$0xff]  ;;  %v11724_v29 = vld [vmem:[#allocation16_spill] sm:$0xff] }
 0x4ef   :  { %v11712_v20 = vrot.slane %v10078_v54, 2  ;;  %v3100_v42 = vmax.f32 %v3099_v30, %v2944_v18  ;;  %v2272_v45 = vadd.f32 %v2271_v47, %v2129_v26  ;;  %v2832_v62 = vadd.f32 %v10104_v2, %v2687_v15  ;;  %v11714_v18 = vld [vmem:[#allocation42_spill] sm:$0xff] }
 0x4f0   :  { %11711 = vst [vmem:[#allocation41_spill] sm:$0xff] %v10319_v23  ;;  %v2382_v32 = vmul.f32 %v10287_v63, %v2381_v39  ;;  %v2287_v0 = vadd.f32 %v2286_v53, %v2082_v61  ;;  %v2983_v55 = vmax.f32 %v2982_v38, %v2879_v10  ;;  %v2952_v5 = vmax.f32 %v2824_v24, 0.0  ;;  %v11715_v24 = vld [vmem:[#allocation78_spill] sm:$0xff] }
 0x4f1   :  { %v10326_v28 = vmax.f32 %v10078_v54, %v11712_v20  ;;  %v10332_v7 = vsub.f32 %v9863_v19, %v10030_v44  ;;  %v2137_v9 = vmul.f32 %v10310_v3, %v10310_v3  ;;  %v2767_v40 = vadd.f32 %v9614_v41, %v2622_v43  ;;  %v11716_v19 = vld [vmem:[#allocation43_spill] sm:$0xff] }
 0x4f2   :  { %v2321_v54 = vadd.f32 %v2320_v37, %v2319_v31  ;;  %v10339_v30 = vsub.f32 %v11713_v1, %v10123_v58  ;;  %v2090_v15 = vmul.f32 %v10319_v23, %v10319_v23  ;;  %v2887_v47 = vmax.f32 %v2759_v4, 0.0  ;;  %v11723_v23 = vld [vmem:[#allocation15_spill] sm:$0xff] }
 0x4f3   :  { %v10345_v39 = vmul.f32 %v11715_v24, %v11714_v18  ;;  %v10349_v53 = vmul.f32 %v11715_v24, %v11716_v19  ;;  %v3101_v38 = vmax.f32 %v3100_v42, %v2952_v5  ;;  %v2273_v26 = vadd.f32 %v2272_v45, %v2137_v9  ;;  %v11718_v42 = vld [vmem:[#allocation88_spill] sm:$0xff] }
 0x4f4   :  { %v2383_v31 = vmul.f32 0.5, %v2382_v32  ;;  %v2288_v43 = vadd.f32 %v2287_v0, %v2090_v15  ;;  %v2984_v37 = vmax.f32 %v2983_v55, %v2887_v47  ;;  %v2422_v61 = vmul.f32 %v10050_v60, %v11717_v27  ;;  %v11719_v55 = vld [vmem:[#allocation24_spill] sm:$0xff]  ;;  %v11721_v15 = vld [vmem:[#allocation30_spill] sm:$0xff] }
 0x4f5   :  { %v2960_v10 = vmax.f32 %v2832_v62, 0.0  ;;  %v10356_v4 = vsub.f32 %v9952_v52, %v10030_v44  ;;  %v2145_v20 = vmul.f32 %v10332_v7, %v10332_v7  ;;  %v2322_v1 = vrot.slane %v2321_v54, 1  ;;  %v11720_v62 = vld [vmem:[#allocation25_spill] sm:$0xff] }
 0x4f6   :  { %v10362_v45 = vsub.f32 %v11718_v42, %v10123_v58  ;;  %v2098_v32 = vmul.f32 %v10339_v30, %v10339_v30  ;;  %v2895_v0 = vmax.f32 %v2767_v40, 0.0  ;;  %v2430_v5 = vmul.f32 %v10050_v60, %v11719_v55  ;;  %v11722_v42 = vld [vmem:[#allocation14_spill] sm:$0xff] }
 0x4f7   :  { %v2438_v9 = vmul.f32 %v10050_v60, %v11720_v62  ;;  %v10370_v52 = vmax.f32 %v3101_v38, %v2960_v10  ;;  %v2274_v44 = vadd.f32 %v2273_v26, %v2145_v20  ;;  %v2446_v47 = vmul.f32 %v10050_v60, %v11721_v15  ;;  %v11725_v10 = vld [vmem:[#allocation17_spill] sm:$0xff] }
 0x4f8   :  { %v2384_v18 = vsub.f32 1.5, %v2383_v31  ;;  %v2289_v19 = vadd.f32 %v2288_v43, %v2098_v32  ;;  %v2985_v27 = vmax.f32 %v2984_v37, %v2895_v0  ;;  %v2454_v41 = vmul.f32 %v10050_v60, %v11722_v42  ;;  %v11726_v31 = vld [vmem:[#allocation67_spill] sm:$0xff] }
 0x4f9   :  { %v2462_v40 = vmul.f32 %v10050_v60, %v11723_v23  ;;  %v2470_v55 = vmul.f32 %v10050_v60, %v11724_v29  ;;  %v2153_v38 = vmul.f32 %v10356_v4, %v10356_v4  ;;  %v2478_v26 = vmul.f32 %v10050_v60, %v11725_v10  ;;  %v11728_v10 = vld [vmem:[#allocation86_spill] sm:$0xff] }
 0x4fa   :  { %v2323_v20 = vadd.f32 %v2322_v1, %v2321_v54  ;;  %v10386_v43 = vsub.f32 %v11726_v31, %v10123_v58  ;;  %v2106_v37 = vmul.f32 %v10362_v45, %v10362_v45  ;;  %vm2387_vm5 = vweird.f32 %v10287_v63  ;;  %v11727_v1 = vld [vmem:[#allocation85_spill] sm:$0xff] }
 0x4fb   :  { %v2275_v23 = vadd.f32 %v2274_v44, %v2153_v38  ;;  %v2567_v29 = vmul.f32 %v10088_v49, %v2422_v61  ;;  %v2385_v0 = vmul.f32 %v10287_v63, %v2384_v18  ;;  %v2986_v15 = vrot.slane %v2985_v27, 4  ;;  %v11729_v44 = vld [vmem:[#allocation34_spill] sm:$0xff] }
 0x4fc   :  { %v2290_v62 = vadd.f32 %v2289_v19, %v2106_v37  ;;  %v2575_v60 = vmul.f32 %v10088_v49, %v2430_v5  ;;  %v10396_v54 = vperm.slane %v10085_v21, 4  ;;  %v10400_v42 = vsub.f32 %v11727_v1, %v10123_v58  ;;  %v11731_v37 = vld [vmem:[#allocation13_spill] sm:$0xff] }
 0x4fd   :  { %v10404_v31 = vsub.f32 %v11728_v10, %v10123_v58  ;;  %v10408_v61 = vsub.f32 %v11729_v44, %v10123_v58  ;;  %vm2386_vm6 = vweird.f32 %v10247_v46  ;;  %v10412_v18 = vperm.slane %v10101_v16, 4 }
 0x4fe   :  { %v2331_v5 = vmul.f32 %v2323_v20, %v11600_v34  ;;  %v2114_v19 = vmul.f32 %v10386_v43, %v10386_v43  ;;  %vm2388_vm7 = vmor %vm2386_vm6, %vm2387_vm5  ;;  %v2276_v38 = vrot.slane %v2275_v23, 4  ;;  %v10421_v1 = vsub.f32 %v11731_v37, %v10123_v58 }
 0x4ff   :  { %11730 = vst [vmem:[#allocation50_spill] sm:$0xff] %v10408_v61  ;;  %v2583_v10 = vmul.f32 %v10088_v49, %v2438_v9  ;;  %v2712_v46 = vadd.f32 %v10104_v2, %v2567_v29  ;;  %v10426_v44 = vsel %vm2388_vm7, %v10287_v63, %v2385_v0  ;;  %v2987_v20 = vmax.f32 %v2985_v27, %v2986_v15 }
 0x500   :  { %11732 = vst [vmem:[#allocation51_spill] sm:$0xff] %v10421_v1  ;;  %v2291_v32 = vadd.f32 %v2290_v62, %v2114_v19  ;;  %v2720_v11 = vadd.f32 %v10104_v2, %v2575_v60  ;;  %v10431_v50 = vsub.f32 %v9955_v59, %v10123_v58  ;;  %v2122_v6 = vmul.f32 %v10400_v42, %v10400_v42 }
 0x501   :  { %v2130_v37 = vmul.f32 %v10404_v31, %v10404_v31  ;;  %v2138_v9 = vmul.f32 %v10408_v61, %v10408_v61  ;;  %v10439_v29 = vadd.f32 1e-05, %v2331_v5  ;;  %v2591_v63 = vmul.f32 %v10088_v49, %v2446_v47  ;;  %v11736_v61 = vld [vmem:[#allocation94_spill] sm:$0xff] }
 0x502   :  { %11733 = vst [vmem:[#allocation72_spill] sm:$0xff] %v10431_v50  ;;  %v2599_v27 = vmul.f32 %v10088_v49, %v2454_v41  ;;  %v2607_v0 = vmul.f32 %v10088_v49, %v2462_v40  ;;  %v2488_v59 = vmul.f32 %v10426_v44, %v9925_v51  ;;  %v2496_v58 = vmul.f32 %v10426_v44, %v9929_v13 }
 0x503   :  { %v2277_v62 = vadd.f32 %v2276_v38, %v2275_v23  ;;  %v2728_v15 = vadd.f32 %v10104_v2, %v2583_v10  ;;  %v2292_v60 = vadd.f32 %v2291_v32, %v2122_v6  ;;  %v2988_v19 = vrot.slane %v2987_v20, 2 }
 0x504   :  { %v2840_v25 = vmax.f32 %v2712_v46, 0.0  ;;  %v2848_v5 = vmax.f32 %v2720_v11, 0.0  ;;  %v2146_v47 = vmul.f32 %v10421_v1, %v10421_v1  ;;  %v2154_v41 = vmul.f32 %v10431_v50, %v10431_v50 }
 0x505   :  { %v11734_v40 = vrot.slane %v10326_v28, 1  ;;  %v2615_v33 = vmul.f32 %v10088_v49, %v2470_v55  ;;  %7599 = vrsqrt.f32 %v10439_v29  ;;  %v2623_v13 = vmul.f32 %v10088_v49, %v2478_v26  ;;  %v11735_v55 = vld [vmem:[#allocation71_spill] sm:$0xff] }
 0x506   :  { %v2736_v6 = vadd.f32 %v10104_v2, %v2591_v63  ;;  %v2744_v11 = vadd.f32 %v10104_v2, %v2599_v27  ;;  %v2633_v32 = vmul.f32 %v10396_v54, %v2488_v59  ;;  %v2641_v23 = vmul.f32 %v10396_v54, %v2496_v58 }
 0x507   :  { %v3095_v51 = vmax.f32 %v10326_v28, %v11734_v40  ;;  %v2278_v38 = vrot.slane %v2277_v62, 2  ;;  %v2752_v10 = vadd.f32 %v10104_v2, %v2607_v0  ;;  %v2293_v46 = vadd.f32 %v2292_v60, %v2130_v37 }
 0x508   :  { %v2989_v57 = vmax.f32 %v2987_v20, %v2988_v19  ;;  %v2856_v28 = vmax.f32 %v2728_v15, 0.0  ;;  %v2992_v40 = vmax.f32 %v2840_v25, %v2848_v5  ;;  %v2504_v8 = vmul.f32 %v10426_v44, %v11735_v55 }
 0x509   :  { %v2279_v50 = vadd.f32 %v2278_v38, %v2277_v62  ;;  %v3183_v49 = vpack.c.bf16 %v3095_v51, %v3095_v51  ;;  %v2760_v26 = vadd.f32 %v10104_v2, %v2615_v33  ;;  %v2294_v63 = vadd.f32 %v2293_v46, %v2138_v9 }
 0x50a   :  { %v2990_v27 = vrot.slane %v2989_v57, 1  ;;  %v2864_v1 = vmax.f32 %v2736_v6, 0.0  ;;  %v2993_v59 = vmax.f32 %v2992_v40, %v2856_v28  ;;  %v2512_v58 = vmul.f32 %v10426_v44, %v11736_v61 }
 0x50b   :  { %v2778_v0 = vadd.f32 %v10412_v18, %v2633_v32  ;;  %v2786_v20 = vadd.f32 %v10412_v18, %v2641_v23  ;;  %v2280_v37 = vrot.slane %v2279_v50, 1  ;;  %v10471_v25 = vpop.eup %7599  ;;  %v2295_v15 = vadd.f32 %v2294_v63, %v2146_v47  ;;  %v11737_v32 = vld [vmem:[#allocation35_spill] sm:$0xff] }
 0x50c   :  { %v2991_v60 = vmax.f32 %v2989_v57, %v2990_v27  ;;  %v2872_v62 = vmax.f32 %v2744_v11, 0.0  ;;  %v2994_v19 = vmax.f32 %v2993_v59, %v2864_v1  ;;  %v2649_v33 = vmul.f32 %v10396_v54, %v2504_v8 }
 0x50d   :  { %v2281_v9 = vadd.f32 %v2280_v37, %v2279_v50  ;;  %v3481_v5 = vunpack.c.l.b16 %v3183_v49  ;;  %v2768_v51 = vadd.f32 %v10104_v2, %v2623_v13  ;;  %v2296_v6 = vadd.f32 %v2295_v15, %v2154_v41 }
 0x50e   :  { %v3175_v38 = vpack.c.bf16 %v2991_v60, %v2991_v60  ;;  %v2880_v61 = vmax.f32 %v2752_v10, 0.0  ;;  %v2995_v46 = vmax.f32 %v2994_v19, %v2872_v62  ;;  %v2520_v23 = vmul.f32 %v10426_v44, %v11737_v32  ;;  %v6427_v62 = vld [vmem:[#allocation5 + $0x320] sm:$0xf]  ;;  %v7347_v19 = vld [vmem:[#allocation5 + $0x32c] sm:$0xf0] }
 0x50f   :  { %v2906_v28 = vmax.f32 %v2778_v0, 0.0  ;;  %v2914_v40 = vmax.f32 %v2786_v20, 0.0  ;;  %v2329_v47 = vmul.f32 %v2281_v9, %v11600_v34  ;;  %v2297_v57 = vrot.slane %v2296_v6, 4  ;;  %v11742_v32 = vld [vmem:[#allocation44_spill] sm:$0xff] }
 0x510   :  { %v3473_v11 = vunpack.c.l.b16 %v3175_v38  ;;  %v2888_v1 = vmax.f32 %v2760_v26, 0.0  ;;  %v2996_v55 = vmax.f32 %v2995_v46, %v2880_v61  ;;  %v2657_v8 = vmul.f32 %v10396_v54, %v2512_v58  ;;  %v11739_v26 = vld [vmem:[#allocation38_spill] sm:$0xff] }
 0x511   :  { %v2794_v50 = vadd.f32 %v10412_v18, %v2649_v33  ;;  %v2411_v2 = vmul.f32 %v10471_v25, %v10439_v29  ;;  %v10482_v41 = vadd.f32 1e-05, %v2329_v47  ;;  %v2298_v13 = vadd.f32 %v2297_v57, %v2296_v6  ;;  %v11744_v57 = vld [vmem:[#allocation31_spill] sm:$0xff] }
 0x512   :  { %v3490_v10 = vsel %vm3488_vm1, %v3481_v5, %v3473_v11  ;;  %v2896_v49 = vmax.f32 %v2768_v51, 0.0  ;;  %v2997_v63 = vmax.f32 %v2996_v55, %v2888_v1  ;;  %v11738_v27 = vrot.slane %v10370_v52, 4 }
 0x513   :  { %v2528_v0 = vmul.f32 %v10426_v44, %v11739_v26  ;;  %7601 = vrsqrt.f32 %v10482_v41  ;;  %v10491_v58 = vpack.c.b16 %v3490_v10, %v3490_v10  ;;  %v2665_v20 = vmul.f32 %v10396_v54, %v2520_v23 }
 0x514   :  { %v3104_v59 = vmax.f32 %v10370_v52, %v11738_v27  ;;  %v3122_v37 = vmax.f32 %v2906_v28, %v2914_v40  ;;  %v2299_v15 = vrot.slane %v2298_v13, 2  ;;  %v2998_v60 = vmax.f32 %v2997_v63, %v2896_v49  ;;  %v11741_v52 = vld [vmem:[#allocation79_spill] sm:$0xff]  ;;  %v11743_v28 = vld [vmem:[#allocation45_spill] sm:$0xff]  ;;  %v11745_v49 = vld [vmem:[#allocation80_spill] sm:$0xff] }
 0x515   :  { %11740 = vst [vmem:[#allocation27_spill] sm:$0xff] %v10491_v58  ;;  %v2802_v33 = vadd.f32 %v10412_v18, %v2657_v8  ;;  %4814 = vmatmul.bf16.vlgmr.msra.gmra.mxu2 %v10491_v58  ;;  %v6428_v9 = vor.u32 %v7347_v19, %v6427_v62  ;;  %v2568_v5 = vmul.f32 %v11741_v52, %v10345_v39  ;;  %v2922_v6 = vmax.f32 %v2794_v50, 0.0  ;;  %v6411_v8 = vld [vmem:[#allocation5 + $0x300] sm:$0xf]  ;;  %v7343_v50 = vld [vmem:[#allocation5 + $0x30c] sm:$0xf0] }
 0x516   :  { %v2576_v51 = vmul.f32 %v11741_v52, %v10349_v53  ;;  %v2412_v38 = vmul.f32 %v10471_v25, %v2411_v2  ;;  %v2300_v61 = vadd.f32 %v2299_v15, %v2298_v13  ;;  %v2999_v46 = vrot.slane %v2998_v60, 4  ;;  %v11747_v19 = vld [vmem:[#allocation47_spill] sm:$0xff] }
 0x517   :  { %v2439_v23 = vmul.f32 %v11715_v24, %v11742_v32  ;;  %v2447_v40 = vmul.f32 %v11715_v24, %v11743_v28  ;;  %v3105_v47 = vrot.slane %v3104_v59, 2  ;;  %v2536_v11 = vmul.f32 %v10426_v44, %v11744_v57  ;;  %4838 = vmatpush.bf16.msrb.mxu1 %v6428_v9 }
 0x518   :  { %v2673_v39 = vmul.f32 %v10396_v54, %v2528_v0  ;;  %v3123_v1 = vmax.f32 %v3122_v37, %v2922_v6  ;;  %v2301_v53 = vrot.slane %v2300_v61, 1  ;;  %v3000_v55 = vmax.f32 %v2998_v60, %v2999_v46  ;;  %v11746_v37 = vld [vmem:[#allocation46_spill] sm:$0xff]  ;;  %v11748_v46 = vld [vmem:[#allocation81_spill] sm:$0xff] }
 0x519   :  { %v10508_v2 = vpop.eup %7601  ;;  %v2810_v13 = vadd.f32 %v10412_v18, %v2665_v20  ;;  %v6412_v10 = vor.u32 %v7343_v50, %v6411_v8  ;;  %v2713_v63 = vadd.f32 %v11745_v49, %v2568_v5  ;;  %v2721_v27 = vadd.f32 %v11745_v49, %v2576_v51 }
 0x51a   :  { %v2930_v26 = vmax.f32 %v2802_v33, 0.0  ;;  %v2413_v15 = vmul.f32 0.5, %v2412_v38  ;;  %v2391_v62 = vmul.f32 %v10508_v2, %v10482_v41  ;;  %v2302_v0 = vadd.f32 %v2301_v53, %v2300_v61  ;;  %v11749_v38 = vld [vmem:[#allocation90_spill] sm:$0xff] }
 0x51b   :  { %v2455_v60 = vmul.f32 %v11715_v24, %v11746_v37  ;;  %v2463_v9 = vmul.f32 %v11715_v24, %v11747_v19  ;;  %v3001_v6 = vrot.slane %v3000_v55, 2  ;;  %4839 = vmatpush.bf16.msrb.mxu1 %v6412_v10  ;;  %v2584_v20 = vmul.f32 %v11741_v52, %v2439_v23 }
 0x51c   :  { %v3116_v5 = vrot.slane %v11748_v46, 4  ;;  %v3106_v32 = vmax.f32 %v3104_v59, %v3105_v47  ;;  %v3124_v51 = vmax.f32 %v3123_v1, %v2930_v26  ;;  %v2392_v33 = vmul.f32 %v10508_v2, %v2391_v62  ;;  %v11750_v1 = vld [vmem:[#allocation48_spill] sm:$0xff] }
 0x51d   :  { %v2544_v28 = vmul.f32 %v10426_v44, %v11749_v38  ;;  %v2681_v61 = vmul.f32 %v10396_v54, %v2536_v11  ;;  %v2841_v57 = vmax.f32 %v2713_v63, 0.0  ;;  %v2849_v53 = vmax.f32 %v2721_v27, 0.0 }
 0x51e   :  { %v2818_v8 = vadd.f32 %v10412_v18, %v2673_v39  ;;  %v2938_v50 = vmax.f32 %v2810_v13, 0.0  ;;  %v2414_v37 = vsub.f32 1.5, %v2413_v15  ;;  %v2330_v10 = vmul.f32 %v2302_v0, %v11600_v34 }
 0x51f   :  { %v2393_v23 = vmul.f32 0.5, %v2392_v33  ;;  %v3002_v19 = vmax.f32 %v3000_v55, %v3001_v6  ;;  %v2592_v59 = vmul.f32 %v11741_v52, %v2447_v40  ;;  %v2729_v47 = vadd.f32 %v11745_v49, %v2584_v20 }
 0x520   :  { %v2471_v26 = vmul.f32 %v11715_v24, %v11750_v1  ;;  %v3117_v62 = vmax.f32 %v11748_v46, %v3116_v5  ;;  %v3107_v11 = vrot.slane %v3106_v32, 1  ;;  %v3125_v63 = vmax.f32 %v3124_v51, %v2938_v50  ;;  %v11751_v5 = vld [vmem:[#allocation49_spill] sm:$0xff] }
 0x521   :  { %v2689_v27 = vmul.f32 %v10396_v54, %v2544_v28  ;;  %v2826_v39 = vadd.f32 %v10412_v18, %v2681_v61  ;;  %vm2417_vm8 = vweird.f32 %v10471_v25  ;;  %v3005_v34 = vmax.f32 %v2841_v57, %v2849_v53 }
 0x522   :  { %v2946_v13 = vmax.f32 %v2818_v8, 0.0  ;;  %v2415_v55 = vmul.f32 %v10471_v25, %v2414_v37  ;;  %v10536_v40 = vadd.f32 1e-05, %v2330_v10  ;;  %v2600_v15 = vmul.f32 %v11741_v52, %v2455_v60 }
 0x523   :  { %v2394_v0 = vsub.f32 1.5, %v2393_v23  ;;  %v3003_v6 = vrot.slane %v3002_v19, 1  ;;  %v2737_v20 = vadd.f32 %v11745_v49, %v2592_v59  ;;  %v2857_v46 = vmax.f32 %v2729_v47, 0.0  ;;  %v11755_v59 = vld [vmem:[#allocation93_spill] sm:$0xff] }
 0x524   :  { %v2479_v51 = vmul.f32 %v11715_v24, %v11751_v5  ;;  %v3118_v33 = vrot.slane %v3117_v62, 2  ;;  %v3126_v38 = vmax.f32 %v3125_v63, %v2946_v13  ;;  %vm2416_vm9 = vweird.f32 %v10439_v29  ;;  %v11756_v63 = vld [vmem:[#allocation53_spill] sm:$0xff] }
 0x525   :  { %v2834_v28 = vadd.f32 %v10412_v18, %v2689_v27  ;;  %v2954_v61 = vmax.f32 %v2826_v39, 0.0  ;;  %vm2418_vm10 = vmor %vm2416_vm9, %vm2417_vm8  ;;  %v3108_v57 = vmax.f32 %v3106_v32, %v3107_v11  ;;  %v3006_v60 = vmax.f32 %v3005_v34, %v2857_v46  ;;  %v11759_v46 = vld [vmem:[#allocation57_spill] sm:$0xff] }
 0x526   :  { %v10547_v53 = vsel %vm2418_vm10, %v10471_v25, %v2415_v55  ;;  %7603 = vrsqrt.f32 %v10536_v40  ;;  %v2608_v8 = vmul.f32 %v11741_v52, %v2463_v9  ;;  %v2745_v24 = vadd.f32 %v11745_v49, %v2600_v15 }
 0x527   :  { %11752 = vst [vmem:[#allocation61_spill] sm:$0xff] %v10547_v53  ;;  %v2395_v50 = vmul.f32 %v10508_v2, %v2394_v0  ;;  %vm2397_vm11 = vweird.f32 %v10508_v2  ;;  %v3004_v29 = vmax.f32 %v3002_v19, %v3003_v6  ;;  %v2865_v37 = vmax.f32 %v2737_v20, 0.0  ;;  %v11758_v6 = vld [vmem:[#allocation76_spill] sm:$0xff] }
 0x528   :  { %v10554_v10 = vmax.f32 %v3117_v62, %v3118_v33  ;;  %v3127_v23 = vmax.f32 %v3126_v38, %v2954_v61  ;;  %v10557_v32 = vperm.slane %v10085_v21, 7  ;;  %v10560_v25 = vperm.slane %v10101_v16, 7  ;;  %v11757_v62 = vld [vmem:[#allocation65_spill] sm:$0xff] }
 0x529   :  { %v2491_v9 = vmul.f32 %v10547_v53, %v11755_v59  ;;  %vm2396_vm12 = vweird.f32 %v10482_v41  ;;  %v3184_v47 = vpack.c.bf16 %v3108_v57, %v3108_v57  ;;  %v3007_v1 = vmax.f32 %v3006_v60, %v2865_v37 }
 0x52a   :  { %11753 = vst [vmem:[#allocation36_spill] sm:$0xff] %v10557_v32  ;;  %v2962_v11 = vmax.f32 %v2834_v28, 0.0  ;;  %v2499_v19 = vmul.f32 %v10547_v53, %v11756_v63  ;;  %v2507_v27 = vmul.f32 %v10547_v53, %v11757_v62  ;;  %vm2398_vm13 = vmor %vm2396_vm12, %vm2397_vm11  ;;  %v2616_v39 = vmul.f32 %v11741_v52, %v2471_v26 }
 0x52b   :  { %11754 = vst [vmem:[#allocation66_spill] sm:$0xff] %v10560_v25  ;;  %v10571_v34 = vsel %vm2398_vm13, %v10508_v2, %v2395_v50  ;;  %v3176_v13 = vpack.c.bf16 %v3004_v29, %v3004_v29  ;;  %v2753_v55 = vadd.f32 %v11745_v49, %v2608_v8  ;;  %v2873_v15 = vmax.f32 %v2745_v24, 0.0 }
 0x52c   :  { %v10574_v41 = vpop.eup %7603  ;;  %v3128_v0 = vmax.f32 %v3127_v23, %v2962_v11  ;;  %v2515_v20 = vmul.f32 %v10547_v53, %v11758_v6  ;;  %v2523_v5 = vmul.f32 %v10547_v53, %v11759_v46  ;;  %v2531_v33 = vmul.f32 %v10547_v53, %v10175_v48 }
 0x52d   :  { %v2539_v2 = vmul.f32 %v10547_v53, %v10197_v22  ;;  %v2636_v26 = vmul.f32 %v10557_v32, %v2491_v9  ;;  %v3482_v38 = vunpack.c.l.b16 %v3184_v47  ;;  %v3008_v28 = vmax.f32 %v3007_v1, %v2873_v15 }
 0x52e   :  { %v2489_v61 = vmul.f32 %v10571_v34, %v10209_v17  ;;  %v2497_v57 = vmul.f32 %v10571_v34, %v10234_v12  ;;  %v10590_v60 = vperm.slane %v10085_v21, 5  ;;  %v2624_v8 = vmul.f32 %v11741_v52, %v2479_v51 }
 0x52f   :  { %v2401_v48 = vmul.f32 %v10574_v41, %v10536_v40  ;;  %v3474_v24 = vunpack.c.l.b16 %v3176_v13  ;;  %v2761_v22 = vadd.f32 %v11745_v49, %v2616_v39  ;;  %v2881_v50 = vmax.f32 %v2753_v55, 0.0 }
 0x530   :  { %v3129_v29 = vrot.slane %v3128_v0, 4  ;;  %v2547_v37 = vmul.f32 %v10547_v53, %v10224_v14  ;;  %v2644_v17 = vmul.f32 %v10557_v32, %v2499_v19  ;;  %v2652_v12 = vmul.f32 %v10557_v32, %v2507_v27 }
 0x531   :  { %v2660_v23 = vmul.f32 %v10557_v32, %v2515_v20  ;;  %v2402_v59 = vmul.f32 %v10574_v41, %v2401_v48  ;;  %v3491_v52 = vsel %vm3488_vm1, %v3482_v38, %v3474_v24  ;;  %v3009_v51 = vmax.f32 %v3008_v28, %v2881_v50 }
 0x532   :  { %v2634_v9 = vmul.f32 %v10590_v60, %v2489_v61  ;;  %v2642_v47 = vmul.f32 %v10590_v60, %v2497_v57  ;;  %v10606_v1 = vperm.slane %v10101_v16, 5  ;;  %v10608_v11 = vpack.c.b16 %v3491_v52, %v3491_v52 }
 0x533   :  { %v2781_v14 = vadd.f32 %v10560_v25, %v2636_v26  ;;  %v2403_v63 = vmul.f32 0.5, %v2402_v59  ;;  %v2769_v19 = vadd.f32 %v11745_v49, %v2624_v8  ;;  %v2889_v62 = vmax.f32 %v2761_v22, 0.0 }
 0x534   :  { %11760 = vst [vmem:[#allocation77_spill] sm:$0xff] %v10608_v11  ;;  %v2668_v27 = vmul.f32 %v10557_v32, %v2523_v5  ;;  %v2676_v39 = vmul.f32 %v10557_v32, %v2531_v33  ;;  %v2789_v13 = vadd.f32 %v10560_v25, %v2644_v17  ;;  %v2505_v55 = vmul.f32 %v10571_v34, %v10254_v35 }
 0x535   :  { %4827 = vmatmul.bf16.vlgmr.msra.gmra.mxu3 %v10608_v11  ;;  %v2684_v15 = vmul.f32 %v10557_v32, %v2539_v2  ;;  %v2513_v6 = vmul.f32 %v10571_v34, %v10269_v36  ;;  %v2404_v20 = vsub.f32 1.5, %v2403_v63  ;;  %v3010_v46 = vmax.f32 %v3009_v51, %v2889_v62  ;;  %v6141_v11 = vld [vmem:[#allocation5 + $0xf0] sm:$0xf0] }
 0x536   :  { %v3130_v49 = vmax.f32 %v3128_v0, %v3129_v29  ;;  %v2692_v26 = vmul.f32 %v10557_v32, %v2547_v37  ;;  %v2779_v5 = vadd.f32 %v10606_v1, %v2634_v9  ;;  %v2787_v33 = vadd.f32 %v10606_v1, %v2642_v47  ;;  %v10905_v32 = vld [vmem:[#allocation5 + $0x740] sm:$0xf] }
 0x537   :  { %v2797_v38 = vadd.f32 %v10560_v25, %v2652_v12  ;;  %v2805_v35 = vadd.f32 %v10560_v25, %v2660_v23  ;;  %v2909_v28 = vmax.f32 %v2781_v14, 0.0  ;;  %v2897_v61 = vmax.f32 %v2769_v19, 0.0 }
 0x538   :  { %v2917_v57 = vmax.f32 %v2789_v13, 0.0  ;;  %v2650_v2 = vmul.f32 %v10590_v60, %v2505_v55  ;;  %v2405_v36 = vmul.f32 %v10574_v41, %v2404_v20  ;;  %vm2407_vm14 = vweird.f32 %v10574_v41  ;;  %v6891_v13 = vld [vmem:[#allocation5 + $0x6c0] sm:$0xf] }
 0x539   :  { %v10630_v0 = vadd.f32 %v10560_v25, %v2668_v27  ;;  %v10633_v8 = vadd.f32 %v10560_v25, %v2676_v39  ;;  %v2658_v48 = vmul.f32 %v10590_v60, %v2513_v6  ;;  %v3011_v24 = vmax.f32 %v3010_v46, %v2897_v61  ;;  %v7393_v27 = vld [vmem:[#allocation5 + $0x4a4] sm:$0xf] }
 0x53a   :  { %v10637_v22 = vadd.f32 %v10560_v25, %v2684_v15  ;;  %v2907_v50 = vmax.f32 %v2779_v5, 0.0  ;;  %v2915_v29 = vmax.f32 %v2787_v33, 0.0  ;;  %vm2406_vm15 = vweird.f32 %v10536_v40  ;;  %v6651_v33 = vld [vmem:[#allocation5 + $0x4e0] sm:$0xf] }
 0x53b   :  { %v3120_v37 = vrot.slane %v10554_v10, 1  ;;  %v3131_v17 = vrot.slane %v3130_v49, 2  ;;  %v10642_v12 = vadd.f32 %v10560_v25, %v2692_v26  ;;  %v2925_v23 = vmax.f32 %v2797_v38, 0.0  ;;  %vm2408_vm0 = vmor %vm2406_vm15, %vm2407_vm14  ;;  %v7305_v25 = vld [vmem:[#allocation5 + $0x1e4] sm:$0xf] }
 0x53c   :  { %v2933_v59 = vmax.f32 %v2805_v35, 0.0  ;;  %v3161_v52 = vmax.f32 %v2909_v28, %v2917_v57  ;;  %v2795_v51 = vadd.f32 %v10606_v1, %v2650_v2  ;;  %v10646_v9 = vsel %vm2408_vm0, %v10574_v41, %v2405_v36  ;;  %v7401_v35 = vld [vmem:[#allocation5 + $0x4e4] sm:$0xf]  ;;  %v6635_v36 = vld [vmem:[#allocation5 + $0x4c0] sm:$0xf] }
 0x53d   :  { %v2521_v47 = vmul.f32 %v10571_v34, %v10291_v56  ;;  %v2529_v40 = vmul.f32 %v10571_v34, %v10310_v3  ;;  %v2803_v14 = vadd.f32 %v10606_v1, %v2658_v48  ;;  %v3012_v63 = vrot.slane %v3011_v24, 4  ;;  %v11761_v28 = vld [vmem:[#allocation68_spill] sm:$0xff]  ;;  %v7399_v48 = vld [vmem:[#allocation5 + $0x4cc] sm:$0xf0] }
 0x53e   :  { %v2941_v19 = vmax.f32 %v10630_v0, 0.0  ;;  %v3135_v39 = vmax.f32 %v2907_v50, %v2915_v29  ;;  %v2490_v41 = vmul.f32 %v10646_v9, %v10339_v30  ;;  %v2498_v56 = vmul.f32 %v10646_v9, %v10362_v45  ;;  %v7403_v45 = vld [vmem:[#allocation5 + $0x4ec] sm:$0xf0] }
 0x53f   :  { %v10662_v3 = vperm.slane %v10085_v21, 6  ;;  %v3162_v55 = vmax.f32 %v3161_v52, %v2925_v23  ;;  %v2537_v15 = vmul.f32 %v10571_v34, %v10332_v7  ;;  %v2923_v6 = vmax.f32 %v2795_v51, 0.0  ;;  %v6653_v21 = vld [vmem:[#allocation5 + $0x4f0] sm:$0xf0]  ;;  %v11762_v7 = vld [vmem:[#allocation69_spill] sm:$0xff] }
 0x540   :  { %v10667_v20 = vperm.slane %v10101_v16, 6  ;;  %v2666_v46 = vmul.f32 %v10590_v60, %v2521_v47  ;;  %v2674_v26 = vmul.f32 %v10590_v60, %v2529_v40  ;;  %v2931_v5 = vmax.f32 %v2803_v14, 0.0  ;;  %v6637_v51 = vld [vmem:[#allocation5 + $0x4d0] sm:$0xf0]  ;;  %v6779_v47 = vld [vmem:[#allocation5 + $0x5e0] sm:$0xf] }
 0x541   :  { %v3013_v30 = vmax.f32 %v3011_v24, %v3012_v63  ;;  %v3136_v38 = vmax.f32 %v3135_v39, %v2923_v6  ;;  %v10673_v61 = vmul.f32 %v10426_v44, %v11761_v28  ;;  %v10677_v57 = vmul.f32 %v10426_v44, %v11762_v7  ;;  %v7397_v24 = vld [vmem:[#allocation5 + $0x4c4] sm:$0xf]  ;;  %v7435_v40 = vld [vmem:[#allocation5 + $0x5ec] sm:$0xf0] }
 0x542   :  { %v2635_v16 = vmul.f32 %v10662_v3, %v2490_v41  ;;  %v2643_v2 = vmul.f32 %v10662_v3, %v2498_v56  ;;  %v10681_v50 = vmax.f32 %v3130_v49, %v3131_v17  ;;  %v10683_v29 = vmax.f32 %v3162_v55, %v2933_v59  ;;  %v6907_v49 = vld [vmem:[#allocation5 + $0x6e0] sm:$0xf]  ;;  %v7467_v17 = vld [vmem:[#allocation5 + $0x6ec] sm:$0xf0] }
 0x543   :  { %v2545_v23 = vmul.f32 %v10571_v34, %v10356_v4  ;;  %v2682_v52 = vmul.f32 %v10590_v60, %v2537_v15  ;;  %v2811_v14 = vadd.f32 %v10606_v1, %v2666_v46  ;;  %v10690_v63 = vadd.f32 %v10606_v1, %v2674_v26  ;;  %v6763_v15 = vld [vmem:[#allocation5 + $0x5c0] sm:$0xf]  ;;  %v7431_v6 = vld [vmem:[#allocation5 + $0x5cc] sm:$0xf0] }
 0x544   :  { %v3014_v39 = vrot.slane %v3013_v30, 2  ;;  %v3121_v41 = vmax.f32 %v10554_v10, %v3120_v37  ;;  %v3137_v59 = vmax.f32 %v3136_v38, %v2931_v5  ;;  %v2506_v56 = vmul.f32 %v10646_v9, %v10386_v43  ;;  %v7463_v10 = vld [vmem:[#allocation5 + $0x6cc] sm:$0xf0]  ;;  %v6619_v38 = vld [vmem:[#allocation5 + $0x4a0] sm:$0xf] }
 0x545   :  { %v6652_v4 = vor.u32 %v7403_v45, %v6651_v33  ;;  %v6656_v55 = vor.u32 %v7401_v35, %v6653_v21  ;;  %v10696_v28 = vadd.f32 %v10667_v20, %v2635_v16  ;;  %v10699_v46 = vadd.f32 %v10667_v20, %v2643_v2  ;;  %v7395_v45 = vld [vmem:[#allocation5 + $0x4ac] sm:$0xf0]  ;;  %v6621_v2 = vld [vmem:[#allocation5 + $0x4b0] sm:$0xf0] }
 0x546   :  { %v3015_v26 = vmax.f32 %v3013_v30, %v3014_v39  ;;  %v6780_v7 = vor.u32 %v7435_v40, %v6779_v47  ;;  %v3133_v37 = vrot.slane %v10681_v50, 1  ;;  %v6636_v5 = vor.u32 %v7399_v48, %v6635_v36  ;;  %v6747_v48 = vld [vmem:[#allocation5 + $0x5a0] sm:$0xf]  ;;  %v7455_v0 = vld [vmem:[#allocation5 + $0x68c] sm:$0xf0] }
 0x547   :  { %4845 = vmatpush.bf16.msrb.mxu2 %v6652_v4  ;;  %4949 = vmatpush.bf16.msrb.mxu0 %v6656_v55  ;;  %v6640_v43 = vor.u32 %v7397_v24, %v6637_v51  ;;  %v6908_v33 = vor.u32 %v7467_v17, %v6907_v49  ;;  %v2939_v35 = vmax.f32 %v2811_v14, 0.0  ;;  %v3185_v16 = vpack.c.bf16 %v3121_v41, %v3121_v41  ;;  %v7427_v24 = vld [vmem:[#allocation5 + $0x5ac] sm:$0xf0]  ;;  %v6875_v49 = vld [vmem:[#allocation5 + $0x6a0] sm:$0xf] }
 0x548   :  { %v3016_v21 = vrot.slane %v3015_v26, 1  ;;  %4858 = vmatpush.bf16.msrb.mxu3 %v6780_v7  ;;  %v6764_v62 = vor.u32 %v7431_v6, %v6763_v15  ;;  %v2690_v30 = vmul.f32 %v10590_v60, %v2545_v23  ;;  %v10704_v47 = vadd.f32 %v10606_v1, %v2682_v52  ;;  %v7459_v17 = vld [vmem:[#allocation5 + $0x6ac] sm:$0xf0]  ;;  %v7389_v6 = vld [vmem:[#allocation5 + $0x484] sm:$0xf] }
 0x549   :  { %v2947_v40 = vmax.f32 %v10690_v63, 0.0  ;;  %4871 = vmatpush.bf16.msra.mxu1 %v6908_v33  ;;  %v6892_v36 = vor.u32 %v7463_v10, %v6891_v13  ;;  %v3138_v51 = vmax.f32 %v3137_v59, %v2939_v35  ;;  %v2514_v14 = vmul.f32 %v10646_v9, %v10400_v42  ;;  %v11763_v13 = vld [vmem:[#allocation12_spill] sm:$0xff]  ;;  %v6605_v10 = vld [vmem:[#allocation5 + $0x490] sm:$0xf0] }
 0x54a   :  { %v2651_v39 = vmul.f32 %v10662_v3, %v2506_v56  ;;  %v3017_v41 = vmax.f32 %v3015_v26, %v3016_v21  ;;  %v2908_v23 = vmax.f32 %v10696_v28, 0.0  ;;  %v2916_v52 = vmax.f32 %v10699_v46, 0.0  ;;  %v6603_v42 = vld [vmem:[#allocation5 + $0x480] sm:$0xf]  ;;  %v7391_v56 = vld [vmem:[#allocation5 + $0x48c] sm:$0xf0] }
 0x54b   :  { %4846 = vmatpush.bf16.msrb.mxu2 %v6636_v5  ;;  %4950 = vmatpush.bf16.msrb.mxu0 %v6640_v43  ;;  %v6620_v63 = vor.u32 %v7395_v45, %v6619_v38  ;;  %v6624_v4 = vor.u32 %v7393_v27, %v6621_v2  ;;  %v10714_v55 = vmul.f32 %v10426_v44, %v11763_v13  ;;  %v3483_v15 = vunpack.c.l.b16 %v3185_v16  ;;  %v11764_v7 = vld [vmem:[#allocation32_spill] sm:$0xff]  ;;  %v11765_v16 = vld [vmem:[#allocation50_spill] sm:$0xff] }
 0x54c   :  { %v3177_v59 = vpack.c.bf16 %v3017_v41, %v3017_v41  ;;  %4859 = vmatpush.bf16.msrb.mxu3 %v6764_v62  ;;  %v6748_v26 = vor.u32 %v7427_v24, %v6747_v48  ;;  %v10718_v28 = vmul.f32 %v10426_v44, %v11764_v7  ;;  %v3164_v46 = vmax.f32 %v10683_v29, %v2941_v19  ;;  %v6731_v43 = vld [vmem:[#allocation5 + $0x580] sm:$0xf]  ;;  %v7423_v62 = vld [vmem:[#allocation5 + $0x58c] sm:$0xf0] }
 0x54d   :  { %v10724_v27 = vadd.f32 %v10606_v1, %v2690_v30  ;;  %4872 = vmatpush.bf16.msra.mxu1 %v6892_v36  ;;  %v6876_v5 = vor.u32 %v7459_v17, %v6875_v49  ;;  %v2522_v33 = vmul.f32 %v10646_v9, %v10404_v31  ;;  %v2659_v38 = vmul.f32 %v10662_v3, %v2514_v14  ;;  %v6859_v21 = vld [vmem:[#allocation5 + $0x680] sm:$0xf]  ;;  %v7387_v14 = vld [vmem:[#allocation5 + $0x46c] sm:$0xf0] }
 0x54e   :  { %v2796_v45 = vadd.f32 %v10667_v20, %v2651_v39  ;;  %v3475_v35 = vunpack.c.l.b16 %v3177_v59  ;;  %v2955_v19 = vmax.f32 %v10704_v47, 0.0  ;;  %v3139_v29 = vmax.f32 %v3138_v51, %v2947_v40  ;;  %v6587_v24 = vld [vmem:[#allocation5 + $0x460] sm:$0xf]  ;;  %v7385_v39 = vld [vmem:[#allocation5 + $0x464] sm:$0xf]  ;;  %v11766_v49 = vld [vmem:[#allocation33_spill] sm:$0xff] }
 0x54f   :  { %v2530_v2 = vmul.f32 %v10646_v9, %v11765_v16  ;;  %4847 = vmatpush.bf16.msrb.mxu2 %v6620_v63  ;;  %4951 = vmatpush.bf16.msrb.mxu0 %v6624_v4  ;;  %v6604_v30 = vor.u32 %v7391_v56, %v6603_v42  ;;  %v3148_v36 = vmax.f32 %v2908_v23, %v2916_v52  ;;  %v11767_v47 = vld [vmem:[#allocation29_spill] sm:$0xff]  ;;  %v6589_v23 = vld [vmem:[#allocation5 + $0x470] sm:$0xf0]  ;;  %v6715_v63 = vld [vmem:[#allocation5 + $0x560] sm:$0xf]  ;;  %v11769_v13 = vmax.f32 %v10633_v8, 0.0 }
 0x550   :  { %v3492_v48 = vsel %vm3488_vm1, %v3483_v15, %v3475_v35  ;;  %v6608_v31 = vor.u32 %v7389_v6, %v6605_v10  ;;  %4860 = vmatpush.bf16.msrb.mxu3 %v6748_v26  ;;  %v6732_v41 = vor.u32 %v7423_v62, %v6731_v43  ;;  %v10736_v17 = vmul.f32 %v10426_v44, %v11766_v49  ;;  %v7419_v4 = vld [vmem:[#allocation5 + $0x56c] sm:$0xf0]  ;;  %v6843_v6 = vld [vmem:[#allocation5 + $0x660] sm:$0xf]  ;;  %v7381_v35 = vld [vmem:[#allocation5 + $0x444] sm:$0xf] }
 0x551   :  { %v10740_v40 = vmul.f32 %v10426_v44, %v11767_v47  ;;  %v10742_v51 = vpack.c.b16 %v3492_v48, %v3492_v48  ;;  %4873 = vmatpush.bf16.msra.mxu1 %v6876_v5  ;;  %v6860_v52 = vor.u32 %v7455_v0, %v6859_v21  ;;  %v3165_v59 = vmax.f32 %v3164_v46, %v11769_v13  ;;  %v7451_v26 = vld [vmem:[#allocation5 + $0x66c] sm:$0xf0]  ;;  %v6571_v46 = vld [vmem:[#allocation5 + $0x440] sm:$0xf]  ;;  %v6573_v16 = vld [vmem:[#allocation5 + $0x450] sm:$0xf0] }
 0x552   :  { %v2667_v15 = vmul.f32 %v10662_v3, %v2522_v33  ;;  %v2804_v42 = vadd.f32 %v10667_v20, %v2659_v38  ;;  %v2924_v56 = vmax.f32 %v2796_v45, 0.0  ;;  %v2963_v7 = vmax.f32 %v10724_v27, 0.0  ;;  %v7383_v33 = vld [vmem:[#allocation5 + $0x44c] sm:$0xf0]  ;;  %v11771_v27 = vld [vmem:[#allocation64_spill] sm:$0xff] }
 0x553   :  { %11768 = vst [vmem:[#allocation39_spill] sm:$0xff] %v10742_v51  ;;  %v3140_v10 = vmax.f32 %v3139_v29, %v2955_v19  ;;  %v2675_v43 = vmul.f32 %v10662_v3, %v2530_v2  ;;  %4840 = vmatmul.bf16.vlgmr.msrb.gmra.mxu1 %v10742_v51  ;;  %4848 = vmatpush.bf16.msrb.mxu2 %v6604_v30  ;;  %v11770_v45 = vld [vmem:[#allocation26_spill] sm:$0xff]  ;;  %v6699_v30 = vld [vmem:[#allocation5 + $0x540] sm:$0xf]  ;;  %v11774_v48 = vmax.f32 %v10637_v22, 0.0 }
 0x554   :  { %v6588_v5 = vor.u32 %v7387_v14, %v6587_v24  ;;  %v3149_v62 = vmax.f32 %v3148_v36, %v2924_v56  ;;  %4952 = vmatpush.bf16.msrb.mxu0 %v6608_v31  ;;  %v6592_v8 = vor.u32 %v7385_v39, %v6589_v23  ;;  %4861 = vmatpush.bf16.msrb.mxu3 %v6732_v41  ;;  %v11772_v19 = vld [vmem:[#allocation22_spill] sm:$0xff]  ;;  %v11775_v24 = vld [vmem:[#allocation51_spill] sm:$0xff]  ;;  %v2932_v41 = vmax.f32 %v2804_v42, 0.0  ;;  %v11776_v23 = vld [vmem:[#allocation72_spill] sm:$0xff] }
 0x555   :  { %v6716_v38 = vor.u32 %v7419_v4, %v6715_v63  ;;  %v10753_v21 = vmul.f32 %v10426_v44, %v11770_v45  ;;  %v10757_v0 = vmul.f32 %v10426_v44, %v11771_v27  ;;  %v10761_v29 = vmul.f32 %v10547_v53, %v11772_v19  ;;  %4874 = vmatpush.bf16.msra.mxu1 %v6860_v52  ;;  %v7415_v36 = vld [vmem:[#allocation5 + $0x54c] sm:$0xf0]  ;;  %v6827_v44 = vld [vmem:[#allocation5 + $0x640] sm:$0xf]  ;;  %v7273_v51 = vld [vmem:[#allocation5 + $0xe4] sm:$0xf] }
 0x556   :  { %v6844_v2 = vor.u32 %v7451_v26, %v6843_v6  ;;  %v3166_v31 = vmax.f32 %v3165_v59, %v11774_v48  ;;  %v2538_v14 = vmul.f32 %v10646_v9, %v11775_v24  ;;  %v2812_v39 = vadd.f32 %v10667_v20, %v2667_v15  ;;  %v7447_v49 = vld [vmem:[#allocation5 + $0x64c] sm:$0xf0]  ;;  %v6555_v59 = vld [vmem:[#allocation5 + $0x420] sm:$0xf]  ;;  %v7377_v15 = vld [vmem:[#allocation5 + $0x424] sm:$0xf] }
 0x557   :  { %11773 = vst [vmem:[#allocation62_spill] sm:$0xff] %v10761_v29  ;;  %v10768_v47 = vmax.f32 %v3140_v10, %v2963_v7  ;;  %v2546_v52 = vmul.f32 %v10646_v9, %v11776_v23  ;;  %v10773_v63 = vadd.f32 %v10667_v20, %v2675_v43  ;;  %4849 = vmatpush.bf16.msrb.mxu2 %v6588_v5  ;;  %v7379_v56 = vld [vmem:[#allocation5 + $0x42c] sm:$0xf0]  ;;  %v11777_v6 = vld [vmem:[#allocation63_spill] sm:$0xff] }
 0x558   :  { %v6572_v4 = vor.u32 %v7383_v33, %v6571_v46  ;;  %v3150_v22 = vmax.f32 %v3149_v62, %v2932_v41  ;;  %4953 = vmatpush.bf16.msrb.mxu0 %v6592_v8  ;;  %v6576_v13 = vor.u32 %v7381_v35, %v6573_v16  ;;  %4862 = vmatpush.bf16.msrb.mxu3 %v6716_v38  ;;  %v11779_v7 = vld [vmem:[#allocation74_spill] sm:$0xff]  ;;  %v11781_v43 = vld [vmem:[#allocation75_spill] sm:$0xff]  ;;  %v11783_v38 = vmax.f32 %v10642_v12, 0.0 }
 0x559   :  { %v6700_v42 = vor.u32 %v7415_v36, %v6699_v30  ;;  %v10777_v26 = vmul.f32 %v10547_v53, %v11777_v6  ;;  %v10781_v10 = vmul.f32 %v10547_v53, %v11779_v7  ;;  %v10785_v5 = vmul.f32 %v10547_v53, %v11781_v43  ;;  %4875 = vmatpush.bf16.msra.mxu1 %v6844_v2  ;;  %v6557_v62 = vld [vmem:[#allocation5 + $0x430] sm:$0xf0]  ;;  %v6683_v46 = vld [vmem:[#allocation5 + $0x520] sm:$0xf]  ;;  %v7411_v33 = vld [vmem:[#allocation5 + $0x52c] sm:$0xf0] }
 0x55a   :  { %v6828_v8 = vor.u32 %v7447_v49, %v6827_v44  ;;  %v10790_v35 = vmax.f32 %v10681_v50, %v3133_v37  ;;  %v10794_v45 = vmax.f32 %v3166_v31, %v11783_v38  ;;  %v2683_v27 = vmul.f32 %v10662_v3, %v2538_v14  ;;  %v6811_v16 = vld [vmem:[#allocation5 + $0x620] sm:$0xf]  ;;  %v7443_v30 = vld [vmem:[#allocation5 + $0x62c] sm:$0xf0]  ;;  %v7373_v31 = vld [vmem:[#allocation5 + $0x404] sm:$0xf] }
 0x55b   :  { %11778 = vst [vmem:[#allocation91_spill] sm:$0xff] %v10777_v26  ;;  %v2940_v19 = vmax.f32 %v2812_v39, 0.0  ;;  %v3142_v2 = vrot.slane %v10768_v47, 4  ;;  %v2691_v36 = vmul.f32 %v10662_v3, %v2546_v52  ;;  %v2948_v48 = vmax.f32 %v10773_v63, 0.0  ;;  %4850 = vmatpush.bf16.msrb.mxu2 %v6572_v4  ;;  %v6539_v41 = vld [vmem:[#allocation5 + $0x400] sm:$0xf] }
 0x55c   :  { %11780 = vst [vmem:[#allocation73_spill] sm:$0xff] %v10781_v10  ;;  %v6556_v24 = vor.u32 %v7379_v56, %v6555_v59  ;;  %v7375_v50 = vld [vmem:[#allocation5 + $0x40c] sm:$0xf0]  ;;  %4954 = vmatpush.bf16.msrb.mxu0 %v6576_v13  ;;  %v6560_v12 = vor.u32 %v7377_v15, %v6557_v62  ;;  %4863 = vmatpush.bf16.msrb.mxu3 %v6700_v42  ;;  %v6541_v44 = vld [vmem:[#allocation5 + $0x410] sm:$0xf0]  ;;  %v11784_v49 = vld [vmem:[#allocation95_spill] sm:$0xff]  ;;  %v10812_v15 = vpop.f32.mrf.mxu1 }
 0x55d   :  { %11782 = vst [vmem:[#allocation37_spill] sm:$0xff] %v10785_v5  ;;  %v3151_v37 = vmax.f32 %v3150_v22, %v2940_v19  ;;  %v7035_v14 = vld [vmem:[#allocation5 + $0x7e0] sm:$0xf]  ;;  %v6684_v39 = vor.u32 %v7411_v33, %v6683_v46  ;;  %v10802_v23 = vmul.f32 %v10571_v34, %v11784_v49  ;;  %v11786_v63 = vld [vmem:[#allocation54_spill] sm:$0xff]  ;;  %4876 = vmatpush.bf16.msra.mxu1 %v6828_v8  ;;  %v6147_v13 = vld [vmem:[#allocation5 + $0xe8] sm:$0xf] }
 0x55e   :  { %v11785_v6 = vld [vmem:[#allocation55_spill] sm:$0xff]  ;;  %v10810_v4 = vmul.f32 %v10571_v34, %v11786_v63  ;;  %v7499_v22 = vld [vmem:[#allocation5 + $0x7ec] sm:$0xf0]  ;;  %v6812_v56 = vor.u32 %v7443_v30, %v6811_v16  ;;  %11787 = vst [vmem:[#allocation52_spill] sm:$0xff] %v10812_v15  ;;  %v11788_v42 = vld [vmem:[#allocation56_spill] sm:$0xff]  ;;  %v2828_v8 = vadd.f32 %v10667_v20, %v2683_v27  ;;  %v6544_v58 = vor.u32 %v7373_v31, %v6541_v44 }
 0x55f   :  { %v10806_v52 = vmul.f32 %v10571_v34, %v11785_v6  ;;  %v7276_v59 = vld [vmem:[#allocation5 + $0xf4] sm:$0xf0]  ;;  %v10816_v7 = vmul.f32 %v10571_v34, %v11788_v42  ;;  %v11789_v43 = vld [vmem:[#allocation60_spill] sm:$0xff]  ;;  %v7407_v19 = vld [vmem:[#allocation5 + $0x50c] sm:$0xf0]  ;;  %v10836_v42 = vadd.f32 %v10667_v20, %v2691_v36  ;;  %4851 = vmatpush.bf16.msrb.mxu2 %v6556_v24  ;;  %v3152_v27 = vmax.f32 %v3151_v37, %v2948_v48 }
 0x560   :  { %v10820_v62 = vmul.f32 %v10571_v34, %v11789_v43  ;;  %v11790_v46 = vld [vmem:[#allocation58_spill] sm:$0xff]  ;;  %v6667_v38 = vld [vmem:[#allocation5 + $0x500] sm:$0xf]  ;;  %v6540_v43 = vor.u32 %v7375_v50, %v6539_v41  ;;  %4955 = vmatpush.bf16.msrb.mxu0 %v6560_v12  ;;  %v7036_v15 = vor.u32 %v7499_v22, %v7035_v14  ;;  %4864 = vmatpush.bf16.msrb.mxu3 %v6684_v39  ;;  %v2956_v50 = vmax.f32 %v2828_v8, 0.0  ;;  %v6131_v37 = vld [vmem:[#allocation5 + $0xc8] sm:$0xf] }
 0x561   :  { %v10824_v33 = vmul.f32 %v10571_v34, %v11790_v46  ;;  %v6795_v49 = vld [vmem:[#allocation5 + $0x600] sm:$0xf]  ;;  %v7439_v46 = vld [vmem:[#allocation5 + $0x60c] sm:$0xf0]  ;;  %v6148_v5 = vor.u32 %v7276_v59, %v6147_v13  ;;  %4877 = vmatpush.bf16.msra.mxu1 %v6812_v56  ;;  %v2569_v36 = vmul.f32 %v10396_v54, %v10673_v61  ;;  %v2577_v24 = vmul.f32 %v10396_v54, %v10677_v57  ;;  %v7272_v12 = vld [vmem:[#allocation5 + $0xd4] sm:$0xf0] }
 0x562   :  { %v11791_v16 = vld [vmem:[#allocation59_spill] sm:$0xff]  ;;  %v11793_v41 = vld [vmem:[#allocation18_spill] sm:$0xff]  ;;  %v6796_v31 = vor.u32 %v7439_v46, %v6795_v49  ;;  %v6144_v44 = vor.u32 %v7273_v51, %v6141_v11  ;;  %v10847_v14 = vmax.f32 %v10768_v47, %v3142_v2  ;;  %v11794_v39 = vld [vmem:[#allocation21_spill] sm:$0xff]  ;;  %v2585_v59 = vmul.f32 %v10396_v54, %v10714_v55 }
 0x563   :  { %v10829_v30 = vmul.f32 %v10571_v34, %v11791_v16  ;;  %v11792_v6 = vld [vmem:[#allocation83_spill] sm:$0xff]  ;;  %v6269_v16 = vld [vmem:[#allocation5 + $0x1f0] sm:$0xf0]  ;;  %v10844_v48 = vmul.f32 %v10646_v9, %v11793_v41  ;;  %v10851_v22 = vmul.f32 %v10646_v9, %v11794_v39  ;;  %4852 = vmatpush.bf16.msrb.mxu2 %v6540_v43  ;;  %v7269_v13 = vld [vmem:[#allocation5 + $0xc4] sm:$0xf]  ;;  %v3153_v56 = vmax.f32 %v3152_v27, %v2956_v50 }
 0x564   :  { %v10833_v63 = vmul.f32 %v10571_v34, %v11792_v6  ;;  %v7019_v10 = vld [vmem:[#allocation5 + $0x7c0] sm:$0xf]  ;;  %v7495_v34 = vld [vmem:[#allocation5 + $0x7cc] sm:$0xf0]  ;;  %v6668_v6 = vor.u32 %v7407_v19, %v6667_v38  ;;  %v6272_v61 = vor.u32 %v7305_v25, %v6269_v16  ;;  %v6125_v57 = vld [vmem:[#allocation5 + $0xd0] sm:$0xf0]  ;;  %4956 = vmatpush.bf16.msrb.mxu0 %v6544_v58  ;;  %v2714_v51 = vadd.f32 %v10412_v18, %v2569_v36  ;;  %v4804_v43 = vpop.f32.mrf.mxu1 }
 0x565   :  { %v7020_v8 = vor.u32 %v7495_v34, %v7019_v10  ;;  %v7301_v38 = vld [vmem:[#allocation5 + $0x1c4] sm:$0xf]  ;;  %v6253_v11 = vld [vmem:[#allocation5 + $0x1d0] sm:$0xf0]  ;;  %v2964_v47 = vmax.f32 %v10836_v42, 0.0  ;;  %v6132_v2 = vor.u32 %v7272_v12, %v6131_v37  ;;  %v2593_v49 = vmul.f32 %v10396_v54, %v10718_v28  ;;  %4878 = vmatpush.bf16.msra.mxu1 %v6796_v31  ;;  %v11800_v53 = vld [vmem:[#allocation41_spill] sm:$0xff] }
 0x566   :  { %4865 = vmatpush.bf16.msrb.mxu3 %v6668_v6  ;;  %v7003_v19 = vld [vmem:[#allocation5 + $0x7a0] sm:$0xf]  ;;  %v7491_v25 = vld [vmem:[#allocation5 + $0x7ac] sm:$0xf0]  ;;  %v2722_v55 = vadd.f32 %v10412_v18, %v2577_v24  ;;  %v7268_v42 = vld [vmem:[#allocation5 + $0xb4] sm:$0xf0]  ;;  %v6128_v27 = vor.u32 %v7269_v13, %v6125_v57  ;;  %v6256_v6 = vor.u32 %v7301_v38, %v6253_v11  ;;  %v2601_v12 = vmul.f32 %v10396_v54, %v10736_v17 }
 0x567   :  { %4884 = vmatpush.bf16.msra.mxu2 %v7036_v15  ;;  %v11795_v58 = vld [vmem:[#allocation28_spill] sm:$0xff]  ;;  %v11797_v34 = vld [vmem:[#allocation82_spill] sm:$0xff]  ;;  %v2730_v31 = vadd.f32 %v10412_v18, %v2585_v59  ;;  %v7004_v39 = vor.u32 %v7491_v25, %v7003_v19  ;;  %v2609_v57 = vmul.f32 %v10396_v54, %v10740_v40  ;;  %v2842_v38 = vmax.f32 %v2714_v51, 0.0 }
 0x568   :  { %5001 = vmatpush.bf16.msra.mxu0 %v6148_v5  ;;  %v10862_v10 = vmul.f32 %v10646_v9, %v11795_v58  ;;  %v11796_v15 = vld [vmem:[#allocation84_spill] sm:$0xff]  ;;  %v10870_v28 = vmul.f32 %v10646_v9, %v11797_v34  ;;  %v10874_v24 = vld [vmem:[#allocation5 + $0x78c] sm:$0xf0]  ;;  %v6109_v41 = vld [vmem:[#allocation5 + $0xb0] sm:$0xf0]  ;;  %v10886_v11 = vmax.f32 %v3153_v56, %v2964_v47  ;;  %v2738_v19 = vadd.f32 %v10412_v18, %v2593_v49 }
 0x569   :  { %v10866_v46 = vmul.f32 %v10646_v9, %v11796_v15  ;;  %v6115_v5 = vld [vmem:[#allocation5 + $0xa8] sm:$0xf]  ;;  %v7265_v16 = vld [vmem:[#allocation5 + $0xa4] sm:$0xf]  ;;  %4910 = vmatpush.bf16.msrb.mxu1 %v6272_v61  ;;  %v10872_v36 = vld [vmem:[#allocation5 + $0x780] sm:$0xf]  ;;  %v2617_v49 = vmul.f32 %v10396_v54, %v10753_v21  ;;  %v2625_v21 = vmul.f32 %v10396_v54, %v10757_v0 }
 0x56a   :  { %4897 = vmatpush.bf16.msra.mxu3 %v6144_v44  ;;  %v7297_v50 = vld [vmem:[#allocation5 + $0x1a4] sm:$0xf]  ;;  %v6237_v37 = vld [vmem:[#allocation5 + $0x1b0] sm:$0xf0]  ;;  %v3144_v44 = vrot.slane %v10847_v14, 2  ;;  %v6116_v43 = vor.u32 %v7268_v42, %v6115_v5  ;;  %v2850_v25 = vmax.f32 %v2722_v55, 0.0  ;;  %v6112_v51 = vor.u32 %v7265_v16, %v6109_v41 }
 0x56b   :  { %4885 = vmatpush.bf16.msra.mxu2 %v7020_v8  ;;  %v10880_v13 = vld [vmem:[#allocation5 + $0x88] sm:$0xf]  ;;  %v10882_v61 = vld [vmem:[#allocation5 + $0x94] sm:$0xf0]  ;;  %v10888_v58 = vld [vmem:[#allocation5 + $0x760] sm:$0xf]  ;;  %v6240_v47 = vor.u32 %v7297_v50, %v6237_v37  ;;  %v2746_v55 = vadd.f32 %v10412_v18, %v2601_v12  ;;  %v2754_v50 = vadd.f32 %v10412_v18, %v2609_v57 }
 0x56c   :  { %5002 = vmatpush.bf16.msra.mxu0 %v6132_v2  ;;  %v10890_v17 = vld [vmem:[#allocation5 + $0x76c] sm:$0xf0]  ;;  %v10892_v59 = vld [vmem:[#allocation5 + $0x68] sm:$0xf]  ;;  %v10894_v8 = vld [vmem:[#allocation5 + $0x74] sm:$0xf0]  ;;  %v3018_v29 = vmax.f32 %v2842_v38, %v2850_v25 }
 0x56d   :  { %v11798_v15 = vld [vmem:[#allocation19_spill] sm:$0xff]  ;;  %v11799_v40 = vld [vmem:[#allocation40_spill] sm:$0xff]  ;;  %v6093_v5 = vld [vmem:[#allocation5 + $0x90] sm:$0xf0]  ;;  %4911 = vmatpush.bf16.msrb.mxu1 %v6256_v6  ;;  %v3155_v37 = vrot.slane %v10886_v11, 4  ;;  %v6972_v54 = vor.u32 %v10890_v17, %v10888_v58  ;;  %v6084_v0 = vor.u32 %v10894_v8, %v10892_v59 }
 0x56e   :  { %v10899_v34 = vmul.f32 %v10646_v9, %v11798_v15  ;;  %v10903_v56 = vmul.f32 %v10646_v9, %v11799_v40  ;;  %4898 = vmatpush.bf16.msra.mxu3 %v6128_v27  ;;  %v7261_v2 = vld [vmem:[#allocation5 + $0x84] sm:$0xf]  ;;  %v6221_v26 = vld [vmem:[#allocation5 + $0x190] sm:$0xf0]  ;;  %v2858_v15 = vmax.f32 %v2730_v31, 0.0  ;;  %v10912_v40 = vmul.f32 %v10646_v9, %v11800_v53 }
 0x56f   :  { %v7293_v42 = vld [vmem:[#allocation5 + $0x184] sm:$0xf]  ;;  %4886 = vmatpush.bf16.msra.mxu2 %v7004_v39  ;;  %v6988_v27 = vor.u32 %v10874_v24, %v10872_v36  ;;  %v10916_v16 = vld [vmem:[#allocation5 + $0x74c] sm:$0xf0]  ;;  %v10918_v6 = vld [vmem:[#allocation5 + $0x48] sm:$0xf]  ;;  %v6100_v53 = vor.u32 %v10882_v61, %v10880_v13  ;;  %v10931_v39 = vmax.f32 %v10847_v14, %v3144_v44  ;;  %v6096_v57 = vor.u32 %v7261_v2, %v6093_v5 }
 0x570   :  { %v10920_v41 = vld [vmem:[#allocation5 + $0x54] sm:$0xf0]  ;;  %5003 = vmatpush.bf16.msra.mxu0 %v6116_v43  ;;  %v7257_v9 = vld [vmem:[#allocation5 + $0x64] sm:$0xf]  ;;  %v6077_v12 = vld [vmem:[#allocation5 + $0x70] sm:$0xf0]  ;;  %v3019_v31 = vmax.f32 %v3018_v29, %v2858_v15  ;;  %v6224_v61 = vor.u32 %v7293_v42, %v6221_v26  ;;  %v2762_v14 = vadd.f32 %v10412_v18, %v2617_v49  ;;  %v6956_v58 = vor.u32 %v10916_v16, %v10905_v32 }
 0x571   :  { %v10928_v36 = vld [vmem:[#allocation5 + $0x164] sm:$0xf]  ;;  %v2866_v24 = vmax.f32 %v2738_v19, 0.0  ;;  %v6205_v38 = vld [vmem:[#allocation5 + $0x170] sm:$0xf0]  ;;  %4912 = vmatpush.bf16.msrb.mxu1 %v6240_v47  ;;  %v2874_v44 = vmax.f32 %v2746_v55, 0.0  ;;  %v6068_v17 = vor.u32 %v10920_v41, %v10918_v6  ;;  %v2570_v5 = vmul.f32 %v10590_v60, %v10802_v23 }
 0x572   :  { %4899 = vmatpush.bf16.msra.mxu3 %v6112_v51  ;;  %v10937_v43 = vld [vmem:[#allocation5 + $0x720] sm:$0xf]  ;;  %v10939_v13 = vld [vmem:[#allocation5 + $0x72c] sm:$0xf0]  ;;  %v10941_v19 = vld [vmem:[#allocation5 + $0x28] sm:$0xf]  ;;  %v2770_v51 = vadd.f32 %v10412_v18, %v2625_v21  ;;  %v2578_v42 = vmul.f32 %v10590_v60, %v10806_v52  ;;  %v2586_v32 = vmul.f32 %v10590_v60, %v10810_v4  ;;  %v6080_v49 = vor.u32 %v7257_v9, %v6077_v12 }
 0x573   :  { %v10943_v29 = vld [vmem:[#allocation5 + $0x34] sm:$0xf0]  ;;  %v3020_v25 = vmax.f32 %v3019_v31, %v2866_v24  ;;  %4887 = vmatpush.bf16.msra.mxu2 %v6988_v27  ;;  %v7253_v59 = vld [vmem:[#allocation5 + $0x44] sm:$0xf]  ;;  %v6061_v8 = vld [vmem:[#allocation5 + $0x50] sm:$0xf0]  ;;  %v6208_v55 = vor.u32 %v10928_v36, %v6205_v38  ;;  %v6940_v18 = vor.u32 %v10939_v13, %v10937_v43  ;;  %v2594_v23 = vmul.f32 %v10590_v60, %v10816_v7 }
 0x574   :  { %v2882_v26 = vmax.f32 %v2754_v50, 0.0  ;;  %5004 = vmatpush.bf16.msra.mxu0 %v6100_v53  ;;  %v10951_v47 = vld [vmem:[#allocation5 + $0x144] sm:$0xf]  ;;  %v6189_v15 = vld [vmem:[#allocation5 + $0x150] sm:$0xf0]  ;;  %v6052_v52 = vor.u32 %v10943_v29, %v10941_v19  ;;  %v6064_v4 = vor.u32 %v7253_v59, %v6061_v8  ;;  %v2890_v41 = vmax.f32 %v2762_v14, 0.0 }
 0x575   :  { %v3021_v2 = vmax.f32 %v3020_v25, %v2874_v44  ;;  %v10962_v27 = vld [vmem:[#allocation5 + $0x700] sm:$0xf]  ;;  %v10964_v16 = vld [vmem:[#allocation5 + $0x70c] sm:$0xf0]  ;;  %4913 = vmatpush.bf16.msrb.mxu1 %v6224_v61  ;;  %v10970_v6 = vld [vmem:[#allocation5 + $0x8] sm:$0xf]  ;;  %v2602_v12 = vmul.f32 %v10590_v60, %v10820_v62  ;;  %v2715_v36 = vadd.f32 %v10606_v1, %v2570_v5  ;;  %v2723_v7 = vadd.f32 %v10606_v1, %v2578_v42 }
 0x576   :  { %4900 = vmatpush.bf16.msra.mxu3 %v6096_v57  ;;  %v10972_v50 = vld [vmem:[#allocation5 + $0x14] sm:$0xf0]  ;;  %v7249_v53 = vld [vmem:[#allocation5 + $0x24] sm:$0xf]  ;;  %v6045_v9 = vld [vmem:[#allocation5 + $0x30] sm:$0xf0]  ;;  %v2731_v24 = vadd.f32 %v10606_v1, %v2586_v32  ;;  %v6192_v31 = vor.u32 %v10951_v47, %v6189_v15  ;;  %v6924_v57 = vor.u32 %v10964_v16, %v10962_v27  ;;  %v2610_v62 = vmul.f32 %v10590_v60, %v10824_v33 }
 0x577   :  { %v3022_v21 = vmax.f32 %v3021_v2, %v2882_v26  ;;  %4888 = vmatpush.bf16.msra.mxu2 %v6972_v54  ;;  %v2898_v54 = vmax.f32 %v2770_v51, 0.0  ;;  %v7281_v43 = vld [vmem:[#allocation5 + $0x124] sm:$0xf]  ;;  %v6173_v13 = vld [vmem:[#allocation5 + $0x130] sm:$0xf0]  ;;  %v2739_v61 = vadd.f32 %v10606_v1, %v2594_v23  ;;  %v2843_v19 = vmax.f32 %v2715_v36, 0.0 }
 0x578   :  { %5005 = vmatpush.bf16.msra.mxu0 %v6084_v0  ;;  %v2851_v29 = vmax.f32 %v2723_v7, 0.0  ;;  %v6036_v0 = vor.u32 %v10972_v50, %v10970_v6  ;;  %v6048_v44 = vor.u32 %v7249_v53, %v6045_v9  ;;  %v2618_v25 = vmul.f32 %v10590_v60, %v10829_v30  ;;  %v7245_v8 = vld [vmem:[#allocation5 + $0x4] sm:$0xf]  ;;  %v6029_v51 = vld [vmem:[#allocation5 + $0x10] sm:$0xf0] }
 0x579   :  { %v3023_v38 = vmax.f32 %v3022_v21, %v2890_v41  ;;  %4914 = vmatpush.bf16.msrb.mxu1 %v6208_v55  ;;  %v6176_v59 = vor.u32 %v7281_v43, %v6173_v13  ;;  %v2747_v26 = vadd.f32 %v10606_v1, %v2602_v12  ;;  %v2859_v33 = vmax.f32 %v2731_v24, 0.0  ;;  %v7277_v30 = vld [vmem:[#allocation5 + $0x104] sm:$0xf] }
 0x57a   :  { %4901 = vmatpush.bf16.msra.mxu3 %v6080_v49  ;;  %v3031_v47 = vmax.f32 %v2843_v19, %v2851_v29  ;;  %v2626_v5 = vmul.f32 %v10590_v60, %v10833_v63  ;;  %v2571_v42 = vmul.f32 %v10662_v3, %v10844_v48  ;;  %v2579_v32 = vmul.f32 %v10662_v3, %v10851_v22 }
 0x57b   :  { %v3024_v14 = vmax.f32 %v3023_v38, %v2898_v54  ;;  %4889 = vmatpush.bf16.msra.mxu2 %v6956_v58  ;;  %v6157_v58 = vld [vmem:[#allocation5 + $0x110] sm:$0xf0]  ;;  %v2755_v49 = vadd.f32 %v10606_v1, %v2610_v62  ;;  %v2867_v55 = vmax.f32 %v2739_v61, 0.0  ;;  %v6032_v16 = vor.u32 %v7245_v8, %v6029_v51 }
 0x57c   :  { %5006 = vmatpush.bf16.msra.mxu0 %v6068_v17  ;;  %v3032_v15 = vmax.f32 %v3031_v47, %v2859_v33  ;;  %v2587_v17 = vmul.f32 %v10662_v3, %v10862_v10  ;;  %v2763_v60 = vadd.f32 %v10606_v1, %v2618_v25  ;;  %v2595_v63 = vmul.f32 %v10662_v3, %v10866_v46  ;;  %v11803_v33 = vld [vmem:[#allocation96_spill] sm:$0xff] }
 0x57d   :  { %v3025_v2 = vrot.slane %v3024_v14, 4  ;;  %4915 = vmatpush.bf16.msrb.mxu1 %v6192_v31  ;;  %v2875_v48 = vmax.f32 %v2747_v26, 0.0  ;;  %v2716_v23 = vadd.f32 %v10667_v20, %v2571_v42  ;;  %v6160_v41 = vor.u32 %v7277_v30, %v6157_v58  ;;  %v7404_v42 = vld [vmem:[#allocation5 + $0x4f4] sm:$0xf0] }
 0x57e   :  { %4902 = vmatpush.bf16.msra.mxu3 %v6064_v4  ;;  %v3033_v22 = vmax.f32 %v3032_v15, %v2867_v55  ;;  %v2724_v4 = vadd.f32 %v10667_v20, %v2579_v32  ;;  %v2603_v10 = vmul.f32 %v10662_v3, %v10870_v28  ;;  %v2732_v21 = vadd.f32 %v10667_v20, %v2587_v17  ;;  %v11804_v15 = vld [vmem:[#allocation97_spill] sm:$0xff] }
 0x57f   :  { %v3026_v27 = vmax.f32 %v3024_v14, %v3025_v2  ;;  %4890 = vmatpush.bf16.msra.mxu2 %v6940_v18  ;;  %v2771_v50 = vadd.f32 %v10606_v1, %v2626_v5  ;;  %v2883_v53 = vmax.f32 %v2755_v49, 0.0  ;;  %v2611_v18 = vmul.f32 %v10662_v3, %v10899_v34  ;;  %v6659_v5 = vld [vmem:[#allocation5 + $0x4e8] sm:$0xf] }
 0x580   :  { %5007 = vmatpush.bf16.msra.mxu0 %v6052_v52  ;;  %v3034_v46 = vmax.f32 %v3033_v22, %v2875_v48  ;;  %v2740_v12 = vadd.f32 %v10667_v20, %v2595_v63  ;;  %v2844_v52 = vmax.f32 %v2716_v23, 0.0  ;;  %v2852_v36 = vmax.f32 %v2724_v4, 0.0  ;;  %v7333_v63 = vld [vmem:[#allocation5 + $0x2c4] sm:$0xf]  ;;  %v6381_v48 = vld [vmem:[#allocation5 + $0x2d0] sm:$0xf0] }
 0x581   :  { %v3027_v6 = vrot.slane %v3026_v27, 2  ;;  %4916 = vmatpush.bf16.msrb.mxu1 %v6176_v59  ;;  %v3186_v28 = vpack.c.bf16 %v10790_v35, %v10790_v35  ;;  %v2891_v7 = vmax.f32 %v2763_v60, 0.0  ;;  %v2619_v1 = vmul.f32 %v10662_v3, %v10903_v56 }
 0x582   :  { %4903 = vmatpush.bf16.msra.mxu3 %v6048_v44  ;;  %v3035_v24 = vmax.f32 %v3034_v46, %v2883_v53  ;;  %v2748_v54 = vadd.f32 %v10667_v20, %v2603_v10  ;;  %v2860_v34 = vmax.f32 %v2732_v21, 0.0  ;;  %v3044_v38 = vmax.f32 %v2844_v52, %v2852_v36  ;;  %v7400_v53 = vld [vmem:[#allocation5 + $0x4d4] sm:$0xf0] }
 0x583   :  { %v3028_v9 = vmax.f32 %v3026_v27, %v3027_v6  ;;  %4891 = vmatpush.bf16.msra.mxu2 %v6924_v57  ;;  %v3156_v43 = vmax.f32 %v10886_v11, %v3155_v37  ;;  %v2899_v57 = vmax.f32 %v2771_v50, 0.0  ;;  %v2627_v35 = vmul.f32 %v10662_v3, %v10912_v40  ;;  %v7337_v11 = vld [vmem:[#allocation5 + $0x2e4] sm:$0xf]  ;;  %v6397_v37 = vld [vmem:[#allocation5 + $0x2f0] sm:$0xf0]  ;;  %v11802_v40 = vld [vmem:[#allocation61_spill] sm:$0xff] }
 0x584   :  { %5008 = vmatpush.bf16.msra.mxu0 %v6036_v0  ;;  %v3036_v13 = vmax.f32 %v3035_v24, %v2891_v7  ;;  %v2756_v56 = vadd.f32 %v10667_v20, %v2611_v18  ;;  %v2868_v61 = vmax.f32 %v2740_v12, 0.0  ;;  %v3045_v19 = vmax.f32 %v3044_v38, %v2860_v34  ;;  %v11801_v3 = vld [vmem:[#allocation70_spill] sm:$0xff]  ;;  %v11805_v27 = vld [vmem:[#allocation20_spill] sm:$0xff]  ;;  %v11808_v24 = vld [vmem:[#allocation91_spill] sm:$0xff] }
 0x585   :  { %v3029_v31 = vrot.slane %v3028_v9, 1  ;;  %4917 = vmatpush.bf16.msrb.mxu1 %v6160_v41  ;;  %v3168_v29 = vrot.slane %v10794_v45, 4  ;;  %v3146_v0 = vrot.slane %v10931_v39, 1  ;;  %v3484_v14 = vunpack.c.l.b16 %v3186_v28  ;;  %v6643_v50 = vld [vmem:[#allocation5 + $0x4c8] sm:$0xf]  ;;  %v11806_v28 = vld [vmem:[#allocation62_spill] sm:$0xff] }
 0x586   :  { %4904 = vmatpush.bf16.msra.mxu3 %v6032_v16  ;;  %v3037_v44 = vmax.f32 %v3036_v13, %v2899_v57  ;;  %v2764_v59 = vadd.f32 %v10667_v20, %v2619_v1  ;;  %v2876_v8 = vmax.f32 %v2748_v54, 0.0  ;;  %v3046_v51 = vmax.f32 %v3045_v19, %v2868_v61  ;;  %v11807_v7 = vld [vmem:[#allocation36_spill] sm:$0xff]  ;;  %v6365_v38 = vld [vmem:[#allocation5 + $0x2b0] sm:$0xf0]  ;;  %v7396_v61 = vld [vmem:[#allocation5 + $0x4b4] sm:$0xf0] }
 0x587   :  { %v3030_v62 = vmax.f32 %v3028_v9, %v3029_v31  ;;  %v2459_v26 = vmul.f32 %v11802_v40, %v11801_v3  ;;  %v2467_v47 = vmul.f32 %v11802_v40, %v11803_v33  ;;  %v3157_v2 = vrot.slane %v3156_v43, 2  ;;  %v3446_v31 = vld [vmem:[%s11225_s14] sm:$0xf]  ;;  %v7329_v34 = vld [vmem:[#allocation5 + $0x2a4] sm:$0xf]  ;;  %v11810_v19 = vld [vmem:[#allocation37_spill] sm:$0xff] }
 0x588   :  { %v3038_v32 = vrot.slane %v3037_v44, 4  ;;  %v2772_v58 = vadd.f32 %v10667_v20, %v2627_v35  ;;  %v2884_v49 = vmax.f32 %v2756_v56, 0.0  ;;  %v3047_v55 = vmax.f32 %v3046_v51, %v2876_v8  ;;  %v6627_v56 = vld [vmem:[#allocation5 + $0x4a8] sm:$0xf] }
 0x589   :  { %v3178_v25 = vpack.c.bf16 %v3030_v62, %v3030_v62  ;;  %v2475_v17 = vmul.f32 %v11802_v40, %v11804_v15  ;;  %v11034_v16 = vmul.f32 %v11802_v40, %v11805_v27  ;;  %v6400_v60 = vor.u32 %v7337_v11, %v6397_v37 }
 0x58a   :  { %v3039_v22 = vmax.f32 %v3037_v44, %v3038_v32  ;;  %v6660_v4 = vor.u32 %v7404_v42, %v6659_v5  ;;  %v2892_v6 = vmax.f32 %v2764_v59, 0.0  ;;  %v3048_v41 = vmax.f32 %v3047_v55, %v2884_v49  ;;  %v11811_v44 = vld [vmem:[#allocation66_spill] sm:$0xff]  ;;  %v7369_v49 = vld [vmem:[#allocation5 + $0x3e4] sm:$0xf] }
 0x58b   :  { %v3476_v30 = vunpack.c.l.b16 %v3178_v25  ;;  %v3147_v20 = vmax.f32 %v10931_v39, %v3146_v0  ;;  %v3158_v10 = vmax.f32 %v3156_v43, %v3157_v2  ;;  %v11041_v18 = vmax.f32 %v10794_v45, %v3168_v29  ;;  %v11809_v43 = vld [vmem:[#allocation73_spill] sm:$0xff]  ;;  %v6525_v55 = vld [vmem:[#allocation5 + $0x3f0] sm:$0xf0] }
 0x58c   :  { %v3040_v46 = vrot.slane %v3039_v22, 2  ;;  %v6384_v9 = vor.u32 %v7333_v63, %v6381_v48  ;;  %v2900_v12 = vmax.f32 %v2772_v58, 0.0  ;;  %v3049_v52 = vmax.f32 %v3048_v41, %v2892_v6 }
 0x58d   :  { %v3493_v23 = vsel %vm3488_vm1, %v3484_v14, %v3476_v30  ;;  %v2572_v39 = vmul.f32 %v11807_v7, %v11806_v28  ;;  %v2580_v1 = vmul.f32 %v11807_v7, %v11808_v24  ;;  %v6644_v45 = vor.u32 %v7400_v53, %v6643_v50 }
 0x58e   :  { %v11038_v21 = vpack.c.b16 %v3493_v23, %v3493_v23  ;;  %v3041_v36 = vmax.f32 %v3039_v22, %v3040_v46  ;;  %v3050_v54 = vmax.f32 %v3049_v52, %v2900_v12  ;;  %v2588_v57 = vmul.f32 %v11807_v7, %v11809_v43  ;;  %v11812_v22 = vld [vmem:[#allocation52_spill] sm:$0xff]  ;;  %v6509_v52 = vld [vmem:[#allocation5 + $0x3d0] sm:$0xf0] }
 0x58f   :  { %v3159_v13 = vrot.slane %v3158_v10, 1  ;;  %v3187_v62 = vpack.c.bf16 %v3147_v20, %v3147_v20  ;;  %v2596_v29 = vmul.f32 %v11807_v7, %v11810_v19  ;;  %v2604_v14 = vmul.f32 %v11807_v7, %v2459_v26  ;;  %v7365_v12 = vld [vmem:[#allocation5 + $0x3c4] sm:$0xf]  ;;  %v6781_v19 = vld [vmem:[#allocation5 + $0x5f0] sm:$0xf0] }
 0x590   :  { %4853 = vmatmul.bf16.vlgmr.msrb.gmra.mxu2 %v11038_v21  ;;  %4957 = vmatmul.bf16.vlgmr.msrb.gmra.mxu0 %v11038_v21  ;;  %v3042_v35 = vrot.slane %v3041_v36, 1  ;;  %v3051_v0 = vrot.slane %v3050_v54, 4  ;;  %v2717_v25 = vadd.f32 %v11811_v44, %v2572_v39  ;;  %v2725_v11 = vadd.f32 %v11811_v44, %v2580_v1  ;;  %v7325_v39 = vld [vmem:[#allocation5 + $0x284] sm:$0xf] }
 0x591   :  { %4923 = vmatpush.bf16.msrb.mxu2 %v6400_v60  ;;  %5053 = vmatpush.bf16.msrb.mxu0 %v6660_v4  ;;  %v3448_v37 = vperm.slane %v3446_v31, 0  ;;  %v2612_v8 = vmul.f32 %v11807_v7, %v2467_v47  ;;  %v2733_v51 = vadd.f32 %v11811_v44, %v2588_v57  ;;  %v6368_v40 = vor.u32 %v7329_v34, %v6365_v38  ;;  %v6349_v31 = vld [vmem:[#allocation5 + $0x290] sm:$0xf0] }
 0x592   :  { %v3043_v59 = vmax.f32 %v3041_v36, %v3042_v35  ;;  %v3052_v3 = vmax.f32 %v3050_v54, %v3051_v0  ;;  %v6628_v33 = vor.u32 %v7396_v61, %v6627_v56  ;;  %v2845_v2 = vmax.f32 %v2717_v25, 0.0  ;;  %v7392_v54 = vld [vmem:[#allocation5 + $0x494] sm:$0xf0]  ;;  %v7433_v61 = vld [vmem:[#allocation5 + $0x5e4] sm:$0xf] }
 0x593   :  { %v3485_v42 = vunpack.c.l.b16 %v3187_v62  ;;  %v2741_v26 = vadd.f32 %v11811_v44, %v2596_v29  ;;  %v2853_v32 = vmax.f32 %v2725_v11, 0.0  ;;  %v3160_v30 = vmax.f32 %v3158_v10, %v3159_v13  ;;  %v11813_v25 = vld [vmem:[#allocation98_spill] sm:$0xff] }
 0x594   :  { %v3179_v5 = vpack.c.bf16 %v3043_v59, %v3043_v59  ;;  %v3053_v58 = vrot.slane %v3052_v3, 2  ;;  %v2620_v15 = vmul.f32 %v11807_v7, %v2475_v17  ;;  %v2749_v47 = vadd.f32 %v11811_v44, %v2604_v14 }
 0x595   :  { %4924 = vmatpush.bf16.msrb.mxu2 %v6384_v9  ;;  %5054 = vmatpush.bf16.msrb.mxu0 %v6644_v45  ;;  %v2757_v60 = vadd.f32 %v11811_v44, %v2612_v8  ;;  %v2861_v63 = vmax.f32 %v2733_v51, 0.0  ;;  %v3057_v48 = vmax.f32 %v2845_v2, %v2853_v32  ;;  %v4803_v23 = vadd.f32 %v11812_v22, %v3448_v37  ;;  %v6611_v45 = vld [vmem:[#allocation5 + $0x488] sm:$0xf]  ;;  %v7425_v22 = vld [vmem:[#allocation5 + $0x5a4] sm:$0xf] }
 0x596   :  { %v3477_v27 = vunpack.c.l.b16 %v3179_v5  ;;  %v3054_v4 = vmax.f32 %v3052_v3, %v3053_v58  ;;  %v2628_v6 = vmul.f32 %v11807_v7, %v11034_v16  ;;  %v6528_v20 = vor.u32 %v7369_v49, %v6525_v55 }
 0x597   :  { %v2869_v10 = vmax.f32 %v2741_v26, 0.0  ;;  %v3058_v17 = vmax.f32 %v3057_v48, %v2861_v63  ;;  %v3188_v46 = vpack.c.bf16 %v3160_v30, %v3160_v30  ;;  %v2765_v36 = vadd.f32 %v11811_v44, %v2620_v15  ;;  %v7361_v63 = vld [vmem:[#allocation5 + $0x3a4] sm:$0xf]  ;;  %v6493_v48 = vld [vmem:[#allocation5 + $0x3b0] sm:$0xf0] }
 0x598   :  { %v3494_v41 = vsel %vm3488_vm1, %v3485_v42, %v3477_v27  ;;  %v3055_v53 = vrot.slane %v3054_v4, 1  ;;  %v4815_v9 = vpop.f32.mrf.mxu2  ;;  %v2877_v24 = vmax.f32 %v2749_v47, 0.0  ;;  %v2885_v1 = vmax.f32 %v2757_v60, 0.0 }
 0x599   :  { %4925 = vmatpush.bf16.msrb.mxu2 %v6368_v40  ;;  %5055 = vmatpush.bf16.msrb.mxu0 %v6628_v33  ;;  %v11069_v50 = vpack.c.b16 %v3494_v41, %v3494_v41  ;;  %v11072_v28 = vadd.f32 %v4815_v9, %v4803_v23  ;;  %v3059_v16 = vmax.f32 %v3058_v17, %v2869_v10  ;;  %v3486_v62 = vunpack.c.l.b16 %v3188_v46  ;;  %v7429_v40 = vld [vmem:[#allocation5 + $0x5c4] sm:$0xf]  ;;  %v6765_v33 = vld [vmem:[#allocation5 + $0x5d0] sm:$0xf0]  ;;  %v11814_v10 = vld [vmem:[#allocation27_spill] sm:$0xff] }
 0x59a   :  { %v3056_v7 = vmax.f32 %v3054_v4, %v3055_v53  ;;  %v2773_v34 = vadd.f32 %v11811_v44, %v2628_v6  ;;  %v6512_v38 = vor.u32 %v7365_v12, %v6509_v52  ;;  %v6352_v43 = vor.u32 %v7325_v39, %v6349_v31  ;;  %v6749_v4 = vld [vmem:[#allocation5 + $0x5b0] sm:$0xf0]  ;;  %v7321_v41 = vld [vmem:[#allocation5 + $0x264] sm:$0xf]  ;;  %v6595_v9 = vld [vmem:[#allocation5 + $0x468] sm:$0xf] }
 0x59b   :  { %4866 = vmatmul.bf16.vlgmr.msrb.gmra.mxu3 %v11069_v50  ;;  %v6612_v57 = vor.u32 %v7392_v54, %v6611_v45  ;;  %v3060_v13 = vmax.f32 %v3059_v16, %v2877_v24  ;;  %v3170_v56 = vrot.slane %v11041_v18, 2  ;;  %v2893_v29 = vmax.f32 %v2765_v36, 0.0  ;;  %v7388_v12 = vld [vmem:[#allocation5 + $0x474] sm:$0xf0]  ;;  %v7357_v52 = vld [vmem:[#allocation5 + $0x384] sm:$0xf] }
 0x59c   :  { %4936 = vmatpush.bf16.msrb.mxu3 %v6528_v20  ;;  %v3180_v35 = vpack.c.bf16 %v3056_v7, %v3056_v7  ;;  %v2901_v44 = vmax.f32 %v2773_v34, 0.0  ;;  %v6784_v59 = vor.u32 %v7433_v61, %v6781_v19  ;;  %v6768_v42 = vor.u32 %v7429_v40, %v6765_v33  ;;  %v6333_v20 = vld [vmem:[#allocation5 + $0x270] sm:$0xf0]  ;;  %v7421_v24 = vld [vmem:[#allocation5 + $0x584] sm:$0xf] }
 0x59d   :  { %4926 = vmatpush.bf16.msrb.mxu2 %v6352_v43  ;;  %5056 = vmatpush.bf16.msrb.mxu0 %v6612_v57  ;;  %v3061_v0 = vmax.f32 %v3060_v13, %v2885_v1  ;;  %v3171_v51 = vmax.f32 %v11041_v18, %v3170_v56  ;;  %v6496_v23 = vor.u32 %v7361_v63, %v6493_v48  ;;  %v6477_v39 = vld [vmem:[#allocation5 + $0x390] sm:$0xf0]  ;;  %v7317_v31 = vld [vmem:[#allocation5 + $0x244] sm:$0xf]  ;;  %v6579_v54 = vld [vmem:[#allocation5 + $0x448] sm:$0xf] }
 0x59e   :  { %v3478_v14 = vunpack.c.l.b16 %v3180_v35  ;;  %v6752_v17 = vor.u32 %v7425_v22, %v6749_v4  ;;  %v6336_v46 = vor.u32 %v7321_v41, %v6333_v20  ;;  %v6596_v36 = vor.u32 %v7388_v12, %v6595_v9  ;;  %v6733_v1 = vld [vmem:[#allocation5 + $0x590] sm:$0xf0]  ;;  %v7384_v43 = vld [vmem:[#allocation5 + $0x454] sm:$0xf0]  ;;  %v7353_v35 = vld [vmem:[#allocation5 + $0x364] sm:$0xf] }
 0x59f   :  { %v3062_v11 = vmax.f32 %v3061_v0, %v2893_v29  ;;  %v3172_v26 = vrot.slane %v3171_v51, 1  ;;  %v6480_v16 = vor.u32 %v7357_v52, %v6477_v39  ;;  %v6736_v7 = vor.u32 %v7421_v24, %v6733_v1  ;;  %v6317_v45 = vld [vmem:[#allocation5 + $0x250] sm:$0xf0]  ;;  %v7417_v56 = vld [vmem:[#allocation5 + $0x564] sm:$0xf] }
 0x5a0   :  { %5009 = vmatmul.bf16.vlgmr.msra.gmra.mxu0 %v11813_v25  ;;  %4937 = vmatpush.bf16.msrb.mxu3 %v6512_v38  ;;  %v3495_v37 = vsel %vm3488_vm1, %v3486_v62, %v3478_v14  ;;  %v4817_v8 = vpop.f32.mrf.mxu2  ;;  %v6320_v38 = vor.u32 %v7317_v31, %v6317_v45  ;;  %v6580_v13 = vor.u32 %v7384_v43, %v6579_v54  ;;  %v6461_v62 = vld [vmem:[#allocation5 + $0x370] sm:$0xf0]  ;;  %v7313_v29 = vld [vmem:[#allocation5 + $0x224] sm:$0xf]  ;;  %v7270_v20 = vld [vmem:[#allocation5 + $0xcc] sm:$0xf] }
 0x5a1   :  { %v11080_v3 = vpack.c.b16 %v3495_v37, %v3495_v37  ;;  %v3063_v2 = vmax.f32 %v3062_v11, %v2901_v44  ;;  %v3173_v58 = vmax.f32 %v3171_v51, %v3172_v26  ;;  %4927 = vmatpush.bf16.msrb.mxu2 %v6336_v46  ;;  %5057 = vmatpush.bf16.msrb.mxu0 %v6596_v36  ;;  %v6717_v19 = vld [vmem:[#allocation5 + $0x570] sm:$0xf0]  ;;  %v6563_v11 = vld [vmem:[#allocation5 + $0x428] sm:$0xf]  ;;  %v7380_v37 = vld [vmem:[#allocation5 + $0x434] sm:$0xf0] }
 0x5a2   :  { %v6464_v61 = vor.u32 %v7353_v35, %v6461_v62  ;;  %v6301_v0 = vld [vmem:[#allocation5 + $0x230] sm:$0xf0]  ;;  %v6720_v14 = vor.u32 %v7417_v56, %v6717_v19  ;;  %v6564_v8 = vor.u32 %v7380_v37, %v6563_v11  ;;  %v7413_v51 = vld [vmem:[#allocation5 + $0x544] sm:$0xf]  ;;  %v6133_v46 = vld [vmem:[#allocation5 + $0xd8] sm:$0xf0] }
 0x5a3   :  { %4879 = vmatmul.bf16.vlgmr.msra.gmra.mxu1 %v11080_v3  ;;  %v3064_v5 = vrot.slane %v3063_v2, 4  ;;  %v3189_v15 = vpack.c.bf16 %v3173_v58, %v3173_v58  ;;  %v6304_v44 = vor.u32 %v7313_v29, %v6301_v0  ;;  %v6701_v40 = vld [vmem:[#allocation5 + $0x550] sm:$0xf0]  ;;  %v7409_v22 = vld [vmem:[#allocation5 + $0x524] sm:$0xf]  ;;  %v6136_v1 = vor.u32 %v7270_v20, %v6133_v46  ;;  %v11815_v43 = vld [vmem:[#allocation77_spill] sm:$0xff] }
 0x5a4   :  { %4962 = vmatpush.bf16.msra.mxu1 %v6784_v59  ;;  %4938 = vmatpush.bf16.msrb.mxu3 %v6496_v23  ;;  %v7349_v59 = vld [vmem:[#allocation5 + $0x344] sm:$0xf]  ;;  %v6704_v26 = vor.u32 %v7413_v51, %v6701_v40  ;;  %v6909_v58 = vld [vmem:[#allocation5 + $0x6f0] sm:$0xf0]  ;;  %v7308_v31 = vld [vmem:[#allocation5 + $0x1f4] sm:$0xf0] }
 0x5a5   :  { %v3065_v32 = vmax.f32 %v3063_v2, %v3064_v5  ;;  %v3487_v27 = vunpack.c.l.b16 %v3189_v15  ;;  %4928 = vmatpush.bf16.msrb.mxu2 %v6320_v38  ;;  %5058 = vmatpush.bf16.msrb.mxu0 %v6580_v13  ;;  %v7309_v2 = vld [vmem:[#allocation5 + $0x204] sm:$0xf]  ;;  %v6285_v5 = vld [vmem:[#allocation5 + $0x210] sm:$0xf0]  ;;  %v7274_v15 = vld [vmem:[#allocation5 + $0xec] sm:$0xf] }
 0x5a6   :  { %v6429_v48 = vld [vmem:[#allocation5 + $0x330] sm:$0xf0]  ;;  %v7341_v9 = vld [vmem:[#allocation5 + $0x304] sm:$0xf]  ;;  %v7266_v38 = vld [vmem:[#allocation5 + $0xac] sm:$0xf] }
 0x5a7   :  { %v3066_v30 = vrot.slane %v3065_v32, 2  ;;  %v6685_v23 = vld [vmem:[#allocation5 + $0x530] sm:$0xf0]  ;;  %v7405_v52 = vld [vmem:[#allocation5 + $0x504] sm:$0xf] }
 0x5a8   :  { %4963 = vmatpush.bf16.msra.mxu1 %v6768_v42  ;;  %4939 = vmatpush.bf16.msrb.mxu3 %v6480_v16  ;;  %v6547_v42 = vld [vmem:[#allocation5 + $0x408] sm:$0xf]  ;;  %v6893_v41 = vld [vmem:[#allocation5 + $0x6d0] sm:$0xf0]  ;;  %v7497_v39 = vld [vmem:[#allocation5 + $0x7e4] sm:$0xf] }
 0x5a9   :  { %v3067_v49 = vmax.f32 %v3065_v32, %v3066_v30  ;;  %v7376_v32 = vld [vmem:[#allocation5 + $0x414] sm:$0xf0]  ;;  %v7465_v30 = vld [vmem:[#allocation5 + $0x6e4] sm:$0xf]  ;;  %4929 = vmatpush.bf16.msrb.mxu2 %v6304_v44  ;;  %5059 = vmatpush.bf16.msrb.mxu0 %v6564_v8  ;;  %v6413_v12 = vld [vmem:[#allocation5 + $0x310] sm:$0xf0] }
 0x5aa   :  { %v6669_v36 = vld [vmem:[#allocation5 + $0x510] sm:$0xf0]  ;;  %v6416_v45 = vor.u32 %v7341_v9, %v6413_v12  ;;  %v7457_v54 = vld [vmem:[#allocation5 + $0x6a4] sm:$0xf]  ;;  %v6117_v62 = vld [vmem:[#allocation5 + $0xb8] sm:$0xf0] }
 0x5ab   :  { %4905 = vmatmul.bf16.vlgmr.msra.gmra.mxu3 %v11813_v25  ;;  %v3068_v55 = vrot.slane %v3067_v49, 1  ;;  %v7037_v16 = vld [vmem:[#allocation5 + $0x7f0] sm:$0xf0]  ;;  %v6672_v13 = vor.u32 %v7405_v52, %v6669_v36  ;;  %v6120_v0 = vor.u32 %v7266_v38, %v6117_v62  ;;  %v7304_v44 = vld [vmem:[#allocation5 + $0x1d4] sm:$0xf0] }
 0x5ac   :  { %4964 = vmatpush.bf16.msra.mxu1 %v6752_v17  ;;  %4940 = vmatpush.bf16.msrb.mxu3 %v6464_v61  ;;  %v6688_v17 = vor.u32 %v7409_v22, %v6685_v23  ;;  %v7040_v35 = vor.u32 %v7497_v39, %v7037_v16  ;;  %v7493_v61 = vld [vmem:[#allocation5 + $0x7c4] sm:$0xf]  ;;  %v7021_v19 = vld [vmem:[#allocation5 + $0x7d0] sm:$0xf0]  ;;  %v6101_v8 = vld [vmem:[#allocation5 + $0x98] sm:$0xf0] }
 0x5ad   :  { %v3069_v18 = vmax.f32 %v3067_v49, %v3068_v55  ;;  %v6288_v55 = vor.u32 %v7309_v2, %v6285_v5  ;;  %v7453_v11 = vld [vmem:[#allocation5 + $0x684] sm:$0xf]  ;;  %v6861_v37 = vld [vmem:[#allocation5 + $0x690] sm:$0xf0]  ;;  %v7296_v22 = vld [vmem:[#allocation5 + $0x194] sm:$0xf0] }
 0x5ae   :  { %v7489_v40 = vld [vmem:[#allocation5 + $0x7a4] sm:$0xf]  ;;  %v6864_v2 = vor.u32 %v7453_v11, %v6861_v37  ;;  %v6069_v20 = vld [vmem:[#allocation5 + $0x58] sm:$0xf0]  ;;  %v6973_v52 = vld [vmem:[#allocation5 + $0x770] sm:$0xf0] }
 0x5af   :  { %v3181_v47 = vpack.c.bf16 %v3069_v18, %v3069_v18  ;;  %v6548_v18 = vor.u32 %v7376_v32, %v6547_v42  ;;  %4930 = vmatpush.bf16.msrb.mxu2 %v6288_v55  ;;  %v6243_v42 = vld [vmem:[#allocation5 + $0x1a8] sm:$0xf]  ;;  %v7449_v32 = vld [vmem:[#allocation5 + $0x664] sm:$0xf]  ;;  %v6085_v55 = vld [vmem:[#allocation5 + $0x78] sm:$0xf0] }
 0x5b0   :  { %4965 = vmatpush.bf16.msra.mxu1 %v6736_v7  ;;  %v6275_v7 = vld [vmem:[#allocation5 + $0x1e8] sm:$0xf]  ;;  %v7445_v23 = vld [vmem:[#allocation5 + $0x644] sm:$0xf]  ;;  %v6957_v38 = vld [vmem:[#allocation5 + $0x750] sm:$0xf0] }
 0x5b1   :  { %v3479_v60 = vunpack.c.l.b16 %v3181_v47  ;;  %v6149_v47 = vld [vmem:[#allocation5 + $0xf8] sm:$0xf0]  ;;  %5060 = vmatpush.bf16.msrb.mxu0 %v6548_v18  ;;  %v6276_v56 = vor.u32 %v7308_v31, %v6275_v7  ;;  %v7481_v12 = vld [vmem:[#allocation5 + $0x764] sm:$0xf]  ;;  %v6813_v7 = vld [vmem:[#allocation5 + $0x630] sm:$0xf0] }
 0x5b2   :  { %v6152_v63 = vor.u32 %v7274_v15, %v6149_v47  ;;  %v7485_v47 = vld [vmem:[#allocation5 + $0x784] sm:$0xf]  ;;  %v7250_v31 = vld [vmem:[#allocation5 + $0x2c] sm:$0xf]  ;;  %v7340_v37 = vld [vmem:[#allocation5 + $0x2f4] sm:$0xf0] }
 0x5b3   :  { %v3496_v6 = vsel %vm3488_vm1, %v3487_v27, %v3479_v60  ;;  %4918 = vmatmul.bf16.vlgmr.msrb.gmra.mxu1 %v11814_v10  ;;  %v7345_v27 = vld [vmem:[#allocation5 + $0x324] sm:$0xf]  ;;  %v6912_v60 = vor.u32 %v7465_v30, %v6909_v58  ;;  %v11816_v30 = vld [vmem:[#allocation39_spill] sm:$0xff]  ;;  %v6845_v58 = vld [vmem:[#allocation5 + $0x670] sm:$0xf0]  ;;  %vm5211_vm1 = vcmask 1041408  }
 0x5b4   :  { %v11086_v53 = vpack.c.b16 %v3496_v6, %v3496_v6  ;;  %4966 = vmatpush.bf16.msra.mxu1 %v6720_v14  ;;  %v6432_v4 = vor.u32 %v7345_v27, %v6429_v48  ;;  %v7461_v6 = vld [vmem:[#allocation5 + $0x6c4] sm:$0xf]  ;;  %5061 = vmatmul.bf16.vlgmr.msrb.gmra.mxu0 %v11038_v21  ;;  %v6259_v14 = vld [vmem:[#allocation5 + $0x1c8] sm:$0xf]  ;;  %v6989_v27 = vld [vmem:[#allocation5 + $0x790] sm:$0xf0] }
 0x5b5   :  { %5105 = vmatpush.bf16.msra.mxu0 %v6152_v63  ;;  %v6896_v24 = vor.u32 %v7461_v6, %v6893_v41  ;;  %v6260_v51 = vor.u32 %v7304_v44, %v6259_v14  ;;  %v6227_v48 = vld [vmem:[#allocation5 + $0x188] sm:$0xf]  ;;  %v6829_v6 = vld [vmem:[#allocation5 + $0x650] sm:$0xf0]  ;;  %v7254_v41 = vld [vmem:[#allocation5 + $0x4c] sm:$0xf]  ;;  %v6992_v46 = vor.u32 %v7485_v47, %v6989_v27 }
 0x5b6   :  { %4892 = vmatmul.bf16.vlgmr.msra.gmra.mxu2 %v11086_v53  ;;  %v6228_v9 = vor.u32 %v7296_v22, %v6227_v48  ;;  %v6832_v36 = vor.u32 %v7445_v23, %v6829_v6  ;;  %v6072_v39 = vor.u32 %v7254_v41, %v6069_v20  ;;  %v7441_v16 = vld [vmem:[#allocation5 + $0x624] sm:$0xf]  ;;  %v6037_v14 = vld [vmem:[#allocation5 + $0x18] sm:$0xf0]  ;;  %v6403_v44 = vld [vmem:[#allocation5 + $0x2e8] sm:$0xf] }
 0x5b7   :  { %4975 = vmatpush.bf16.msra.mxu2 %v6912_v60  ;;  %v6848_v60 = vor.u32 %v7449_v32, %v6845_v58  ;;  %v6387_v58 = vld [vmem:[#allocation5 + $0x2c8] sm:$0xf]  ;;  %v7469_v27 = vld [vmem:[#allocation5 + $0x704] sm:$0xf]  ;;  %v7280_v48 = vld [vmem:[#allocation5 + $0x114] sm:$0xf0] }
 0x5b8   :  { %v4828_v34 = vpop.f32.mrf.mxu3  ;;  %4967 = vmatpush.bf16.msra.mxu1 %v6704_v26  ;;  %v7300_v26 = vld [vmem:[#allocation5 + $0x1b4] sm:$0xf0]  ;;  %v6531_v22 = vld [vmem:[#allocation5 + $0x3e8] sm:$0xf] }
 0x5b9   :  { %v11090_v57 = vadd.f32 %v4828_v34, %v11072_v28  ;;  %v6445_v28 = vld [vmem:[#allocation5 + $0x350] sm:$0xf0]  ;;  %5106 = vmatpush.bf16.msra.mxu0 %v6136_v1  ;;  %v6244_v15 = vor.u32 %v7300_v26, %v6243_v42  ;;  %v7292_v1 = vld [vmem:[#allocation5 + $0x174] sm:$0xf0]  ;;  %v6404_v26 = vor.u32 %v7340_v37, %v6403_v44  ;;  %v6787_v41 = vld [vmem:[#allocation5 + $0x5e8] sm:$0xf] }
 0x5ba   :  { %v6448_v33 = vor.u32 %v7349_v59, %v6445_v28  ;;  %v6877_v34 = vld [vmem:[#allocation5 + $0x6b0] sm:$0xf0]  ;;  %v7262_v59 = vld [vmem:[#allocation5 + $0x8c] sm:$0xf]  ;;  %v7024_v28 = vor.u32 %v7493_v61, %v7021_v19  ;;  %v7437_v61 = vld [vmem:[#allocation5 + $0x604] sm:$0xf] }
 0x5bb   :  { %4976 = vmatpush.bf16.msra.mxu2 %v6896_v24  ;;  %v6880_v29 = vor.u32 %v7457_v54, %v6877_v34  ;;  %v6104_v5 = vor.u32 %v7262_v59, %v6101_v8  ;;  %v6211_v24 = vld [vmem:[#allocation5 + $0x168] sm:$0xf]  ;;  %v6976_v54 = vor.u32 %v7481_v12, %v6973_v52  ;;  %v7477_v34 = vld [vmem:[#allocation5 + $0x744] sm:$0xf]  ;;  %v6797_v19 = vld [vmem:[#allocation5 + $0x610] sm:$0xf0] }
 0x5bc   :  { %4941 = vmatpush.bf16.msrb.mxu3 %v6448_v33  ;;  %4968 = vmatpush.bf16.msra.mxu1 %v6688_v17  ;;  %v7005_v33 = vld [vmem:[#allocation5 + $0x7b0] sm:$0xf0]  ;;  %v6960_v11 = vor.u32 %v7477_v34, %v6957_v38  ;;  %v7402_v59 = vld [vmem:[#allocation5 + $0x4ec] sm:$0xf]  ;;  %v6661_v8 = vld [vmem:[#allocation5 + $0x4f8] sm:$0xf0] }
 0x5bd   :  { %5107 = vmatpush.bf16.msra.mxu0 %v6120_v0  ;;  %v7008_v18 = vor.u32 %v7489_v40, %v7005_v33  ;;  %v7246_v0 = vld [vmem:[#allocation5 + $0xc] sm:$0xf]  ;;  %v6941_v40 = vld [vmem:[#allocation5 + $0x730] sm:$0xf0]  ;;  %v6800_v33 = vor.u32 %v7437_v61, %v6797_v19  ;;  %v7284_v42 = vld [vmem:[#allocation5 + $0x134] sm:$0xf0]  ;;  %v6664_v32 = vor.u32 %v7402_v59, %v6661_v8 }
 0x5be   :  { %v7372_v23 = vld [vmem:[#allocation5 + $0x3f4] sm:$0xf0]  ;;  %v6355_v34 = vld [vmem:[#allocation5 + $0x288] sm:$0xf]  ;;  %v7386_v59 = vld [vmem:[#allocation5 + $0x46c] sm:$0xf] }
 0x5bf   :  { %4977 = vmatpush.bf16.msra.mxu2 %v6880_v29  ;;  %v7436_v20 = vld [vmem:[#allocation5 + $0x5f4] sm:$0xf0]  ;;  %v6339_v44 = vld [vmem:[#allocation5 + $0x268] sm:$0xf]  ;;  %v6597_v8 = vld [vmem:[#allocation5 + $0x478] sm:$0xf0] }
 0x5c0   :  { %v4830_v49 = vpop.f32.mrf.mxu3  ;;  %4942 = vmatpush.bf16.msrb.mxu3 %v6432_v4  ;;  %4969 = vmatpush.bf16.msra.mxu1 %v6672_v13  ;;  %v6195_v13 = vld [vmem:[#allocation5 + $0x148] sm:$0xf]  ;;  %v7332_v12 = vld [vmem:[#allocation5 + $0x2b4] sm:$0xf0] }
 0x5c1   :  { %v7258_v49 = vld [vmem:[#allocation5 + $0x6c] sm:$0xf]  ;;  %5108 = vmatpush.bf16.msra.mxu0 %v6104_v5  ;;  %v6179_v5 = vld [vmem:[#allocation5 + $0x128] sm:$0xf]  ;;  %v7328_v38 = vld [vmem:[#allocation5 + $0x294] sm:$0xf0] }
 0x5c2   :  { %v6088_v63 = vor.u32 %v7258_v49, %v6085_v55  ;;  %v7336_v55 = vld [vmem:[#allocation5 + $0x2d4] sm:$0xf0]  ;;  %v6180_v47 = vor.u32 %v7284_v42, %v6179_v5  ;;  %v6356_v19 = vor.u32 %v7328_v38, %v6355_v34  ;;  %v6600_v42 = vor.u32 %v7386_v59, %v6597_v8  ;;  %v6435_v34 = vld [vmem:[#allocation5 + $0x328] sm:$0xf] }
 0x5c3   :  { %4970 = vmatmul.bf16.vlgmr.msra.gmra.mxu1 %v11069_v50  ;;  %4978 = vmatpush.bf16.msra.mxu2 %v6864_v2  ;;  %v6040_v2 = vor.u32 %v7246_v0, %v6037_v14  ;;  %v7364_v61 = vld [vmem:[#allocation5 + $0x3b4] sm:$0xf0]  ;;  %v7043_v59 = vld [vmem:[#allocation5 + $0x7e8] sm:$0xf] }
 0x5c4   :  { %4943 = vmatpush.bf16.msrb.mxu3 %v6416_v45  ;;  %5014 = vmatpush.bf16.msrb.mxu1 %v6276_v56  ;;  %v6053_v45 = vld [vmem:[#allocation5 + $0x38] sm:$0xf0]  ;;  %v7288_v56 = vld [vmem:[#allocation5 + $0x154] sm:$0xf0] }
 0x5c5   :  { %5109 = vmatpush.bf16.msra.mxu0 %v6088_v63  ;;  %v6056_v62 = vor.u32 %v7250_v31, %v6053_v45  ;;  %v6163_v63 = vld [vmem:[#allocation5 + $0x108] sm:$0xf]  ;;  %v7428_v0 = vld [vmem:[#allocation5 + $0x5b4] sm:$0xf0] }
 0x5c6   :  { %4931 = vmatmul.bf16.vlgmr.msrb.gmra.mxu2 %v11815_v43  ;;  %v6164_v52 = vor.u32 %v7280_v48, %v6163_v63  ;;  %v6771_v45 = vld [vmem:[#allocation5 + $0x5c8] sm:$0xf]  ;;  %v7424_v5 = vld [vmem:[#allocation5 + $0x594] sm:$0xf0] }
 0x5c7   :  { %4944 = vmatmul.bf16.vlgmr.msrb.gmra.mxu3 %v11816_v30  ;;  %4979 = vmatpush.bf16.msra.mxu2 %v6848_v60  ;;  %v6925_v60 = vld [vmem:[#allocation5 + $0x710] sm:$0xf0]  ;;  %v7420_v63 = vld [vmem:[#allocation5 + $0x574] sm:$0xf0] }
 0x5c8   :  { %4988 = vmatpush.bf16.msra.mxu3 %v7040_v35  ;;  %5015 = vmatpush.bf16.msrb.mxu1 %v6260_v51  ;;  %v6816_v35 = vor.u32 %v7441_v16, %v6813_v7  ;;  %v7473_v51 = vld [vmem:[#allocation5 + $0x724] sm:$0xf]  ;;  %v6515_v16 = vld [vmem:[#allocation5 + $0x3c8] sm:$0xf]  ;;  %v7368_v7 = vld [vmem:[#allocation5 + $0x3d4] sm:$0xf0] }
 0x5c9   :  { %5110 = vmatpush.bf16.msra.mxu0 %v6072_v39  ;;  %v6944_v49 = vor.u32 %v7473_v51, %v6941_v40  ;;  %v7394_v39 = vld [vmem:[#allocation5 + $0x4ac] sm:$0xf]  ;;  %v6483_v51 = vld [vmem:[#allocation5 + $0x388] sm:$0xf]  ;;  %v7360_v40 = vld [vmem:[#allocation5 + $0x394] sm:$0xf0] }
 0x5ca   :  { %v7348_v38 = vld [vmem:[#allocation5 + $0x334] sm:$0xf0] }
 0x5cb   :  { %4980 = vmatpush.bf16.msra.mxu2 %v6832_v36  ;;  %v6532_v36 = vor.u32 %v7372_v23, %v6531_v22  ;;  %v6307_v22 = vld [vmem:[#allocation5 + $0x228] sm:$0xf]  ;;  %v7316_v23 = vld [vmem:[#allocation5 + $0x234] sm:$0xf0] }
 0x5cc   :  { %4989 = vmatpush.bf16.msra.mxu3 %v7024_v28  ;;  %5016 = vmatpush.bf16.msrb.mxu1 %v6244_v15  ;;  %v6196_v28 = vor.u32 %v7288_v56, %v6195_v13  ;;  %v6645_v15 = vld [vmem:[#allocation5 + $0x4d8] sm:$0xf0]  ;;  %v6516_v13 = vor.u32 %v7368_v7, %v6515_v16  ;;  %v7374_v16 = vld [vmem:[#allocation5 + $0x40c] sm:$0xf]  ;;  %v7500_v8 = vld [vmem:[#allocation5 + $0x7f4] sm:$0xf0] }
 0x5cd   :  { %5111 = vmatpush.bf16.msra.mxu0 %v6056_v62  ;;  %v6613_v62 = vld [vmem:[#allocation5 + $0x498] sm:$0xf0] }
 0x5cf   :  { %4981 = vmatpush.bf16.msra.mxu2 %v6816_v35  ;;  %v7390_v35 = vld [vmem:[#allocation5 + $0x48c] sm:$0xf] }
 0x5d0   :  { %v4841_v4 = vpop.f32.mrf.mxu1  ;;  %4990 = vmatpush.bf16.msra.mxu3 %v7008_v18  ;;  %5017 = vmatpush.bf16.msrb.mxu1 %v6228_v9  ;;  %v7398_v18 = vld [vmem:[#allocation5 + $0x4cc] sm:$0xf]  ;;  %v6371_v9 = vld [vmem:[#allocation5 + $0x2a8] sm:$0xf]  ;;  %v6616_v14 = vor.u32 %v7390_v35, %v6613_v62  ;;  %v7412_v62 = vld [vmem:[#allocation5 + $0x534] sm:$0xf0] }
 0x5d1   :  { %v11097_v17 = vadd.f32 %v4841_v4, %v11090_v57  ;;  %v6212_v57 = vor.u32 %v7292_v1, %v6211_v24  ;;  %5112 = vmatpush.bf16.msra.mxu0 %v6040_v2  ;;  %v6388_v4 = vor.u32 %v7336_v55, %v6387_v58  ;;  %v6648_v6 = vor.u32 %v7398_v18, %v6645_v15  ;;  %v6629_v24 = vld [vmem:[#allocation5 + $0x4b8] sm:$0xf0]  ;;  %v6739_v2 = vld [vmem:[#allocation5 + $0x588] sm:$0xf] }
 0x5d2   :  { %v6788_v1 = vor.u32 %v7436_v20, %v6787_v41  ;;  %v6372_v31 = vor.u32 %v7332_v12, %v6371_v9  ;;  %v6484_v58 = vor.u32 %v7360_v40, %v6483_v51  ;;  %v6581_v55 = vld [vmem:[#allocation5 + $0x458] sm:$0xf0]  ;;  %v6740_v18 = vor.u32 %v7424_v5, %v6739_v2  ;;  %v6467_v15 = vld [vmem:[#allocation5 + $0x368] sm:$0xf]  ;;  %v7352_v9 = vld [vmem:[#allocation5 + $0x354] sm:$0xf0] }
 0x5d3   :  { %4982 = vmatpush.bf16.msra.mxu2 %v6800_v33  ;;  %v6565_v41 = vld [vmem:[#allocation5 + $0x438] sm:$0xf0]  ;;  %v6308_v12 = vor.u32 %v7316_v23, %v6307_v22  ;;  %v6691_v35 = vld [vmem:[#allocation5 + $0x528] sm:$0xf]  ;;  %v7306_v51 = vld [vmem:[#allocation5 + $0x1ec] sm:$0xf] }
 0x5d4   :  { %4991 = vmatpush.bf16.msra.mxu3 %v6992_v46  ;;  %5018 = vmatpush.bf16.msrb.mxu1 %v6212_v57  ;;  %v6928_v46 = vor.u32 %v7469_v27, %v6925_v60  ;;  %v6632_v57 = vor.u32 %v7394_v39, %v6629_v24  ;;  %v6723_v60 = vld [vmem:[#allocation5 + $0x568] sm:$0xf]  ;;  %v6277_v40 = vld [vmem:[#allocation5 + $0x1f8] sm:$0xf0]  ;;  %v7460_v5 = vld [vmem:[#allocation5 + $0x6b4] sm:$0xf0] }
 0x5d5   :  { %5157 = vmatpush.bf16.msrb.mxu0 %v6664_v32  ;;  %v7320_v32 = vld [vmem:[#allocation5 + $0x254] sm:$0xf0]  ;;  %v6724_v20 = vor.u32 %v7420_v63, %v6723_v60  ;;  %v6291_v24 = vld [vmem:[#allocation5 + $0x208] sm:$0xf]  ;;  %v7298_v23 = vld [vmem:[#allocation5 + $0x1ac] sm:$0xf] }
 0x5d6   :  { %4983 = vmatmul.bf16.vlgmr.msra.gmra.mxu2 %v11080_v3  ;;  %5113 = vmatmul.bf16.vlgmr.msra.gmra.mxu0 %v11813_v25  ;;  %v6499_v25 = vld [vmem:[#allocation5 + $0x3a8] sm:$0xf]  ;;  %v7492_v22 = vld [vmem:[#allocation5 + $0x7b4] sm:$0xf0] }
 0x5d7   :  { %5027 = vmatpush.bf16.msrb.mxu2 %v6404_v26  ;;  %v6500_v37 = vor.u32 %v7364_v61, %v6499_v25  ;;  %v6323_v26 = vld [vmem:[#allocation5 + $0x248] sm:$0xf]  ;;  %v6436_v61 = vor.u32 %v7348_v38, %v6435_v34  ;;  %v7290_v34 = vld [vmem:[#allocation5 + $0x16c] sm:$0xf]  ;;  %v6213_v38 = vld [vmem:[#allocation5 + $0x178] sm:$0xf0] }
 0x5d8   :  { %v4843_v29 = vpop.f32.mrf.mxu1  ;;  %4992 = vmatpush.bf16.msra.mxu3 %v6976_v54  ;;  %5019 = vmatpush.bf16.msrb.mxu1 %v6196_v28  ;;  %v7432_v54 = vld [vmem:[#allocation5 + $0x5d4] sm:$0xf0]  ;;  %v6324_v27 = vor.u32 %v7320_v32, %v6323_v26  ;;  %v6883_v2 = vld [vmem:[#allocation5 + $0x6a8] sm:$0xf]  ;;  %v7044_v26 = vor.u32 %v7500_v8, %v7043_v59  ;;  %v6280_v32 = vor.u32 %v7306_v51, %v6277_v40  ;;  %v7338_v8 = vld [vmem:[#allocation5 + $0x2ec] sm:$0xf] }
 0x5d9   :  { %5158 = vmatpush.bf16.msrb.mxu0 %v6648_v6  ;;  %v6772_v56 = vor.u32 %v7432_v54, %v6771_v45  ;;  %v6755_v29 = vld [vmem:[#allocation5 + $0x5a8] sm:$0xf]  ;;  %v7378_v6 = vld [vmem:[#allocation5 + $0x42c] sm:$0xf]  ;;  %v7468_v54 = vld [vmem:[#allocation5 + $0x6f4] sm:$0xf0] }
 0x5da   :  { %v6756_v28 = vor.u32 %v7428_v0, %v6755_v29  ;;  %v6568_v39 = vor.u32 %v7378_v6, %v6565_v41  ;;  %v6915_v45 = vld [vmem:[#allocation5 + $0x6e8] sm:$0xf]  ;;  %v7464_v29 = vld [vmem:[#allocation5 + $0x6d4] sm:$0xf0]  ;;  %v6692_v0 = vor.u32 %v7412_v62, %v6691_v35 }
 0x5db   :  { %5028 = vmatpush.bf16.msrb.mxu2 %v6388_v4  ;;  %v6916_v25 = vor.u32 %v7468_v54, %v6915_v45  ;;  %v6851_v6 = vld [vmem:[#allocation5 + $0x668] sm:$0xf]  ;;  %v7452_v41 = vld [vmem:[#allocation5 + $0x674] sm:$0xf0] }
 0x5dc   :  { %4993 = vmatpush.bf16.msra.mxu3 %v6960_v11  ;;  %5020 = vmatpush.bf16.msrb.mxu1 %v6180_v47  ;;  %v7324_v11 = vld [vmem:[#allocation5 + $0x274] sm:$0xf0]  ;;  %v6979_v45 = vld [vmem:[#allocation5 + $0x768] sm:$0xf] }
 0x5dd   :  { %5159 = vmatpush.bf16.msrb.mxu0 %v6632_v57  ;;  %v6340_v33 = vor.u32 %v7324_v11, %v6339_v44  ;;  %v7356_v47 = vld [vmem:[#allocation5 + $0x374] sm:$0xf0]  ;;  %v6675_v11 = vld [vmem:[#allocation5 + $0x508] sm:$0xf] }
 0x5de   :  { %v6468_v4 = vor.u32 %v7356_v47, %v6467_v15  ;;  %v7344_v44 = vld [vmem:[#allocation5 + $0x314] sm:$0xf0]  ;;  %v6261_v15 = vld [vmem:[#allocation5 + $0x1d8] sm:$0xf0]  ;;  %v6867_v47 = vld [vmem:[#allocation5 + $0x688] sm:$0xf] }
 0x5df   :  { %5029 = vmatpush.bf16.msrb.mxu2 %v6372_v31  ;;  %v6549_v31 = vld [vmem:[#allocation5 + $0x418] sm:$0xf0]  ;;  %v7484_v54 = vld [vmem:[#allocation5 + $0x774] sm:$0xf0]  ;;  %v6947_v40 = vld [vmem:[#allocation5 + $0x728] sm:$0xf] }
 0x5e0   :  { %4994 = vmatpush.bf16.msra.mxu3 %v6944_v49  ;;  %5021 = vmatpush.bf16.msrb.mxu1 %v6164_v52  ;;  %v7382_v49 = vld [vmem:[#allocation5 + $0x44c] sm:$0xf]  ;;  %v6707_v52 = vld [vmem:[#allocation5 + $0x548] sm:$0xf]  ;;  %v7444_v35 = vld [vmem:[#allocation5 + $0x634] sm:$0xf0]  ;;  %v6980_v62 = vor.u32 %v7484_v54, %v6979_v45 }
 0x5e1   :  { %5160 = vmatpush.bf16.msrb.mxu0 %v6616_v14  ;;  %v6584_v48 = vor.u32 %v7382_v49, %v6581_v55  ;;  %v6419_v14 = vld [vmem:[#allocation5 + $0x308] sm:$0xf]  ;;  %v7496_v49 = vld [vmem:[#allocation5 + $0x7d4] sm:$0xf0]  ;;  %v6884_v55 = vor.u32 %v7460_v5, %v6883_v2  ;;  %v7282_v5 = vld [vmem:[#allocation5 + $0x12c] sm:$0xf] }
 0x5e2   :  { %v6357_v45 = vld [vmem:[#allocation5 + $0x298] sm:$0xf0] }
 0x5e3   :  { %5022 = vmatmul.bf16.vlgmr.msrb.gmra.mxu1 %v11814_v10  ;;  %5030 = vmatpush.bf16.msrb.mxu2 %v6356_v19  ;;  %v6899_v19 = vld [vmem:[#allocation5 + $0x6c8] sm:$0xf] }
 0x5e4   :  { %4995 = vmatpush.bf16.msra.mxu3 %v6928_v46  ;;  %5066 = vmatpush.bf16.msra.mxu1 %v6788_v1  ;;  %v6451_v46 = vld [vmem:[#allocation5 + $0x348] sm:$0xf]  ;;  %v7312_v1 = vld [vmem:[#allocation5 + $0x214] sm:$0xf0] }
 0x5e5   :  { %5161 = vmatpush.bf16.msrb.mxu0 %v6600_v42  ;;  %v6452_v7 = vor.u32 %v7352_v9, %v6451_v46  ;;  %v6995_v9 = vld [vmem:[#allocation5 + $0x788] sm:$0xf] }
 0x5e7   :  { %4996 = vmatmul.bf16.vlgmr.msra.gmra.mxu3 %v11086_v53  ;;  %5031 = vmatpush.bf16.msrb.mxu2 %v6340_v33  ;;  %v6420_v33 = vor.u32 %v7344_v44, %v6419_v14  ;;  %v6197_v14 = vld [vmem:[#allocation5 + $0x158] sm:$0xf0] }
 0x5e8   :  { %5040 = vmatpush.bf16.msrb.mxu3 %v6532_v36  ;;  %5067 = vmatpush.bf16.msra.mxu1 %v6772_v56  ;;  %v7416_v36 = vld [vmem:[#allocation5 + $0x554] sm:$0xf0]  ;;  %v6552_v56 = vor.u32 %v7374_v16, %v6549_v31 }
 0x5e9   :  { %5162 = vmatpush.bf16.msrb.mxu0 %v6584_v48  ;;  %v6708_v57 = vor.u32 %v7416_v36, %v6707_v52  ;;  %v7011_v48 = vld [vmem:[#allocation5 + $0x7a8] sm:$0xf]  ;;  %v6852_v52 = vor.u32 %v7452_v41, %v6851_v6  ;;  %v7294_v36 = vld [vmem:[#allocation5 + $0x18c] sm:$0xf]  ;;  %v7448_v16 = vld [vmem:[#allocation5 + $0x654] sm:$0xf0] }
 0x5ea   :  { %v7330_v41 = vld [vmem:[#allocation5 + $0x2ac] sm:$0xf] }
 0x5eb   :  { %5032 = vmatpush.bf16.msrb.mxu2 %v6324_v27  ;;  %v7456_v27 = vld [vmem:[#allocation5 + $0x694] sm:$0xf0] }
 0x5ec   :  { %5041 = vmatpush.bf16.msrb.mxu3 %v6516_v13  ;;  %5068 = vmatpush.bf16.msra.mxu1 %v6756_v28  ;;  %v6292_v13 = vor.u32 %v7312_v1, %v6291_v24  ;;  %v6900_v28 = vor.u32 %v7464_v29, %v6899_v19  ;;  %v6835_v1 = vld [vmem:[#allocation5 + $0x648] sm:$0xf]  ;;  %v7480_v19 = vld [vmem:[#allocation5 + $0x754] sm:$0xf0] }
 0x5ed   :  { %5163 = vmatpush.bf16.msrb.mxu0 %v6568_v39  ;;  %v6229_v39 = vld [vmem:[#allocation5 + $0x198] sm:$0xf0] }
 0x5ee   :  { %v6232_v31 = vor.u32 %v7294_v36, %v6229_v39  ;;  %v7366_v36 = vld [vmem:[#allocation5 + $0x3cc] sm:$0xf]  ;;  %v6517_v39 = vld [vmem:[#allocation5 + $0x3d8] sm:$0xf0] }
 0x5ef   :  { %5033 = vmatpush.bf16.msrb.mxu2 %v6308_v12  ;;  %v7488_v12 = vld [vmem:[#allocation5 + $0x794] sm:$0xf0] }
 0x5f0   :  { %5042 = vmatpush.bf16.msrb.mxu3 %v6500_v37  ;;  %5069 = vmatpush.bf16.msra.mxu1 %v6740_v18  ;;  %v7408_v37 = vld [vmem:[#allocation5 + $0x514] sm:$0xf0]  ;;  %v7302_v18 = vld [vmem:[#allocation5 + $0x1cc] sm:$0xf] }
 0x5f1   :  { %5164 = vmatpush.bf16.msrb.mxu0 %v6552_v56  ;;  %v6676_v42 = vor.u32 %v7408_v37, %v6675_v11  ;;  %v6264_v63 = vor.u32 %v7302_v18, %v6261_v15  ;;  %v6803_v11 = vld [vmem:[#allocation5 + $0x608] sm:$0xf]  ;;  %v7440_v37 = vld [vmem:[#allocation5 + $0x614] sm:$0xf0] }
 0x5f2   :  { %v6804_v2 = vor.u32 %v7440_v37, %v6803_v11  ;;  %v6931_v15 = vld [vmem:[#allocation5 + $0x708] sm:$0xf]  ;;  %v7358_v11 = vld [vmem:[#allocation5 + $0x38c] sm:$0xf]  ;;  %v6485_v37 = vld [vmem:[#allocation5 + $0x398] sm:$0xf0] }
 0x5f3   :  { %5034 = vmatpush.bf16.msrb.mxu2 %v6292_v13  ;;  %v6819_v13 = vld [vmem:[#allocation5 + $0x628] sm:$0xf] }
 0x5f4   :  { %5043 = vmatpush.bf16.msrb.mxu3 %v6484_v58  ;;  %5070 = vmatpush.bf16.msra.mxu1 %v6724_v20  ;;  %v7027_v58 = vld [vmem:[#allocation5 + $0x7c8] sm:$0xf]  ;;  %v7012_v20 = vor.u32 %v7492_v22, %v7011_v48  ;;  %v6820_v29 = vor.u32 %v7444_v35, %v6819_v13  ;;  %v6533_v48 = vld [vmem:[#allocation5 + $0x3f8] sm:$0xf0] }
 0x5f5   :  { %5165 = vmatmul.bf16.vlgmr.msrb.gmra.mxu0 %v11038_v21  ;;  %v7028_v60 = vor.u32 %v7496_v49, %v7027_v58  ;;  %v6868_v21 = vor.u32 %v7456_v27, %v6867_v47  ;;  %v7334_v58 = vld [vmem:[#allocation5 + $0x2cc] sm:$0xf]  ;;  %v6389_v49 = vld [vmem:[#allocation5 + $0x2d8] sm:$0xf0]  ;;  %v7472_v47 = vld [vmem:[#allocation5 + $0x714] sm:$0xf0] }
 0x5f6   :  { %5035 = vmatmul.bf16.vlgmr.msrb.gmra.mxu2 %v11815_v43  ;;  %v7278_v27 = vld [vmem:[#allocation5 + $0x10c] sm:$0xf]  ;;  %v6392_v22 = vor.u32 %v7334_v58, %v6389_v49  ;;  %v6932_v6 = vor.u32 %v7472_v47, %v6931_v15  ;;  %v6501_v13 = vld [vmem:[#allocation5 + $0x3b8] sm:$0xf0]  ;;  %v7735_v15 = vmov 2.0  }
 0x5f7   :  { %5079 = vmatpush.bf16.msra.mxu2 %v6916_v25  ;;  %v6216_v25 = vor.u32 %v7290_v34, %v6213_v38  ;;  %v7362_v38 = vld [vmem:[#allocation5 + $0x3ac] sm:$0xf]  ;;  %v6725_v58 = vld [vmem:[#allocation5 + $0x578] sm:$0xf0]  ;;  %7605 = vrcp.f32 %v7735_v15 }
 0x5f8   :  { %5044 = vmatpush.bf16.msrb.mxu3 %v6468_v4  ;;  %5071 = vmatpush.bf16.msra.mxu1 %v6708_v57  ;;  %v6245_v4 = vld [vmem:[#allocation5 + $0x1b8] sm:$0xf0]  ;;  %v6836_v57 = vor.u32 %v7448_v16, %v6835_v1  ;;  %v7430_v16 = vld [vmem:[#allocation5 + $0x5cc] sm:$0xf] }
 0x5f9   :  { %v6248_v46 = vor.u32 %v7298_v23, %v6245_v4  ;;  %v6789_v23 = vld [vmem:[#allocation5 + $0x5f8] sm:$0xf0]  ;;  %v7314_v49 = vld [vmem:[#allocation5 + $0x22c] sm:$0xf] }
 0x5fa   :  { %v7494_v15 = vld [vmem:[#allocation5 + $0x7cc] sm:$0xf] }
 0x5fb   :  { %5080 = vmatpush.bf16.msra.mxu2 %v6900_v28  ;;  %v6405_v28 = vld [vmem:[#allocation5 + $0x2f8] sm:$0xf0] }
 0x5fc   :  { %5045 = vmatpush.bf16.msrb.mxu3 %v6452_v7  ;;  %5072 = vmatpush.bf16.msra.mxu1 %v6692_v0  ;;  %v6996_v7 = vor.u32 %v7488_v12, %v6995_v9  ;;  %v7286_v0 = vld [vmem:[#allocation5 + $0x14c] sm:$0xf] }
 0x5fd   :  { %v6200_v51 = vor.u32 %v7286_v0, %v6197_v14  ;;  %v6504_v0 = vor.u32 %v7362_v38, %v6501_v13 }
 0x5ff   :  { %5081 = vmatpush.bf16.msra.mxu2 %v6884_v55 }
 0x600   :  { %5046 = vmatpush.bf16.msrb.mxu3 %v6436_v61  ;;  %5073 = vmatpush.bf16.msra.mxu1 %v6676_v42  ;;  %v6963_v61 = vld [vmem:[#allocation5 + $0x748] sm:$0xf]  ;;  %v6181_v42 = vld [vmem:[#allocation5 + $0x138] sm:$0xf0] }
 0x601   :  { %v6964_v59 = vor.u32 %v7480_v19, %v6963_v61  ;;  %v6184_v18 = vor.u32 %v7282_v5, %v6181_v42  ;;  %v7322_v19 = vld [vmem:[#allocation5 + $0x26c] sm:$0xf]  ;;  %v6469_v42 = vld [vmem:[#allocation5 + $0x378] sm:$0xf0] }
 0x602   :  { %v7354_v5 = vld [vmem:[#allocation5 + $0x36c] sm:$0xf] }
 0x603   :  { %5074 = vmatmul.bf16.vlgmr.msra.gmra.mxu1 %v11069_v50  ;;  %5082 = vmatpush.bf16.msra.mxu2 %v6868_v21  ;;  %v7434_v21 = vld [vmem:[#allocation5 + $0x5ec] sm:$0xf] }
 0x604   :  { %5047 = vmatpush.bf16.msrb.mxu3 %v6420_v33  ;;  %5118 = vmatpush.bf16.msrb.mxu1 %v6280_v32  ;;  %v7476_v33 = vld [vmem:[#allocation5 + $0x734] sm:$0xf0] }
 0x605   :  { %v6948_v32 = vor.u32 %v7476_v33, %v6947_v40  ;;  %v6325_v40 = vld [vmem:[#allocation5 + $0x258] sm:$0xf0] }
 0x607   :  { %5048 = vmatmul.bf16.vlgmr.msrb.gmra.mxu3 %v11816_v30  ;;  %5083 = vmatpush.bf16.msra.mxu2 %v6852_v52  ;;  %v6792_v52 = vor.u32 %v7434_v21, %v6789_v23  ;;  %v7310_v21 = vld [vmem:[#allocation5 + $0x20c] sm:$0xf]  ;;  %v6293_v23 = vld [vmem:[#allocation5 + $0x218] sm:$0xf0] }
 0x608   :  { %5092 = vmatpush.bf16.msra.mxu3 %v7044_v26  ;;  %5119 = vmatpush.bf16.msrb.mxu1 %v6264_v63  ;;  %v6408_v26 = vor.u32 %v7338_v8, %v6405_v28  ;;  %v7370_v63 = vld [vmem:[#allocation5 + $0x3ec] sm:$0xf]  ;;  %v6741_v28 = vld [vmem:[#allocation5 + $0x598] sm:$0xf0] }
 0x609   :  { %v6536_v9 = vor.u32 %v7370_v63, %v6533_v48  ;;  %v7422_v8 = vld [vmem:[#allocation5 + $0x58c] sm:$0xf] }
 0x60a   :  { %v7414_v48 = vld [vmem:[#allocation5 + $0x54c] sm:$0xf] }
 0x60b   :  { %5084 = vmatpush.bf16.msra.mxu2 %v6836_v57  ;;  %v6520_v57 = vor.u32 %v7366_v36, %v6517_v39  ;;  %v6437_v36 = vld [vmem:[#allocation5 + $0x338] sm:$0xf0]  ;;  %v7606_v39 = vpop.eup %7605 }
 0x60c   :  { %5093 = vmatpush.bf16.msra.mxu3 %v7028_v60  ;;  %5120 = vmatpush.bf16.msrb.mxu1 %v6248_v46  ;;  %v6165_v60 = vld [vmem:[#allocation5 + $0x118] sm:$0xf0]  ;;  %v5241_v38 = vmul.f32 2.0, %v7606_v39  ;;  %vm5245_vm2 = vweird.f32 %v7606_v39 }
 0x60d   :  { %v11107_v24 = vpop.f32.mrf.mxu0  ;;  %v6168_v46 = vor.u32 %v7278_v27, %v6165_v60  ;;  %v7350_v27 = vld [vmem:[#allocation5 + $0x34c] sm:$0xf]  ;;  %v6453_v60 = vld [vmem:[#allocation5 + $0x358] sm:$0xf0] }
 0x60f   :  { %5085 = vmatpush.bf16.msra.mxu2 %v6820_v29  ;;  %v6341_v29 = vld [vmem:[#allocation5 + $0x278] sm:$0xf0] }
 0x610   :  { %5094 = vmatpush.bf16.msra.mxu3 %v7012_v20  ;;  %5121 = vmatpush.bf16.msrb.mxu1 %v6232_v31  ;;  %v6373_v20 = vld [vmem:[#allocation5 + $0x2b8] sm:$0xf0]  ;;  %v7326_v31 = vld [vmem:[#allocation5 + $0x28c] sm:$0xf] }
 0x611   :  { %v6376_v1 = vor.u32 %v7330_v41, %v6373_v20  ;;  %v6360_v35 = vor.u32 %v7326_v31, %v6357_v45  ;;  %v7466_v41 = vld [vmem:[#allocation5 + $0x6ec] sm:$0xf]  ;;  %v6917_v20 = vld [vmem:[#allocation5 + $0x6f8] sm:$0xf0] }
 0x612   :  { %v6920_v45 = vor.u32 %v7466_v41, %v6917_v20  ;;  %v7490_v20 = vld [vmem:[#allocation5 + $0x7ac] sm:$0xf] }
 0x613   :  { %v11109_v56 = vpop.f32.mrf.mxu2  ;;  %5086 = vmatpush.bf16.msra.mxu2 %v6804_v2  ;;  %v6488_v2 = vor.u32 %v7358_v11, %v6485_v37  ;;  %v7462_v11 = vld [vmem:[#allocation5 + $0x6cc] sm:$0xf]  ;;  %v6901_v37 = vld [vmem:[#allocation5 + $0x6d8] sm:$0xf0] }
 0x614   :  { %5095 = vmatpush.bf16.msra.mxu3 %v6996_v7  ;;  %5122 = vmatpush.bf16.msrb.mxu1 %v6216_v25  ;;  %v6773_v7 = vld [vmem:[#allocation5 + $0x5d8] sm:$0xf0] }
 0x615   :  { %v4960_v44 = vpop.f32.mrf.mxu0  ;;  %v6776_v34 = vor.u32 %v7430_v16, %v6773_v7  ;;  %v6757_v25 = vld [vmem:[#allocation5 + $0x5b8] sm:$0xf0]  ;;  %v7410_v16 = vld [vmem:[#allocation5 + $0x52c] sm:$0xf] }
 0x616   :  { %5087 = vmatmul.bf16.vlgmr.msra.gmra.mxu2 %v11080_v3  ;;  %v6693_v7 = vld [vmem:[#allocation5 + $0x538] sm:$0xf0] }
 0x617   :  { %5131 = vmatpush.bf16.msrb.mxu2 %v6408_v26 }
 0x618   :  { %5096 = vmatpush.bf16.msra.mxu3 %v6980_v62  ;;  %5123 = vmatpush.bf16.msrb.mxu1 %v6200_v51  ;;  %v7426_v62 = vld [vmem:[#allocation5 + $0x5ac] sm:$0xf] }
 0x619   :  { %v6760_v44 = vor.u32 %v7426_v62, %v6757_v25  ;;  %v7318_v51 = vld [vmem:[#allocation5 + $0x24c] sm:$0xf] }
 0x61a   :  { %v6328_v26 = vor.u32 %v7318_v51, %v6325_v40  ;;  %v6421_v51 = vld [vmem:[#allocation5 + $0x318] sm:$0xf0]  ;;  %v7406_v40 = vld [vmem:[#allocation5 + $0x50c] sm:$0xf] }
 0x61b   :  { %v4856_v55 = vpop.f32.mrf.mxu2  ;;  %5132 = vmatpush.bf16.msrb.mxu2 %v6392_v22  ;;  %v6709_v22 = vld [vmem:[#allocation5 + $0x558] sm:$0xf0] }
 0x61c   :  { %5097 = vmatpush.bf16.msra.mxu3 %v6964_v59  ;;  %5124 = vmatpush.bf16.msrb.mxu1 %v6184_v18  ;;  %v6344_v59 = vor.u32 %v7322_v19, %v6341_v29  ;;  %v6309_v55 = vld [vmem:[#allocation5 + $0x238] sm:$0xf0]  ;;  %v6472_v18 = vor.u32 %v7354_v5, %v6469_v42 }
 0x61d   :  { %v11111_v4 = vpop.f32.mrf.mxu0  ;;  %v6312_v63 = vor.u32 %v7314_v49, %v6309_v55  ;;  %v7045_v5 = vld [vmem:[#allocation5 + $0x7f8] sm:$0xf0] }
 0x61e   :  { %v11114_v12 = vpop.f32.mrf.mxu3  ;;  %v6885_v49 = vld [vmem:[#allocation5 + $0x6b8] sm:$0xf0] }
 0x61f   :  { %5133 = vmatpush.bf16.msrb.mxu2 %v6376_v1  ;;  %v6296_v1 = vor.u32 %v7310_v21, %v6293_v23 }
 0x620   :  { %5098 = vmatpush.bf16.msra.mxu3 %v6948_v32  ;;  %v11116_v54 = vpop.f32.mrf.mxu1  ;;  %5125 = vmatpush.bf16.msrb.mxu1 %v6168_v46  ;;  %v7418_v32 = vld [vmem:[#allocation5 + $0x56c] sm:$0xf]  ;;  %v4855_v46 = vadd.f32 %v11109_v56, %v11097_v17 }
 0x621   :  { %v6728_v47 = vor.u32 %v7418_v32, %v6725_v58  ;;  %v7458_v58 = vld [vmem:[#allocation5 + $0x6ac] sm:$0xf] }
 0x622   :  { %v4868_v31 = vadd.f32 %v11114_v12, %v4855_v46  ;;  %v7013_v46 = vld [vmem:[#allocation5 + $0x7b8] sm:$0xf0] }
 0x623   :  { %5126 = vmatmul.bf16.vlgmr.msrb.gmra.mxu1 %v11814_v10  ;;  %5134 = vmatpush.bf16.msrb.mxu2 %v6360_v35  ;;  %v6744_v10 = vor.u32 %v7422_v8, %v6741_v28  ;;  %v5242_v35 = vsub.f32 1.0, %v5241_v38  ;;  %v6904_v28 = vor.u32 %v7462_v11, %v6901_v37  ;;  %v6821_v11 = vld [vmem:[#allocation5 + $0x638] sm:$0xf0]  ;;  %v7478_v37 = vld [vmem:[#allocation5 + $0x74c] sm:$0xf] }
 0x624   :  { %5099 = vmatpush.bf16.msra.mxu3 %v6932_v6  ;;  %5170 = vmatpush.bf16.msra.mxu1 %v6792_v52  ;;  %v6456_v6 = vor.u32 %v7350_v27, %v6453_v60  ;;  %v7346_v52 = vld [vmem:[#allocation5 + $0x32c] sm:$0xf]  ;;  %v4881_v17 = vadd.f32 %v11116_v54, %v4868_v31 }
 0x625   :  { %v5012_v61 = vpop.f32.mrf.mxu0  ;;  %v5243_v25 = vmul.f32 %v7606_v39, %v5242_v35 }
 0x626   :  { %v4869_v14 = vpop.f32.mrf.mxu3 }
 0x627   :  { %5100 = vmatmul.bf16.vlgmr.msra.gmra.mxu3 %v11086_v53  ;;  %5135 = vmatpush.bf16.msrb.mxu2 %v6344_v59 }
 0x628   :  { %5144 = vmatpush.bf16.msrb.mxu3 %v6536_v9  ;;  %5171 = vmatpush.bf16.msra.mxu1 %v6776_v34  ;;  %v4882_v33 = vpop.f32.mrf.mxu1  ;;  %v6712_v9 = vor.u32 %v7414_v48, %v6709_v22  ;;  %v6696_v34 = vor.u32 %v7410_v16, %v6693_v7  ;;  %v7454_v48 = vld [vmem:[#allocation5 + $0x68c] sm:$0xf]  ;;  %v6869_v22 = vld [vmem:[#allocation5 + $0x698] sm:$0xf0] }
 0x629   :  { %v7486_v16 = vld [vmem:[#allocation5 + $0x78c] sm:$0xf]  ;;  %v6997_v7 = vld [vmem:[#allocation5 + $0x798] sm:$0xf0] }
 0x62b   :  { %5136 = vmatpush.bf16.msrb.mxu2 %v6328_v26 }
 0x62c   :  { %5145 = vmatpush.bf16.msrb.mxu3 %v6520_v57  ;;  %5172 = vmatpush.bf16.msra.mxu1 %v6760_v44  ;;  %v6440_v57 = vor.u32 %v7346_v52, %v6437_v36  ;;  %v7016_v52 = vor.u32 %v7490_v20, %v7013_v46 }
 0x62e   :  { %v4906_v60 = vpop.f32.mrf.mxu3 }
 0x62f   :  { %5137 = vmatpush.bf16.msrb.mxu2 %v6312_v63 }
 0x630   :  { %5146 = vmatpush.bf16.msrb.mxu3 %v6504_v0  ;;  %5173 = vmatpush.bf16.msra.mxu1 %v6744_v10  ;;  %v5244_v0 = vadd.f32 %v7606_v39, %v5243_v25  ;;  %v11128_v8 = vpop.f32.mrf.mxu1  ;;  %v7498_v10 = vld [vmem:[#allocation5 + $0x7ec] sm:$0xf] }
 0x631   :  { %v7048_v32 = vor.u32 %v7498_v10, %v7045_v5  ;;  %v7482_v25 = vld [vmem:[#allocation5 + $0x76c] sm:$0xf]  ;;  %v6949_v10 = vld [vmem:[#allocation5 + $0x738] sm:$0xf0] }
 0x632   :  { %v11126_v54 = vsel %vm5245_vm2, %v7606_v39, %v5244_v0  ;;  %v6853_v39 = vld [vmem:[#allocation5 + $0x678] sm:$0xf0] }
 0x633   :  { %5138 = vmatpush.bf16.msrb.mxu2 %v6296_v1 }
 0x634   :  { %5147 = vmatpush.bf16.msrb.mxu3 %v6488_v2  ;;  %5174 = vmatpush.bf16.msra.mxu1 %v6728_v47  ;;  %v6677_v2 = vld [vmem:[#allocation5 + $0x518] sm:$0xf0] }
 0x635   :  { %v6680_v26 = vor.u32 %v7406_v40, %v6677_v2  ;;  %v7029_v47 = vld [vmem:[#allocation5 + $0x7d8] sm:$0xf0]  ;;  %v7474_v2 = vld [vmem:[#allocation5 + $0x72c] sm:$0xf] }
 0x636   :  { %5139 = vmatmul.bf16.vlgmr.msrb.gmra.mxu2 %v11815_v43  ;;  %v7342_v43 = vld [vmem:[#allocation5 + $0x30c] sm:$0xf]  ;;  %v7032_v63 = vor.u32 %v7494_v15, %v7029_v47  ;;  %v4908_v31 = vpop.f32.mrf.mxu3  ;;  %v6952_v15 = vor.u32 %v7474_v2, %v6949_v10  ;;  %v7507_v47 = vld [vmem:[#allocation7 + $0x30] sm:$0xff] }
 0x637   :  { %5183 = vmatpush.bf16.msra.mxu2 %v6920_v45  ;;  %v6424_v33 = vor.u32 %v7342_v43, %v6421_v51  ;;  %v7000_v45 = vor.u32 %v7486_v16, %v6997_v7  ;;  %v7438_v43 = vld [vmem:[#allocation5 + $0x60c] sm:$0xf]  ;;  %v6805_v51 = vld [vmem:[#allocation5 + $0x618] sm:$0xf0] }
 0x638   :  { %5148 = vmatpush.bf16.msrb.mxu3 %v6472_v18  ;;  %5175 = vmatpush.bf16.msra.mxu1 %v6712_v9  ;;  %v6888_v18 = vor.u32 %v7458_v58, %v6885_v49  ;;  %v4921_v23 = vpop.f32.mrf.mxu1  ;;  %v11138_v9 = vpop.f32.mrf.mxu0 }
 0x639   :  { %v4893_v56 = vpop.f32.mrf.mxu2 }
 0x63a   :  { %v4894_v13 = vadd.f32 %v4893_v56, %v4881_v17  ;;  %v7446_v17 = vld [vmem:[#allocation5 + $0x64c] sm:$0xf]  ;;  %v6837_v56 = vld [vmem:[#allocation5 + $0x658] sm:$0xf0] }
 0x63b   :  { %5184 = vmatpush.bf16.msra.mxu2 %v6904_v28  ;;  %v6965_v28 = vld [vmem:[#allocation5 + $0x758] sm:$0xf0] }
 0x63c   :  { %5149 = vmatpush.bf16.msrb.mxu3 %v6456_v6  ;;  %5176 = vmatpush.bf16.msra.mxu1 %v6696_v34  ;;  %v5212_v12 = vsel %vm5211_vm1, %v4894_v13, 0.0  ;;  %v6872_v6 = vor.u32 %v7454_v48, %v6869_v22  ;;  %v11143_v34 = vld [vmem:[%s11225_s14] sm:$0xf] }
 0x63d   :  { %v5213_v62 = vrot.slane %v5212_v12, 4  ;;  %v3449_v38 = vperm.slane %v11143_v34, 1  ;;  %v3450_v22 = vperm.slane %v11143_v34, 2 }
 0x63f   :  { %v5214_v61 = vadd.f32 %v5213_v62, %v5212_v12  ;;  %5185 = vmatpush.bf16.msra.mxu2 %v6888_v18  ;;  %v6840_v12 = vor.u32 %v7446_v17, %v6837_v56  ;;  %v5011_v20 = vadd.f32 %v11111_v4, %v3450_v22 }
 0x640   :  { %5150 = vmatpush.bf16.msrb.mxu3 %v6440_v57  ;;  %5177 = vmatpush.bf16.msra.mxu1 %v6680_v26  ;;  %v4971_v35 = vpop.f32.mrf.mxu1  ;;  %v7508_v26 = vld [vmem:[#allocation7 + $0x38] sm:$0xff] }
 0x641   :  { %v5215_v19 = vrot.slane %v5214_v61, 2  ;;  %v4895_v29 = vpop.f32.mrf.mxu2  ;;  %5633 = vmatpush.bf16.msra.mxu0 %v7508_v26 }
 0x643   :  { %v5216_v14 = vadd.f32 %v5215_v19, %v5214_v61  ;;  %5178 = vmatmul.bf16.vlgmr.msra.gmra.mxu1 %v11069_v50  ;;  %5186 = vmatpush.bf16.msra.mxu2 %v6872_v6  ;;  %v6981_v61 = vld [vmem:[#allocation5 + $0x778] sm:$0xf0]  ;;  %v5064_v19 = vpop.f32.mrf.mxu0 }
 0x644   :  { %5151 = vmatpush.bf16.msrb.mxu3 %v6424_v33  ;;  %v6984_v29 = vor.u32 %v7482_v25, %v6981_v61  ;;  %v6968_v33 = vor.u32 %v7478_v37, %v6965_v28 }
 0x645   :  { %v5217_v44 = vrot.slane %v5216_v14, 1  ;;  %5634 = vmatpush.bf16.msra.mxu0 %v7507_v47 }
 0x647   :  { %v5218_v59 = vadd.f32 %v5217_v44, %v5216_v14  ;;  %5152 = vmatmul.bf16.vlgmr.msrb.gmra.mxu3 %v11816_v30  ;;  %v7450_v30 = vld [vmem:[#allocation5 + $0x66c] sm:$0xf]  ;;  %v4907_v14 = vadd.f32 %v4906_v60, %v3449_v38 }
 0x648   :  { %5196 = vmatpush.bf16.msra.mxu3 %v7048_v32  ;;  %v6856_v1 = vor.u32 %v7450_v30, %v6853_v39  ;;  %v7442_v44 = vld [vmem:[#allocation5 + $0x62c] sm:$0xf]  ;;  %v4973_v18 = vpop.f32.mrf.mxu1  ;;  %v7505_v39 = vld [vmem:[#allocation7 + $0x20] sm:$0xff] }
 0x649   :  { %v5247_v42 = vmul.f32 %v11126_v54, %v5218_v59  ;;  %v6824_v59 = vor.u32 %v7442_v44, %v6821_v11  ;;  %v4920_v58 = vadd.f32 %v11128_v8, %v4907_v14  ;;  %v7470_v60 = vld [vmem:[#allocation5 + $0x70c] sm:$0xf]  ;;  %v7504_v44 = vld [vmem:[#allocation7 + $0x18] sm:$0xff] }
 0x64a   :  { %5187 = vmatpush.bf16.msra.mxu2 %v6856_v1  ;;  %v4945_v5 = vpop.f32.mrf.mxu3  ;;  %v7506_v8 = vld [vmem:[#allocation7 + $0x28] sm:$0xff] }
 0x64b   :  { %v11131_v55 = vsub.f32 %v4894_v13, %v5247_v42  ;;  %v4932_v13 = vpop.f32.mrf.mxu2  ;;  %v6808_v42 = vor.u32 %v7438_v43, %v6805_v51  ;;  %5635 = vmatpush.bf16.msra.mxu0 %v7506_v8  ;;  %v7503_v43 = vld [vmem:[#allocation7 + $0x10] sm:$0xff] }
 0x64c   :  { %5197 = vmatpush.bf16.msra.mxu3 %v7032_v63  ;;  %v6933_v63 = vld [vmem:[#allocation5 + $0x718] sm:$0xf0]  ;;  %v7515_v8 = vld [vmem:[#allocation7 + $0x70] sm:$0xff] }
 0x64d   :  { %v5255_v27 = vmul.f32 %v11131_v55, %v11131_v55  ;;  %v6936_v23 = vor.u32 %v7470_v60, %v6933_v63  ;;  %v7516_v63 = vld [vmem:[#allocation7 + $0x78] sm:$0xff] }
 0x64e   :  { %5188 = vmatpush.bf16.msra.mxu2 %v6840_v12  ;;  %5646 = vmatpush.bf16.msrb.mxu1 %v7516_v63 }
 0x64f   :  { %v5259_v21 = vsel %vm5211_vm1, %v5255_v27, 0.0  ;;  %v4933_v27 = vadd.f32 %v4932_v13, %v4920_v58  ;;  %5636 = vmatpush.bf16.msra.mxu0 %v7505_v39 }
 0x650   :  { %v5260_v41 = vrot.slane %v5259_v21, 4  ;;  %5198 = vmatpush.bf16.msra.mxu3 %v7016_v52 }
 0x652   :  { %v5261_v36 = vadd.f32 %v5260_v41, %v5259_v21  ;;  %5189 = vmatpush.bf16.msra.mxu2 %v6824_v59  ;;  %v4946_v21 = vadd.f32 %v4945_v5, %v4933_v27  ;;  %v4947_v6 = vpop.f32.mrf.mxu3  ;;  %5647 = vmatpush.bf16.msrb.mxu1 %v7515_v8  ;;  %v7523_v8 = vld [vmem:[#allocation7 + $0xb0] sm:$0xff] }
 0x653   :  { %v4934_v49 = vpop.f32.mrf.mxu2  ;;  %v11148_v48 = vpop.f32.mrf.mxu0  ;;  %5637 = vmatpush.bf16.msra.mxu0 %v7504_v44 }
 0x654   :  { %v5262_v50 = vrot.slane %v5261_v36, 2  ;;  %5199 = vmatpush.bf16.msra.mxu3 %v7000_v45  ;;  %v4959_v46 = vadd.f32 %v11107_v24, %v4946_v21 }
 0x656   :  { %v5263_v57 = vadd.f32 %v5262_v50, %v5261_v36  ;;  %5190 = vmatpush.bf16.msra.mxu2 %v6808_v42  ;;  %v4972_v7 = vadd.f32 %v4971_v35, %v4959_v46  ;;  %v7501_v42 = vld [vmem:[#allocation7] sm:$0xff] }
 0x657   :  { %5638 = vmatpush.bf16.msra.mxu0 %v7503_v43 }
 0x658   :  { %v5264_v62 = vrot.slane %v5263_v57, 1  ;;  %5200 = vmatpush.bf16.msra.mxu3 %v6984_v29  ;;  %v11166_v29 = vld [vmem:[%s11227_s16] sm:$0xf] }
 0x659   :  { %5191 = vmatmul.bf16.vlgmr.msra.gmra.mxu2 %v11080_v3  ;;  %v5353_v37 = vperm.slane %v11166_v29, 0 }
 0x65a   :  { %v5265_v0 = vadd.f32 %v5264_v62, %v5263_v57 }
 0x65b   :  { %v4984_v36 = vpop.f32.mrf.mxu2  ;;  %v5116_v16 = vpop.f32.mrf.mxu0 }
 0x65c   :  { %v5287_v40 = vmul.f32 %v5265_v0, %v11126_v54  ;;  %5201 = vmatpush.bf16.msra.mxu3 %v6968_v33  ;;  %v4985_v3 = vadd.f32 %v4984_v36, %v4972_v7  ;;  %v7502_v33 = vld [vmem:[#allocation7 + $0x8] sm:$0xff]  ;;  %v3451_v7 = vperm.slane %v11143_v34, 3 }
 0x65d   :  { %5639 = vmatpush.bf16.msra.mxu0 %v7502_v33  ;;  %v7510_v33 = vld [vmem:[#allocation7 + $0x48] sm:$0xff] }
 0x65e   :  { %v5291_v32 = vadd.f32 1e-05, %v5287_v40 }
 0x660   :  { %7607 = vrsqrt.f32 %v5291_v32  ;;  %5202 = vmatpush.bf16.msra.mxu3 %v6952_v15  ;;  %v5023_v30 = vpop.f32.mrf.mxu1  ;;  %vm5301_vm4 = vweird.f32 %v5291_v32 }
 0x661   :  { %v5024_v1 = vadd.f32 %v5023_v30, %v5011_v20  ;;  %5640 = vmatpush.bf16.msra.mxu0 %v7501_v42 }
 0x663   :  { %v4986_v24 = vpop.f32.mrf.mxu2 }
 0x664   :  { %5203 = vmatpush.bf16.msra.mxu3 %v6936_v23 }
 0x666   :  { %v7608_v41 = vpop.eup %7607 }
 0x667   :  { %v5296_v52 = vmul.f32 %v7608_v41, %v5291_v32  ;;  %5204 = vmatmul.bf16.vlgmr.msra.gmra.mxu3 %v11086_v53  ;;  %vm5302_vm3 = vweird.f32 %v7608_v41  ;;  %v11159_v53 = vld [vmem:[%s11226_s15] sm:$0xf] }
 0x668   :  { %v5025_v17 = vpop.f32.mrf.mxu1  ;;  %vm5303_vm5 = vmor %vm5301_vm4, %vm5302_vm3  ;;  %v5340_v19 = vperm.slane %v11159_v53, 0 }
 0x669   :  { %v5297_v50 = vmul.f32 %v7608_v41, %v5296_v52  ;;  %v7514_v52 = vld [vmem:[#allocation7 + $0x68] sm:$0xff] }
 0x66a   :  { %v4997_v57 = vpop.f32.mrf.mxu3  ;;  %5648 = vmatpush.bf16.msrb.mxu1 %v7514_v52 }
 0x66b   :  { %v5298_v31 = vmul.f32 0.5, %v5297_v50  ;;  %v4998_v4 = vadd.f32 %v4997_v57, %v4985_v3  ;;  %v7513_v50 = vld [vmem:[#allocation7 + $0x60] sm:$0xff]  ;;  %v5115_v57 = vadd.f32 %v11148_v48, %v3451_v7  ;;  %v5341_v48 = vperm.slane %v11159_v53, 1 }
 0x66d   :  { %v5299_v45 = vsub.f32 1.5, %v5298_v31  ;;  %v5219_v56 = vsel %vm5211_vm1, %v4998_v4, 0.0  ;;  %v7512_v31 = vld [vmem:[#allocation7 + $0x58] sm:$0xff] }
 0x66e   :  { %v5220_v13 = vrot.slane %v5219_v56, 4  ;;  %5649 = vmatpush.bf16.msrb.mxu1 %v7513_v50 }
 0x66f   :  { %v5300_v38 = vmul.f32 %v7608_v41, %v5299_v45 }
 0x670   :  { %v5221_v12 = vadd.f32 %v5220_v13, %v5219_v56 }
 0x671   :  { %v5304_v35 = vsel %vm5303_vm5, %v7608_v41, %v5300_v38 }
 0x672   :  { %v5222_v62 = vrot.slane %v5221_v12, 2  ;;  %v4999_v25 = vpop.f32.mrf.mxu3  ;;  %v5335_v61 = vmul.f32 %v5304_v35, %v11131_v55  ;;  %v11171_v18 = vpop.f32.mrf.mxu0  ;;  %5650 = vmatpush.bf16.msrb.mxu1 %v7512_v31 }
 0x674   :  { %v5223_v0 = vadd.f32 %v5222_v62, %v5221_v12  ;;  %v5348_v11 = vmul.f32 %v5340_v19, %v5335_v61 }
 0x676   :  { %v5224_v14 = vrot.slane %v5223_v0, 1  ;;  %v5361_v51 = vadd.f32 %v5353_v37, %v5348_v11  ;;  %v5354_v11 = vperm.slane %v11166_v29, 1 }
 0x678   :  { %v5225_v59 = vadd.f32 %v5224_v14, %v5223_v0  ;;  %v5365_v2 = vmax.f32 %v5361_v51, 0.0 }
 0x679   :  { %v5036_v27 = vpop.f32.mrf.mxu2 }
 0x67a   :  { %v5248_v28 = vmul.f32 %v11126_v54, %v5225_v59  ;;  %v5369_v26 = vpack.c.bf16 %v5365_v2, %v5365_v2  ;;  %v5037_v22 = vadd.f32 %v5036_v27, %v5024_v1  ;;  %v5168_v20 = vpop.f32.mrf.mxu0 }
 0x67b   :  { %v7522_v20 = vld [vmem:[#allocation7 + $0xa8] sm:$0xff] }
 0x67c   :  { %v5252_v55 = vsub.f32 %v4998_v4, %v5248_v28  ;;  %5641 = vmatmul.bf16.vlgmr.msra.gmra.mxu0 %v5369_v26 }
 0x67e   :  { %v5256_v40 = vmul.f32 %v5252_v55, %v5252_v55 }
 0x680   :  { %v5266_v10 = vsel %vm5211_vm1, %v5256_v40, 0.0  ;;  %v5075_v60 = vpop.f32.mrf.mxu1 }
 0x681   :  { %v5267_v5 = vrot.slane %v5266_v10, 4  ;;  %v5038_v36 = vpop.f32.mrf.mxu2 }
 0x682   :  { %v7521_v36 = vld [vmem:[#allocation7 + $0xa0] sm:$0xff] }
 0x683   :  { %v5268_v32 = vadd.f32 %v5267_v5, %v5266_v10  ;;  %v7509_v5 = vld [vmem:[#allocation7 + $0x40] sm:$0xff] }
 0x685   :  { %v5269_v58 = vrot.slane %v5268_v32, 2 }
 0x687   :  { %v5270_v49 = vadd.f32 %v5269_v58, %v5268_v32 }
 0x688   :  { %v5077_v30 = vpop.f32.mrf.mxu1 }
 0x689   :  { %v5271_v15 = vrot.slane %v5270_v49, 1 }
 0x68a   :  { %v5049_v21 = vpop.f32.mrf.mxu3 }
 0x68b   :  { %v5272_v47 = vadd.f32 %v5271_v15, %v5270_v49  ;;  %v5050_v6 = vadd.f32 %v5049_v21, %v5037_v22  ;;  %v7524_v21 = vld [vmem:[#allocation7 + $0xb8] sm:$0xff] }
 0x68c   :  { %5659 = vmatpush.bf16.msrb.mxu2 %v7524_v21 }
 0x68d   :  { %v5288_v23 = vmul.f32 %v5272_v47, %v11126_v54  ;;  %v5063_v46 = vadd.f32 %v11138_v9, %v5050_v6  ;;  %v7511_v9 = vld [vmem:[#allocation7 + $0x50] sm:$0xff] }
 0x68e   :  { %5651 = vmatpush.bf16.msrb.mxu1 %v7511_v9 }
 0x68f   :  { %v5292_v41 = vadd.f32 1e-05, %v5288_v23  ;;  %v5076_v13 = vadd.f32 %v5075_v60, %v5063_v46 }
 0x690   :  { %5660 = vmatpush.bf16.msrb.mxu2 %v7523_v8  ;;  %v7529_v8 = vld [vmem:[#allocation7 + $0xe0] sm:$0xff] }
 0x691   :  { %7609 = vrsqrt.f32 %v5292_v41  ;;  %vm5311_vm7 = vweird.f32 %v5292_v41 }
 0x692   :  { %v5051_v39 = vpop.f32.mrf.mxu3  ;;  %5652 = vmatpush.bf16.msrb.mxu1 %v7510_v33 }
 0x694   :  { %5661 = vmatpush.bf16.msrb.mxu2 %v7522_v20  ;;  %v7528_v20 = vld [vmem:[#allocation7 + $0xd8] sm:$0xff] }
 0x696   :  { %5653 = vmatpush.bf16.msrb.mxu1 %v7509_v5 }
 0x697   :  { %v7610_v16 = vpop.eup %7609 }
 0x698   :  { %v5306_v1 = vmul.f32 %v7610_v16, %v5292_v41  ;;  %vm5312_vm6 = vweird.f32 %v7610_v16  ;;  %5662 = vmatpush.bf16.msrb.mxu2 %v7521_v36  ;;  %v7527_v36 = vld [vmem:[#allocation7 + $0xd0] sm:$0xff] }
 0x699   :  { %v5088_v4 = vpop.f32.mrf.mxu2  ;;  %vm5313_vm8 = vmor %vm5311_vm7, %vm5312_vm6 }
 0x69a   :  { %v5307_v3 = vmul.f32 %v7610_v16, %v5306_v1  ;;  %v5089_v35 = vadd.f32 %v5088_v4, %v5076_v13 }
 0x69c   :  { %v5308_v45 = vmul.f32 0.5, %v5307_v3  ;;  %v7519_v3 = vld [vmem:[#allocation7 + $0x90] sm:$0xff] }
 0x69e   :  { %v5309_v38 = vsub.f32 1.5, %v5308_v45 }
 0x6a0   :  { %v5127_v24 = vpop.f32.mrf.mxu1  ;;  %v5310_v56 = vmul.f32 %v7610_v16, %v5309_v38 }
 0x6a1   :  { %v11177_v17 = vadd.f32 %v5127_v24, %v5115_v57  ;;  %v5090_v61 = vpop.f32.mrf.mxu2  ;;  %v5342_v24 = vperm.slane %v11159_v53, 2 }
 0x6a2   :  { %v5314_v34 = vsel %vm5313_vm8, %v7610_v16, %v5310_v56  ;;  %v7520_v16 = vld [vmem:[#allocation7 + $0x98] sm:$0xff] }
 0x6a3   :  { %v5336_v25 = vmul.f32 %v5314_v34, %v5252_v55  ;;  %5663 = vmatpush.bf16.msrb.mxu2 %v7520_v16  ;;  %v5355_v34 = vperm.slane %v11166_v29, 2  ;;  %v7526_v16 = vld [vmem:[#allocation7 + $0xc8] sm:$0xff] }
 0x6a5   :  { %v5349_v44 = vmul.f32 %v5341_v48, %v5336_v25 }
 0x6a7   :  { %v5362_v43 = vadd.f32 %v5354_v11, %v5349_v44  ;;  %5664 = vmatpush.bf16.msrb.mxu2 %v7519_v3 }
 0x6a8   :  { %v5129_v0 = vpop.f32.mrf.mxu1 }
 0x6a9   :  { %v5366_v2 = vmax.f32 %v5362_v43, 0.0 }
 0x6aa   :  { %v5101_v12 = vpop.f32.mrf.mxu3 }
 0x6ab   :  { %v5102_v62 = vadd.f32 %v5101_v12, %v5089_v35  ;;  %v5370_v42 = vpack.c.bf16 %v5366_v2, %v5366_v2 }
 0x6ad   :  { %v5226_v19 = vsel %vm5211_vm1, %v5102_v62, 0.0  ;;  %5654 = vmatmul.bf16.vlgmr.msrb.gmra.mxu1 %v5370_v42 }
 0x6ae   :  { %v5227_v14 = vrot.slane %v5226_v19, 4 }
 0x6b0   :  { %v5228_v37 = vadd.f32 %v5227_v14, %v5226_v19  ;;  %v7518_v19 = vld [vmem:[#allocation7 + $0x88] sm:$0xff] }
 0x6b1   :  { %5665 = vmatpush.bf16.msrb.mxu2 %v7518_v19 }
 0x6b2   :  { %v5229_v59 = vrot.slane %v5228_v37, 2  ;;  %v5103_v28 = vpop.f32.mrf.mxu3 }
 0x6b4   :  { %v5230_v51 = vadd.f32 %v5229_v59, %v5228_v37  ;;  %v7517_v37 = vld [vmem:[#allocation7 + $0x80] sm:$0xff] }
 0x6b5   :  { %5666 = vmatpush.bf16.msrb.mxu2 %v7517_v37 }
 0x6b6   :  { %v5231_v40 = vrot.slane %v5230_v51, 1 }
 0x6b8   :  { %v5232_v10 = vadd.f32 %v5231_v40, %v5230_v51 }
 0x6b9   :  { %v5140_v22 = vpop.f32.mrf.mxu2 }
 0x6ba   :  { %v5249_v55 = vmul.f32 %v11126_v54, %v5232_v10  ;;  %v5141_v9 = vadd.f32 %v5140_v22, %v11177_v17  ;;  %v7531_v22 = vld [vmem:[#allocation7 + $0xf0] sm:$0xff] }
 0x6bc   :  { %v5253_v26 = vsub.f32 %v5102_v62, %v5249_v55 }
 0x6be   :  { %v5257_v32 = vmul.f32 %v5253_v26, %v5253_v26 }
 0x6c0   :  { %v5273_v58 = vsel %vm5211_vm1, %v5257_v32, 0.0  ;;  %v5179_v41 = vpop.f32.mrf.mxu1 }
 0x6c1   :  { %v5274_v49 = vrot.slane %v5273_v58, 4  ;;  %v5142_v46 = vpop.f32.mrf.mxu2 }
 0x6c3   :  { %v5275_v15 = vadd.f32 %v5274_v49, %v5273_v58 }
 0x6c5   :  { %v5276_v47 = vrot.slane %v5275_v15, 2 }
 0x6c7   :  { %v5277_v27 = vadd.f32 %v5276_v47, %v5275_v15 }
 0x6c8   :  { %v5181_v39 = vpop.f32.mrf.mxu1 }
 0x6c9   :  { %v5278_v60 = vrot.slane %v5277_v27, 1 }
 0x6ca   :  { %v5153_v52 = vpop.f32.mrf.mxu3 }
 0x6cb   :  { %v5279_v63 = vadd.f32 %v5278_v60, %v5277_v27  ;;  %v5154_v56 = vadd.f32 %v5153_v52, %v5141_v9  ;;  %v7532_v27 = vld [vmem:[#allocation7 + $0xf8] sm:$0xff] }
 0x6cc   :  { %5672 = vmatpush.bf16.msrb.mxu3 %v7532_v27 }
 0x6cd   :  { %v5289_v23 = vmul.f32 %v5279_v63, %v11126_v54  ;;  %v5167_v35 = vadd.f32 %v11171_v18, %v5154_v56 }
 0x6cf   :  { %v5293_v6 = vadd.f32 1e-05, %v5289_v23  ;;  %v5180_v25 = vadd.f32 %v5179_v41, %v5167_v35  ;;  %v7530_v23 = vld [vmem:[#allocation7 + $0xe8] sm:$0xff] }
 0x6d0   :  { %5673 = vmatpush.bf16.msrb.mxu3 %v7531_v22 }
 0x6d1   :  { %7611 = vrsqrt.f32 %v5293_v6  ;;  %vm5321_vm10 = vweird.f32 %v5293_v6 }
 0x6d2   :  { %v5155_v31 = vpop.f32.mrf.mxu3 }
 0x6d3   :  { %v5356_v31 = vperm.slane %v11166_v29, 3 }
 0x6d4   :  { %5674 = vmatpush.bf16.msrb.mxu3 %v7530_v23 }
 0x6d7   :  { %v7612_v30 = vpop.eup %7611 }
 0x6d8   :  { %v5316_v50 = vmul.f32 %v7612_v30, %v5293_v6  ;;  %vm5322_vm9 = vweird.f32 %v7612_v30  ;;  %5675 = vmatpush.bf16.msrb.mxu3 %v7529_v8 }
 0x6d9   :  { %vm5323_vm11 = vmor %vm5321_vm10, %vm5322_vm9 }
 0x6da   :  { %v5317_v1 = vmul.f32 %v7612_v30, %v5316_v50  ;;  %v5343_v50 = vperm.slane %v11159_v53, 3 }
 0x6dc   :  { %v5318_v7 = vmul.f32 0.5, %v5317_v1  ;;  %v5192_v12 = vpop.f32.mrf.mxu2  ;;  %5676 = vmatpush.bf16.msrb.mxu3 %v7528_v20 }
 0x6dd   :  { %v5193_v48 = vadd.f32 %v5192_v12, %v5180_v25 }
 0x6de   :  { %v5319_v45 = vsub.f32 1.5, %v5318_v7 }
 0x6e0   :  { %v5320_v57 = vmul.f32 %v7612_v30, %v5319_v45  ;;  %5677 = vmatpush.bf16.msrb.mxu3 %v7527_v36  ;;  %v7525_v45 = vld [vmem:[#allocation7 + $0xc0] sm:$0xff] }
 0x6e2   :  { %v5324_v4 = vsel %vm5323_vm11, %v7612_v30, %v5320_v57 }
 0x6e3   :  { %v5337_v38 = vmul.f32 %v5324_v4, %v5253_v26 }
 0x6e4   :  { %v5194_v44 = vpop.f32.mrf.mxu2  ;;  %5678 = vmatpush.bf16.msrb.mxu3 %v7526_v16 }
 0x6e5   :  { %v5350_v13 = vmul.f32 %v5342_v24, %v5337_v38  ;;  %v7580_v38 = vld [vmem:[%s11229_s18] ss:$0 sm:$0xff] }
 0x6e7   :  { %v5363_v62 = vadd.f32 %v5355_v34, %v5350_v13 }
 0x6e8   :  { %5679 = vmatpush.bf16.msrb.mxu3 %v7525_v45 }
 0x6e9   :  { %v5367_v0 = vmax.f32 %v5363_v62, 0.0 }
 0x6ea   :  { %v5205_v61 = vpop.f32.mrf.mxu3 }
 0x6eb   :  { %v5206_v14 = vadd.f32 %v5205_v61, %v5193_v48  ;;  %v5371_v59 = vpack.c.bf16 %v5367_v0, %v5367_v0 }
 0x6ed   :  { %v5233_v17 = vsel %vm5211_vm1, %v5206_v14, 0.0  ;;  %5667 = vmatmul.bf16.vlgmr.msrb.gmra.mxu2 %v5371_v59 }
 0x6ee   :  { %v5234_v11 = vrot.slane %v5233_v17, 4 }
 0x6f0   :  { %v5235_v28 = vadd.f32 %v5234_v11, %v5233_v17 }
 0x6f2   :  { %v5236_v43 = vrot.slane %v5235_v28, 2  ;;  %v5207_v51 = vpop.f32.mrf.mxu3 }
 0x6f4   :  { %v5237_v18 = vadd.f32 %v5236_v43, %v5235_v28 }
 0x6f6   :  { %v5238_v40 = vrot.slane %v5237_v18, 1 }
 0x6f8   :  { %v5239_v33 = vadd.f32 %v5238_v40, %v5237_v18 }
 0x6f9   :  { %v5642_v32 = vpop.f32.mrf.mxu0 }
 0x6fa   :  { %v5250_v2 = vmul.f32 %v11126_v54, %v5239_v33  ;;  %v5643_v24 = vadd.f32 %v7580_v38, %v5642_v32 }
 0x6fc   :  { %v5254_v10 = vsub.f32 %v5206_v14, %v5250_v2 }
 0x6fe   :  { %v5258_v55 = vmul.f32 %v5254_v10, %v5254_v10 }
 0x700   :  { %v5280_v5 = vsel %vm5211_vm1, %v5258_v55, 0.0 }
 0x701   :  { %v5281_v42 = vrot.slane %v5280_v5, 4  ;;  %v5644_v60 = vpop.f32.mrf.mxu0 }
 0x703   :  { %v5282_v26 = vadd.f32 %v5281_v42, %v5280_v5 }
 0x705   :  { %v5283_v58 = vrot.slane %v5282_v26, 2 }
 0x707   :  { %v5284_v49 = vadd.f32 %v5283_v58, %v5282_v26 }
 0x709   :  { %v5285_v15 = vrot.slane %v5284_v49, 1 }
 0x70b   :  { %v5286_v47 = vadd.f32 %v5285_v15, %v5284_v49  ;;  %v7581_v15 = vld [vmem:[%s11230_s19] ss:$0 sm:$0xff] }
 0x70d   :  { %v5290_v63 = vmul.f32 %v5286_v47, %v11126_v54 }
 0x70f   :  { %v5294_v21 = vadd.f32 1e-05, %v5290_v63 }
 0x711   :  { %7613 = vrsqrt.f32 %v5294_v21  ;;  %vm5331_vm13 = vweird.f32 %v5294_v21 }
 0x717   :  { %v7614_v6 = vpop.eup %7613 }
 0x718   :  { %v5326_v41 = vmul.f32 %v7614_v6, %v5294_v21  ;;  %vm5332_vm12 = vweird.f32 %v7614_v6 }
 0x719   :  { %vm5333_vm14 = vmor %vm5331_vm13, %vm5332_vm12 }
 0x71a   :  { %v5327_v46 = vmul.f32 %v7614_v6, %v5326_v41 }
 0x71c   :  { %v5328_v52 = vmul.f32 0.5, %v5327_v46 }
 0x71e   :  { %v5329_v30 = vsub.f32 1.5, %v5328_v52 }
 0x720   :  { %v5330_v39 = vmul.f32 %v7614_v6, %v5329_v30 }
 0x722   :  { %v5334_v1 = vsel %vm5333_vm14, %v7614_v6, %v5330_v39 }
 0x723   :  { %v5338_v7 = vmul.f32 %v5334_v1, %v5254_v10 }
 0x725   :  { %v5351_v3 = vmul.f32 %v5343_v50, %v5338_v7 }
 0x727   :  { %v5364_v57 = vadd.f32 %v5356_v31, %v5351_v3 }
 0x729   :  { %v5368_v4 = vmax.f32 %v5364_v57, 0.0 }
 0x72a   :  { %v5655_v53 = vpop.f32.mrf.mxu1 }
 0x72b   :  { %v5372_v9 = vpack.c.bf16 %v5368_v4, %v5368_v4  ;;  %v5656_v56 = vadd.f32 %v5655_v53, %v5643_v24 }
 0x72d   :  { %5680 = vmatmul.bf16.vlgmr.msrb.gmra.mxu3 %v5372_v9 }
 0x732   :  { %v5657_v13 = vpop.f32.mrf.mxu1 }
 0x770   :  { %v5668_v34 = vpop.f32.mrf.mxu2 }
 0x771   :  { %v5669_v12 = vadd.f32 %v5668_v34, %v5656_v56 }
 0x778   :  { %v5670_v35 = vpop.f32.mrf.mxu2 }
 0x7b0   :  { %v5681_v29 = vpop.f32.mrf.mxu3 }
 0x7b1   :  { %v5682_v62 = vadd.f32 %v5681_v29, %v5669_v12 }
 0x7b3   :  { %v5687_v25 = vsel %vm5211_vm1, %v5682_v62, 0.0 }
 0x7b4   :  { %v5688_v48 = vrot.slane %v5687_v25, 4 }
 0x7b6   :  { %v5689_v61 = vadd.f32 %v5688_v48, %v5687_v25 }
 0x7b8   :  { %v5690_v19 = vrot.slane %v5689_v61, 2  ;;  %v5683_v0 = vpop.f32.mrf.mxu3 }
 0x7ba   :  { %v5691_v14 = vadd.f32 %v5690_v19, %v5689_v61 }
 0x7bc   :  { %v5692_v44 = vrot.slane %v5691_v14, 1 }
 0x7be   :  { %v5693_v17 = vadd.f32 %v5692_v44, %v5691_v14 }
 0x7c0   :  { %v5694_v11 = vmul.f32 %v5693_v17, %v11126_v54 }
 0x7c2   :  { %v5695_v37 = vsub.f32 %v5682_v62, %v5694_v11 }
 0x7c4   :  { %v5696_v59 = vmul.f32 %v5695_v37, %v5695_v37 }
 0x7c6   :  { %v5697_v28 = vsel %vm5211_vm1, %v5696_v59, 0.0 }
 0x7c7   :  { %v5698_v43 = vrot.slane %v5697_v28, 4 }
 0x7c9   :  { %v5699_v51 = vadd.f32 %v5698_v43, %v5697_v28 }
 0x7cb   :  { %v5700_v18 = vrot.slane %v5699_v51, 2 }
 0x7cd   :  { %v5701_v40 = vadd.f32 %v5700_v18, %v5699_v51 }
 0x7cf   :  { %v5702_v33 = vrot.slane %v5701_v40, 1 }
 0x7d1   :  { %v5703_v2 = vadd.f32 %v5702_v33, %v5701_v40 }
 0x7d3   :  { %v5704_v10 = vmul.f32 %v5703_v2, %v11126_v54  ;;  %v7582_v54 = vld [vmem:[%s11231_s20] ss:$0 sm:$0xff] }
 0x7d5   :  { %v5705_v55 = vadd.f32 1e-05, %v5704_v10 }
 0x7d7   :  { %7615 = vrsqrt.f32 %v5705_v55  ;;  %vm5712_vm0 = vweird.f32 %v5705_v55 }
 0x7dd   :  { %v7616_v5 = vpop.eup %7615 }
 0x7de   :  { %v5707_v42 = vmul.f32 %v7616_v5, %v5705_v55  ;;  %vm5713_vm15 = vweird.f32 %v7616_v5 }
 0x7df   :  { %vm5714_vm2 = vmor %vm5712_vm0, %vm5713_vm15 }
 0x7e0   :  { %v5708_v26 = vmul.f32 %v7616_v5, %v5707_v42 }
 0x7e2   :  { %v5709_v32 = vmul.f32 0.5, %v5708_v26 }
 0x7e4   :  { %v5710_v58 = vsub.f32 1.5, %v5709_v32 }
 0x7e6   :  { %v5711_v49 = vmul.f32 %v7616_v5, %v5710_v58 }
 0x7e8   :  { %v5715_v47 = vsel %vm5714_vm2, %v7616_v5, %v5711_v49 }
 0x7e9   :  { %v5716_v27 = vmul.f32 %v5715_v47, %v5695_v37 }
 0x7eb   :  { %v5720_v60 = vmul.f32 %v7581_v15, %v5716_v27 }
 0x7ed   :  { %v5724_v63 = vadd.f32 %v7582_v54, %v5720_v60 }
 0x7ef   :  { %v5725_v22 = vmax.f32 %v5724_v63, 0.0 }
 0x7f1   :  { %5726 = vst [vmem:[#allocation8] sm:$0x3] %v5725_v22 }
 0x7f2   :  { %5737 = dma.vmem_to_hbm [thread:$0]  %s5733_s29, 32, %s5735_s8, [#allocation4]  }
 0x7f3   :  { %7720 = dma.done.wait [#allocation4], 32  }
 0x7f4   :  { %7721 = vsyncadd [#allocation4], 4294967264 }
 0x7f5   :  { %5742 = vsyncpa [#allocation3], 1 }
 0x7f6   :  { %5743 = vsyncpa [#allocation6], 1 }
 0x7f7   :  { %5744 = vsyncpa [#allocation4], 1 }

</bundles_post_ra>
